<compile_context>
chip_gen: v5e
topology: v5e:2x2
jax: 0.10.0
libtpu: 0.0.40
codegen_flags: <defaults>
</compile_context>

<pallas_src>
import functools

import jax
import jax.numpy as jnp
from jax.experimental import pallas as pl
from jax.experimental.pallas import tpu as pltpu

HIDDEN = 32
TILE_N = 4096     # node tile (lane axis); large tiles amortize per-grid-step overhead
NUM_CORES = 2     # leading 'parallel' grid axis -> 2 TensorCores on v7x, serial elsewhere


def _dcrnn_regression_kernel(
    x_ref,        # (F, TILE_N)      bf16   node features, feature-major (nodes on lanes)
    ids_ref,      # (1, TILE_N)      int32  graph id per node (-1 on padding)
    w_gate_ref,   # (64, F)          bf16   fused [Wz_x ; Wh_x]^T
    b_gate_ref,   # (64, 1)          f32    fused [bz ; bh]^T
    w_lin_ref,    # (32, 1)          f32    Linear(32,1) weight as a column
    inv_cnt_ref,  # (B_pad, 1)       f32    1 / nodes-per-graph
    out_ref,      # (1, B_pad, 1)    f32    per-core partial (mean-pooled, no bias yet)
    acc_ref,      # (B_pad, 32)      f32    VMEM scratch: per-graph sum of relu(H_new)
):
    t = pl.program_id(1)

    @pl.when(t == 0)
    def _init():
        acc_ref[...] = jnp.zeros_like(acc_ref)

    # Fused DCRNN (K=1) gate matmul.  H0 == 0 => only the X parts of the Z / H~ gates are
    # live, the reset gate R is dead code, and H_new = (1 - Z) * H_tilde exactly.
    gates = (
        jnp.dot(w_gate_ref[...], x_ref[...], preferred_element_type=jnp.float32)
        + b_gate_ref[...]
    )                                                   # (64, TILE_N) f32
    z = jax.nn.sigmoid(gates[:HIDDEN, :])               # update gate      (32, TILE_N)
    h_tilde = jnp.tanh(gates[HIDDEN:, :])               # candidate state  (32, TILE_N)
    h = jnp.maximum((1.0 - z) * h_tilde, 0.0)           # relu(H_new)      (32, TILE_N) f32

    # Segment-sum pooling: build a (B_pad, TILE_N) one-hot from the lane-dense graph ids
    # and contract the node (lane) axis on the MXU in bf16 (exact for a 0/1 one-hot),
    # accumulating in f32.  Padded nodes carry id -1 and never match any graph.
    ids = ids_ref[...]                                                   # (1, TILE_N)
    graph_iota = jax.lax.broadcasted_iota(
        jnp.int32, (acc_ref.shape[0], ids.shape[1]), 0)                  # (B_pad, TILE_N)
    one_hot = (graph_iota == ids).astype(jnp.bfloat16)                   # (B_pad, TILE_N)
    acc_ref[...] += jax.lax.dot_general(
        one_hot, h.astype(jnp.bfloat16),
        dimension_numbers=(((1,), (1,)), ((), ())),                      # one_hot @ h.T
        preferred_element_type=jnp.float32)                              # (B_pad, 32)

    @pl.when(t == pl.num_programs(1) - 1)
    def _finish():
        # Per-core partial: mean-pool (1/count distributes over the cross-core sum) and fold
        # the skinny Linear(32 -> 1).  The bias is added once in the wrapper after the
        # cross-core reduction so it is not counted per core.
        pooled = acc_ref[...] * inv_cnt_ref[...]                         # (B_pad, 32)
        out_ref[...] = jnp.dot(
            pooled, w_lin_ref[...], preferred_element_type=jnp.float32
        ).reshape(out_ref.shape)                                         # (1, B_pad, 1)


def init_params(key, node_features, hidden=HIDDEN):
    """Deterministic synthetic parameters with the same shapes as the torch module."""
    fin = node_features + hidden
    ks = jax.random.split(key, 7)

    def dconv_weight(k):
        # torch_geometric_temporal DConv weight shape: (2, K=1, in_channels, out_channels)
        return 0.1 * jax.random.normal(k, (2, 1, fin, hidden), jnp.float32)

    def split(W):
        w = W[0, 0] + W[1, 0]                          # K=1 => effective dense weight
        return w[:node_features, :], w[node_features:, :]

    wz_x, wz_h = split(dconv_weight(ks[0]))
    wr_x, wr_h = split(dconv_weight(ks[1]))            # dead code when H0 == 0
    wh_x, wh_h = split(dconv_weight(ks[2]))

    bz = 0.05 * jax.random.normal(ks[3], (1, hidden), jnp.float32)
    br = jnp.zeros((1, hidden), jnp.float32)
    bh = 0.05 * jax.random.normal(ks[4], (1, hidden), jnp.float32)

    # torch.nn.Linear(32, 1): weight (1, 32), bias (1,)
    w_lin = 0.1 * jax.random.normal(ks[5], (1, hidden), jnp.float32)
    b_lin = 0.1 * jax.random.normal(ks[6], (1,), jnp.float32)

    # Packed kernel-facing parameters (feature-major): only the live X-parts, fused.
    w_gate = jnp.concatenate([wz_x, wh_x], axis=1)     # (F, 64)
    b_gate = jnp.concatenate([bz, bh], axis=1)         # (1, 64)

    return dict(
        # kernel inputs
        w_gate_t_bf16=jnp.transpose(w_gate).astype(jnp.bfloat16),   # (64, F)
        b_gate_col=jnp.transpose(b_gate),                           # (64, 1)
        w_lin_col=jnp.transpose(w_lin),                             # (32, 1)
        b_lin=b_lin,                                                # (1,)
        # full-precision originals (for the reference / fidelity with the torch module)
        wz_x=wz_x, wz_h=wz_h, bz=bz,
        wr_x=wr_x, wr_h=wr_h, br=br,
        wh_x=wh_x, wh_h=wh_h, bh=bh,
        w_lin=w_lin,
    )


@functools.partial(jax.jit, static_argnames=("num_graphs",))
def recurrent_gcn_regression(params, x, edge_index, edge_weight, batch, *, num_graphs):
    # DCRNN with K=1 never propagates along edges; the output is independent of them.
    # TODO(synk): if K > 1 were ever required, the diffusion (edge-propagation) term would
    # need a sparse gather/scatter stage that is not implemented here.
    del edge_index, edge_weight

    n, f = x.shape
    b_pad = max(8, -(-num_graphs // 8) * 8)                 # graphs padded to sublane multiple
    n_pad = -(-n // (NUM_CORES * TILE_N)) * (NUM_CORES * TILE_N)
    tiles_per_core = n_pad // (NUM_CORES * TILE_N)

    # Feature-major node features in bf16 (lane-dense node tiles); padded columns are zero.
    x_t = jnp.zeros((f, n_pad), jnp.bfloat16).at[:, :n].set(
        jnp.transpose(x).astype(jnp.bfloat16))
    # Graph ids, lane-major (1, n_pad); padded nodes get id -1 -> never match any graph.
    # TODO(synk): ids could be stored as int16 to shave HBM traffic for tiny-F inputs.
    ids_p = jnp.full((1, n_pad), -1, jnp.int32).at[0, :n].set(batch.astype(jnp.int32))
    # Per-graph 1/count for mean pooling; padded graph slots get 1.0.
    counts = jnp.zeros((b_pad,), jnp.float32).at[batch].add(1.0)
    inv_cnt = (1.0 / jnp.maximum(counts, 1.0)).reshape(b_pad, 1)

    grid_spec = pltpu.PrefetchScalarGridSpec(
        num_scalar_prefetch=0,
        grid=(NUM_CORES, tiles_per_core),
        in_specs=[
            pl.BlockSpec((f, TILE_N), lambda c, t: (0, c * tiles_per_core + t)),   # x tile
            pl.BlockSpec((1, TILE_N), lambda c, t: (0, c * tiles_per_core + t)),   # ids tile
            pl.BlockSpec((2 * HIDDEN, f), lambda c, t: (0, 0)),                    # gate weight
            pl.BlockSpec((2 * HIDDEN, 1), lambda c, t: (0, 0)),                    # gate bias
            pl.BlockSpec((HIDDEN, 1), lambda c, t: (0, 0)),                        # linear weight
            pl.BlockSpec((b_pad, 1), lambda c, t: (0, 0)),                         # 1/count
        ],
        out_specs=pl.BlockSpec((1, b_pad, 1), lambda c, t: (c, 0, 0)),
        scratch_shapes=[pltpu.VMEM((b_pad, HIDDEN), jnp.float32)],
    )

    cost = pl.CostEstimate(
        flops=int(2 * n_pad * f * 2 * HIDDEN            # fused gate matmul
                  + 2 * n_pad * HIDDEN * b_pad          # one-hot pooling matmul
                  + 4 * n_pad * HIDDEN),                # gate elementwise
        transcendentals=int(2 * HIDDEN * n_pad),        # sigmoid + tanh
        bytes_accessed=int(n_pad * (2 * f + 4)          # x (bf16) + ids (int32)
                           + 2 * HIDDEN * f * 2         # fused gate weight
                           + NUM_CORES * b_pad * 4),    # partial outputs
    )

    partials = pl.pallas_call(
        _dcrnn_regression_kernel,
        out_shape=jax.ShapeDtypeStruct((NUM_CORES, b_pad, 1), jnp.float32),
        grid_spec=grid_spec,
        compiler_params=pltpu.CompilerParams(
            dimension_semantics=("parallel", "arbitrary"),   # cores x node-tile reduction
            vmem_limit_bytes=32 * 1024 * 1024,               # fits v7x's 64 MiB with margin
        ),
        cost_estimate=cost,
    )(x_t, ids_p, params["w_gate_t_bf16"], params["b_gate_col"],
      params["w_lin_col"], inv_cnt)

    # Tiny epilogue: reduce the per-core partials and add the Linear bias exactly once.
    y = partials.sum(axis=0) + params["b_lin"]               # (b_pad, 1)
    return y[:num_graphs]


def _reference(params, x, batch, num_graphs):
    """Pure-JAX f32 reference implementing the FULL original DCRNN cell (H0 = 0)."""
    n = x.shape[0]
    H = jnp.zeros((n, HIDDEN), jnp.float32)
    Z = jax.nn.sigmoid(x @ params["wz_x"] + H @ params["wz_h"] + params["bz"])
    R = jax.nn.sigmoid(x @ params["wr_x"] + H @ params["wr_h"] + params["br"])
    Ht = jnp.tanh(x @ params["wh_x"] + (H * R) @ params["wh_h"] + params["bh"])
    Hn = Z * H + (1.0 - Z) * Ht
    h = jnp.maximum(Hn, 0.0)
    y = h @ params["w_lin_col"] + params["b_lin"]
    seg = jnp.zeros((num_graphs, 1), jnp.float32).at[batch].add(y)
    cnt = jnp.zeros((num_graphs, 1), jnp.float32).at[batch].add(1.0)
    return seg / jnp.maximum(cnt, 1.0)


if __name__ == "__main__":
    node_features = 4
    batch_size = 2
    num_nodes = 8
    n_total = batch_size * num_nodes

    key = jax.random.PRNGKey(0)
    k_x, k_p = jax.random.split(key)

    x = jax.random.normal(k_x, (n_total, node_features), jnp.float32)
    batch = jnp.repeat(jnp.arange(batch_size, dtype=jnp.int32), num_nodes)

    # COO edges: fully connected (both directions) within each graph of the batch
    # (API parity only; DCRNN with K=1 never uses them).
    src, dst = jnp.meshgrid(jnp.arange(num_nodes), jnp.arange(num_nodes), indexing="ij")
    mask = src != dst
    src, dst = src[mask], dst[mask]
    edge_index = jnp.concatenate(
        [jnp.stack([src + b * num_nodes, dst + b * num_nodes]) for b in range(batch_size)],
        axis=1,
    ).astype(jnp.int32)
    edge_weight = jnp.ones((edge_index.shape[1],), jnp.float32)

    params = init_params(k_p, node_features)

    out = recurrent_gcn_regression(
        params, x, edge_index, edge_weight, batch, num_graphs=batch_size
    )
    out = jax.block_until_ready(out)

    assert out.shape == (batch_size, 1), out.shape
    ref = _reference(params, x, batch, batch_size)
    # bf16 gate matmul + bf16 pooling dot => allow ~2% deviation from the pure-f32 reference.
    assert bool(jnp.allclose(out, ref, atol=2e-2, rtol=2e-2)), (out, ref)

    print("KERNEL_OK")
</pallas_src>

<mosaic_0001>
module attributes {stable_mosaic.version = 11 : i64} {
  func.func @_dcrnn_regression_kernel(%arg0: i32, %arg1: i32, %arg2: memref<4x4096xbf16, #tpu.memory_space<vmem>>, %arg3: memref<1x4096xi32, #tpu.memory_space<vmem>>, %arg4: memref<64x4xbf16, #tpu.memory_space<vmem>>, %arg5: memref<64x1xf32, #tpu.memory_space<vmem>>, %arg6: memref<32x1xf32, #tpu.memory_space<vmem>>, %arg7: memref<8x1xf32, #tpu.memory_space<vmem>>, %arg8: memref<1x8x1xf32, #tpu.memory_space<vmem>>, %arg9: memref<8x32xf32, #tpu.memory_space<vmem>>) attributes {dimension_semantics = [#tpu.dimension_semantics<parallel>, #tpu.dimension_semantics<arbitrary>], iteration_bounds = array<i64: 2, 1>, scalar_prefetch = 0 : i64, scratch_operands = 1 : i64, tpu.core_type = #tpu.core_type<tc>, window_params = [{transform_indices = @transform_0, window_bounds = array<i64: 4, 4096>}, {transform_indices = @transform_1, window_bounds = array<i64: 1, 4096>}, {pipeline_mode = #tpu.pipeline_mode<synchronous>, transform_indices = @transform_2, window_bounds = array<i64: 64, 4>}, {pipeline_mode = #tpu.pipeline_mode<synchronous>, transform_indices = @transform_3, window_bounds = array<i64: 64, 1>}, {pipeline_mode = #tpu.pipeline_mode<synchronous>, transform_indices = @transform_4, window_bounds = array<i64: 32, 1>}, {pipeline_mode = #tpu.pipeline_mode<synchronous>, transform_indices = @transform_5, window_bounds = array<i64: 8, 1>}, {transform_indices = @transform_6, window_bounds = array<i64: 1, 8, 1>}]} {
    %c0_i32 = arith.constant 0 : i32
    %0 = arith.cmpi eq, %arg1, %c0_i32 : i32
    %1 = arith.extui %0 : i1 to i32
    %c0_i32_0 = arith.constant 0 : i32
    %2 = arith.cmpi ne, %1, %c0_i32_0 : i32
    scf.if %2 {
      %cst_18 = arith.constant 0.000000e+00 : f32
      %37 = vector.broadcast %cst_18 : f32 to vector<8x32xf32>
      %c0_19 = arith.constant 0 : index
      %c0_20 = arith.constant 0 : index
      %38 = vector.load %arg9[%c0_19, %c0_20] : memref<8x32xf32, #tpu.memory_space<vmem>>, vector<8x32xf32>
      tpu.vector_store %arg9[%c0_19, %c0_20], %37 {strides = array<i32>} : memref<8x32xf32, #tpu.memory_space<vmem>>, vector<8x32xf32>,
    } else {
    }
    %c0 = arith.constant 0 : index
    %c0_1 = arith.constant 0 : index
    %3 = vector.load %arg4[%c0, %c0_1] : memref<64x4xbf16, #tpu.memory_space<vmem>>, vector<64x4xbf16>
    %c0_2 = arith.constant 0 : index
    %c0_3 = arith.constant 0 : index
    %4 = vector.load %arg2[%c0_2, %c0_3] : memref<4x4096xbf16, #tpu.memory_space<vmem>>, vector<4x4096xbf16>
    %cst = arith.constant dense<0.000000e+00> : vector<64x4096xf32>
    %5 = tpu.matmul %3, %4, %cst {dimension_numbers = #tpu.dot_dimension_numbers<[1], [0], [0], [1], [0, 0, 1, 1], [], []>} : vector<64x4xbf16>, vector<4x4096xbf16>, vector<64x4096xf32> -> vector<64x4096xf32>
    %c0_4 = arith.constant 0 : index
    %c0_5 = arith.constant 0 : index
    %6 = vector.load %arg5[%c0_4, %c0_5] : memref<64x1xf32, #tpu.memory_space<vmem>>, vector<64x1xf32>
    %7 = vector.broadcast %6 : vector<64x1xf32> to vector<64x4096xf32>
    %8 = arith.addf %5, %7 : vector<64x4096xf32>
    %9 = vector.extract_strided_slice %8 {offsets = [0, 0], sizes = [32, 4096], strides = [1, 1]} : vector<64x4096xf32> to vector<32x4096xf32>
    %10 = arith.negf %9 : vector<32x4096xf32>
    %11 = math.exp %10 : vector<32x4096xf32>
    %cst_6 = arith.constant 1.000000e+00 : f32
    %12 = vector.broadcast %cst_6 : f32 to vector<32x4096xf32>
    %13 = arith.addf %12, %11 : vector<32x4096xf32>
    %14 = arith.divf %12, %13 : vector<32x4096xf32>
    %15 = vector.extract_strided_slice %8 {offsets = [32, 0], sizes = [32, 4096], strides = [1, 1]} : vector<64x4096xf32> to vector<32x4096xf32>
    %16 = math.tanh %15 : vector<32x4096xf32>
    %cst_7 = arith.constant 1.000000e+00 : f32
    %17 = vector.broadcast %cst_7 : f32 to vector<32x4096xf32>
    %18 = arith.subf %17, %14 : vector<32x4096xf32>
    %19 = arith.mulf %18, %16 : vector<32x4096xf32>
    %cst_8 = arith.constant 0.000000e+00 : f32
    %20 = vector.broadcast %cst_8 : f32 to vector<32x4096xf32>
    %21 = arith.maximumf %19, %20 : vector<32x4096xf32>
    %c0_9 = arith.constant 0 : index
    %c0_10 = arith.constant 0 : index
    %22 = vector.load %arg3[%c0_9, %c0_10] : memref<1x4096xi32, #tpu.memory_space<vmem>>, vector<1x4096xi32>
    %23 = tpu.iota {dimensions = array<i32: 0>} : vector<8x4096xi32>
    %24 = vector.broadcast %22 : vector<1x4096xi32> to vector<8x4096xi32>
    %25 = arith.cmpi eq, %23, %24 : vector<8x4096xi32>
    %26 = arith.extui %25 : vector<8x4096xi1> to vector<8x4096xi32>
    %27 = arith.sitofp %26 : vector<8x4096xi32> to vector<8x4096xf32>
    %28 = arith.truncf %27 : vector<8x4096xf32> to vector<8x4096xbf16>
    %c0_11 = arith.constant 0 : index
    %c0_12 = arith.constant 0 : index
    %29 = vector.load %arg9[%c0_11, %c0_12] : memref<8x32xf32, #tpu.memory_space<vmem>>, vector<8x32xf32>
    %30 = arith.truncf %21 : vector<32x4096xf32> to vector<32x4096xbf16>
    %cst_13 = arith.constant dense<0.000000e+00> : vector<8x32xf32>
    %31 = tpu.matmul %28, %30, %cst_13 {dimension_numbers = #tpu.dot_dimension_numbers<[1], [1], [0], [0], [0, 0, 1, 0], [], []>} : vector<8x4096xbf16>, vector<32x4096xbf16>, vector<8x32xf32> -> vector<8x32xf32>
    %32 = arith.addf %29, %31 : vector<8x32xf32>
    %c0_14 = arith.constant 0 : index
    %c0_15 = arith.constant 0 : index
    %33 = vector.load %arg9[%c0_14, %c0_15] : memref<8x32xf32, #tpu.memory_space<vmem>>, vector<8x32xf32>
    tpu.vector_store %arg9[%c0_14, %c0_15], %32 {strides = array<i32>} : memref<8x32xf32, #tpu.memory_space<vmem>>, vector<8x32xf32>,
    %c0_i32_16 = arith.constant 0 : i32
    %34 = arith.cmpi eq, %arg1, %c0_i32_16 : i32
    %35 = arith.extui %34 : i1 to i32
    %c0_i32_17 = arith.constant 0 : i32
    %36 = arith.cmpi ne, %35, %c0_i32_17 : i32
    scf.if %36 {
      %c0_18 = arith.constant 0 : index
      %c0_19 = arith.constant 0 : index
      %37 = vector.load %arg9[%c0_18, %c0_19] : memref<8x32xf32, #tpu.memory_space<vmem>>, vector<8x32xf32>
      %c0_20 = arith.constant 0 : index
      %c0_21 = arith.constant 0 : index
      %38 = vector.load %arg7[%c0_20, %c0_21] : memref<8x1xf32, #tpu.memory_space<vmem>>, vector<8x1xf32>
      %39 = vector.broadcast %38 : vector<8x1xf32> to vector<8x32xf32>
      %40 = arith.mulf %37, %39 : vector<8x32xf32>
      %c0_22 = arith.constant 0 : index
      %c0_23 = arith.constant 0 : index
      %41 = vector.load %arg6[%c0_22, %c0_23] : memref<32x1xf32, #tpu.memory_space<vmem>>, vector<32x1xf32>
      %cst_24 = arith.constant dense<0.000000e+00> : vector<8x1xf32>
      %42 = tpu.matmul %40, %41, %cst_24 {dimension_numbers = #tpu.dot_dimension_numbers<[1], [0], [0], [1], [0, 0, 1, 1], [], []>} : vector<8x32xf32>, vector<32x1xf32>, vector<8x1xf32> -> vector<8x1xf32>
      %43 = vector.shape_cast %42 : vector<8x1xf32> to vector<1x8x1xf32>
      %c0_25 = arith.constant 0 : index
      %c0_26 = arith.constant 0 : index
      %c0_27 = arith.constant 0 : index
      %44 = vector.load %arg8[%c0_25, %c0_26, %c0_27] : memref<1x8x1xf32, #tpu.memory_space<vmem>>, vector<1x8x1xf32>
      tpu.vector_store %arg8[%c0_25, %c0_26, %c0_27], %43 {strides = array<i32>} : memref<1x8x1xf32, #tpu.memory_space<vmem>>, vector<1x8x1xf32>,
    } else {
    }
    return
  }
  func.func @transform_0(%arg0: i32, %arg1: i32) -> (i32, i32) {
    %c1_i32 = arith.constant 1 : i32
    %0 = arith.muli %arg0, %c1_i32 : i32
    %1 = arith.addi %0, %arg1 : i32
    %c0_i32 = arith.constant 0 : i32
    %c0_i32_0 = arith.constant 0 : i32
    return %c0_i32, %1 : i32, i32
  }
  func.func @transform_1(%arg0: i32, %arg1: i32) -> (i32, i32) {
    %c1_i32 = arith.constant 1 : i32
    %0 = arith.muli %arg0, %c1_i32 : i32
    %1 = arith.addi %0, %arg1 : i32
    %c0_i32 = arith.constant 0 : i32
    %c0_i32_0 = arith.constant 0 : i32
    return %c0_i32, %1 : i32, i32
  }
  func.func @transform_2(%arg0: i32, %arg1: i32) -> (i32, i32) {
    %c0_i32 = arith.constant 0 : i32
    %c0_i32_0 = arith.constant 0 : i32
    %c0_i32_1 = arith.constant 0 : i32
    return %c0_i32, %c0_i32_0 : i32, i32
  }
  func.func @transform_3(%arg0: i32, %arg1: i32) -> (i32, i32) {
    %c0_i32 = arith.constant 0 : i32
    %c0_i32_0 = arith.constant 0 : i32
    %c0_i32_1 = arith.constant 0 : i32
    return %c0_i32, %c0_i32_0 : i32, i32
  }
  func.func @transform_4(%arg0: i32, %arg1: i32) -> (i32, i32) {
    %c0_i32 = arith.constant 0 : i32
    %c0_i32_0 = arith.constant 0 : i32
    %c0_i32_1 = arith.constant 0 : i32
    return %c0_i32, %c0_i32_0 : i32, i32
  }
  func.func @transform_5(%arg0: i32, %arg1: i32) -> (i32, i32) {
    %c0_i32 = arith.constant 0 : i32
    %c0_i32_0 = arith.constant 0 : i32
    %c0_i32_1 = arith.constant 0 : i32
    return %c0_i32, %c0_i32_0 : i32, i32
  }
  func.func @transform_6(%arg0: i32, %arg1: i32) -> (i32, i32, i32) {
    %c0_i32 = arith.constant 0 : i32
    %c0_i32_0 = arith.constant 0 : i32
    %c0_i32_1 = arith.constant 0 : i32
    return %arg0, %c0_i32, %c0_i32_0 : i32, i32, i32
  }
}

</mosaic_0001>

<bundles_post_ra>
// kernel: recurrent_gcn_regression.1
= control target key start
LH: loop header
LB: loop body
LE: loop exit
PB: predicated region body
PF: predicated region fallthrough
CT: control target
= control target key end

     0   :  { %s6401_s21 = smov 0   ;;  %s6403_s22 = smov 0   ;;  %s10880_s0 = inlined_call_operand.vmem [shape: bf16[4,8192], index: 0, kind: input, shape index: {}]   ;;  %s10881_s1 = inlined_call_operand.vmem [shape: s32[1,8192], index: 1, kind: input, shape index: {}]   ;;  %s10882_s2 = inlined_call_operand.vmem [shape: bf16[64,4], index: 2, kind: input, shape index: {}]   ;;  %s10883_s3 = inlined_call_operand.vmem [shape: f32[64,1], index: 3, kind: input, shape index: {}]   ;;  %s10884_s4 = inlined_call_operand.vmem [shape: f32[32,1], index: 4, kind: input, shape index: {}]   ;;  %s10885_s5 = inlined_call_operand.vmem [shape: f32[8,1], index: 5, kind: input, shape index: {}]   ;;  %s10886_s6 = inlined_call_operand.vmem [shape: f32[2,8,1], index: 6, kind: output, shape index: {}]  }
   0x1   :  { %s6405_s23 = smov 0  }
   0x2 LB: > { %s28_s24 = sadd.s32 1, %s6357_s22  ;;  %p5151_p0 = scmp.ge.s32.totalorder %s6361_s23, 1  ;;  %s6361_s23 = sphi %s6405_s23, %s16_s23   ;;  %s6357_s22 = sphi %s6403_s22, %s12074_s22   ;;  %s6353_s21 = sphi %s6401_s21, %s12073_s21  }
   0x3   : > { %p30_p1 = scmp.ge.s32.totalorder %s28_s24, 2  ;;  %p243_p2 = scmp.lt.s32.totalorder %s6361_s23, 3 }
   0x5   : > { %s12076_s24 = smov (%p30_p1, %s28_s24), 0  ;;  %p244_p3 = pnand %p5151_p0, %p243_p2 }
   0x7   : > { %247 = sbr.rel (%p244_p3) target bundleno = 1216 (0x4c0), region = 44 }
   0xc   : > { %s5152_s25 = sshll.u32 %s6353_s21, 5  ;;  %v320_v0 = vld [vmem:[%s10883_s3] sm:$0xff]  ;;  %v6363_v1 = vmov 0   ;;  %v322_v2 = vld [vmem:[%s10883_s3 + $0x10] sm:$0xff]  ;;  %v321_v4 = vld [vmem:[%s10883_s3 + $0x8] sm:$0xff]  ;;  %vm450_vm0 = vcmask 1041408  }
   0xd   : > { %p280_p4 = scmp.lt.s32.totalorder %s5152_s25, 63  ;;  %5559 = vset.pattern.permute.xlu1 %v6363_v1  ;;  %5558 = vset.pattern.permute.xlu0 %v6363_v1  ;;  %v6447_v12 = vld [vmem:[%s10882_s2] sm:$0xff]  ;;  %vm437_vm1 = vcmask 31744   ;;  %v323_v25 = vld [vmem:[%s10883_s3 + $0x18] sm:$0xff]  ;;  %v6473_v27 = vld [vmem:[%s10882_s2 + $0x8] sm:$0xff]  ;;  %p293_p5 = scmp.lt.s32.totalorder %s6353_s21, 1 }
   0xe   : > { %330 = vperm.xlu1 %5559, %v320_v0   ;;  %5560 = vset.pattern.permute.xlu2 %v6363_v1  ;;  %v324_v26 = vld [vmem:[%s10883_s3 + $0x20] sm:$0xff]  ;;  %v325_v28 = vld [vmem:[%s10883_s3 + $0x28] sm:$0xff]  ;;  %v6489_v29 = vld [vmem:[%s10882_s2 + $0x10] sm:$0xff] }
   0xf   : > { %s12078_s25 = smov (!%p280_p4, %s5152_s25), 63  ;;  %340 = vperm.xlu0 %5558, %v322_v2   ;;  %v6507_v39 = vld [vmem:[%s10882_s2 + $0x18] sm:$0xff]  ;;  %v326_v40 = vld [vmem:[%s10883_s3 + $0x30] sm:$0xff]  ;;  %s12080_s21 = smov (!%p293_p5, %s6353_s21), 1 }
  0x10   : > { %s5153_s28 = sshll.u32 %s12078_s25, 1  ;;  %360 = vperm.xlu2 %5560, %v326_v40   ;;  %v327_v41 = vld [vmem:[%s10883_s3 + $0x38] sm:$0xff]  ;;  %s9150_s17 = scalar_lea.vmem %s10881_s1, %s12078_s25 }
  0x11   : > { %s6431_s7 = scalar_lea.vmem %s10880_s0, %s5153_s28  ;;  %s5155_s29 = sshll.u32 %s12080_s21, 3 }
  0x12   : > { %v312_v3 = vld [vmem:[%s6431_s7] sm:$0xff]  ;;  %v313_v5 = vld [vmem:[%s6431_s7 + $0x8] sm:$0xff]  ;;  %v314_v6 = vld [vmem:[%s6431_s7 + $0x10] sm:$0xff]  ;;  %s296_s9 = scalar_lea.vmem %s10886_s6, %s5155_s29 }
  0x13   : > { %389 = vst [vmem:[#allocation1] ss:$4 sm:$0xff] %v312_v3  ;;  %v315_v19 = vld [vmem:[%s6431_s7 + $0x18] sm:$0xff]  ;;  %v316_v35 = vld [vmem:[%s6431_s7 + $0x20] sm:$0xff]  ;;  %v317_v63 = vld [vmem:[%s6431_s7 + $0x28] sm:$0xff] }
  0x14   : > { %392 = vst [vmem:[#allocation1 + $0x20] ss:$4 sm:$0xff] %v313_v5 }
  0x16   : > { %335 = vperm.xlu1 %5559, %v321_v4  }
  0x17   : > { %345 = vperm.xlu0 %5558, %v323_v25  }
  0x18   : > { %365 = vperm.xlu2 %5560, %v327_v41  }
  0x1a   : > { %v393_v7 = vld.sshfl [vmem:[#allocation1] sm:$0xff pattern:$0x73625140]  ;;  %v394_v8 = vld.sshfl [vmem:[#allocation1 + $0x8] sm:$0xff pattern:$0x73625140] }
  0x1b   : > { %v451_v9 = vsel %vm450_vm0, %v393_v7, 0  ;;  %v453_v10 = vsel %vm450_vm0, %v394_v8, 0  ;;  %v395_v11 = vld.sshfl [vmem:[#allocation1 + $0x10] sm:$0xff pattern:$0x73625140] }
  0x1c   : > { %522 = vmatpush.bf16.msra.mxu0 %v451_v9  ;;  %551 = vmatpush.bf16.msra.mxu1 %v453_v10  ;;  %v455_v13 = vsel %vm450_vm0, %v395_v11, 0  ;;  %v396_v14 = vld.sshfl [vmem:[#allocation1 + $0x18] sm:$0xff pattern:$0x73625140] }
  0x1d   : > { %580 = vmatpush.bf16.msra.mxu2 %v455_v13  ;;  %402 = vst [vmem:[#allocation1] ss:$4 sm:$0xff] %v314_v6  ;;  %v457_v15 = vsel %vm450_vm0, %v396_v14, 0  ;;  %v399_v16 = vld.sshfl [vmem:[#allocation1 + $0x30] sm:$0xff pattern:$0x73625140] }
  0x1e   : > { %609 = vmatpush.bf16.msra.mxu3 %v457_v15  ;;  %v463_v17 = vsel %vm450_vm0, %v399_v16, 0  ;;  %v400_v18 = vld.sshfl [vmem:[#allocation1 + $0x38] sm:$0xff pattern:$0x73625140]  ;;  %355 = vperm.xlu1 %5559, %v325_v28  }
  0x1f   : > { %5172 = vmatmul.msk.bf16.vlgmr.msra.gmra.mxu0 %vm437_vm1, %v6447_v12  ;;  %5176 = vmatmul.msk.bf16.vlgmr.msra.gmra.mxu1 %vm437_vm1, %v6447_v12  ;;  %v465_v20 = vsel %vm450_vm0, %v400_v18, 0  ;;  %v397_v21 = vld.sshfl [vmem:[#allocation1 + $0x20] sm:$0xff pattern:$0x73625140] }
  0x20   : > { %5180 = vmatmul.msk.bf16.vlgmr.msra.gmra.mxu2 %vm437_vm1, %v6447_v12  ;;  %v459_v22 = vsel %vm450_vm0, %v397_v21, 0  ;;  %v398_v23 = vld.sshfl [vmem:[#allocation1 + $0x28] sm:$0xff pattern:$0x73625140]  ;;  %350 = vperm.xlu0 %5558, %v324_v26  }
  0x21   : > { %5184 = vmatmul.msk.bf16.vlgmr.msra.gmra.mxu3 %vm437_vm1, %v6447_v12  ;;  %696 = vmatpush.bf16.msrb.mxu2 %v463_v17  ;;  %404 = vst [vmem:[#allocation1 + $0x20] ss:$4 sm:$0xff] %v315_v19  ;;  %v461_v24 = vsel %vm450_vm0, %v398_v23, 0 }
  0x22   : > { %725 = vmatpush.bf16.msrb.mxu3 %v465_v20  ;;  %638 = vmatpush.bf16.msrb.mxu0 %v459_v22 }
  0x23   : > { %667 = vmatpush.bf16.msrb.mxu1 %v461_v24 }
  0x24   : > { %v407_v30 = vld.sshfl [vmem:[#allocation1 + $0x10] sm:$0xff pattern:$0x73625140]  ;;  %v408_v31 = vld.sshfl [vmem:[#allocation1 + $0x18] sm:$0xff pattern:$0x73625140] }
  0x25   : > { %v471_v32 = vsel %vm450_vm0, %v407_v30, 0  ;;  %v473_v33 = vsel %vm450_vm0, %v408_v31, 0  ;;  %v405_v34 = vld.sshfl [vmem:[#allocation1] sm:$0xff pattern:$0x73625140] }
  0x26   : > { %812 = vmatpush.bf16.msra.mxu2 %v471_v32  ;;  %841 = vmatpush.bf16.msra.mxu3 %v473_v33  ;;  %v467_v36 = vsel %vm450_vm0, %v405_v34, 0  ;;  %v406_v37 = vld.sshfl [vmem:[#allocation1 + $0x8] sm:$0xff pattern:$0x73625140] }
  0x27   : > { %754 = vmatpush.bf16.msra.mxu0 %v467_v36  ;;  %414 = vst [vmem:[#allocation1] ss:$4 sm:$0xff] %v316_v35  ;;  %v469_v38 = vsel %vm450_vm0, %v406_v37, 0 }
  0x28   : > { %783 = vmatpush.bf16.msra.mxu1 %v469_v38  ;;  %v411_v42 = vld.sshfl [vmem:[#allocation1 + $0x30] sm:$0xff pattern:$0x73625140]  ;;  %v412_v45 = vld.sshfl [vmem:[#allocation1 + $0x38] sm:$0xff pattern:$0x73625140] }
  0x29   : > { %v479_v43 = vsel %vm450_vm0, %v411_v42, 0  ;;  %v481_v48 = vsel %vm450_vm0, %v412_v45, 0  ;;  %v409_v53 = vld.sshfl [vmem:[#allocation1 + $0x20] sm:$0xff pattern:$0x73625140] }
  0x2a   : > { %v475_v54 = vsel %vm450_vm0, %v409_v53, 0  ;;  %v410_v0 = vld.sshfl [vmem:[#allocation1 + $0x28] sm:$0xff pattern:$0x73625140] }
  0x2b   : > { %416 = vst [vmem:[#allocation1 + $0x20] ss:$4 sm:$0xff] %v317_v63  ;;  %v477_v3 = vsel %vm450_vm0, %v410_v0, 0 }
  0x2f   : > { %5173 = vmatmul.msk.bf16.gmra.mxu0 %vm437_vm1, %v6473_v27  ;;  %5177 = vmatmul.msk.bf16.gmra.mxu1 %vm437_vm1, %v6473_v27 }
  0x30   : > { %5181 = vmatmul.msk.bf16.gmra.mxu2 %vm437_vm1, %v6473_v27 }
  0x31   : > { %5185 = vmatmul.msk.bf16.gmra.mxu3 %vm437_vm1, %v6473_v27 }
  0x3f   : > { %5174 = vmatmul.msk.bf16.gmra.mxu0 %vm437_vm1, %v6489_v29  ;;  %5178 = vmatmul.msk.bf16.gmra.mxu1 %vm437_vm1, %v6489_v29 }
  0x40   : > { %5182 = vmatmul.msk.bf16.gmra.mxu2 %vm437_vm1, %v6489_v29 }
  0x41   : > { %5186 = vmatmul.msk.bf16.gmra.mxu3 %vm437_vm1, %v6489_v29 }
  0x4f   : > { %5175 = vmatmul.msk.bf16.gmra.mxu0 %vm437_vm1, %v6507_v39  ;;  %5179 = vmatmul.msk.bf16.gmra.mxu1 %vm437_vm1, %v6507_v39 }
  0x50   : > { %5183 = vmatmul.msk.bf16.gmra.mxu2 %vm437_vm1, %v6507_v39 }
  0x51   : > { %5187 = vmatmul.msk.bf16.gmra.mxu3 %vm437_vm1, %v6507_v39 }
  0x5f   : > { %5188 = vmatmul.msk.bf16.vlgmr.msrb.gmra.mxu0 %vm437_vm1, %v6447_v12  ;;  %5192 = vmatmul.msk.bf16.vlgmr.msrb.gmra.mxu1 %vm437_vm1, %v6447_v12 }
  0x60   : > { %5196 = vmatmul.msk.bf16.vlgmr.msrb.gmra.mxu2 %vm437_vm1, %v6447_v12  ;;  %870 = vmatpush.bf16.msrb.mxu0 %v475_v54 }
  0x61   : > { %5200 = vmatmul.msk.bf16.vlgmr.msrb.gmra.mxu3 %vm437_vm1, %v6447_v12  ;;  %928 = vmatpush.bf16.msrb.mxu2 %v479_v43 }
  0x62   : > { %957 = vmatpush.bf16.msrb.mxu3 %v481_v48  ;;  %899 = vmatpush.bf16.msrb.mxu1 %v477_v3 }
  0x6f   : > { %5189 = vmatmul.msk.bf16.gmra.mxu0 %vm437_vm1, %v6473_v27  ;;  %5193 = vmatmul.msk.bf16.gmra.mxu1 %vm437_vm1, %v6473_v27 }
  0x70   : > { %5197 = vmatmul.msk.bf16.gmra.mxu2 %vm437_vm1, %v6473_v27 }
  0x71   : > { %5201 = vmatmul.msk.bf16.gmra.mxu3 %vm437_vm1, %v6473_v27 }
  0x7f   : > { %5190 = vmatmul.msk.bf16.gmra.mxu0 %vm437_vm1, %v6489_v29  ;;  %5194 = vmatmul.msk.bf16.gmra.mxu1 %vm437_vm1, %v6489_v29 }
  0x80   : > { %5198 = vmatmul.msk.bf16.gmra.mxu2 %vm437_vm1, %v6489_v29  ;;  %v6556_v44 = vpop.permute.xlu1 %330 }
  0x81   : > { %5202 = vmatmul.msk.bf16.gmra.mxu3 %vm437_vm1, %v6489_v29  ;;  %11189 = vst [vmem:[#allocation3_spill] sm:$0xff] %v6556_v44  ;;  %v6578_v4 = vpop.permute.xlu0 %340 }
  0x82   : > { %11191 = vst [vmem:[#allocation5_spill] sm:$0xff] %v6578_v4 }
  0x88   : > { %v6570_v55 = vpop.permute.xlu1 %335 }
  0x89   : > { %11190 = vst [vmem:[#allocation4_spill] sm:$0xff] %v6570_v55  ;;  %v6600_v30 = vpop.permute.xlu0 %345 }
  0x8a   : > { %11195 = vst [vmem:[#allocation9_spill] sm:$0xff] %v6600_v30 }
  0x8f   : > { %5191 = vmatmul.msk.bf16.gmra.mxu0 %vm437_vm1, %v6507_v39  ;;  %5195 = vmatmul.msk.bf16.gmra.mxu1 %vm437_vm1, %v6507_v39 }
  0x90   : > { %5199 = vmatmul.msk.bf16.gmra.mxu2 %vm437_vm1, %v6507_v39 }
  0x91   : > { %5203 = vmatmul.msk.bf16.gmra.mxu3 %vm437_vm1, %v6507_v39 }
  0x9c   : > { %v524_v46 = vpop.f32.mrf.mxu0  ;;  %v553_v47 = vpop.f32.mrf.mxu1 }
  0x9d   : > { %v525_v49 = vadd.f32 %v524_v46, %v6556_v44  ;;  %v554_v50 = vadd.f32 %v553_v47, %v6556_v44 }
  0x9f   : > { %v5300_v51 = vmul.f32 -1.442695, %v525_v49  ;;  %v5301_v52 = vmul.f32 -1.442695, %v554_v50  ;;  %5204 = vmatmul.msk.bf16.vlgmr.msra.gmra.mxu0 %vm437_vm1, %v6447_v12  ;;  %5208 = vmatmul.msk.bf16.vlgmr.msra.gmra.mxu1 %vm437_vm1, %v6447_v12 }
  0xa0   : > { %5212 = vmatmul.msk.bf16.vlgmr.msra.gmra.mxu2 %vm437_vm1, %v6447_v12 }
  0xa1   : > { %5561 = vpow2.f32 %v5300_v51  ;;  %5216 = vmatmul.msk.bf16.vlgmr.msra.gmra.mxu3 %vm437_vm1, %v6447_v12 }
  0xa2   : > { %5563 = vpow2.f32 %v5301_v52 }
  0xa3   : > { %v582_v56 = vpop.f32.mrf.mxu2 }
  0xa4   : > { %v583_v57 = vadd.f32 %v582_v56, %v6556_v44  ;;  %v611_v58 = vpop.f32.mrf.mxu3  ;;  %v526_v59 = vpop.f32.mrf.mxu0 }
  0xa5   : > { %v612_v60 = vadd.f32 %v611_v58, %v6556_v44  ;;  %v527_v61 = vadd.f32 %v526_v59, %v6570_v55  ;;  %v555_v62 = vpop.f32.mrf.mxu1 }
  0xa6   : > { %v5302_v1 = vmul.f32 -1.442695, %v583_v57  ;;  %v556_v2 = vadd.f32 %v555_v62, %v6570_v55 }
  0xa7   : > { %v5562_v5 = vpop.eup %5561  ;;  %v5303_v6 = vmul.f32 -1.442695, %v612_v60  ;;  %v5332_v8 = vmul.f32 -1.442695, %v527_v61  ;;  %v6629_v60 = vpop.permute.xlu0 %350 }
  0xa8   : > { %v5564_v7 = vpop.eup %5563  ;;  %5565 = vpow2.f32 %v5302_v1  ;;  %v5333_v9 = vmul.f32 -1.442695, %v556_v2  ;;  %v6580_v10 = vadd.f32 1.0, %v5562_v5  ;;  %11202 = vst [vmem:[#allocation16_spill] sm:$0xff] %v6629_v60 }
  0xa9   : > { %5567 = vpow2.f32 %v5303_v6  ;;  %v6582_v11 = vadd.f32 1.0, %v5564_v7 }
  0xaa   : > { %5569 = vpow2.f32 %v5332_v8 }
  0xab   : > { %11192 = vst [vmem:[#allocation6_spill] sm:$0xff] %v6582_v11  ;;  %v584_v13 = vpop.f32.mrf.mxu2  ;;  %5571 = vpow2.f32 %v5333_v9 }
  0xac   : > { %v585_v14 = vadd.f32 %v584_v13, %v6570_v55  ;;  %v613_v15 = vpop.f32.mrf.mxu3  ;;  %v529_v16 = vpop.f32.mrf.mxu0  ;;  %5573 = vrcp.f32 %v6580_v10 }
  0xad   : > { %v614_v17 = vadd.f32 %v613_v15, %v6570_v55  ;;  %v530_v18 = vadd.f32 %v529_v16, %v6578_v4  ;;  %v558_v19 = vpop.f32.mrf.mxu1  ;;  %5575 = vrcp.f32 %v6582_v11 }
  0xae   : > { %v5566_v20 = vpop.eup %5565  ;;  %v5334_v21 = vmul.f32 -1.442695, %v585_v14  ;;  %v559_v25 = vadd.f32 %v558_v19, %v6578_v4 }
  0xaf   : > { %v5568_v22 = vpop.eup %5567  ;;  %v6589_v23 = vadd.f32 1.0, %v5566_v20  ;;  %v5335_v24 = vmul.f32 -1.442695, %v614_v17  ;;  %5205 = vmatmul.msk.bf16.gmra.mxu0 %vm437_vm1, %v6473_v27  ;;  %5209 = vmatmul.msk.bf16.gmra.mxu1 %vm437_vm1, %v6473_v27  ;;  %v5364_v28 = vmul.f32 -1.442695, %v530_v18 }
  0xb0   : > { %v6596_v26 = vadd.f32 1.0, %v5568_v22  ;;  %5577 = vpow2.f32 %v5334_v21  ;;  %5213 = vmatmul.msk.bf16.gmra.mxu2 %vm437_vm1, %v6473_v27  ;;  %v5570_v31 = vpop.eup %5569  ;;  %v5365_v34 = vmul.f32 -1.442695, %v559_v25 }
  0xb1   : > { %11193 = vst [vmem:[#allocation7_spill] sm:$0xff] %v6589_v23  ;;  %5579 = vrcp.f32 %v6589_v23  ;;  %5217 = vmatmul.msk.bf16.gmra.mxu3 %vm437_vm1, %v6473_v27  ;;  %v5572_v32 = vpop.eup %5571  ;;  %v6606_v33 = vadd.f32 1.0, %v5570_v31 }
  0xb2   : > { %11194 = vst [vmem:[#allocation8_spill] sm:$0xff] %v6596_v26  ;;  %5581 = vrcp.f32 %v6596_v26  ;;  %v6608_v36 = vpop.eup %5573  ;;  %v6610_v37 = vadd.f32 1.0, %v5572_v32  ;;  %v6669_v32 = vpop.permute.xlu1 %355 }
  0xb3   : > { %5583 = vpow2.f32 %v5335_v24  ;;  %v587_v35 = vpop.f32.mrf.mxu2  ;;  %v6613_v42 = vpop.eup %5575  ;;  %11206 = vst [vmem:[#allocation20_spill] sm:$0xff] %v6669_v32 }
  0xb4   : > { %11196 = vst [vmem:[#allocation10_spill] sm:$0xff] %v6610_v37  ;;  %5585 = vpow2.f32 %v5364_v28  ;;  %v588_v38 = vadd.f32 %v587_v35, %v6578_v4  ;;  %v616_v40 = vpop.f32.mrf.mxu3  ;;  %v531_v41 = vpop.f32.mrf.mxu0 }
  0xb5   : > { %11197 = vst [vmem:[#allocation11_spill] sm:$0xff] %v6613_v42  ;;  %5587 = vrcp.f32 %v6606_v33  ;;  %v617_v43 = vadd.f32 %v616_v40, %v6578_v4  ;;  %v532_v45 = vadd.f32 %v531_v41, %v6600_v30  ;;  %v560_v46 = vpop.f32.mrf.mxu1 }
  0xb6   : > { %v5578_v47 = vpop.eup %5577  ;;  %5589 = vrcp.f32 %v6610_v37  ;;  %v5366_v48 = vmul.f32 -1.442695, %v588_v38  ;;  %v561_v49 = vadd.f32 %v560_v46, %v6600_v30 }
  0xb7   : > { %v6620_v50 = vpop.eup %5579  ;;  %v6622_v51 = vadd.f32 1.0, %v5578_v47  ;;  %5591 = vpow2.f32 %v5365_v34  ;;  %v5367_v52 = vmul.f32 -1.442695, %v617_v43  ;;  %v5396_v53 = vmul.f32 -1.442695, %v532_v45 }
  0xb8   : > { %11198 = vst [vmem:[#allocation12_spill] sm:$0xff] %v6620_v50  ;;  %v6624_v54 = vpop.eup %5581  ;;  %5593 = vpow2.f32 %v5366_v48  ;;  %v5397_v59 = vmul.f32 -1.442695, %v561_v49 }
  0xb9   : > { %11199 = vst [vmem:[#allocation13_spill] sm:$0xff] %v6622_v51  ;;  %v5584_v56 = vpop.eup %5583  ;;  %5595 = vrcp.f32 %v6622_v51 }
  0xba   : > { %11200 = vst [vmem:[#allocation14_spill] sm:$0xff] %v6624_v54  ;;  %v5586_v57 = vpop.eup %5585  ;;  %v6627_v58 = vadd.f32 1.0, %v5584_v56  ;;  %5597 = vpow2.f32 %v5367_v52 }
  0xbb   : > { %v6631_v61 = vpop.eup %5587  ;;  %v6633_v62 = vadd.f32 1.0, %v5586_v57  ;;  %5599 = vpow2.f32 %v5396_v53  ;;  %v589_v63 = vpop.f32.mrf.mxu2 }
  0xbc   : > { %11201 = vst [vmem:[#allocation15_spill] sm:$0xff] %v6627_v58  ;;  %v6635_v0 = vpop.eup %5589  ;;  %5601 = vrcp.f32 %v6627_v58  ;;  %v590_v1 = vadd.f32 %v589_v63, %v6600_v30  ;;  %v618_v2 = vpop.f32.mrf.mxu3 }
  0xbd   : > { %11203 = vst [vmem:[#allocation17_spill] sm:$0xff] %v6635_v0  ;;  %v534_v3 = vpop.f32.mrf.mxu0  ;;  %v5592_v5 = vpop.eup %5591  ;;  %5603 = vrcp.f32 %v6633_v62  ;;  %v619_v6 = vadd.f32 %v618_v2, %v6600_v30  ;;  %v2926_v25 = vand.u32 2147483648, %v6633_v62  ;;  %v2924_v34 = vand.u32 2147483647, %v6633_v62 }
  0xbe   : > { %v535_v7 = vadd.f32 %v534_v3, %v6629_v60  ;;  %v563_v8 = vpop.f32.mrf.mxu1  ;;  %v5594_v9 = vpop.eup %5593  ;;  %v6642_v13 = vadd.f32 1.0, %v5592_v5  ;;  %5605 = vpow2.f32 %v5397_v59  ;;  %v5398_v14 = vmul.f32 -1.442695, %v590_v1 }
  0xbf   : > { %v6644_v15 = vpop.eup %5595  ;;  %v6646_v16 = vadd.f32 1.0, %v5594_v9  ;;  %5206 = vmatmul.msk.bf16.gmra.mxu0 %vm437_vm1, %v6489_v29  ;;  %5210 = vmatmul.msk.bf16.gmra.mxu1 %vm437_vm1, %v6489_v29  ;;  %v5399_v20 = vmul.f32 -1.442695, %v619_v6  ;;  %v564_v24 = vadd.f32 %v563_v8, %v6629_v60  ;;  %vm2920_vm2 = vweird.f32 %v6633_v62 }
  0xc0   : > { %11204 = vst [vmem:[#allocation18_spill] sm:$0xff] %v6644_v15  ;;  %5607 = vtanh.f32 %v535_v7  ;;  %v5598_v17 = vpop.eup %5597  ;;  %5214 = vmatmul.msk.bf16.gmra.mxu2 %vm437_vm1, %v6489_v29  ;;  %v2927_v53 = vor.u32 1.1754944e-38, %v2926_v25  ;;  %vm2935_vm3 = vweird.f32 %v6642_v13  ;;  %vm6693_vm5 = vcmp.eq.f32.partialorder %v2924_v34, 8.507059e+37 }
  0xc1   : > { %5609 = vrcp.f32 %v6642_v13  ;;  %v5600_v18 = vpop.eup %5599  ;;  %v6656_v19 = vadd.f32 1.0, %v5598_v17  ;;  %5218 = vmatmul.msk.bf16.gmra.mxu3 %vm437_vm1, %v6489_v29  ;;  %v2939_v8 = vand.u32 2147483647, %v6642_v13  ;;  %vm2950_vm11 = vweird.f32 %v6646_v16 }
  0xc2   : > { %5611 = vrcp.f32 %v6646_v16  ;;  %v6660_v21 = vpop.eup %5601  ;;  %v6662_v22 = vadd.f32 1.0, %v5600_v18  ;;  %v6710_v18 = vpop.permute.xlu2 %360 }
  0xc3   : > { %11205 = vst [vmem:[#allocation19_spill] sm:$0xff] %v6660_v21  ;;  %5613 = vpow2.f32 %v5398_v14  ;;  %v6666_v28 = vpop.eup %5603  ;;  %v592_v31 = vpop.f32.mrf.mxu2  ;;  %vm6744_vm8 = vcmp.eq.f32.partialorder %v2939_v8, 8.507059e+37  ;;  %vm2965_vm14 = vweird.f32 %v6656_v19 }
  0xc4   : > { %5615 = vrcp.f32 %v6656_v19  ;;  %v5606_v35 = vpop.eup %5605  ;;  %v2916_v29 = vmul.f32 %v6666_v28, %v6633_v62  ;;  %v593_v38 = vadd.f32 %v592_v31, %v6629_v60  ;;  %v621_v40 = vpop.f32.mrf.mxu3  ;;  %vm2921_vm4 = vweird.f32 %v6666_v28 }
  0xc5   : > { %5617 = vrcp.f32 %v6662_v22  ;;  %v536_v41 = vpop.f32.mrf.mxu0  ;;  %v6678_v45 = vadd.f32 1.0, %v5606_v35  ;;  %v622_v46 = vadd.f32 %v621_v40, %v6629_v60  ;;  %v2941_v35 = vand.u32 2147483648, %v6642_v13  ;;  %vm6732_vm7 = vmor %vm2920_vm2, %vm2921_vm4 }
  0xc6   : > { %v6676_v43 = vpop.eup %5607  ;;  %5619 = vpow2.f32 %v5399_v20  ;;  %v565_v47 = vpop.f32.mrf.mxu1  ;;  %v2917_v49 = vsub.f32 1.0, %v2916_v29  ;;  %v537_v52 = vadd.f32 %v536_v41, %v6669_v32  ;;  %vm3400_vm4 = vweird.f32 %v6662_v22 }
  0xc7   : > { %v6682_v48 = vpop.eup %5609  ;;  %5621 = vtanh.f32 %v564_v24  ;;  %v566_v59 = vadd.f32 %v565_v47, %v6669_v32 }
  0xc8   : > { %v6686_v56 = vpop.eup %5611  ;;  %v2931_v57 = vmul.f32 %v6682_v48, %v6642_v13  ;;  %5623 = vrcp.f32 %v6678_v45  ;;  %v2918_v2 = vmul.f32 %v6666_v28, %v2917_v49  ;;  %vm2936_vm6 = vweird.f32 %v6682_v48 }
  0xc9   : > { %v5614_v1 = vpop.eup %5613  ;;  %v2946_v3 = vmul.f32 %v6686_v56, %v6646_v16  ;;  %5625 = vtanh.f32 %v593_v38  ;;  %vm2937_vm9 = vmor %vm2935_vm3, %vm2936_vm6  ;;  %vm2951_vm10 = vweird.f32 %v6686_v56 }
  0xca   : > { %v6701_v5 = vpop.eup %5615  ;;  %v2932_v6 = vsub.f32 1.0, %v2931_v57  ;;  %v6703_v7 = vadd.f32 1.0, %v5614_v1  ;;  %5627 = vtanh.f32 %v622_v46  ;;  %v2919_v20 = vadd.f32 %v6666_v28, %v2918_v2  ;;  %vm6782_vm12 = vmor %vm2950_vm11, %vm2951_vm10 }
  0xcb   : > { %v6706_v9 = vpop.eup %5617  ;;  %v2947_v14 = vsub.f32 1.0, %v2946_v3  ;;  %v2961_v17 = vmul.f32 %v6701_v5, %v6656_v19  ;;  %5629 = vtanh.f32 %v537_v52  ;;  %v594_v34 = vpop.f32.mrf.mxu2  ;;  %vm2966_vm15 = vweird.f32 %v6701_v5 }
  0xcc   : > { %v5620_v24 = vpop.eup %5619  ;;  %v2933_v25 = vmul.f32 %v6682_v48, %v2932_v6  ;;  %v3396_v31 = vmul.f32 %v6706_v9, %v6662_v22  ;;  %5631 = vrcp.f32 %v6703_v7  ;;  %v623_v46 = vpop.f32.mrf.mxu3  ;;  %v595_v57 = vadd.f32 %v594_v34, %v6669_v32  ;;  %vm6804_vm2 = vmor %vm2965_vm14, %vm2966_vm15 }
  0xcd   : > { %v6718_v29 = vpop.eup %5621  ;;  %v2948_v38 = vmul.f32 %v6686_v56, %v2947_v14  ;;  %v2962_v40 = vsub.f32 1.0, %v2961_v17  ;;  %v6721_v41 = vadd.f32 1.0, %v5620_v24  ;;  %5633 = vtanh.f32 %v566_v59  ;;  %v539_v47 = vpop.f32.mrf.mxu0 }
  0xce   : > { %11209 = vst [vmem:[#allocation21_spill] sm:$0xff] %v6718_v29  ;;  %v6723_v49 = vpop.eup %5623  ;;  %v3397_v52 = vsub.f32 1.0, %v3396_v31  ;;  %v624_v1 = vadd.f32 %v623_v46, %v6669_v32  ;;  %v540_v2 = vadd.f32 %v539_v47, %v6710_v18  ;;  %v568_v59 = vpop.f32.mrf.mxu1  ;;  %v2923_v17 = vsel %vm6732_vm7, %v6666_v28, %v2919_v20 }
  0xcf   : > { %v6736_v6 = vpop.eup %5625  ;;  %v3411_v14 = vmul.f32 %v6723_v49, %v6678_v45  ;;  %5635 = vrcp.f32 %v6721_v41  ;;  %v2963_v31 = vmul.f32 %v6701_v5, %v2962_v40  ;;  %v569_v34 = vadd.f32 %v568_v59, %v6710_v18  ;;  %5207 = vmatmul.msk.bf16.gmra.mxu0 %vm437_vm1, %v6507_v39  ;;  %5211 = vmatmul.msk.bf16.gmra.mxu1 %vm437_vm1, %v6507_v39 }
  0xd0   : > { %11212 = vst [vmem:[#allocation22_spill] sm:$0xff] %v6736_v6  ;;  %v6748_v62 = vpop.eup %5627  ;;  %5637 = vtanh.f32 %v595_v57  ;;  %v2942_v46 = vor.u32 1.1754944e-38, %v2941_v35  ;;  %v3398_v28 = vmul.f32 %v6706_v9, %v3397_v52  ;;  %v2928_v8 = vsel %vm6693_vm5, %v2927_v53, %v2923_v17  ;;  %5215 = vmatmul.msk.bf16.gmra.mxu2 %vm437_vm1, %v6507_v39 }
  0xd1   : > { %11215 = vst [vmem:[#allocation23_spill] sm:$0xff] %v6748_v62  ;;  %v6756_v47 = vpop.eup %5629  ;;  %5639 = vtanh.f32 %v624_v1  ;;  %v2934_v20 = vadd.f32 %v6682_v48, %v2933_v25  ;;  %v3412_v40 = vsub.f32 1.0, %v3411_v14  ;;  %5219 = vmatmul.msk.bf16.gmra.mxu3 %vm437_vm1, %v6507_v39  ;;  %v2949_v63 = vadd.f32 %v6686_v56, %v2948_v38 }
  0xd2   : > { %11216 = vst [vmem:[#allocation24_spill] sm:$0xff] %v6756_v47  ;;  %v6764_v35 = vpop.eup %5631  ;;  %5641 = vtanh.f32 %v540_v2  ;;  %v4067_v57 = vsub.f32 1.0, %v2928_v8  ;;  %v2954_v38 = vand.u32 2147483647, %v6646_v16  ;;  %v2956_v2 = vand.u32 2147483648, %v6646_v16 }
  0xd3   : > { %v6774_v53 = vpop.eup %5633  ;;  %v3426_v25 = vmul.f32 %v6764_v35, %v6703_v7  ;;  %v2938_v52 = vsel %vm2937_vm9, %v6682_v48, %v2934_v20  ;;  %5643 = vtanh.f32 %v569_v34  ;;  %v597_v1 = vpop.f32.mrf.mxu2  ;;  %v2953_v14 = vsel %vm6782_vm12, %v6686_v56, %v2949_v63 }
  0xd4   : > { %11217 = vst [vmem:[#allocation25_spill] sm:$0xff] %v6774_v53  ;;  %v2943_v13 = vsel %vm6744_vm8, %v2942_v46, %v2938_v52  ;;  %v598_v48 = vadd.f32 %v597_v1, %v6710_v18  ;;  %v626_v17 = vpop.f32.mrf.mxu3  ;;  %v2964_v24 = vadd.f32 %v6701_v5, %v2963_v31  ;;  %v2957_v16 = vor.u32 1.1754944e-38, %v2956_v2  ;;  %v6810_v2 = vpop.permute.xlu2 %365 }
  0xd5   : > { %v6788_v3 = vpop.eup %5635  ;;  %v3427_v59 = vsub.f32 1.0, %v3426_v25  ;;  %v541_v34 = vpop.f32.mrf.mxu0  ;;  %v4068_v20 = vsub.f32 1.0, %v2943_v13  ;;  %v627_v52 = vadd.f32 %v626_v17, %v6710_v18  ;;  %vm2955_vm13 = vcmp.eq.f32.partialorder %v2954_v38, 8.507059e+37 }
  0xd6   : > { %v6795_v46 = vpop.eup %5637  ;;  %v3441_v8 = vmul.f32 %v6788_v3, %v6721_v41  ;;  %v570_v25 = vpop.f32.mrf.mxu1  ;;  %5645 = vtanh.f32 %v598_v48  ;;  %v2958_v63 = vsel %vm2955_vm13, %v2957_v16, %v2953_v14  ;;  %v2969_v13 = vand.u32 2147483647, %v6656_v19 }
  0xd7   : > { %11220 = vst [vmem:[#allocation26_spill] sm:$0xff] %v6795_v46  ;;  %v6800_v62 = vpop.eup %5639  ;;  %v2971_v39 = vand.u32 2147483648, %v6656_v19  ;;  %v3413_v38 = vmul.f32 %v6723_v49, %v3412_v40  ;;  %5647 = vtanh.f32 %v627_v52  ;;  %v3428_v14 = vmul.f32 %v6764_v35, %v3427_v59 }
  0xd8   : > { %11221 = vst [vmem:[#allocation27_spill] sm:$0xff] %v6800_v62  ;;  %v5642_v56 = vpop.eup %5641  ;;  %v3442_v31 = vsub.f32 1.0, %v3441_v8  ;;  %v2968_v8 = vsel %vm6804_vm2, %v6701_v5, %v2964_v24  ;;  %v4069_v62 = vsub.f32 1.0, %v2958_v63  ;;  %vm2970_vm3 = vcmp.eq.f32.partialorder %v2969_v13, 8.507059e+37 }
  0xd9   : > { %v5644_v17 = vpop.eup %5643  ;;  %v6813_v48 = vmul.f32 %v5642_v56, %v4067_v57  ;;  %v2972_v46 = vor.u32 1.1754944e-38, %v2971_v39  ;;  %v542_v6 = vadd.f32 %v541_v34, %v6810_v2  ;;  %v3399_v40 = vadd.f32 %v6706_v9, %v3398_v28 }
  0xda   : > { %v6819_v16 = vmul.f32 %v5644_v17, %v4068_v20  ;;  %v6822_v19 = vmul.f32 %v6788_v3, %v3442_v31  ;;  %vm3401_vm5 = vweird.f32 %v6706_v9  ;;  %v3404_v5 = vand.u32 2147483647, %v6662_v22 }
  0xdb   : > { %v2973_v57 = vsel %vm2970_vm3, %v2972_v46, %v2968_v8  ;;  %v599_v59 = vpop.f32.mrf.mxu2  ;;  %v4323_v20 = vmax.f32 %v6813_v48, 0.0  ;;  %vm6830_vm6 = vmor %vm3400_vm4, %vm3401_vm5  ;;  %v3406_v56 = vand.u32 2147483648, %v6662_v22  ;;  %5649 = vtanh.f32 %v542_v6 }
  0xdc   : > { %v5646_v24 = vpop.eup %5645  ;;  %v571_v28 = vadd.f32 %v570_v25, %v6810_v2  ;;  %v628_v34 = vpop.f32.mrf.mxu3  ;;  %v4070_v63 = vsub.f32 1.0, %v2973_v57  ;;  %v3403_v1 = vsel %vm6830_vm6, %v6706_v9, %v3399_v40  ;;  %v3414_v13 = vadd.f32 %v6723_v49, %v3413_v38 }
  0xdd   : > { %v6836_v46 = vpop.f32.mrf.mxu0  ;;  %v6838_v31 = vmul.f32 %v5646_v24, %v4069_v62  ;;  %v5648_v17 = vpop.eup %5647  ;;  %v3407_v8 = vor.u32 1.1754944e-38, %v3406_v56  ;;  %vm3415_vm7 = vweird.f32 %v6678_v45  ;;  %vm3416_vm8 = vweird.f32 %v6723_v49 }
  0xde   : > { %v669_v39 = vpop.f32.mrf.mxu1  ;;  %v3419_v22 = vand.u32 2147483647, %v6678_v45  ;;  %v6847_v6 = vmul.f32 %v5648_v17, %v4070_v63  ;;  %vm3405_vm9 = vcmp.eq.f32.partialorder %v3404_v5, 8.507059e+37  ;;  %vm6849_vm10 = vmor %vm3415_vm7, %vm3416_vm8  ;;  %v3421_v9 = vand.u32 2147483648, %v6678_v45  ;;  %v318_v45 = vld [vmem:[%s6431_s7 + $0x30] sm:$0xff] }
  0xdf   : > { %5651 = vtanh.f32 %v571_v28  ;;  %5220 = vmatmul.msk.bf16.vlgmr.msrb.gmra.mxu0 %vm437_vm1, %v6447_v12  ;;  %5224 = vmatmul.msk.bf16.vlgmr.msrb.gmra.mxu1 %vm437_vm1, %v6447_v12  ;;  %v4324_v25 = vmax.f32 %v6819_v16, 0.0  ;;  %v3408_v38 = vsel %vm3405_vm9, %v3407_v8, %v3403_v1  ;;  %v3418_v40 = vsel %vm6849_vm10, %v6723_v49, %v3414_v13  ;;  %v419_v28 = vld.sshfl [vmem:[#allocation1 + $0x10] sm:$0xff pattern:$0x73625140] }
  0xe0   : > { %v600_v57 = vadd.f32 %v599_v59, %v6810_v2  ;;  %5228 = vmatmul.msk.bf16.vlgmr.msrb.gmra.mxu2 %vm437_vm1, %v6447_v12  ;;  %v4099_v5 = vsub.f32 1.0, %v3408_v38  ;;  %vm3420_vm11 = vcmp.eq.f32.partialorder %v3419_v22, 8.507059e+37  ;;  %v3422_v24 = vor.u32 1.1754944e-38, %v3421_v9  ;;  %v420_v17 = vld.sshfl [vmem:[#allocation1 + $0x18] sm:$0xff pattern:$0x73625140] }
  0xe1   : > { %v3429_v52 = vadd.f32 %v6764_v35, %v3428_v14  ;;  %5232 = vmatmul.msk.bf16.vlgmr.msrb.gmra.mxu3 %vm437_vm1, %v6447_v12  ;;  %v5650_v56 = vpop.eup %5649  ;;  %vm3430_vm12 = vweird.f32 %v6703_v7  ;;  %vm3431_vm13 = vweird.f32 %v6764_v35  ;;  %v3434_v49 = vand.u32 2147483647, %v6703_v7  ;;  %v417_v8 = vld.sshfl [vmem:[#allocation1] sm:$0xff pattern:$0x73625140] }
  0xe2   : > { %v3436_v59 = vand.u32 2147483648, %v6703_v7  ;;  %v6873_v63 = vmul.f32 %v5650_v56, %v4099_v5  ;;  %v3423_v1 = vsel %vm3420_vm11, %v3422_v24, %v3418_v40  ;;  %vm6875_vm14 = vmor %vm3430_vm12, %vm3431_vm13  ;;  %5653 = vtanh.f32 %v600_v57  ;;  %v418_v40 = vld.sshfl [vmem:[#allocation1 + $0x8] sm:$0xff pattern:$0x73625140] }
  0xe3   : > { %v629_v12 = vadd.f32 %v628_v34, %v6810_v2  ;;  %v698_v14 = vpop.f32.mrf.mxu2  ;;  %v4100_v22 = vsub.f32 1.0, %v3423_v1  ;;  %v3433_v62 = vsel %vm6875_vm14, %v6764_v35, %v3429_v52  ;;  %vm3435_vm15 = vcmp.eq.f32.partialorder %v3434_v49, 8.507059e+37  ;;  %426 = vst [vmem:[#allocation1] ss:$4 sm:$0xff] %v318_v45 }
  0xe4   : > { %v3437_v7 = vor.u32 1.1754944e-38, %v3436_v59  ;;  %v727_v9 = vpop.f32.mrf.mxu3  ;;  %v3444_v24 = vadd.f32 %v6788_v3, %v6822_v19  ;;  %vm3445_vm2 = vweird.f32 %v6721_v41  ;;  %vm3446_vm3 = vweird.f32 %v6788_v3 }
  0xe5   : > { %v642_v38 = vpop.f32.mrf.mxu0  ;;  %v5652_v5 = vpop.eup %5651  ;;  %v3449_v34 = vand.u32 2147483647, %v6721_v41  ;;  %vm6890_vm4 = vmor %vm3445_vm2, %vm3446_vm3  ;;  %v3451_v49 = vand.u32 2147483648, %v6721_v41  ;;  %5655 = vtanh.f32 %v629_v12  ;;  %v641_v1 = vadd.f32 %v6836_v46, %v6556_v44 }
  0xe6   : > { %v671_v57 = vpop.f32.mrf.mxu1  ;;  %v6888_v56 = vmul.f32 %v5652_v5, %v4100_v22  ;;  %v3438_v35 = vsel %vm3435_vm15, %v3437_v7, %v3433_v62  ;;  %v3448_v19 = vsel %vm6890_vm4, %v6788_v3, %v3444_v24  ;;  %v670_v13 = vadd.f32 %v669_v39, %v6556_v44 }
  0xe7   : > { %v4101_v59 = vsub.f32 1.0, %v3438_v35  ;;  %vm3450_vm5 = vcmp.eq.f32.partialorder %v3449_v34, 8.507059e+37  ;;  %v3452_v45 = vor.u32 1.1754944e-38, %v3451_v49  ;;  %v487_v22 = vsel %vm450_vm0, %v419_v28, 0 }
  0xe8   : > { %v699_v62 = vadd.f32 %v698_v14, %v6556_v44  ;;  %v5654_v7 = vpop.eup %5653  ;;  %v5304_v5 = vmul.f32 -1.442695, %v641_v1  ;;  %1044 = vmatpush.bf16.msra.mxu2 %v487_v22  ;;  %v728_v41 = vadd.f32 %v727_v9, %v6556_v44  ;;  %v489_v12 = vsel %vm450_vm0, %v420_v17, 0 }
  0xe9   : > { %v643_v3 = vadd.f32 %v642_v38, %v6570_v55  ;;  %v4229_v24 = vmul.f32 %v5654_v7, %v4101_v59  ;;  %v3453_v34 = vsel %vm3450_vm5, %v3452_v45, %v3448_v19  ;;  %v5305_v35 = vmul.f32 -1.442695, %v670_v13  ;;  %1073 = vmatpush.bf16.msra.mxu3 %v489_v12 }
  0xea   : > { %v5306_v46 = vmul.f32 -1.442695, %v699_v62  ;;  %v4102_v52 = vsub.f32 1.0, %v3453_v34  ;;  %5657 = vpow2.f32 %v5304_v5  ;;  %v5307_v39 = vmul.f32 -1.442695, %v728_v41 }
  0xeb   : > { %v5336_v28 = vmul.f32 -1.442695, %v643_v3  ;;  %v700_v49 = vpop.f32.mrf.mxu2  ;;  %v5656_v14 = vpop.eup %5655  ;;  %5659 = vpow2.f32 %v5305_v35  ;;  %v672_v1 = vadd.f32 %v671_v57, %v6570_v55  ;;  %v483_v9 = vsel %vm450_vm0, %v417_v8, 0 }
  0xec   : > { %v701_v17 = vadd.f32 %v700_v49, %v6570_v55  ;;  %v729_v22 = vpop.f32.mrf.mxu3  ;;  %v4230_v59 = vmul.f32 %v5656_v14, %v4102_v52  ;;  %5661 = vpow2.f32 %v5306_v46  ;;  %986 = vmatpush.bf16.msra.mxu0 %v483_v9  ;;  %v485_v45 = vsel %vm450_vm0, %v418_v40, 0 }
  0xed   : > { %v645_v38 = vpop.f32.mrf.mxu0  ;;  %v730_v19 = vadd.f32 %v729_v22, %v6570_v55  ;;  %5663 = vpow2.f32 %v5307_v39  ;;  %v5337_v62 = vmul.f32 -1.442695, %v672_v1  ;;  %1015 = vmatpush.bf16.msra.mxu1 %v485_v45  ;;  %v4325_v8 = vmax.f32 %v6838_v31, 0.0 }
  0xee   : > { %v674_v13 = vpop.f32.mrf.mxu1  ;;  %v5338_v7 = vmul.f32 -1.442695, %v701_v17  ;;  %v646_v57 = vadd.f32 %v645_v38, %v6578_v4  ;;  %5665 = vpow2.f32 %v5336_v28  ;;  %v4355_v41 = vmax.f32 %v6873_v63, 0.0 }
  0xef   : > { %v5339_v5 = vmul.f32 -1.442695, %v730_v19  ;;  %5221 = vmatmul.msk.bf16.gmra.mxu0 %vm437_vm1, %v6473_v27  ;;  %5225 = vmatmul.msk.bf16.gmra.mxu1 %vm437_vm1, %v6473_v27  ;;  %5667 = vpow2.f32 %v5337_v62  ;;  %v4356_v12 = vmax.f32 %v6888_v56, 0.0  ;;  %v4357_v3 = vmax.f32 %v4229_v24, 0.0 }
  0xf0   : > { %v5368_v40 = vmul.f32 -1.442695, %v646_v57  ;;  %5229 = vmatmul.msk.bf16.gmra.mxu2 %vm437_vm1, %v6473_v27  ;;  %v5658_v34 = vpop.eup %5657  ;;  %v4326_v31 = vmax.f32 %v6847_v6, 0.0  ;;  %5669 = vpow2.f32 %v5338_v7  ;;  %v6926_v35 = vpack.c.bf16 %v4355_v41, %v4323_v20 }
  0xf1   : > { %5233 = vmatmul.msk.bf16.gmra.mxu3 %vm437_vm1, %v6473_v27  ;;  %v4358_v63 = vmax.f32 %v4230_v59, 0.0  ;;  %v5660_v46 = vpop.eup %5659  ;;  %v6928_v52 = vadd.f32 1.0, %v5658_v34  ;;  %5671 = vpow2.f32 %v5339_v5  ;;  %v6932_v56 = vpack.c.bf16 %v4356_v12, %v4324_v25 }
  0xf2   : > { %11232 = vst [vmem:[#allocation28_spill] sm:$0xff] %v6926_v35  ;;  %v6934_v24 = vpack.c.bf16 %v4357_v3, %v4325_v8  ;;  %v5662_v6 = vpop.eup %5661  ;;  %v6936_v39 = vadd.f32 1.0, %v5660_v46  ;;  %5673 = vpow2.f32 %v5368_v40  ;;  %v675_v25 = vadd.f32 %v674_v13, %v6578_v4 }
  0xf3   : > { %11233 = vst [vmem:[#allocation29_spill] sm:$0xff] %v6928_v52  ;;  %v703_v27 = vpop.f32.mrf.mxu2  ;;  %v6938_v28 = vpack.c.bf16 %v4358_v63, %v4326_v31  ;;  %v5664_v48 = vpop.eup %5663  ;;  %5675 = vrcp.f32 %v6928_v52  ;;  %v6941_v20 = vadd.f32 1.0, %v5662_v6  ;;  %v1956_v7 = vmul.f32 %v6608_v36, %v6580_v10 }
  0xf4   : > { %11234 = vst [vmem:[#allocation30_spill] sm:$0xff] %v6932_v56  ;;  %v732_v49 = vpop.f32.mrf.mxu3  ;;  %v5666_v1 = vpop.eup %5665  ;;  %5677 = vrcp.f32 %v6936_v39  ;;  %v6944_v16 = vadd.f32 1.0, %v5664_v48  ;;  %v704_v38 = vadd.f32 %v703_v27, %v6578_v4  ;;  %v5369_v41 = vmul.f32 -1.442695, %v675_v25 }
  0xf5   : > { %11235 = vst [vmem:[#allocation31_spill] sm:$0xff] %v6934_v24  ;;  %v647_v14 = vpop.f32.mrf.mxu0  ;;  %v5668_v17 = vpop.eup %5667  ;;  %5679 = vrcp.f32 %v6941_v20  ;;  %v6948_v22 = vadd.f32 1.0, %v5666_v1  ;;  %v733_v45 = vadd.f32 %v732_v49, %v6578_v4  ;;  %v1957_v27 = vsub.f32 1.0, %v1956_v7 }
  0xf6   : > { %11236 = vst [vmem:[#allocation32_spill] sm:$0xff] %v6936_v39  ;;  %v676_v9 = vpop.f32.mrf.mxu1  ;;  %v5670_v59 = vpop.eup %5669  ;;  %5681 = vrcp.f32 %v6944_v16  ;;  %v6952_v19 = vadd.f32 1.0, %v5668_v17  ;;  %v648_v57 = vadd.f32 %v647_v14, %v6600_v30  ;;  %v5370_v34 = vmul.f32 -1.442695, %v704_v38 }
  0xf7   : > { %11237 = vst [vmem:[#allocation33_spill] sm:$0xff] %v6938_v28  ;;  %v5672_v62 = vpop.eup %5671  ;;  %5683 = vrcp.f32 %v6948_v22  ;;  %v6958_v13 = vadd.f32 1.0, %v5670_v59  ;;  %v677_v40 = vadd.f32 %v676_v9, %v6600_v30  ;;  %v5371_v63 = vmul.f32 -1.442695, %v733_v45 }
  0xf8   : > { %11238 = vst [vmem:[#allocation34_spill] sm:$0xff] %v6941_v20  ;;  %v5674_v8 = vpop.eup %5673  ;;  %5685 = vrcp.f32 %v6952_v19  ;;  %v6962_v5 = vadd.f32 1.0, %v5672_v62  ;;  %v5400_v48 = vmul.f32 -1.442695, %v648_v57  ;;  %v6986_v7 = vmul.f32 %v6613_v42, %v6582_v11 }
  0xf9   : > { %11239 = vst [vmem:[#allocation35_spill] sm:$0xff] %v6944_v16  ;;  %v6965_v12 = vpop.eup %5675  ;;  %5687 = vrcp.f32 %v6958_v13  ;;  %v6968_v3 = vadd.f32 1.0, %v5674_v8  ;;  %v5401_v9 = vmul.f32 -1.442695, %v677_v40  ;;  %v6991_v8 = vld [vmem:[%s10882_s2 + $0x10] sm:$0xff]  ;;  %v7001_v40 = vmul.f32 %v6620_v50, %v6589_v23 }
  0xfa   : > { %11240 = vst [vmem:[#allocation36_spill] sm:$0xff] %v6948_v22  ;;  %v6970_v31 = vpop.eup %5677  ;;  %5689 = vrcp.f32 %v6962_v5 }
  0xfb   : > { %11241 = vst [vmem:[#allocation37_spill] sm:$0xff] %v6952_v19  ;;  %v705_v46 = vpop.f32.mrf.mxu2  ;;  %v6973_v6 = vpop.eup %5679  ;;  %5691 = vrcp.f32 %v6968_v3  ;;  %vm2980_vm6 = vweird.f32 %v6968_v3 }
  0xfc   : > { %11242 = vst [vmem:[#allocation38_spill] sm:$0xff] %v6958_v13  ;;  %v706_v49 = vadd.f32 %v705_v46, %v6600_v30  ;;  %v734_v14 = vpop.f32.mrf.mxu3  ;;  %v6977_v25 = vpop.eup %5681  ;;  %5693 = vpow2.f32 %v5369_v41 }
  0xfd   : > { %11243 = vst [vmem:[#allocation39_spill] sm:$0xff] %v6962_v5  ;;  %v650_v1 = vpop.f32.mrf.mxu0  ;;  %v735_v17 = vadd.f32 %v734_v14, %v6600_v30  ;;  %v6980_v59 = vpop.eup %5683  ;;  %5695 = vpow2.f32 %v5370_v34 }
  0xfe   : > { %11244 = vst [vmem:[#allocation40_spill] sm:$0xff] %v6965_v12  ;;  %v679_v38 = vpop.f32.mrf.mxu1  ;;  %v5402_v45 = vmul.f32 -1.442695, %v706_v49  ;;  %v6982_v62 = vpop.eup %5685  ;;  %5697 = vpow2.f32 %v5371_v63  ;;  %v651_v34 = vadd.f32 %v650_v1, %v6629_v60  ;;  %v1958_v63 = vmul.f32 %v6608_v36, %v1957_v27 }
  0xff   : > { %11245 = vst [vmem:[#allocation41_spill] sm:$0xff] %v6970_v31  ;;  %v5403_v57 = vmul.f32 -1.442695, %v735_v17  ;;  %5222 = vmatmul.msk.bf16.gmra.mxu0 %vm437_vm1, %v6991_v8  ;;  %5226 = vmatmul.msk.bf16.gmra.mxu1 %vm437_vm1, %v6991_v8  ;;  %v6997_v41 = vpop.eup %5687  ;;  %5699 = vpow2.f32 %v5400_v48  ;;  %v680_v49 = vadd.f32 %v679_v38, %v6629_v60  ;;  %v7017_v1 = vmul.f32 %v6624_v54, %v6596_v26 }
 0x100   : > { %11246 = vst [vmem:[#allocation42_spill] sm:$0xff] %v6973_v6  ;;  %5230 = vmatmul.msk.bf16.gmra.mxu2 %vm437_vm1, %v6991_v8  ;;  %v7007_v46 = vpop.eup %5689  ;;  %5701 = vpow2.f32 %v5401_v9  ;;  %v7025_v50 = vadd.f32 %v6608_v36, %v1958_v63  ;;  %v7029_v26 = vmul.f32 %v6631_v61, %v6606_v33 }
 0x101   : > { %11247 = vst [vmem:[#allocation43_spill] sm:$0xff] %v6977_v25  ;;  %5234 = vmatmul.msk.bf16.gmra.mxu3 %vm437_vm1, %v6991_v8  ;;  %v7012_v14 = vpop.eup %5691  ;;  %5703 = vpow2.f32 %v5402_v45 }
 0x102   : > { %11248 = vst [vmem:[#allocation44_spill] sm:$0xff] %v6980_v59  ;;  %v5694_v17 = vpop.eup %5693  ;;  %v2976_v27 = vmul.f32 %v7012_v14, %v6968_v3  ;;  %5705 = vpow2.f32 %v5403_v57  ;;  %vm2981_vm7 = vweird.f32 %v7012_v14 }
 0x103   : > { %11249 = vst [vmem:[#allocation45_spill] sm:$0xff] %v6982_v62  ;;  %v708_v9 = vpop.f32.mrf.mxu2  ;;  %v5696_v53 = vpop.eup %5695  ;;  %v7022_v29 = vadd.f32 1.0, %v5694_v17  ;;  %5707 = vtanh.f32 %v651_v34  ;;  %vm7060_vm8 = vmor %vm2980_vm6, %vm2981_vm7 }
 0x104   : > { %11250 = vst [vmem:[#allocation46_spill] sm:$0xff] %v6986_v7  ;;  %v737_v23 = vpop.f32.mrf.mxu3  ;;  %v5698_v48 = vpop.eup %5697  ;;  %v2977_v54 = vsub.f32 1.0, %v2976_v27  ;;  %v7031_v28 = vadd.f32 1.0, %v5696_v53  ;;  %5709 = vtanh.f32 %v680_v49  ;;  %v2986_v27 = vand.u32 2147483648, %v6968_v3 }
 0x105   : > { %11251 = vst [vmem:[#allocation47_spill] sm:$0xff] %v6997_v41  ;;  %v652_v45 = vpop.f32.mrf.mxu0  ;;  %v5700_v24 = vpop.eup %5699  ;;  %5711 = vrcp.f32 %v7022_v29  ;;  %v7034_v17 = vadd.f32 1.0, %v5698_v48  ;;  %v2984_v48 = vand.u32 2147483647, %v6968_v3  ;;  %v2999_v42 = vand.u32 2147483647, %v7022_v29 }
 0x106   : > { %11252 = vst [vmem:[#allocation48_spill] sm:$0xff] %v7001_v40  ;;  %v681_v57 = vpop.f32.mrf.mxu1  ;;  %v5702_v63 = vpop.eup %5701  ;;  %v2978_v38 = vmul.f32 %v7012_v14, %v2977_v54  ;;  %5713 = vrcp.f32 %v7031_v28  ;;  %v7040_v40 = vadd.f32 1.0, %v5700_v24  ;;  %v709_v54 = vadd.f32 %v708_v9, %v6629_v60 }
 0x107   : > { %11253 = vst [vmem:[#allocation49_spill] sm:$0xff] %v7007_v46  ;;  %v5704_v53 = vpop.eup %5703  ;;  %5715 = vrcp.f32 %v7034_v17  ;;  %v7044_v49 = vadd.f32 1.0, %v5702_v63  ;;  %v738_v9 = vadd.f32 %v737_v23, %v6629_v60  ;;  %v682_v47 = vadd.f32 %v681_v57, %v6669_v32 }
 0x108   : > { %11254 = vst [vmem:[#allocation50_spill] sm:$0xff] %v7017_v1  ;;  %v5706_v56 = vpop.eup %5705  ;;  %5717 = vrcp.f32 %v7040_v40  ;;  %v7049_v34 = vadd.f32 1.0, %v5704_v53  ;;  %v2979_v24 = vadd.f32 %v7012_v14, %v2978_v38  ;;  %v3001_v53 = vand.u32 2147483648, %v7022_v29 }
 0x109   : > { %v7053_v35 = vpop.eup %5707  ;;  %5719 = vrcp.f32 %v7044_v49  ;;  %v7056_v11 = vadd.f32 1.0, %v5706_v56  ;;  %v653_v38 = vadd.f32 %v652_v45, %v6669_v32  ;;  %vm2985_vm9 = vcmp.eq.f32.partialorder %v2984_v48, 8.507059e+37 }
 0x10a   : > { %11255 = vst [vmem:[#allocation51_spill] sm:$0xff] %v7053_v35  ;;  %v7066_v7 = vpop.eup %5709  ;;  %5721 = vrcp.f32 %v7049_v34  ;;  %v2983_v3 = vsel %vm7060_vm8, %v7012_v14, %v2979_v24  ;;  %vm2995_vm10 = vweird.f32 %v7022_v29  ;;  %vm3010_vm11 = vweird.f32 %v7031_v28 }
 0x10b   : > { %11258 = vst [vmem:[#allocation52_spill] sm:$0xff] %v7066_v7  ;;  %v710_v56 = vpop.f32.mrf.mxu2  ;;  %v7074_v35 = vpop.eup %5711  ;;  %5723 = vrcp.f32 %v7056_v11  ;;  %v2987_v7 = vor.u32 1.1754944e-38, %v2986_v27  ;;  %vm7093_vm12 = vcmp.eq.f32.partialorder %v2999_v42, 8.507059e+37  ;;  %v3002_v24 = vor.u32 1.1754944e-38, %v3001_v53 }
 0x10c   : > { %v739_v46 = vpop.f32.mrf.mxu3  ;;  %v7078_v41 = vpop.eup %5713  ;;  %v2991_v23 = vmul.f32 %v7074_v35, %v7022_v29  ;;  %v7083_v45 = vadd.f32 %v710_v56, %v6669_v32  ;;  %5725 = vtanh.f32 %v709_v54  ;;  %v7105_v54 = vld [vmem:[%s10882_s2 + $0x18] sm:$0xff]  ;;  %vm2996_vm13 = vweird.f32 %v7074_v35 }
 0x10d   : > { %v655_v5 = vpop.f32.mrf.mxu0  ;;  %v7087_v14 = vpop.eup %5715  ;;  %v3006_v57 = vmul.f32 %v7078_v41, %v7031_v28  ;;  %v7091_v48 = vsel %vm2985_vm9, %v2987_v7, %v2983_v3  ;;  %5727 = vtanh.f32 %v738_v9  ;;  %11261 = vst [vmem:[#allocation53_spill] sm:$0xff] %v7105_v54  ;;  %vm3011_vm14 = vweird.f32 %v7078_v41  ;;  %vm2997_vm15 = vmor %vm2995_vm10, %vm2996_vm13 }
 0x10e   : > { %v684_v63 = vpop.f32.mrf.mxu1  ;;  %v7097_v56 = vpop.eup %5717  ;;  %v2992_v13 = vsub.f32 1.0, %v2991_v23  ;;  %v3021_v60 = vmul.f32 %v7087_v14, %v7034_v17  ;;  %v656_v62 = vadd.f32 %v655_v5, %v6710_v18  ;;  %5729 = vtanh.f32 %v653_v38  ;;  %vm7158_vm2 = vmor %vm3010_vm11, %vm3011_vm14 }
 0x10f   : > { %5223 = vmatmul.msk.bf16.gmra.mxu0 %vm437_vm1, %v7105_v54  ;;  %5227 = vmatmul.msk.bf16.gmra.mxu1 %vm437_vm1, %v7105_v54  ;;  %v7111_v42 = vpop.eup %5719  ;;  %v3007_v7 = vsub.f32 1.0, %v3006_v57  ;;  %v3456_v53 = vmul.f32 %v7097_v56, %v7040_v40  ;;  %v685_v5 = vadd.f32 %v684_v63, %v6710_v18  ;;  %5731 = vtanh.f32 %v682_v47 }
 0x110   : > { %5231 = vmatmul.msk.bf16.gmra.mxu2 %vm437_vm1, %v7105_v54  ;;  %v7118_v9 = vpop.eup %5721  ;;  %v2993_v3 = vmul.f32 %v7074_v35, %v2992_v13  ;;  %v3022_v23 = vsub.f32 1.0, %v3021_v60  ;;  %v3471_v19 = vmul.f32 %v7111_v42, %v7044_v49  ;;  %v7132_v60 = vadd.f32 %v739_v46, %v6669_v32 }
 0x111   : > { %5235 = vmatmul.msk.bf16.gmra.mxu3 %vm437_vm1, %v7105_v54  ;;  %v7126_v57 = vpop.eup %5723  ;;  %v3008_v38 = vmul.f32 %v7078_v41, %v3007_v7  ;;  %v3457_v63 = vsub.f32 1.0, %v3456_v53  ;;  %v3486_v59 = vmul.f32 %v7118_v9, %v7049_v34  ;;  %5733 = vtanh.f32 %v656_v62 }
 0x112   : > { %v3472_v22 = vsub.f32 1.0, %v3471_v19  ;;  %v7135_v25 = vpop.eup %5725  ;;  %v3023_v54 = vmul.f32 %v7087_v14, %v3022_v23  ;;  %v4071_v16 = vsub.f32 1.0, %v7091_v48  ;;  %v2994_v7 = vadd.f32 %v7074_v35, %v2993_v3 }
 0x113   : > { %v713_v13 = vpop.f32.mrf.mxu2  ;;  %11262 = vst [vmem:[#allocation54_spill] sm:$0xff] %v7135_v25  ;;  %5735 = vtanh.f32 %v685_v5  ;;  %v7140_v47 = vpop.eup %5727  ;;  %v3458_v19 = vmul.f32 %v7097_v56, %v3457_v63  ;;  %v3501_v62 = vmul.f32 %v7126_v57, %v7056_v11  ;;  %v3009_v48 = vadd.f32 %v7078_v41, %v3008_v38 }
 0x114   : > { %v742_v53 = vpop.f32.mrf.mxu3  ;;  %11263 = vst [vmem:[#allocation55_spill] sm:$0xff] %v7140_v47  ;;  %v714_v46 = vadd.f32 %v713_v13, %v6710_v18  ;;  %v7151_v5 = vpop.eup %5729  ;;  %v3487_v23 = vsub.f32 1.0, %v3486_v59  ;;  %v2998_v47 = vsel %vm2997_vm15, %v7074_v35, %v2994_v7  ;;  %v3014_v29 = vand.u32 2147483647, %v7031_v28 }
 0x115   : > { %v657_v6 = vpop.f32.mrf.mxu0  ;;  %11264 = vst [vmem:[#allocation56_spill] sm:$0xff] %v7151_v5  ;;  %v3016_v13 = vand.u32 2147483648, %v7031_v28  ;;  %v3473_v38 = vmul.f32 %v7111_v42, %v3472_v22  ;;  %v3003_v25 = vsel %vm7093_vm12, %v3002_v24, %v2998_v47  ;;  %v3013_v35 = vsel %vm7158_vm2, %v7078_v41, %v3009_v48  ;;  %v7170_v59 = vpop.eup %5731 }
 0x116   : > { %v686_v3 = vpop.f32.mrf.mxu1  ;;  %5737 = vtanh.f32 %v714_v46  ;;  %11267 = vst [vmem:[#allocation57_spill] sm:$0xff] %v7170_v59  ;;  %v4072_v7 = vsub.f32 1.0, %v3003_v25  ;;  %vm3015_vm3 = vcmp.eq.f32.partialorder %v3014_v29, 8.507059e+37  ;;  %v743_v32 = vadd.f32 %v742_v53, %v6710_v18 }
 0x117   : > { %v3017_v5 = vor.u32 1.1754944e-38, %v3016_v13  ;;  %v5734_v20 = vpop.eup %5733  ;;  %v3024_v28 = vadd.f32 %v7087_v14, %v3023_v54  ;;  %vm3025_vm4 = vweird.f32 %v7034_v17  ;;  %vm3026_vm5 = vweird.f32 %v7087_v14 }
 0x118   : > { %v3029_v22 = vand.u32 2147483647, %v7034_v17  ;;  %v7177_v24 = vmul.f32 %v5734_v20, %v4071_v16  ;;  %vm7179_vm6 = vmor %vm3025_vm4, %vm3026_vm5  ;;  %v3031_v25 = vand.u32 2147483648, %v7034_v17  ;;  %5739 = vtanh.f32 %v743_v32 }
 0x119   : > { %v5736_v27 = vpop.eup %5735  ;;  %v3018_v41 = vsel %vm3015_vm3, %v3017_v5, %v3013_v35  ;;  %v3488_v53 = vmul.f32 %v7118_v9, %v3487_v23  ;;  %v3502_v54 = vsub.f32 1.0, %v3501_v62  ;;  %v3028_v48 = vsel %vm7179_vm6, %v7087_v14, %v3024_v28 }
 0x11a   : > { %11268 = vst [vmem:[#allocation58_spill] sm:$0xff] %v7177_v24  ;;  %v7185_v46 = vmul.f32 %v5736_v27, %v4072_v7  ;;  %v4073_v20 = vsub.f32 1.0, %v3018_v41  ;;  %v3032_v16 = vor.u32 1.1754944e-38, %v3031_v25  ;;  %v658_v5 = vadd.f32 %v657_v6, %v6810_v2  ;;  %v7214_v41 = vld [vmem:[%s10882_s2] sm:$0xff] }
 0x11b   : > { %v715_v63 = vpop.f32.mrf.mxu2  ;;  %v3459_v29 = vadd.f32 %v7097_v56, %v3458_v19  ;;  %vm3030_vm7 = vcmp.eq.f32.partialorder %v3029_v22, 8.507059e+37  ;;  %vm3460_vm8 = vweird.f32 %v7040_v40  ;;  %vm3461_vm9 = vweird.f32 %v7097_v56 }
 0x11c   : > { %11271 = vst [vmem:[#allocation59_spill] sm:$0xff] %v7185_v46  ;;  %v744_v13 = vpop.f32.mrf.mxu3  ;;  %v5738_v32 = vpop.eup %5737  ;;  %v3464_v17 = vand.u32 2147483647, %v7040_v40  ;;  %v3033_v23 = vsel %vm3030_vm7, %v3032_v16, %v3028_v48  ;;  %vm7201_vm10 = vmor %vm3460_vm8, %vm3461_vm9  ;;  %v3466_v19 = vand.u32 2147483648, %v7040_v40  ;;  %5741 = vtanh.f32 %v658_v5 }
 0x11d   : > { %v7192_v35 = vpop.f32.mrf.mxu0  ;;  %v7199_v14 = vmul.f32 %v5738_v32, %v4073_v20  ;;  %v3503_v7 = vmul.f32 %v7126_v57, %v3502_v54  ;;  %v4074_v28 = vsub.f32 1.0, %v3033_v23  ;;  %v3463_v22 = vsel %vm7201_vm10, %v7097_v56, %v3459_v29 }
 0x11e   : > { %v7197_v62 = vpop.f32.mrf.mxu1  ;;  %v687_v27 = vadd.f32 %v686_v3, %v6810_v2  ;;  %v5740_v40 = vpop.eup %5739  ;;  %vm3465_vm11 = vcmp.eq.f32.partialorder %v3464_v17, 8.507059e+37  ;;  %v3467_v47 = vor.u32 1.1754944e-38, %v3466_v19  ;;  %v3474_v25 = vadd.f32 %v7111_v42, %v3473_v38 }
 0x11f   : > { %11272 = vst [vmem:[#allocation60_spill] sm:$0xff] %v7199_v14  ;;  %5236 = vmatmul.msk.bf16.vlgmr.msra.gmra.mxu0 %vm437_vm1, %v7214_v41  ;;  %5240 = vmatmul.msk.bf16.vlgmr.msra.gmra.mxu1 %vm437_vm1, %v7214_v41  ;;  %vm3475_vm12 = vweird.f32 %v7044_v49  ;;  %v7224_v56 = vmul.f32 %v5740_v40, %v4074_v28  ;;  %vm3476_vm13 = vweird.f32 %v7111_v42  ;;  %v3479_v3 = vand.u32 2147483647, %v7044_v49 }
 0x120   : > { %5244 = vmatmul.msk.bf16.vlgmr.msra.gmra.mxu2 %vm437_vm1, %v7214_v41  ;;  %v3481_v54 = vand.u32 2147483648, %v7044_v49  ;;  %v3468_v48 = vsel %vm3465_vm11, %v3467_v47, %v3463_v22  ;;  %vm7231_vm14 = vmor %vm3475_vm12, %vm3476_vm13  ;;  %5743 = vtanh.f32 %v687_v27  ;;  %v716_v38 = vadd.f32 %v715_v63, %v6810_v2 }
 0x121   : > { %11275 = vst [vmem:[#allocation61_spill] sm:$0xff] %v7224_v56  ;;  %5248 = vmatmul.msk.bf16.vlgmr.msra.gmra.mxu3 %vm437_vm1, %v7214_v41  ;;  %v3489_v16 = vadd.f32 %v7118_v9, %v3488_v53  ;;  %5745 = vtanh.f32 %v7083_v45  ;;  %v4103_v5 = vsub.f32 1.0, %v3468_v48  ;;  %v3478_v49 = vsel %vm7231_vm14, %v7111_v42, %v3474_v25  ;;  %v319_v25 = vld [vmem:[%s6431_s7 + $0x38] sm:$0xff] }
 0x122   : > { %vm3480_vm15 = vcmp.eq.f32.partialorder %v3479_v3, 8.507059e+37  ;;  %v5742_v32 = vpop.eup %5741  ;;  %v3482_v17 = vor.u32 1.1754944e-38, %v3481_v54  ;;  %vm3490_vm2 = vweird.f32 %v7049_v34  ;;  %vm3491_vm3 = vweird.f32 %v7118_v9 }
 0x123   : > { %v814_v29 = vpop.f32.mrf.mxu2  ;;  %v3494_v63 = vand.u32 2147483647, %v7049_v34  ;;  %v7244_v6 = vmul.f32 %v5742_v32, %v4103_v5  ;;  %vm7246_vm4 = vmor %vm3490_vm2, %vm3491_vm3  ;;  %v3496_v42 = vand.u32 2147483648, %v7049_v34  ;;  %5747 = vtanh.f32 %v716_v38  ;;  %v423_v34 = vld.sshfl [vmem:[#allocation1 + $0x30] sm:$0xff pattern:$0x73625140] }
 0x124   : > { %v843_v23 = vpop.f32.mrf.mxu3  ;;  %v745_v19 = vadd.f32 %v744_v13, %v6810_v2  ;;  %v3483_v22 = vsel %vm3480_vm15, %v3482_v17, %v3478_v49  ;;  %v3493_v27 = vsel %vm7246_vm4, %v7118_v9, %v3489_v16  ;;  %v3504_v47 = vadd.f32 %v7126_v57, %v3503_v7  ;;  %v424_v38 = vld.sshfl [vmem:[#allocation1 + $0x38] sm:$0xff pattern:$0x73625140] }
 0x125   : > { %v758_v53 = vpop.f32.mrf.mxu0  ;;  %11278 = vst [vmem:[#allocation62_spill] sm:$0xff] %v7244_v6  ;;  %vm7255_vm5 = vcmp.eq.f32.partialorder %v3494_v63, 8.507059e+37  ;;  %v4104_v3 = vsub.f32 1.0, %v3483_v22  ;;  %v3497_v54 = vor.u32 1.1754944e-38, %v3496_v42  ;;  %vm3505_vm6 = vweird.f32 %v7056_v11  ;;  %v11325_v6 = vld [vmem:[#allocation45_spill] sm:$0xff] }
 0x126   : > { %v787_v28 = vpop.f32.mrf.mxu1  ;;  %vm3506_vm7 = vweird.f32 %v7126_v57  ;;  %vm1960_vm8 = vweird.f32 %v6580_v10  ;;  %vm1961_vm9 = vweird.f32 %v6608_v36  ;;  %v5744_v13 = vpop.eup %5743  ;;  %v3509_v48 = vand.u32 2147483647, %v7056_v11  ;;  %v422_v63 = vld.sshfl [vmem:[#allocation1 + $0x28] sm:$0xff pattern:$0x73625140] }
 0x127   : > { %vm7265_vm10 = vmor %vm3505_vm6, %vm3506_vm7  ;;  %v3511_v7 = vand.u32 2147483648, %v7056_v11  ;;  %5749 = vtanh.f32 %v745_v19  ;;  %v757_v20 = vadd.f32 %v7192_v35, %v6556_v44  ;;  %v7273_v16 = vpop.eup %5745  ;;  %v7275_v5 = vmul.f32 %v5744_v13, %v4104_v3  ;;  %v421_v11 = vld.sshfl [vmem:[#allocation1 + $0x20] sm:$0xff pattern:$0x73625140] }
 0x128   : > { %11285 = vst [vmem:[#allocation63_spill] sm:$0xff] %v7273_v16  ;;  %v3498_v49 = vsel %vm7255_vm5, %v3497_v54, %v3493_v27  ;;  %v3508_v32 = vsel %vm7265_vm10, %v7126_v57, %v3504_v47  ;;  %v786_v17 = vadd.f32 %v7197_v62, %v6556_v44  ;;  %vm3510_vm11 = vcmp.eq.f32.partialorder %v3509_v48, 8.507059e+37  ;;  %vm7328_vm12 = vmor %vm1960_vm8, %vm1961_vm9 }
 0x129   : > { %11286 = vst [vmem:[#allocation64_spill] sm:$0xff] %v7275_v5  ;;  %v4105_v45 = vsub.f32 1.0, %v3498_v49  ;;  %v3512_v35 = vor.u32 1.1754944e-38, %v3511_v7  ;;  %v5308_v42 = vmul.f32 -1.442695, %v757_v20  ;;  %v5748_v19 = vpop.eup %5747  ;;  %v495_v3 = vsel %vm450_vm0, %v423_v34, 0 }
 0x12a   : > { %v5309_v22 = vmul.f32 -1.442695, %v786_v17  ;;  %v815_v40 = vadd.f32 %v814_v29, %v6556_v44  ;;  %v844_v27 = vadd.f32 %v843_v23, %v6556_v44  ;;  %428 = vst [vmem:[#allocation1 + $0x20] ss:$4 sm:$0xff] %v319_v25  ;;  %1160 = vmatpush.bf16.msrb.mxu2 %v495_v3  ;;  %v497_v62 = vsel %vm450_vm0, %v424_v38, 0 }
 0x12b   : > { %v816_v54 = vpop.f32.mrf.mxu2  ;;  %v7287_v57 = vmul.f32 %v5748_v19, %v4105_v45  ;;  %v3513_v47 = vsel %vm3510_vm11, %v3512_v35, %v3508_v32  ;;  %5751 = vpow2.f32 %v5308_v42  ;;  %1189 = vmatpush.bf16.msrb.mxu3 %v497_v62  ;;  %v759_v23 = vadd.f32 %v758_v53, %v6570_v55  ;;  %v7301_v35 = vld [vmem:[%s10882_s2 + $0x8] sm:$0xff] }
 0x12c   : > { %v845_v13 = vpop.f32.mrf.mxu3  ;;  %v4106_v48 = vsub.f32 1.0, %v3513_v47  ;;  %5753 = vpow2.f32 %v5309_v22  ;;  %v5310_v7 = vmul.f32 -1.442695, %v815_v40  ;;  %v5311_v20 = vmul.f32 -1.442695, %v844_v27 }
 0x12d   : > { %11287 = vst [vmem:[#allocation65_spill] sm:$0xff] %v7287_v57  ;;  %v761_v9 = vpop.f32.mrf.mxu0  ;;  %v5750_v29 = vpop.eup %5749  ;;  %v788_v25 = vadd.f32 %v787_v28, %v6570_v55  ;;  %v491_v49 = vsel %vm450_vm0, %v421_v11, 0  ;;  %v817_v32 = vadd.f32 %v816_v54, %v6570_v55  ;;  %v846_v38 = vadd.f32 %v845_v13, %v6570_v55 }
 0x12e   : > { %v790_v34 = vpop.f32.mrf.mxu1  ;;  %v7294_v17 = vmul.f32 %v5750_v29, %v4106_v48  ;;  %5755 = vpow2.f32 %v5310_v7  ;;  %1102 = vmatpush.bf16.msrb.mxu0 %v491_v49  ;;  %v493_v45 = vsel %vm450_vm0, %v422_v63, 0  ;;  %v5340_v53 = vmul.f32 -1.442695, %v759_v23 }
 0x12f   : > { %5241 = vmatmul.msk.bf16.gmra.mxu1 %vm437_vm1, %v7301_v35  ;;  %5757 = vpow2.f32 %v5311_v20  ;;  %v5341_v28 = vmul.f32 -1.442695, %v788_v25  ;;  %v5342_v11 = vmul.f32 -1.442695, %v817_v32  ;;  %5237 = vmatmul.msk.bf16.gmra.mxu0 %vm437_vm1, %v7301_v35  ;;  %v7310_v63 = vmul.f32 %v6635_v0, %v6610_v37 }
 0x130   : > { %11288 = vst [vmem:[#allocation66_spill] sm:$0xff] %v7294_v17  ;;  %1131 = vmatpush.bf16.msrb.mxu1 %v493_v45  ;;  %5759 = vtanh.f32 %v7132_v60  ;;  %5245 = vmatmul.msk.bf16.gmra.mxu2 %vm437_vm1, %v7301_v35  ;;  %v1964_v19 = vand.u32 2147483647, %v6580_v10  ;;  %v2437_v3 = vsub.f32 1.0, %v7029_v26  ;;  %v7321_v40 = vmul.f32 %v6644_v15, %v6622_v51 }
 0x131   : > { %11289 = vst [vmem:[#allocation67_spill] sm:$0xff] %v7310_v63  ;;  %5249 = vmatmul.msk.bf16.gmra.mxu3 %vm437_vm1, %v7301_v35  ;;  %v5752_v22 = vpop.eup %5751  ;;  %5761 = vpow2.f32 %v5340_v53  ;;  %v762_v27 = vadd.f32 %v761_v9, %v6578_v4  ;;  %v5343_v26 = vmul.f32 -1.442695, %v846_v38  ;;  %v1963_v13 = vsel %vm7328_vm12, %v6608_v36, %v7025_v50 }
 0x132   : > { %11290 = vst [vmem:[#allocation68_spill] sm:$0xff] %v7321_v40  ;;  %v5754_v54 = vpop.eup %5753  ;;  %v7332_v47 = vadd.f32 1.0, %v5752_v22  ;;  %5763 = vpow2.f32 %v5341_v28  ;;  %v7340_v9 = vmul.f32 %v6660_v21, %v6627_v58  ;;  %v11296_v29 = vand.u32 2147483648, %v6580_v10 }
 0x133   : > { %v819_v62 = vpop.f32.mrf.mxu2  ;;  %v7342_v48 = vadd.f32 1.0, %v5754_v54  ;;  %5765 = vpow2.f32 %v5342_v11  ;;  %v791_v32 = vadd.f32 %v790_v34, %v6578_v4  ;;  %vm1965_vm13 = vcmp.eq.f32.partialorder %v1964_v19, 8.507059e+37 }
 0x134   : > { %11293 = vst [vmem:[#allocation69_spill] sm:$0xff] %v7332_v47  ;;  %v848_v7 = vpop.f32.mrf.mxu3  ;;  %v1967_v23 = vor.u32 1.1754944e-38, %v11296_v29  ;;  %v5756_v25 = vpop.eup %5755  ;;  %5767 = vrcp.f32 %v7332_v47  ;;  %v5372_v45 = vmul.f32 -1.442695, %v762_v27  ;;  %v820_v22 = vadd.f32 %v819_v62, %v6578_v4 }
 0x135   : > { %11294 = vst [vmem:[#allocation70_spill] sm:$0xff] %v7340_v9  ;;  %v763_v20 = vpop.f32.mrf.mxu0  ;;  %v5758_v50 = vpop.eup %5757  ;;  %5769 = vrcp.f32 %v7342_v48  ;;  %v7350_v38 = vadd.f32 1.0, %v5756_v25  ;;  %v849_v19 = vadd.f32 %v848_v7, %v6578_v4  ;;  %v2438_v54 = vmul.f32 %v6631_v61, %v2437_v3 }
 0x136   : > { %11295 = vst [vmem:[#allocation71_spill] sm:$0xff] %v7342_v48  ;;  %v792_v36 = vpop.f32.mrf.mxu1  ;;  %v1968_v53 = vsel %vm1965_vm13, %v1967_v23, %v1963_v13  ;;  %v7352_v28 = vpop.eup %5759  ;;  %v7355_v11 = vadd.f32 1.0, %v5758_v50  ;;  %5771 = vpow2.f32 %v5343_v26  ;;  %v764_v29 = vadd.f32 %v763_v20, %v6600_v30 }
 0x137   : > { %11297 = vst [vmem:[#allocation72_spill] sm:$0xff] %v7350_v38  ;;  %v5762_v60 = vpop.eup %5761  ;;  %5773 = vrcp.f32 %v7350_v38  ;;  %v4003_v23 = vsub.f32 1.0, %v1968_v53  ;;  %v7368_v62 = vmul.f32 %v6965_v12, %v6928_v52  ;;  %v5373_v50 = vmul.f32 -1.442695, %v791_v32  ;;  %v11314_v52 = vld [vmem:[#allocation43_spill] sm:$0xff] }
 0x138   : > { %11298 = vst [vmem:[#allocation73_spill] sm:$0xff] %v7352_v28  ;;  %v5764_v27 = vpop.eup %5763  ;;  %5775 = vrcp.f32 %v7355_v11  ;;  %v7363_v13 = vadd.f32 1.0, %v5762_v60  ;;  %v5374_v60 = vmul.f32 -1.442695, %v820_v22  ;;  %v2439_v32 = vadd.f32 %v6631_v61, %v2438_v54 }
 0x139   : > { %11299 = vst [vmem:[#allocation74_spill] sm:$0xff] %v7355_v11  ;;  %v5766_v26 = vpop.eup %5765  ;;  %v7370_v25 = vadd.f32 1.0, %v5764_v27  ;;  %5777 = vpow2.f32 %v5372_v45  ;;  %v7378_v20 = vmul.f32 %v6676_v43, %v4003_v23  ;;  %v793_v27 = vadd.f32 %v792_v36, %v6600_v30 }
 0x13a   : > { %11300 = vst [vmem:[#allocation75_spill] sm:$0xff] %v7363_v13  ;;  %v7372_v7 = vpop.eup %5767  ;;  %5779 = vrcp.f32 %v7363_v13  ;;  %v7375_v3 = vadd.f32 1.0, %v5766_v26  ;;  %vm2441_vm14 = vweird.f32 %v6631_v61  ;;  %v5375_v22 = vmul.f32 -1.442695, %v849_v19  ;;  %v11310_v19 = vld [vmem:[#allocation34_spill] sm:$0xff] }
 0x13b   : > { %11301 = vst [vmem:[#allocation76_spill] sm:$0xff] %v7368_v62  ;;  %v821_v34 = vpop.f32.mrf.mxu2  ;;  %v7380_v53 = vpop.eup %5769  ;;  %5781 = vrcp.f32 %v7370_v25  ;;  %v5404_v26 = vmul.f32 -1.442695, %v764_v29  ;;  %v2446_v16 = vand.u32 2147483648, %v6606_v33  ;;  %v7398_v59 = vmul.f32 %v6970_v31, %v6936_v39  ;;  %v11311_v29 = vld [vmem:[#allocation42_spill] sm:$0xff]  ;;  %v11321_v31 = vld [vmem:[#allocation44_spill] sm:$0xff] }
 0x13c   : > { %11302 = vst [vmem:[#allocation77_spill] sm:$0xff] %v7370_v25  ;;  %v850_v42 = vpop.f32.mrf.mxu3  ;;  %v5772_v10 = vpop.eup %5771  ;;  %5783 = vrcp.f32 %v7375_v3  ;;  %v822_v43 = vadd.f32 %v821_v34, %v6600_v30  ;;  %vm2440_vm15 = vweird.f32 %v6606_v33  ;;  %v5405_v39 = vmul.f32 -1.442695, %v793_v27 }
 0x13d   : > { %11303 = vst [vmem:[#allocation78_spill] sm:$0xff] %v7372_v7  ;;  %v766_v45 = vpop.f32.mrf.mxu0  ;;  %v7388_v49 = vpop.eup %5773  ;;  %v7390_v28 = vadd.f32 1.0, %v5772_v10  ;;  %5785 = vpow2.f32 %v5373_v50  ;;  %v851_v36 = vadd.f32 %v850_v42, %v6600_v30  ;;  %v2444_v10 = vand.u32 2147483647, %v6606_v33  ;;  %v11313_v50 = vld [vmem:[#allocation35_spill] sm:$0xff]  ;;  %vm7417_vm2 = vmor %vm2440_vm15, %vm2441_vm14 }
 0x13e   : > { %11304 = vst [vmem:[#allocation79_spill] sm:$0xff] %v7375_v3  ;;  %v795_v23 = vpop.f32.mrf.mxu1  ;;  %v7394_v54 = vpop.eup %5775  ;;  %5787 = vpow2.f32 %v5374_v60  ;;  %v7406_v42 = vmul.f32 %v11311_v29, %v11310_v19  ;;  %v7410_v12 = vmul.f32 %v11314_v52, %v11313_v50  ;;  %v5406_v29 = vmul.f32 -1.442695, %v822_v43  ;;  %v11320_v52 = vld [vmem:[#allocation36_spill] sm:$0xff] }
 0x13f   : > { %11305 = vst [vmem:[#allocation80_spill] sm:$0xff] %v7380_v53  ;;  %5242 = vmatmul.msk.bf16.gmra.mxu1 %vm437_vm1, %v6991_v8  ;;  %v5778_v34 = vpop.eup %5777  ;;  %5789 = vrcp.f32 %v7390_v28  ;;  %5238 = vmatmul.msk.bf16.gmra.mxu0 %vm437_vm1, %v6991_v8  ;;  %v2443_v27 = vsel %vm7417_vm2, %v6631_v61, %v2439_v32  ;;  %v7436_v17 = vmul.f32 %v11321_v31, %v11320_v52  ;;  %vm2445_vm3 = vcmp.eq.f32.partialorder %v2444_v10, 8.507059e+37  ;;  %v11324_v31 = vld [vmem:[#allocation37_spill] sm:$0xff]  ;;  %v11330_v32 = vld [vmem:[#allocation47_spill] sm:$0xff] }
 0x140   : > { %11306 = vst [vmem:[#allocation81_spill] sm:$0xff] %v7388_v49  ;;  %v7421_v33 = vpop.eup %5779  ;;  %v7423_v19 = vadd.f32 1.0, %v5778_v34  ;;  %5791 = vpow2.f32 %v5375_v22  ;;  %5246 = vmatmul.msk.bf16.gmra.mxu2 %vm437_vm1, %v6991_v8  ;;  %v5407_v34 = vmul.f32 -1.442695, %v851_v36  ;;  %v2447_v22 = vor.u32 1.1754944e-38, %v2446_v16 }
 0x141   : > { %11307 = vst [vmem:[#allocation82_spill] sm:$0xff] %v7390_v28  ;;  %5250 = vmatmul.msk.bf16.gmra.mxu3 %vm437_vm1, %v6991_v8  ;;  %v7432_v50 = vpop.eup %5781  ;;  %5793 = vpow2.f32 %v5404_v26  ;;  %v7449_v57 = vmul.f32 %v11325_v6, %v11324_v31  ;;  %v11333_v31 = vld [vmem:[#allocation49_spill] sm:$0xff] }
 0x142   : > { %11308 = vst [vmem:[#allocation83_spill] sm:$0xff] %v7394_v54  ;;  %v7438_v43 = vpop.eup %5783  ;;  %5795 = vrcp.f32 %v7423_v19  ;;  %v7445_v36 = vsel %vm2445_vm3, %v2447_v22, %v2443_v27  ;;  %vm3040_vm4 = vweird.f32 %v7423_v19 }
 0x143   : > { %11309 = vst [vmem:[#allocation84_spill] sm:$0xff] %v7398_v59  ;;  %v824_v8 = vpop.f32.mrf.mxu2  ;;  %v5786_v61 = vpop.eup %5785  ;;  %5797 = vpow2.f32 %v5405_v39  ;;  %v11327_v59 = vld [vmem:[#allocation16_spill] sm:$0xff]  ;;  %v11329_v39 = vld [vmem:[#allocation38_spill] sm:$0xff] }
 0x144   : > { %11312 = vst [vmem:[#allocation85_spill] sm:$0xff] %v7406_v42  ;;  %v853_v52 = vpop.f32.mrf.mxu3  ;;  %v5788_v16 = vpop.eup %5787  ;;  %v7451_v5 = vadd.f32 1.0, %v5786_v61  ;;  %5799 = vpow2.f32 %v5406_v29  ;;  %v767_v10 = vadd.f32 %v766_v45, %v11327_v59  ;;  %v11332_v42 = vld [vmem:[#allocation39_spill] sm:$0xff]  ;;  %v796_v45 = vadd.f32 %v795_v23, %v11327_v59 }
 0x145   : > { %11315 = vst [vmem:[#allocation86_spill] sm:$0xff] %v7410_v12  ;;  %v768_v26 = vpop.f32.mrf.mxu0  ;;  %v7454_v58 = vpop.eup %5789  ;;  %v7459_v12 = vmul.f32 %v11330_v32, %v11329_v39  ;;  %v7461_v27 = vadd.f32 1.0, %v5788_v16  ;;  %5801 = vpow2.f32 %v5407_v34  ;;  %v7465_v61 = vmul.f32 %v11333_v31, %v11332_v42 }
 0x146   : > { %11318 = vst [vmem:[#allocation87_spill] sm:$0xff] %v7421_v33  ;;  %v797_v62 = vpop.f32.mrf.mxu1  ;;  %v5792_v22 = vpop.eup %5791  ;;  %5803 = vrcp.f32 %v7451_v5  ;;  %v3044_v34 = vand.u32 2147483647, %v7423_v19  ;;  %v825_v42 = vadd.f32 %v824_v8, %v11327_v59  ;;  %v854_v23 = vadd.f32 %v853_v52, %v11327_v59 }
 0x147   : > { %11319 = vst [vmem:[#allocation88_spill] sm:$0xff] %v7432_v50  ;;  %v5794_v6 = vpop.eup %5793  ;;  %5805 = vrcp.f32 %v7461_v27  ;;  %v7471_v60 = vadd.f32 1.0, %v5792_v22  ;;  %v11335_v22 = vld [vmem:[#allocation20_spill] sm:$0xff]  ;;  %v3059_v52 = vand.u32 2147483647, %v7451_v5  ;;  %vm3055_vm7 = vweird.f32 %v7451_v5 }
 0x148   : > { %11322 = vst [vmem:[#allocation89_spill] sm:$0xff] %v7436_v17  ;;  %v7475_v16 = vpop.eup %5795  ;;  %v7477_v39 = vadd.f32 1.0, %v5794_v6  ;;  %5807 = vtanh.f32 %v767_v10  ;;  %v769_v32 = vadd.f32 %v768_v26, %v11335_v22  ;;  %v3046_v17 = vand.u32 2147483648, %v7423_v19 }
 0x149   : > { %11323 = vst [vmem:[#allocation90_spill] sm:$0xff] %v7438_v43  ;;  %v5798_v31 = vpop.eup %5797  ;;  %v3036_v29 = vmul.f32 %v7475_v16, %v7423_v19  ;;  %5809 = vrcp.f32 %v7471_v60  ;;  %v798_v10 = vadd.f32 %v797_v62, %v11335_v22  ;;  %vm7495_vm5 = vcmp.eq.f32.partialorder %v3044_v34, 8.507059e+37 }
 0x14a   : > { %11326 = vst [vmem:[#allocation91_spill] sm:$0xff] %v7449_v57  ;;  %v5800_v21 = vpop.eup %5799  ;;  %5811 = vrcp.f32 %v7477_v39  ;;  %v7487_v6 = vadd.f32 1.0, %v5798_v31  ;;  %vm3041_vm6 = vweird.f32 %v7475_v16  ;;  %v3047_v34 = vor.u32 1.1754944e-38, %v3046_v17 }
 0x14b   : > { %11328 = vst [vmem:[#allocation92_spill] sm:$0xff] %v7454_v58  ;;  %v826_v8 = vpop.f32.mrf.mxu2  ;;  %v5802_v9 = vpop.eup %5801  ;;  %v3037_v1 = vsub.f32 1.0, %v3036_v29  ;;  %v7491_v51 = vadd.f32 1.0, %v5800_v21  ;;  %5813 = vtanh.f32 %v796_v45  ;;  %vm7517_vm8 = vcmp.eq.f32.partialorder %v3059_v52, 8.507059e+37  ;;  %vm3042_vm9 = vmor %vm3040_vm4, %vm3041_vm6 }
 0x14c   : > { %11331 = vst [vmem:[#allocation93_spill] sm:$0xff] %v7459_v12  ;;  %v7493_v15 = vpop.f32.mrf.mxu3  ;;  %v7499_v37 = vpop.eup %5803  ;;  %5815 = vrcp.f32 %v7487_v6  ;;  %v7502_v31 = vadd.f32 1.0, %v5802_v9  ;;  %v3061_v59 = vand.u32 2147483648, %v7451_v5  ;;  %v7527_v17 = vadd.f32 %v826_v8, %v11335_v22 }
 0x14d   : > { %11334 = vst [vmem:[#allocation94_spill] sm:$0xff] %v7465_v61  ;;  %v771_v26 = vpop.f32.mrf.mxu0  ;;  %v7506_v21 = vpop.eup %5805  ;;  %v3038_v45 = vmul.f32 %v7475_v16, %v3037_v1  ;;  %v3051_v29 = vmul.f32 %v7499_v37, %v7451_v5  ;;  %5817 = vrcp.f32 %v7491_v51  ;;  %v11341_v1 = vld [vmem:[#allocation53_spill] sm:$0xff]  ;;  %vm3056_vm10 = vweird.f32 %v7499_v37 }
 0x14e   : > { %v800_v62 = vpop.f32.mrf.mxu1  ;;  %v7512_v0 = vpop.eup %5807  ;;  %v3066_v9 = vmul.f32 %v7506_v21, %v7461_v27  ;;  %5819 = vrcp.f32 %v7502_v31  ;;  %v3062_v33 = vor.u32 1.1754944e-38, %v3061_v59  ;;  %vm3070_vm11 = vweird.f32 %v7461_v27  ;;  %vm3057_vm12 = vmor %vm3055_vm7, %vm3056_vm10 }
 0x14f   : > { %11338 = vst [vmem:[#allocation20_spill] sm:$0xff] %v7512_v0  ;;  %5243 = vmatmul.msk.bf16.gmra.mxu1 %vm437_vm1, %v11341_v1  ;;  %v7524_v58 = vpop.eup %5809  ;;  %v3052_v28 = vsub.f32 1.0, %v3051_v29  ;;  %v772_v0 = vadd.f32 %v771_v26, %v6710_v18  ;;  %v3039_v43 = vadd.f32 %v7475_v16, %v3038_v45  ;;  %5239 = vmatmul.msk.bf16.gmra.mxu0 %vm437_vm1, %v11341_v1  ;;  %5821 = vtanh.f32 %v825_v42 }
 0x150   : > { %v7533_v52 = vpop.eup %5811  ;;  %v3067_v3 = vsub.f32 1.0, %v3066_v9  ;;  %v3081_v50 = vmul.f32 %v7524_v58, %v7471_v60  ;;  %v801_v8 = vadd.f32 %v800_v62, %v6710_v18  ;;  %5247 = vmatmul.msk.bf16.gmra.mxu2 %vm437_vm1, %v11341_v1  ;;  %5823 = vtanh.f32 %v854_v23 }
 0x151   : > { %5251 = vmatmul.msk.bf16.gmra.mxu3 %vm437_vm1, %v11341_v1  ;;  %v7547_v26 = vpop.eup %5813  ;;  %v3053_v45 = vmul.f32 %v7499_v37, %v3052_v28  ;;  %v3516_v29 = vmul.f32 %v7533_v52, %v7477_v39  ;;  %v3043_v19 = vsel %vm3042_vm9, %v7475_v16, %v3039_v43  ;;  %5825 = vtanh.f32 %v769_v32 }
 0x152   : > { %11342 = vst [vmem:[#allocation53_spill] sm:$0xff] %v7547_v26  ;;  %v7553_v9 = vpop.eup %5815  ;;  %v3082_v62 = vsub.f32 1.0, %v3081_v50  ;;  %v3048_v25 = vsel %vm7495_vm5, %v3047_v34, %v3043_v19  ;;  %v3068_v26 = vmul.f32 %v7506_v21, %v3067_v3  ;;  %5827 = vtanh.f32 %v798_v10 }
 0x153   : > { %v829_v13 = vpop.f32.mrf.mxu2  ;;  %v7557_v1 = vpop.eup %5817  ;;  %v3517_v28 = vsub.f32 1.0, %v3516_v29  ;;  %v3531_v30 = vmul.f32 %v7553_v9, %v7487_v6  ;;  %v3054_v59 = vadd.f32 %v7499_v37, %v3053_v45  ;;  %5829 = vtanh.f32 %v772_v0 }
 0x154   : > { %v858_v42 = vpop.f32.mrf.mxu3  ;;  %v7562_v16 = vpop.eup %5819  ;;  %v3546_v50 = vmul.f32 %v7557_v1, %v7491_v51  ;;  %v4075_v23 = vsub.f32 1.0, %v3048_v25  ;;  %vm3071_vm13 = vweird.f32 %v7506_v21  ;;  %v3083_v32 = vmul.f32 %v7524_v58, %v3082_v62 }
 0x155   : > { %v773_v43 = vpop.f32.mrf.mxu0  ;;  %v3532_v3 = vsub.f32 1.0, %v3531_v30  ;;  %v3058_v10 = vsel %vm3057_vm12, %v7499_v37, %v3054_v59  ;;  %5831 = vtanh.f32 %v801_v8  ;;  %v830_v34 = vadd.f32 %v829_v13, %v6710_v18  ;;  %v7578_v45 = vpop.eup %5821  ;;  %vm7591_vm14 = vmor %vm3070_vm11, %vm3071_vm13 }
 0x156   : > { %v7568_v40 = vpop.f32.mrf.mxu1  ;;  %11343 = vst [vmem:[#allocation95_spill] sm:$0xff] %v7578_v45  ;;  %v3518_v30 = vmul.f32 %v7533_v52, %v3517_v28  ;;  %v3561_v0 = vmul.f32 %v7562_v16, %v7502_v31  ;;  %v3063_v5 = vsel %vm7517_vm8, %v3062_v33, %v3058_v10  ;;  %v3069_v25 = vadd.f32 %v7506_v21, %v3068_v26  ;;  %v7586_v29 = vpop.eup %5823 }
 0x157   : > { %11344 = vst [vmem:[#allocation96_spill] sm:$0xff] %v7586_v29  ;;  %v3533_v19 = vmul.f32 %v7553_v9, %v3532_v3  ;;  %v3547_v37 = vsub.f32 1.0, %v3546_v50  ;;  %v3074_v8 = vand.u32 2147483647, %v7461_v27  ;;  %v3076_v62 = vand.u32 2147483648, %v7461_v27  ;;  %v7597_v28 = vpop.eup %5825 }
 0x158   : > { %11347 = vst [vmem:[#allocation97_spill] sm:$0xff] %v7597_v28  ;;  %v4076_v63 = vsub.f32 1.0, %v3063_v5  ;;  %v3073_v33 = vsel %vm7591_vm14, %v7506_v21, %v3069_v25  ;;  %5833 = vtanh.f32 %v830_v34  ;;  %v859_v26 = vadd.f32 %v858_v42, %v6710_v18  ;;  %v7603_v50 = vpop.eup %5827 }
 0x159   : > { %11348 = vst [vmem:[#allocation98_spill] sm:$0xff] %v7603_v50  ;;  %vm3075_vm15 = vcmp.eq.f32.partialorder %v3074_v8, 8.507059e+37  ;;  %v3077_v59 = vor.u32 1.1754944e-38, %v3076_v62  ;;  %v3084_v3 = vadd.f32 %v7524_v58, %v3083_v32  ;;  %vm3085_vm2 = vweird.f32 %v7471_v60  ;;  %v5830_v27 = vpop.eup %5829 }
 0x15a   : > { %vm3086_vm3 = vweird.f32 %v7524_v58  ;;  %v3089_v5 = vand.u32 2147483647, %v7471_v60  ;;  %v3091_v13 = vand.u32 2147483648, %v7471_v60  ;;  %5835 = vtanh.f32 %v859_v26 }
 0x15b   : > { %v831_v10 = vpop.f32.mrf.mxu2  ;;  %v5832_v34 = vpop.eup %5831  ;;  %v7614_v25 = vmul.f32 %v5830_v27, %v4075_v23  ;;  %v3078_v8 = vsel %vm3075_vm15, %v3077_v59, %v3073_v33  ;;  %vm7616_vm4 = vmor %vm3085_vm2, %vm3086_vm3  ;;  %v774_v62 = vadd.f32 %v773_v43, %v6810_v2  ;;  %v3519_v29 = vadd.f32 %v7533_v52, %v3518_v30 }
 0x15c   : > { %v7610_v21 = vpop.f32.mrf.mxu3  ;;  %v3548_v45 = vmul.f32 %v7557_v1, %v3547_v37  ;;  %v3562_v60 = vsub.f32 1.0, %v3561_v0  ;;  %v7623_v26 = vmul.f32 %v5832_v34, %v4076_v63  ;;  %v3088_v50 = vsel %vm7616_vm4, %v7524_v58, %v3084_v3 }
 0x15d   : > { %v7612_v42 = vpop.f32.mrf.mxu0  ;;  %11349 = vst [vmem:[#allocation99_spill] sm:$0xff] %v7614_v25  ;;  %v4077_v33 = vsub.f32 1.0, %v3078_v8  ;;  %v3092_v59 = vor.u32 1.1754944e-38, %v3091_v13  ;;  %vm3520_vm5 = vweird.f32 %v7477_v39  ;;  %vm3521_vm6 = vweird.f32 %v7533_v52 }
 0x15e   : > { %11352 = vst [vmem:[#allocation100_spill] sm:$0xff] %v7623_v26  ;;  %v7628_v23 = vpop.f32.mrf.mxu1  ;;  %v5834_v43 = vpop.eup %5833  ;;  %vm3090_vm7 = vcmp.eq.f32.partialorder %v3089_v5, 8.507059e+37  ;;  %vm7634_vm8 = vmor %vm3520_vm5, %vm3521_vm6  ;;  %v3524_v0 = vand.u32 2147483647, %v7477_v39  ;;  %v3526_v58 = vand.u32 2147483648, %v7477_v39  ;;  %5837 = vtanh.f32 %v774_v62 }
 0x15f   : > { %5256 = vmatmul.msk.bf16.vlgmr.msrb.gmra.mxu1 %vm437_vm1, %v7214_v41  ;;  %5252 = vmatmul.msk.bf16.vlgmr.msrb.gmra.mxu0 %vm437_vm1, %v7214_v41  ;;  %v7642_v37 = vmul.f32 %v5834_v43, %v4077_v33  ;;  %v3093_v63 = vsel %vm3090_vm7, %v3092_v59, %v3088_v50  ;;  %v3523_v3 = vsel %vm7634_vm8, %v7533_v52, %v3519_v29  ;;  %vm3535_vm10 = vweird.f32 %v7487_v6 }
 0x160   : > { %v803_v27 = vadd.f32 %v7568_v40, %v6810_v2  ;;  %5260 = vmatmul.msk.bf16.vlgmr.msrb.gmra.mxu2 %vm437_vm1, %v7214_v41  ;;  %v5836_v5 = vpop.eup %5835  ;;  %v3563_v39 = vmul.f32 %v7562_v16, %v3562_v60  ;;  %v4078_v13 = vsub.f32 1.0, %v3093_v63  ;;  %v3527_v34 = vor.u32 1.1754944e-38, %v3526_v58 }
 0x161   : > { %11355 = vst [vmem:[#allocation101_spill] sm:$0xff] %v7642_v37  ;;  %v3534_v8 = vadd.f32 %v7553_v9, %v3533_v19  ;;  %5264 = vmatmul.msk.bf16.vlgmr.msrb.gmra.mxu3 %vm437_vm1, %v7214_v41  ;;  %vm3525_vm9 = vcmp.eq.f32.partialorder %v3524_v0, 8.507059e+37  ;;  %vm3536_vm11 = vweird.f32 %v7553_v9  ;;  %v3539_v52 = vand.u32 2147483647, %v7487_v6 }
 0x162   : > { %v7658_v29 = vmul.f32 %v5836_v5, %v4078_v13  ;;  %v3528_v50 = vsel %vm3525_vm9, %v3527_v34, %v3523_v3  ;;  %vm7660_vm12 = vmor %vm3535_vm10, %vm3536_vm11  ;;  %v3541_v19 = vand.u32 2147483648, %v7487_v6  ;;  %5839 = vtanh.f32 %v803_v27 }
 0x163   : > { %v930_v40 = vpop.f32.mrf.mxu2  ;;  %5841 = vtanh.f32 %v7527_v17  ;;  %v4107_v41 = vsub.f32 1.0, %v3528_v50  ;;  %v3538_v60 = vsel %vm7660_vm12, %v7553_v9, %v3534_v8  ;;  %v832_v33 = vadd.f32 %v831_v10, %v6810_v2 }
 0x164   : > { %11356 = vst [vmem:[#allocation102_spill] sm:$0xff] %v7658_v29  ;;  %v959_v62 = vpop.f32.mrf.mxu3  ;;  %v5838_v43 = vpop.eup %5837  ;;  %vm3540_vm13 = vcmp.eq.f32.partialorder %v3539_v52, 8.507059e+37  ;;  %v3542_v30 = vor.u32 1.1754944e-38, %v3541_v19  ;;  %v3549_v0 = vadd.f32 %v7557_v1, %v3548_v45  ;;  %vm3550_vm14 = vweird.f32 %v7491_v51  ;;  %v431_v52 = vld.sshfl [vmem:[#allocation1 + $0x10] sm:$0xff pattern:$0x73625140] }
 0x165   : > { %v874_v59 = vpop.f32.mrf.mxu0  ;;  %v7672_v58 = vmul.f32 %v5838_v43, %v4107_v41  ;;  %vm3551_vm15 = vweird.f32 %v7557_v1  ;;  %v3554_v17 = vand.u32 2147483647, %v7491_v51  ;;  %v3556_v63 = vand.u32 2147483648, %v7491_v51  ;;  %v432_v19 = vld.sshfl [vmem:[#allocation1 + $0x18] sm:$0xff pattern:$0x73625140] }
 0x166   : > { %v903_v6 = vpop.f32.mrf.mxu1  ;;  %v3543_v9 = vsel %vm3540_vm13, %v3542_v30, %v3538_v60  ;;  %vm7677_vm2 = vmor %vm3550_vm14, %vm3551_vm15  ;;  %5843 = vtanh.f32 %v832_v33  ;;  %v861_v45 = vadd.f32 %v7610_v21, %v6810_v2  ;;  %v3564_v3 = vadd.f32 %v7562_v16, %v3563_v39 }
 0x167   : > { %11359 = vst [vmem:[#allocation103_spill] sm:$0xff] %v7672_v58  ;;  %v4108_v27 = vsub.f32 1.0, %v3543_v9  ;;  %v3553_v5 = vsel %vm7677_vm2, %v7557_v1, %v3549_v0  ;;  %vm3555_vm3 = vcmp.eq.f32.partialorder %v3554_v17, 8.507059e+37  ;;  %v3557_v13 = vor.u32 1.1754944e-38, %v3556_v63 }
 0x168   : > { %v5840_v34 = vpop.eup %5839  ;;  %vm3565_vm4 = vweird.f32 %v7502_v31  ;;  %vm3566_vm5 = vweird.f32 %v7562_v16  ;;  %v3569_v51 = vand.u32 2147483647, %v7502_v31  ;;  %v3571_v8 = vand.u32 2147483648, %v7502_v31 }
 0x169   : > { %v7691_v21 = vpop.eup %5841  ;;  %v7693_v39 = vmul.f32 %v5840_v34, %v4108_v27  ;;  %v3558_v50 = vsel %vm3555_vm3, %v3557_v13, %v3553_v5  ;;  %vm7695_vm6 = vmor %vm3565_vm4, %vm3566_vm5  ;;  %5845 = vtanh.f32 %v861_v45  ;;  %v873_v1 = vadd.f32 %v7612_v42, %v6556_v44 }
 0x16a   : > { %11362 = vst [vmem:[#allocation104_spill] sm:$0xff] %v7691_v21  ;;  %v4109_v60 = vsub.f32 1.0, %v3558_v50  ;;  %v3568_v31 = vsel %vm7695_vm6, %v7562_v16, %v3564_v3  ;;  %vm3570_vm7 = vcmp.eq.f32.partialorder %v3569_v51, 8.507059e+37  ;;  %v3572_v33 = vor.u32 1.1754944e-38, %v3571_v8 }
 0x16b   : > { %11363 = vst [vmem:[#allocation105_spill] sm:$0xff] %v7693_v39  ;;  %v932_v41 = vpop.f32.mrf.mxu2  ;;  %v5312_v30 = vmul.f32 -1.442695, %v873_v1  ;;  %v902_v0 = vadd.f32 %v7628_v23, %v6556_v44  ;;  %v503_v17 = vsel %vm450_vm0, %v431_v52, 0  ;;  %v931_v63 = vadd.f32 %v930_v40, %v6556_v44 }
 0x16c   : > { %v961_v43 = vpop.f32.mrf.mxu3  ;;  %v5844_v42 = vpop.eup %5843  ;;  %v3573_v10 = vsel %vm3570_vm7, %v3572_v33, %v3568_v31  ;;  %1276 = vmatpush.bf16.msra.mxu2 %v503_v17  ;;  %v960_v45 = vadd.f32 %v959_v62, %v6556_v44  ;;  %v505_v27 = vsel %vm450_vm0, %v432_v19, 0  ;;  %v875_v16 = vadd.f32 %v874_v59, %v6570_v55  ;;  %v429_v3 = vld.sshfl [vmem:[#allocation1] sm:$0xff pattern:$0x73625140] }
 0x16d   : > { %v877_v9 = vpop.f32.mrf.mxu0  ;;  %v7711_v13 = vmul.f32 %v5844_v42, %v4109_v60  ;;  %v4110_v34 = vsub.f32 1.0, %v3573_v10  ;;  %5847 = vpow2.f32 %v5312_v30  ;;  %v5313_v23 = vmul.f32 -1.442695, %v902_v0  ;;  %1305 = vmatpush.bf16.msra.mxu3 %v505_v27  ;;  %v430_v51 = vld.sshfl [vmem:[#allocation1 + $0x8] sm:$0xff pattern:$0x73625140] }
 0x16e   : > { %v906_v5 = vpop.f32.mrf.mxu1  ;;  %v5314_v40 = vmul.f32 -1.442695, %v931_v63  ;;  %v5315_v8 = vmul.f32 -1.442695, %v960_v45  ;;  %v5344_v52 = vmul.f32 -1.442695, %v875_v16  ;;  %v904_v62 = vadd.f32 %v903_v6, %v6570_v55 }
 0x16f   : > { %11366 = vst [vmem:[#allocation106_spill] sm:$0xff] %v7711_v13  ;;  %5257 = vmatmul.msk.bf16.gmra.mxu1 %vm437_vm1, %v7301_v35  ;;  %5253 = vmatmul.msk.bf16.gmra.mxu0 %vm437_vm1, %v7301_v35  ;;  %v5846_v59 = vpop.eup %5845  ;;  %5849 = vpow2.f32 %v5313_v23  ;;  %v499_v50 = vsel %vm450_vm0, %v429_v3, 0  ;;  %v933_v32 = vadd.f32 %v932_v41, %v6570_v55  ;;  %v962_v1 = vadd.f32 %v961_v43, %v6570_v55  ;;  %v11369_v42 = vld [vmem:[#allocation24_spill] sm:$0xff]  ;;  %v11384_v43 = vld [vmem:[#allocation87_spill] sm:$0xff] }
 0x170   : > { %5261 = vmatmul.msk.bf16.gmra.mxu2 %vm437_vm1, %v7301_v35  ;;  %v7723_v19 = vmul.f32 %v5846_v59, %v4110_v34  ;;  %5851 = vpow2.f32 %v5314_v40  ;;  %v5345_v60 = vmul.f32 -1.442695, %v904_v62  ;;  %1218 = vmatpush.bf16.msra.mxu0 %v499_v50  ;;  %v501_v6 = vsel %vm450_vm0, %v430_v51, 0 }
 0x171   : > { %5265 = vmatmul.msk.bf16.gmra.mxu3 %vm437_vm1, %v7301_v35  ;;  %v856_v31 = vadd.f32 %v7493_v15, %v11335_v22  ;;  %5853 = vpow2.f32 %v5315_v8  ;;  %v5346_v41 = vmul.f32 -1.442695, %v933_v32  ;;  %1247 = vmatpush.bf16.msra.mxu1 %v501_v6  ;;  %v878_v33 = vadd.f32 %v877_v9, %v6578_v4  ;;  %v11383_v35 = vld [vmem:[#allocation75_spill] sm:$0xff]  ;;  %v11386_v8 = vld [vmem:[#allocation46_spill] sm:$0xff] }
 0x172   : > { %11367 = vst [vmem:[#allocation107_spill] sm:$0xff] %v7723_v19  ;;  %5855 = vpow2.f32 %v5344_v52  ;;  %v5347_v30 = vmul.f32 -1.442695, %v962_v1  ;;  %v11368_v63 = vsub.f32 1.0, %v7445_v36  ;;  %v7738_v15 = vmul.f32 %v7372_v7, %v7332_v47 }
 0x173   : > { %v935_v0 = vpop.f32.mrf.mxu2  ;;  %v5848_v45 = vpop.eup %5847  ;;  %5857 = vpow2.f32 %v5345_v60  ;;  %v5376_v27 = vmul.f32 -1.442695, %v878_v33  ;;  %v4259_v34 = vmax.f32 %v7378_v20, 0.0  ;;  %v907_v60 = vadd.f32 %v906_v5, %v6578_v4 }
 0x174   : > { %v964_v17 = vpop.f32.mrf.mxu3  ;;  %v4163_v10 = vmul.f32 %v11369_v42, %v11368_v63  ;;  %11370 = vst [vmem:[#allocation24_spill] sm:$0xff] %v7738_v15  ;;  %v7740_v9 = vadd.f32 1.0, %v5848_v45  ;;  %5859 = vpow2.f32 %v5346_v41  ;;  %v7765_v63 = vmul.f32 %v7388_v49, %v7350_v38 }
 0x175   : > { %v879_v16 = vpop.f32.mrf.mxu0  ;;  %v5850_v36 = vpop.eup %5849  ;;  %5861 = vtanh.f32 %v856_v31  ;;  %v7758_v31 = vmul.f32 %v7380_v53, %v7342_v48  ;;  %v936_v5 = vadd.f32 %v935_v0, %v6578_v4  ;;  %v7773_v45 = vmul.f32 %v7394_v54, %v7355_v11  ;;  %v11390_v11 = vld [vmem:[#allocation88_spill] sm:$0xff] }
 0x176   : > { %11371 = vst [vmem:[#allocation108_spill] sm:$0xff] %v7740_v9  ;;  %v908_v3 = vpop.f32.mrf.mxu1  ;;  %v4291_v23 = vmax.f32 %v4163_v10, 0.0  ;;  %v5852_v52 = vpop.eup %5851  ;;  %v7747_v59 = vadd.f32 1.0, %v5850_v36  ;;  %5863 = vpow2.f32 %v5347_v30  ;;  %v5377_v0 = vmul.f32 -1.442695, %v907_v60  ;;  %v11389_v60 = vld [vmem:[#allocation77_spill] sm:$0xff] }
 0x177   : > { %v5854_v32 = vpop.eup %5853  ;;  %v7752_v1 = vadd.f32 1.0, %v5852_v52  ;;  %5865 = vpow2.f32 %v5376_v27  ;;  %11374 = vst [vmem:[#allocation111_spill] sm:$0xff] %v7758_v31  ;;  %v7787_v20 = vmul.f32 %v11384_v43, %v11383_v35  ;;  %v11387_v40 = vsub.f32 1.0, %v11386_v8  ;;  %v11399_v35 = vld [vmem:[#allocation92_spill] sm:$0xff] }
 0x178   : > { %11372 = vst [vmem:[#allocation109_spill] sm:$0xff] %v7747_v59  ;;  %v7749_v50 = vpack.c.bf16 %v4291_v23, %v4259_v34  ;;  %v5856_v6 = vpop.eup %5855  ;;  %5867 = vrcp.f32 %v7740_v9  ;;  %v7761_v33 = vadd.f32 1.0, %v5854_v32  ;;  %v965_v34 = vadd.f32 %v964_v17, %v6578_v4 }
 0x179   : > { %11373 = vst [vmem:[#allocation110_spill] sm:$0xff] %v7752_v1  ;;  %v5858_v30 = vpop.eup %5857  ;;  %5869 = vrcp.f32 %v7747_v59  ;;  %v7768_v42 = vadd.f32 1.0, %v5856_v6  ;;  %v11382_v6 = vld [vmem:[#allocation9_spill] sm:$0xff]  ;;  %v5378_v54 = vmul.f32 -1.442695, %v936_v5 }
 0x17a   : > { %11375 = vst [vmem:[#allocation112_spill] sm:$0xff] %v7761_v33  ;;  %v5860_v10 = vpop.eup %5859  ;;  %5871 = vrcp.f32 %v7752_v1  ;;  %v7776_v27 = vadd.f32 1.0, %v5858_v30  ;;  %v880_v41 = vadd.f32 %v879_v16, %v11382_v6  ;;  %v909_v17 = vadd.f32 %v908_v3, %v11382_v6  ;;  %v7805_v3 = vld [vmem:[%s10882_s2 + $0x10] sm:$0xff] }
 0x17b   : > { %11376 = vst [vmem:[#allocation113_spill] sm:$0xff] %v7765_v63  ;;  %v937_v23 = vpop.f32.mrf.mxu2  ;;  %v7779_v52 = vpop.eup %5861  ;;  %5873 = vrcp.f32 %v7761_v33  ;;  %v7782_v32 = vadd.f32 1.0, %v5860_v10  ;;  %v7798_v16 = vmul.f32 %v11390_v11, %v11389_v60  ;;  %v5379_v49 = vmul.f32 -1.442695, %v965_v34  ;;  %v11396_v34 = vld [vmem:[#allocation90_spill] sm:$0xff] }
 0x17c   : > { %11377 = vst [vmem:[#allocation114_spill] sm:$0xff] %v7768_v42  ;;  %v966_v36 = vpop.f32.mrf.mxu3  ;;  %v5864_v51 = vpop.eup %5863  ;;  %5875 = vrcp.f32 %v7768_v42  ;;  %v938_v38 = vadd.f32 %v937_v23, %v11382_v6  ;;  %v5408_v11 = vmul.f32 -1.442695, %v880_v41  ;;  %v5409_v23 = vmul.f32 -1.442695, %v909_v17 }
 0x17d   : > { %11378 = vst [vmem:[#allocation115_spill] sm:$0xff] %v7773_v45  ;;  %v882_v30 = vpop.f32.mrf.mxu0  ;;  %v5866_v21 = vpop.eup %5865  ;;  %5877 = vrcp.f32 %v7776_v27  ;;  %v967_v60 = vadd.f32 %v966_v36, %v11382_v6  ;;  %v11398_v36 = vld [vmem:[#allocation82_spill] sm:$0xff]  ;;  %v11407_v45 = vld [vmem:[#allocation16_spill] sm:$0xff] }
 0x17e   : > { %11379 = vst [vmem:[#allocation116_spill] sm:$0xff] %v7776_v27  ;;  %v7791_v62 = vpop.f32.mrf.mxu1  ;;  %v7809_v8 = vpop.eup %5867  ;;  %5879 = vrcp.f32 %v7782_v32  ;;  %v7831_v43 = vmul.f32 %v11399_v35, %v11398_v36  ;;  %v5410_v63 = vmul.f32 -1.442695, %v938_v38 }
 0x17f   : > { %11380 = vst [vmem:[#allocation117_spill] sm:$0xff] %v7779_v52  ;;  %v11388_v52 = vld [vmem:[#allocation11_spill] sm:$0xff]  ;;  %5258 = vmatmul.msk.bf16.gmra.mxu1 %vm437_vm1, %v7805_v3  ;;  %5254 = vmatmul.msk.bf16.gmra.mxu0 %vm437_vm1, %v7805_v3  ;;  %v7817_v5 = vpop.eup %5869  ;;  %5881 = vpow2.f32 %v5377_v0  ;;  %v5411_v36 = vmul.f32 -1.442695, %v967_v60  ;;  %v7852_v0 = vadd.f32 1.0, %v5864_v51  ;;  %v7892_v51 = vmul.f32 %v7809_v8, %v7740_v9 }
 0x180   : > { %11381 = vst [vmem:[#allocation118_spill] sm:$0xff] %v7782_v32  ;;  %v1973_v10 = vmul.f32 %v11388_v52, %v11387_v40  ;;  %v7812_v40 = vadd.f32 1.0, %v5866_v21  ;;  %5262 = vmatmul.msk.bf16.gmra.mxu2 %vm437_vm1, %v7805_v3  ;;  %v7823_v48 = vpop.eup %5871  ;;  %v11395_v21 = vld [vmem:[#allocation79_spill] sm:$0xff]  ;;  %vm1976_vm9 = vweird.f32 %v11388_v52  ;;  %v7903_v15 = vmul.f32 %v7817_v5, %v7747_v59 }
 0x181   : > { %11385 = vst [vmem:[#allocation119_spill] sm:$0xff] %v7787_v20  ;;  %v7827_v53 = vmul.f32 %v11396_v34, %v11395_v21  ;;  %5266 = vmatmul.msk.bf16.gmra.mxu3 %vm437_vm1, %v7805_v3  ;;  %v7836_v41 = vpop.eup %5873 }
 0x182   : > { %11391 = vst [vmem:[#allocation46_spill] sm:$0xff] %v7798_v16  ;;  %5883 = vrcp.f32 %v7812_v40  ;;  %v7840_v21 = vpop.eup %5875  ;;  %v7848_v31 = vadd.f32 %v11388_v52, %v1973_v10  ;;  %v883_v16 = vadd.f32 %v882_v30, %v11407_v45  ;;  %vm3100_vm11 = vweird.f32 %v7812_v40 }
 0x183   : > { %11392 = vst [vmem:[#allocation11_spill] sm:$0xff] %v7809_v8  ;;  %5885 = vpow2.f32 %v5378_v54  ;;  %v7843_v35 = vpop.f32.mrf.mxu2  ;;  %v7850_v47 = vpop.eup %5877  ;;  %v11405_v54 = vld [vmem:[#allocation6_spill] sm:$0xff]  ;;  %v3104_v8 = vand.u32 2147483647, %v7812_v40 }
 0x184   : > { %11393 = vst [vmem:[#allocation120_spill] sm:$0xff] %v7817_v5  ;;  %5887 = vpow2.f32 %v5379_v49  ;;  %v7845_v17 = vpop.f32.mrf.mxu3  ;;  %vm1975_vm8 = vweird.f32 %v11405_v54  ;;  %v7856_v38 = vpop.eup %5879 }
 0x185   : > { %11394 = vst [vmem:[#allocation121_spill] sm:$0xff] %v7823_v48  ;;  %5889 = vpow2.f32 %v5408_v11  ;;  %v7861_v10 = vpop.f32.mrf.mxu0  ;;  %v5882_v28 = vpop.eup %5881  ;;  %vm7877_vm10 = vmor %vm1975_vm8, %vm1976_vm9  ;;  %vm7951_vm13 = vcmp.eq.f32.partialorder %v3104_v8, 8.507059e+37  ;;  %v7969_v8 = vadd.f32 %v7845_v17, %v11407_v45 }
 0x186   : > { %11397 = vst [vmem:[#allocation122_spill] sm:$0xff] %v7827_v53  ;;  %5891 = vpow2.f32 %v5409_v23  ;;  %v7866_v20 = vpop.f32.mrf.mxu1  ;;  %v7871_v60 = vadd.f32 1.0, %v5882_v28 }
 0x187   : > { %11400 = vst [vmem:[#allocation123_spill] sm:$0xff] %v7831_v43  ;;  %5893 = vpow2.f32 %v5410_v63  ;;  %v1981_v63 = vand.u32 2147483648, %v11405_v54  ;;  %v7899_v43 = vadd.f32 %v7791_v62, %v11407_v45 }
 0x188   : > { %11401 = vst [vmem:[#allocation124_spill] sm:$0xff] %v7836_v41  ;;  %v7868_v7 = vpop.eup %5883  ;;  %5895 = vpow2.f32 %v5411_v36  ;;  %v3119_v26 = vand.u32 2147483647, %v7871_v60  ;;  %v3121_v13 = vand.u32 2147483648, %v7871_v60  ;;  %vm3115_vm15 = vweird.f32 %v7871_v60 }
 0x189   : > { %11402 = vst [vmem:[#allocation125_spill] sm:$0xff] %v7840_v21  ;;  %v5886_v30 = vpop.eup %5885  ;;  %5897 = vrcp.f32 %v7852_v0  ;;  %v3096_v11 = vmul.f32 %v7868_v7, %v7812_v40  ;;  %v7913_v62 = vor.u32 1.1754944e-38, %v1981_v63  ;;  %vm3101_vm12 = vweird.f32 %v7868_v7 }
 0x18a   : > { %11403 = vst [vmem:[#allocation126_spill] sm:$0xff] %v7850_v47  ;;  %v5888_v49 = vpop.eup %5887  ;;  %5899 = vrcp.f32 %v7871_v60  ;;  %v7895_v34 = vadd.f32 1.0, %v5886_v30  ;;  %vm7975_vm14 = vmor %vm3100_vm11, %vm3101_vm12  ;;  %vm7992_vm3 = vcmp.eq.f32.partialorder %v3119_v26, 8.507059e+37 }
 0x18b   : > { %11404 = vst [vmem:[#allocation127_spill] sm:$0xff] %v7852_v0  ;;  %v5890_v53 = vpop.eup %5889  ;;  %v3097_v28 = vsub.f32 1.0, %v3096_v11  ;;  %v7905_v36 = vadd.f32 1.0, %v5888_v49  ;;  %5901 = vtanh.f32 %v883_v16  ;;  %v7910_v30 = vpop.f32.mrf.mxu2 }
 0x18c   : > { %11406 = vst [vmem:[#allocation6_spill] sm:$0xff] %v7856_v38  ;;  %v5892_v29 = vpop.eup %5891  ;;  %5903 = vrcp.f32 %v7895_v34  ;;  %v7908_v9 = vadd.f32 1.0, %v5890_v53  ;;  %v5041_v53 = vld [vmem:[%s10885_s5] sm:$0xff]  ;;  %v7926_v63 = vpop.f32.mrf.mxu3  ;;  %vm3130_vm2 = vweird.f32 %v7895_v34  ;;  %v3134_v24 = vand.u32 2147483647, %v7895_v34 }
 0x18d   : > { %11410 = vst [vmem:[#allocation128_spill] sm:$0xff] %v7892_v51  ;;  %v5894_v37 = vpop.eup %5893  ;;  %v3098_v19 = vmul.f32 %v7868_v7, %v3097_v28  ;;  %5905 = vrcp.f32 %v7905_v36  ;;  %v7917_v11 = vadd.f32 1.0, %v5892_v29  ;;  %v3106_v28 = vand.u32 2147483648, %v7812_v40  ;;  %5044 = vperm.xlu2 %5560, %v5041_v53  }
 0x18e   : > { %11411 = vst [vmem:[#allocation129_spill] sm:$0xff] %v7903_v15  ;;  %v5896_v16 = vpop.eup %5895  ;;  %5907 = vrcp.f32 %v7908_v9  ;;  %v7924_v49 = vadd.f32 1.0, %v5894_v37  ;;  %v7940_v37 = vld [vmem:[%s10882_s2 + $0x18] sm:$0xff]  ;;  %v7948_v53 = vmul.f32 %v7823_v48, %v7752_v1  ;;  %v7965_v1 = vadd.f32 %v7843_v35, %v11407_v45 }
 0x18f   : > { %v7930_v29 = vpop.eup %5897  ;;  %5909 = vrcp.f32 %v7917_v11  ;;  %v7933_v59 = vadd.f32 1.0, %v5896_v16  ;;  %v3099_v5 = vadd.f32 %v7868_v7, %v3098_v19  ;;  %5259 = vmatmul.msk.bf16.gmra.mxu1 %vm437_vm1, %v7940_v37  ;;  %v887_v16 = vpop.f32.mrf.mxu0  ;;  %5255 = vmatmul.msk.bf16.gmra.mxu0 %vm437_vm1, %v7940_v37  ;;  %v3107_v12 = vor.u32 1.1754944e-38, %v3106_v28 }
 0x190   : > { %11412 = vst [vmem:[#allocation130_spill] sm:$0xff] %v7930_v29  ;;  %v7944_v25 = vpop.eup %5899  ;;  %5911 = vrcp.f32 %v7924_v49  ;;  %5263 = vmatmul.msk.bf16.gmra.mxu2 %vm437_vm1, %v7940_v37  ;;  %v888_v56 = vadd.f32 %v887_v16, %v6710_v18  ;;  %v3122_v28 = vor.u32 1.1754944e-38, %v3121_v13  ;;  %v3136_v29 = vand.u32 2147483648, %v7895_v34 }
 0x191   : > { %11413 = vst [vmem:[#allocation131_spill] sm:$0xff] %v7948_v53  ;;  %v7958_v39 = vpop.eup %5901  ;;  %v3111_v58 = vmul.f32 %v7944_v25, %v7871_v60  ;;  %5913 = vrcp.f32 %v7933_v59  ;;  %v3103_v35 = vsel %vm7975_vm14, %v7868_v7, %v3099_v5  ;;  %5267 = vmatmul.msk.bf16.gmra.mxu3 %vm437_vm1, %v7940_v37  ;;  %vm3116_vm4 = vweird.f32 %v7944_v25 }
 0x192   : > { %11416 = vst [vmem:[#allocation132_spill] sm:$0xff] %v7958_v39  ;;  %v916_v39 = vpop.f32.mrf.mxu1  ;;  %v5904_v61 = vpop.eup %5903  ;;  %v3108_v53 = vsel %vm7951_vm13, %v3107_v12, %v3103_v35  ;;  %5915 = vtanh.f32 %v888_v56  ;;  %vm8022_vm6 = vcmp.eq.f32.partialorder %v3134_v24, 8.507059e+37  ;;  %vm3117_vm7 = vmor %vm3115_vm15, %vm3116_vm4  ;;  %vm3145_vm9 = vweird.f32 %v7905_v36 }
 0x193   : > { %v7988_v40 = vpop.eup %5905  ;;  %v3112_v17 = vsub.f32 1.0, %v3111_v58  ;;  %v3126_v57 = vmul.f32 %v5904_v61, %v7895_v34  ;;  %v917_v5 = vadd.f32 %v916_v39, %v6710_v18  ;;  %v945_v46 = vpop.f32.mrf.mxu2  ;;  %vm3131_vm5 = vweird.f32 %v5904_v61 }
 0x194   : > { %v7996_v48 = vpop.eup %5907  ;;  %v3141_v7 = vmul.f32 %v7988_v40, %v7905_v36  ;;  %v946_v13 = vadd.f32 %v945_v46, %v6710_v18  ;;  %v4079_v38 = vsub.f32 1.0, %v3108_v53  ;;  %vm3132_vm8 = vmor %vm3130_vm2, %vm3131_vm5  ;;  %vm3146_vm11 = vweird.f32 %v7988_v40 }
 0x195   : > { %v8002_v58 = vpop.eup %5909  ;;  %v3113_v45 = vmul.f32 %v7944_v25, %v3112_v17  ;;  %v3127_v16 = vsub.f32 1.0, %v3126_v57  ;;  %v3576_v26 = vmul.f32 %v7996_v48, %v7908_v9  ;;  %5917 = vtanh.f32 %v917_v5  ;;  %vm8047_vm12 = vmor %vm3145_vm9, %vm3146_vm11 }
 0x196   : > { %v8009_v15 = vpop.eup %5911  ;;  %v3142_v51 = vsub.f32 1.0, %v3141_v7  ;;  %v3591_v39 = vmul.f32 %v8002_v58, %v7917_v11  ;;  %v974_v7 = vpop.f32.mrf.mxu3  ;;  %5919 = vtanh.f32 %v946_v13  ;;  %vm3580_vm13 = vweird.f32 %v7908_v9 }
 0x197   : > { %v8015_v0 = vpop.eup %5913  ;;  %v3128_v17 = vmul.f32 %v5904_v61, %v3127_v16  ;;  %v3577_v57 = vsub.f32 1.0, %v3576_v26  ;;  %v3606_v35 = vmul.f32 %v8009_v15, %v7924_v49  ;;  %v3114_v46 = vadd.f32 %v7944_v25, %v3113_v45  ;;  %v889_v5 = vpop.f32.mrf.mxu0 }
 0x198   : > { %v3143_v19 = vmul.f32 %v7988_v40, %v3142_v51  ;;  %v3592_v12 = vsub.f32 1.0, %v3591_v39  ;;  %v8028_v16 = vmul.f32 %v8015_v0, %v7933_v59  ;;  %v3137_v26 = vor.u32 1.1754944e-38, %v3136_v29  ;;  %v5916_v34 = vpop.eup %5915 }
 0x199   : > { %v3129_v51 = vadd.f32 %v5904_v61, %v3128_v17  ;;  %v3578_v56 = vmul.f32 %v7996_v48, %v3577_v57  ;;  %v3118_v53 = vsel %vm3117_vm7, %v7944_v25, %v3114_v46  ;;  %v975_v24 = vadd.f32 %v974_v7, %v6710_v18 }
 0x19a   : > { %v3144_v45 = vadd.f32 %v7988_v40, %v3143_v19  ;;  %v3593_v39 = vmul.f32 %v8002_v58, %v3592_v12  ;;  %v3607_v60 = vsub.f32 1.0, %v3606_v35  ;;  %v3123_v29 = vsel %vm7992_vm3, %v3122_v28, %v3118_v53 }
 0x19b   : > { %v3133_v13 = vsel %vm3132_vm8, %v5904_v61, %v3129_v51  ;;  %v3149_v25 = vand.u32 2147483647, %v7905_v36  ;;  %v4080_v57 = vsub.f32 1.0, %v3123_v29  ;;  %v3151_v12 = vand.u32 2147483648, %v7905_v36  ;;  %v918_v61 = vpop.f32.mrf.mxu1  ;;  %v5918_v32 = vpop.eup %5917  ;;  %v8062_v51 = vld [vmem:[%s10882_s2] sm:$0xff] }
 0x19c   : > { %v3138_v17 = vsel %vm8022_vm6, %v3137_v26, %v3133_v13  ;;  %5921 = vtanh.f32 %v975_v24  ;;  %v890_v14 = vadd.f32 %v889_v5, %v6810_v2  ;;  %v8053_v28 = vmul.f32 %v5916_v34, %v4079_v38  ;;  %v5920_v36 = vpop.eup %5919  ;;  %v947_v13 = vpop.f32.mrf.mxu2 }
 0x19d   : > { %v4081_v35 = vsub.f32 1.0, %v3138_v17  ;;  %v3148_v7 = vsel %vm8047_vm12, %v7988_v40, %v3144_v45  ;;  %v3579_v46 = vadd.f32 %v7996_v48, %v3578_v56  ;;  %v8066_v26 = vmul.f32 %v5918_v32, %v4080_v57 }
 0x19e   : > { %v3152_v38 = vor.u32 1.1754944e-38, %v3151_v12  ;;  %vm3581_vm14 = vweird.f32 %v7996_v48  ;;  %vm3150_vm15 = vcmp.eq.f32.partialorder %v3149_v25, 8.507059e+37  ;;  %v3584_v53 = vand.u32 2147483647, %v7908_v9 }
 0x19f   : > { %5272 = vmatmul.msk.bf16.vlgmr.msra.gmra.mxu1 %vm437_vm1, %v8062_v51  ;;  %5268 = vmatmul.msk.bf16.vlgmr.msra.gmra.mxu0 %vm437_vm1, %v8062_v51  ;;  %v8072_v40 = vmul.f32 %v5920_v36, %v4081_v35  ;;  %vm8074_vm2 = vmor %vm3580_vm13, %vm3581_vm14  ;;  %v3586_v24 = vand.u32 2147483648, %v7908_v9  ;;  %v3622_v45 = vsub.f32 1.0, %v8028_v16  ;;  %5923 = vtanh.f32 %v890_v14 }
 0x1a0   : > { %5276 = vmatmul.msk.bf16.vlgmr.msra.gmra.mxu2 %vm437_vm1, %v8062_v51  ;;  %v3153_v5 = vsel %vm3150_vm15, %v3152_v38, %v3148_v7  ;;  %v3583_v29 = vsel %vm8074_vm2, %v7996_v48, %v3579_v46  ;;  %v3608_v17 = vmul.f32 %v8009_v15, %v3607_v60  ;;  %vm3585_vm3 = vcmp.eq.f32.partialorder %v3584_v53, 8.507059e+37  ;;  %v976_v48 = vpop.f32.mrf.mxu3  ;;  %v988_v7 = vpop.f32.mrf.mxu0 }
 0x1a1   : > { %11425 = vst [vmem:[#allocation133_spill] sm:$0xff] %v8072_v40  ;;  %5280 = vmatmul.msk.bf16.vlgmr.msra.gmra.mxu3 %vm437_vm1, %v8062_v51  ;;  %v4082_v25 = vsub.f32 1.0, %v3153_v5  ;;  %v3587_v9 = vor.u32 1.1754944e-38, %v3586_v24  ;;  %v919_v57 = vadd.f32 %v918_v61, %v6810_v2  ;;  %v3594_v16 = vadd.f32 %v8002_v58, %v3593_v39 }
 0x1a2   : > { %v5922_v34 = vpop.eup %5921  ;;  %vm3595_vm4 = vweird.f32 %v7917_v11  ;;  %vm3596_vm5 = vweird.f32 %v8002_v58  ;;  %v3599_v60 = vand.u32 2147483647, %v7917_v11  ;;  %v3601_v32 = vand.u32 2147483648, %v7917_v11 }
 0x1a3   : > { %v8093_v19 = vmul.f32 %v5922_v34, %v4082_v25  ;;  %v3588_v12 = vsel %vm3585_vm3, %v3587_v9, %v3583_v29  ;;  %vm8095_vm6 = vmor %vm3595_vm4, %vm3596_vm5  ;;  %v3623_v61 = vmul.f32 %v8015_v0, %v3622_v45  ;;  %5925 = vtanh.f32 %v919_v57  ;;  %v1017_v24 = vpop.f32.mrf.mxu1 }
 0x1a4   : > { %v3598_v39 = vsel %vm8095_vm6, %v8002_v58, %v3594_v16  ;;  %v948_v35 = vadd.f32 %v947_v13, %v6810_v2  ;;  %v4111_v46 = vsub.f32 1.0, %v3588_v12  ;;  %vm3600_vm7 = vcmp.eq.f32.partialorder %v3599_v60, 8.507059e+37  ;;  %v433_v13 = vld.sshfl [vmem:[#allocation1 + $0x20] sm:$0xff pattern:$0x73625140]  ;;  %v11442_v60 = vld [vmem:[#allocation31_spill] sm:$0xff] }
 0x1a5   : > { %11428 = vst [vmem:[#allocation134_spill] sm:$0xff] %v8093_v19  ;;  %v3602_v36 = vor.u32 1.1754944e-38, %v3601_v32  ;;  %v3609_v38 = vadd.f32 %v8009_v15, %v3608_v17  ;;  %v5924_v56 = vpop.eup %5923  ;;  %vm3610_vm8 = vweird.f32 %v7924_v49  ;;  %vm3611_vm9 = vweird.f32 %v8009_v15  ;;  %v435_v12 = vld.sshfl [vmem:[#allocation1 + $0x30] sm:$0xff pattern:$0x73625140] }
 0x1a6   : > { %v3614_v11 = vand.u32 2147483647, %v7924_v49  ;;  %v3616_v53 = vand.u32 2147483648, %v7924_v49  ;;  %v8111_v58 = vmul.f32 %v5924_v56, %v4111_v46  ;;  %vm8113_vm11 = vmor %vm3610_vm8, %vm3611_vm9  ;;  %5927 = vtanh.f32 %v948_v35  ;;  %v434_v49 = vld.sshfl [vmem:[#allocation1 + $0x28] sm:$0xff pattern:$0x73625140] }
 0x1a7   : > { %v3603_v45 = vsel %vm3600_vm7, %v3602_v36, %v3598_v39  ;;  %v977_v29 = vadd.f32 %v976_v48, %v6810_v2  ;;  %v3613_v25 = vsel %vm8113_vm11, %v8009_v15, %v3609_v38  ;;  %v11433_v34 = vand.u32 2147483647, %v11405_v54  ;;  %v436_v39 = vld.sshfl [vmem:[#allocation1 + $0x38] sm:$0xff pattern:$0x73625140] }
 0x1a8   : > { %v4112_v17 = vsub.f32 1.0, %v3603_v45  ;;  %vm3615_vm12 = vcmp.eq.f32.partialorder %v3614_v11, 8.507059e+37  ;;  %v3617_v9 = vor.u32 1.1754944e-38, %v3616_v53  ;;  %v3624_v16 = vadd.f32 %v8015_v0, %v3623_v61  ;;  %v1046_v61 = vpop.f32.mrf.mxu2 }
 0x1a9   : > { %vm8123_vm13 = vcmp.eq.f32.partialorder %v11433_v34, 8.507059e+37  ;;  %vm3625_vm14 = vweird.f32 %v7933_v59  ;;  %vm3626_vm15 = vweird.f32 %v8015_v0  ;;  %v3629_v48 = vand.u32 2147483647, %v7933_v59  ;;  %v5926_v14 = vpop.eup %5925 }
 0x1aa   : > { %v3618_v15 = vsel %vm3615_vm12, %v3617_v9, %v3613_v25  ;;  %vm8131_vm2 = vmor %vm3625_vm14, %vm3626_vm15  ;;  %v3631_v54 = vand.u32 2147483648, %v7933_v59  ;;  %5929 = vtanh.f32 %v977_v29  ;;  %v989_v32 = vadd.f32 %v988_v7, %v6556_v44  ;;  %v1075_v7 = vpop.f32.mrf.mxu3  ;;  %v8155_v25 = vld [vmem:[%s10882_s2 + $0x8] sm:$0xff] }
 0x1ab   : > { %v8137_v35 = vmul.f32 %v5926_v14, %v4112_v17  ;;  %v4113_v46 = vsub.f32 1.0, %v3618_v15  ;;  %v3628_v36 = vsel %vm8131_vm2, %v8015_v0, %v3624_v16  ;;  %vm8142_vm3 = vcmp.eq.f32.partialorder %v3629_v48, 8.507059e+37  ;;  %v11440_v48 = vld [vmem:[#allocation28_spill] sm:$0xff]  ;;  %v11441_v15 = vld [vmem:[#allocation30_spill] sm:$0xff] }
 0x1ac   : > { %v3632_v56 = vor.u32 1.1754944e-38, %v3631_v54  ;;  %v5316_v11 = vmul.f32 -1.442695, %v989_v32  ;;  %v1018_v59 = vadd.f32 %v1017_v24, %v6556_v44  ;;  %v507_v53 = vsel %vm450_vm0, %v433_v13, 0  ;;  %v5928_v45 = vpop.eup %5927  ;;  %v1019_v54 = vpop.f32.mrf.mxu1  ;;  %v11443_v32 = vld [vmem:[#allocation67_spill] sm:$0xff] }
 0x1ad   : > { %1334 = vmatpush.bf16.msrb.mxu0 %v507_v53  ;;  %v509_v5 = vsel %vm450_vm0, %v434_v49, 0  ;;  %v511_v29 = vsel %vm450_vm0, %v435_v12, 0  ;;  %v513_v17 = vsel %vm450_vm0, %v436_v39, 0  ;;  %v1047_v0 = vadd.f32 %v1046_v61, %v6556_v44  ;;  %v990_v49 = vpop.f32.mrf.mxu0  ;;  %v11445_v39 = vld [vmem:[#allocation17_spill] sm:$0xff] }
 0x1ae   : > { %5931 = vtanh.f32 %v7899_v43  ;;  %v8160_v24 = vmul.f32 %v5928_v45, %v4113_v46  ;;  %v3633_v13 = vsel %vm8142_vm3, %v3632_v56, %v3628_v36  ;;  %v5317_v9 = vmul.f32 -1.442695, %v1018_v59  ;;  %1363 = vmatpush.bf16.msrb.mxu1 %v509_v5  ;;  %1392 = vmatpush.bf16.msrb.mxu2 %v511_v29  ;;  %v11446_v36 = vld [vmem:[#allocation33_spill] sm:$0xff]  ;;  %v11452_v45 = vld [vmem:[#allocation48_spill] sm:$0xff] }
 0x1af   : > { %5273 = vmatmul.msk.bf16.gmra.mxu1 %vm437_vm1, %v8155_v25  ;;  %5933 = vtanh.f32 %v7965_v1  ;;  %v885_v34 = vadd.f32 %v7861_v10, %v11335_v22  ;;  %v4114_v16 = vsub.f32 1.0, %v3633_v13  ;;  %1421 = vmatpush.bf16.msrb.mxu3 %v513_v17  ;;  %v1076_v43 = vadd.f32 %v1075_v7, %v6556_v44  ;;  %v11454_v29 = vld [vmem:[#allocation12_spill] sm:$0xff] }
 0x1b0   : > { %v5930_v12 = vpop.eup %5929  ;;  %5935 = vtanh.f32 %v7969_v8  ;;  %v914_v14 = vadd.f32 %v7866_v20, %v11335_v22  ;;  %v5318_v1 = vmul.f32 -1.442695, %v1047_v0  ;;  %v11444_v10 = vsub.f32 1.0, %v11443_v32  ;;  %5269 = vmatmul.msk.bf16.gmra.mxu0 %vm437_vm1, %v8155_v25  ;;  %5277 = vmatmul.msk.bf16.gmra.mxu2 %vm437_vm1, %v8155_v25  ;;  %v11474_v32 = vld [vmem:[#allocation22_spill] sm:$0xff] }
 0x1b1   : > { %4624 = vmatpush.bf16.xpose.msra.mxu0 %v11440_v48  ;;  %v8177_v46 = vmul.f32 %v5930_v12, %v4114_v16  ;;  %5937 = vpow2.f32 %v5316_v11  ;;  %v991_v8 = vadd.f32 %v990_v49, %v6570_v55  ;;  %v11447_v20 = vsel %vm7877_vm10, %v11388_v52, %v7848_v31  ;;  %v11448_v11 = vld [vmem:[#allocation10_spill] sm:$0xff]  ;;  %5281 = vmatmul.msk.bf16.gmra.mxu3 %vm437_vm1, %v8155_v25  ;;  %v11456_v49 = vld [vmem:[#allocation7_spill] sm:$0xff]  ;;  %v11458_v48 = vld [vmem:[#allocation21_spill] sm:$0xff] }
 0x1b2   : > { %4637 = vmatpush.bf16.xpose.msra.mxu1 %v11441_v15  ;;  %4650 = vmatpush.bf16.xpose.msra.mxu2 %v11442_v60  ;;  %v2453_v61 = vmul.f32 %v11445_v39, %v11444_v10  ;;  %v1983_v38 = vsel %vm8123_vm13, %v7913_v62, %v11447_v20  ;;  %5939 = vpow2.f32 %v5317_v9  ;;  %vm2455_vm0 = vweird.f32 %v11448_v11 }
 0x1b3   : > { %4663 = vmatpush.bf16.xpose.msra.mxu3 %v11446_v36  ;;  %vm2456_vm4 = vweird.f32 %v11445_v39  ;;  %v5319_v31 = vmul.f32 -1.442695, %v1076_v43  ;;  %v1020_v52 = vadd.f32 %v1019_v54, %v6570_v55  ;;  %v2459_v62 = vand.u32 2147483647, %v11448_v11 }
 0x1b4   : > { %v2454_v56 = vadd.f32 %v11445_v39, %v2453_v61  ;;  %vm8199_vm10 = vmor %vm2455_vm0, %vm2456_vm4  ;;  %v2461_v57 = vand.u32 2147483648, %v11448_v11  ;;  %v8205_v59 = vpop.eup %5931  ;;  %5941 = vpow2.f32 %v5318_v1  ;;  %v4004_v7 = vsub.f32 1.0, %v1983_v38  ;;  %v11461_v38 = vld [vmem:[#allocation68_spill] sm:$0xff]  ;;  %v11463_v11 = vld [vmem:[#allocation18_spill] sm:$0xff] }
 0x1b5   : > { %11451 = vst [vmem:[#allocation28_spill] sm:$0xff] %v8205_v59  ;;  %v11453_v5 = vsub.f32 1.0, %v11452_v45  ;;  %v8213_v0 = vpop.eup %5933  ;;  %v5348_v13 = vmul.f32 -1.442695, %v991_v8  ;;  %vm2460_vm5 = vcmp.eq.f32.partialorder %v2459_v62, 8.507059e+37  ;;  %vm1990_vm6 = vweird.f32 %v11456_v49 }
 0x1b6   : > { %v2458_v53 = vsel %vm8199_vm10, %v11445_v39, %v2454_v56  ;;  %11455 = vst [vmem:[#allocation30_spill] sm:$0xff] %v8213_v0  ;;  %v2462_v9 = vor.u32 1.1754944e-38, %v2461_v57  ;;  %v8216_v16 = vpop.eup %5935  ;;  %v4132_v43 = vmul.f32 %v11458_v48, %v4004_v7  ;;  %vm1991_vm7 = vweird.f32 %v11454_v29  ;;  %v11466_v7 = vld [vmem:[#allocation13_spill] sm:$0xff] }
 0x1b7   : > { %v1988_v17 = vmul.f32 %v11454_v29, %v11453_v5  ;;  %11457 = vst [vmem:[#allocation31_spill] sm:$0xff] %v8216_v16  ;;  %v1994_v15 = vand.u32 2147483647, %v11456_v49  ;;  %v5938_v60 = vpop.eup %5937  ;;  %5943 = vpow2.f32 %v5319_v31  ;;  %v5349_v1 = vmul.f32 -1.442695, %v1020_v52  ;;  %vm8223_vm8 = vmor %vm1990_vm6, %vm1991_vm7  ;;  %v8238_v52 = vpop.f32.mrf.mxu2 }
 0x1b8   : > { %v2463_v54 = vsel %vm2460_vm5, %v2462_v9, %v2458_v53  ;;  %v1996_v10 = vand.u32 2147483648, %v11456_v49  ;;  %v5940_v39 = vpop.eup %5939  ;;  %5945 = vtanh.f32 %v885_v34  ;;  %v943_v61 = vadd.f32 %v7910_v30, %v11335_v22  ;;  %v11465_v30 = vld [vmem:[#allocation25_spill] sm:$0xff] }
 0x1b9   : > { %v1989_v12 = vadd.f32 %v11454_v29, %v1988_v17  ;;  %4625 = vmatpush.bf16.xpose.msra.mxu0 %v7749_v50  ;;  %v4036_v36 = vsub.f32 1.0, %v2463_v54  ;;  %5947 = vtanh.f32 %v914_v14  ;;  %v972_v50 = vadd.f32 %v7926_v63, %v11335_v22  ;;  %v11485_v17 = vld [vmem:[#allocation70_spill] sm:$0xff] }
 0x1ba   : > { %v1997_v20 = vor.u32 1.1754944e-38, %v1996_v10  ;;  %v11462_v56 = vsub.f32 1.0, %v11461_v38  ;;  %v5942_v34 = vpop.eup %5941  ;;  %v8240_v23 = vadd.f32 1.0, %v5938_v60  ;;  %5949 = vpow2.f32 %v5348_v13 }
 0x1bb   : > { %v1993_v8 = vsel %vm8223_vm8, %v11454_v29, %v1989_v12  ;;  %v4164_v62 = vmul.f32 %v11465_v30, %v4036_v36  ;;  %vm1995_vm9 = vcmp.eq.f32.partialorder %v1994_v15, 8.507059e+37  ;;  %5951 = vpow2.f32 %v5349_v1  ;;  %v1077_v15 = vpop.f32.mrf.mxu3 }
 0x1bc   : > { %v2468_v31 = vmul.f32 %v11463_v11, %v11462_v56  ;;  %11464 = vst [vmem:[#allocation67_spill] sm:$0xff] %v8240_v23  ;;  %v1998_v57 = vsel %vm1995_vm9, %v1997_v20, %v1993_v8  ;;  %vm2471_vm11 = vweird.f32 %v11463_v11  ;;  %v4260_v63 = vmax.f32 %v4132_v43, 0.0  ;;  %v11477_v8 = vld [vmem:[#allocation14_spill] sm:$0xff] }
 0x1bd   : > { %v4292_v53 = vmax.f32 %v4164_v62, 0.0  ;;  %vm2470_vm12 = vweird.f32 %v11466_v7  ;;  %v2474_v45 = vand.u32 2147483647, %v11466_v7  ;;  %v5944_v5 = vpop.eup %5943  ;;  %v8249_v29 = vmul.f32 %v7836_v41, %v7761_v33 }
 0x1be   : > { %v2469_v14 = vadd.f32 %v11463_v11, %v2468_v31  ;;  %5953 = vtanh.f32 %v943_v61  ;;  %vm8251_vm13 = vmor %vm2470_vm12, %vm2471_vm11  ;;  %v2476_v13 = vand.u32 2147483648, %v11466_v7  ;;  %v4005_v9 = vsub.f32 1.0, %v1998_v57  ;;  %v8258_v49 = vpop.eup %5945  ;;  %v11475_v61 = vld [vmem:[#allocation50_spill] sm:$0xff] }
 0x1bf   : > { %11467 = vst [vmem:[#allocation17_spill] sm:$0xff] %v8249_v29  ;;  %5274 = vmatmul.msk.bf16.gmra.mxu1 %vm437_vm1, %v7805_v3  ;;  %5955 = vtanh.f32 %v972_v50  ;;  %v8260_v48 = vadd.f32 1.0, %v5940_v39  ;;  %v4555_v43 = vpack.c.bf16 %v4292_v53, %v4260_v63  ;;  %v8265_v60 = vpop.eup %5947  ;;  %v8267_v1 = vadd.f32 1.0, %v5942_v34  ;;  %v993_v50 = vpop.f32.mrf.mxu0  ;;  %v11479_v34 = vld [vmem:[#allocation8_spill] sm:$0xff] }
 0x1c0   : > { %11470 = vst [vmem:[#allocation33_spill] sm:$0xff] %v8258_v49  ;;  %v2473_v12 = vsel %vm8251_vm13, %v11463_v11, %v2469_v14  ;;  %v2477_v54 = vor.u32 1.1754944e-38, %v2476_v13  ;;  %v4133_v10 = vmul.f32 %v11474_v32, %v4005_v9  ;;  %v11476_v36 = vsub.f32 1.0, %v11475_v61  ;;  %v5950_v39 = vpop.eup %5949  ;;  %5270 = vmatmul.msk.bf16.gmra.mxu0 %vm437_vm1, %v7805_v3  ;;  %v1022_v53 = vpop.f32.mrf.mxu1  ;;  %5278 = vmatmul.msk.bf16.gmra.mxu2 %vm437_vm1, %v7805_v3  ;;  %v11487_v9 = vld [vmem:[#allocation19_spill] sm:$0xff]  ;;  %v11490_v32 = vld [vmem:[#allocation26_spill] sm:$0xff] }
 0x1c1   : > { %11471 = vst [vmem:[#allocation10_spill] sm:$0xff] %v8260_v48  ;;  %5957 = vrcp.f32 %v8240_v23  ;;  %v8274_v38 = vadd.f32 1.0, %v5944_v5  ;;  %4638 = vmatpush.bf16.xpose.msra.mxu1 %v4555_v43  ;;  %vm2475_vm14 = vcmp.eq.f32.partialorder %v2474_v45, 8.507059e+37  ;;  %vm2006_vm15 = vweird.f32 %v11477_v8  ;;  %v5952_v56 = vpop.eup %5951  ;;  %5282 = vmatmul.msk.bf16.gmra.mxu3 %vm437_vm1, %v7805_v3 }
 0x1c2   : > { %11472 = vst [vmem:[#allocation48_spill] sm:$0xff] %v8265_v60  ;;  %v2003_v20 = vmul.f32 %v11477_v8, %v11476_v36  ;;  %v2478_v11 = vsel %vm2475_vm14, %v2477_v54, %v2473_v12  ;;  %vm2005_vm2 = vweird.f32 %v11479_v34  ;;  %v2009_v30 = vand.u32 2147483647, %v11479_v34  ;;  %v1051_v12 = vpop.f32.mrf.mxu2 }
 0x1c3   : > { %11473 = vst [vmem:[#allocation12_spill] sm:$0xff] %v8267_v1  ;;  %v8284_v62 = vmul.f32 %v7840_v21, %v7768_v42  ;;  %5959 = vrcp.f32 %v8260_v48  ;;  %v4037_v57 = vsub.f32 1.0, %v2478_v11  ;;  %vm8287_vm3 = vmor %vm2005_vm2, %vm2006_vm15  ;;  %v2011_v63 = vand.u32 2147483648, %v11479_v34 }
 0x1c4   : > { %11478 = vst [vmem:[#allocation7_spill] sm:$0xff] %v8274_v38  ;;  %v2004_v31 = vadd.f32 %v11477_v8, %v2003_v20  ;;  %v8296_v7 = vpop.eup %5953  ;;  %5961 = vrcp.f32 %v8267_v1  ;;  %v8299_v45 = vadd.f32 1.0, %v5950_v39  ;;  %v11486_v13 = vsub.f32 1.0, %v11485_v17  ;;  %v11491_v39 = vld [vmem:[#allocation15_spill] sm:$0xff] }
 0x1c5   : > { %11480 = vst [vmem:[#allocation21_spill] sm:$0xff] %v8284_v62  ;;  %v8307_v54 = vpop.eup %5955  ;;  %5963 = vrcp.f32 %v8274_v38  ;;  %v8310_v3 = vadd.f32 1.0, %v5952_v56  ;;  %v4165_v61 = vmul.f32 %v11490_v32, %v4037_v57  ;;  %v2012_v36 = vor.u32 1.1754944e-38, %v2011_v63  ;;  %v1080_v57 = vpop.f32.mrf.mxu3 }
 0x1c6   : > { %11483 = vst [vmem:[#allocation68_spill] sm:$0xff] %v8296_v7  ;;  %v2008_v5 = vsel %vm8287_vm3, %v11477_v8, %v2004_v31  ;;  %v2483_v43 = vmul.f32 %v11487_v9, %v11486_v13  ;;  %vm2010_vm0 = vcmp.eq.f32.partialorder %v2009_v30, 8.507059e+37  ;;  %vm2485_vm4 = vweird.f32 %v11491_v39 }
 0x1c7   : > { %11484 = vst [vmem:[#allocation18_spill] sm:$0xff] %v8299_v45  ;;  %vm2486_vm10 = vweird.f32 %v11487_v9  ;;  %v8316_v8 = vpop.eup %5957  ;;  %v4261_v11 = vmax.f32 %v4133_v10, 0.0  ;;  %v4293_v31 = vmax.f32 %v4165_v61, 0.0  ;;  %v2013_v34 = vsel %vm2010_vm0, %v2012_v36, %v2008_v5  ;;  %v995_v61 = vpop.f32.mrf.mxu0  ;;  %v11503_v5 = vld [vmem:[#allocation118_spill] sm:$0xff] }
 0x1c8   : > { %11488 = vst [vmem:[#allocation25_spill] sm:$0xff] %v8307_v54  ;;  %v2484_v20 = vadd.f32 %v11487_v9, %v2483_v43  ;;  %vm8318_vm5 = vmor %vm2485_vm4, %vm2486_vm10  ;;  %v2489_v56 = vand.u32 2147483647, %v11491_v39  ;;  %5965 = vrcp.f32 %v8299_v45  ;;  %v2491_v63 = vand.u32 2147483648, %v11491_v39 }
 0x1c9   : > { %11489 = vst [vmem:[#allocation13_spill] sm:$0xff] %v8310_v3  ;;  %v4006_v17 = vsub.f32 1.0, %v2013_v34  ;;  %v8328_v13 = vpop.eup %5959  ;;  %v4556_v10 = vpack.c.bf16 %v4293_v31, %v4261_v11  ;;  %v1049_v43 = vadd.f32 %v8238_v52, %v6570_v55  ;;  %v1078_v32 = vadd.f32 %v1077_v15, %v6570_v55  ;;  %v1024_v15 = vpop.f32.mrf.mxu1 }
 0x1ca   : > { %11492 = vst [vmem:[#allocation22_spill] sm:$0xff] %v8316_v8  ;;  %v2488_v30 = vsel %vm8318_vm5, %v11487_v9, %v2484_v20  ;;  %vm8330_vm6 = vcmp.eq.f32.partialorder %v2489_v56, 8.507059e+37  ;;  %v8337_v36 = vpop.eup %5961  ;;  %v2492_v14 = vor.u32 1.1754944e-38, %v2491_v63  ;;  %v11499_v9 = vld [vmem:[#allocation23_spill] sm:$0xff]  ;;  %v994_v39 = vadd.f32 %v993_v50, %v6578_v4  ;;  %v1053_v50 = vpop.f32.mrf.mxu2 }
 0x1cb   : > { %11495 = vst [vmem:[#allocation50_spill] sm:$0xff] %v8328_v13  ;;  %v4134_v20 = vmul.f32 %v11499_v9, %v4006_v17  ;;  %v1023_v34 = vadd.f32 %v1022_v53, %v6578_v4  ;;  %v8342_v11 = vpop.eup %5963  ;;  %4651 = vmatpush.bf16.xpose.msra.mxu2 %v4556_v10  ;;  %v5350_v31 = vmul.f32 -1.442695, %v1049_v43  ;;  %v5351_v56 = vmul.f32 -1.442695, %v1078_v32  ;;  %v11504_v32 = vld [vmem:[#allocation6_spill] sm:$0xff] }
 0x1cc   : > { %11498 = vst [vmem:[#allocation14_spill] sm:$0xff] %v8337_v36  ;;  %v1052_v54 = vadd.f32 %v1051_v12, %v6578_v4  ;;  %v1081_v52 = vadd.f32 %v1080_v57, %v6578_v4  ;;  %5967 = vrcp.f32 %v8310_v3  ;;  %v2493_v63 = vsel %vm8330_vm6, %v2492_v14, %v2488_v30  ;;  %v11506_v14 = vld [vmem:[#allocation27_spill] sm:$0xff] }
 0x1cd   : > { %11500 = vst [vmem:[#allocation8_spill] sm:$0xff] %v8342_v11  ;;  %v5380_v17 = vmul.f32 -1.442695, %v994_v39  ;;  %v5381_v9 = vmul.f32 -1.442695, %v1023_v34  ;;  %v4038_v16 = vsub.f32 1.0, %v2493_v63  ;;  %5969 = vpow2.f32 %v5350_v31  ;;  %v1082_v34 = vpop.f32.mrf.mxu3 }
 0x1ce   : > { %v5382_v53 = vmul.f32 -1.442695, %v1052_v54  ;;  %v5383_v7 = vmul.f32 -1.442695, %v1081_v52  ;;  %v8349_v10 = vpop.eup %5965  ;;  %5971 = vpow2.f32 %v5351_v56  ;;  %v996_v12 = vadd.f32 %v995_v61, %v11382_v6  ;;  %v11507_v61 = vld [vmem:[#allocation127_spill] sm:$0xff]  ;;  %v11508_v31 = vld [vmem:[#allocation130_spill] sm:$0xff] }
 0x1cf   : > { %11501 = vst [vmem:[#allocation70_spill] sm:$0xff] %v8349_v10  ;;  %v1025_v57 = vadd.f32 %v1024_v15, %v11382_v6  ;;  %v1054_v43 = vadd.f32 %v1053_v50, %v11382_v6  ;;  %5275 = vmatmul.msk.bf16.gmra.mxu1 %vm437_vm1, %v7940_v37  ;;  %v8358_v30 = vmul.f32 %v7850_v47, %v7776_v27  ;;  %5973 = vpow2.f32 %v5380_v17 }
 0x1d0   : > { %v8362_v54 = vmul.f32 %v11504_v32, %v11503_v5  ;;  %v4166_v39 = vmul.f32 %v11506_v14, %v4038_v16  ;;  %v8367_v56 = vmul.f32 %v11508_v31, %v11507_v61  ;;  %5975 = vpow2.f32 %v5381_v9  ;;  %5271 = vmatmul.msk.bf16.gmra.mxu0 %vm437_vm1, %v7940_v37  ;;  %5279 = vmatmul.msk.bf16.gmra.mxu2 %vm437_vm1, %v7940_v37 }
 0x1d1   : > { %11502 = vst [vmem:[#allocation19_spill] sm:$0xff] %v8358_v30  ;;  %v5412_v52 = vmul.f32 -1.442695, %v996_v12  ;;  %v5413_v15 = vmul.f32 -1.442695, %v1025_v57  ;;  %v4262_v63 = vmax.f32 %v4134_v20, 0.0  ;;  %5977 = vpow2.f32 %v5382_v53  ;;  %v998_v53 = vpop.f32.mrf.mxu0  ;;  %v1027_v57 = vpop.f32.mrf.mxu1  ;;  %5283 = vmatmul.msk.bf16.gmra.mxu3 %vm437_vm1, %v7940_v37 }
 0x1d2   : > { %11505 = vst [vmem:[#allocation26_spill] sm:$0xff] %v8362_v54  ;;  %v4294_v50 = vmax.f32 %v4166_v39, 0.0  ;;  %v5414_v0 = vmul.f32 -1.442695, %v1054_v43  ;;  %v8369_v33 = vpop.eup %5967  ;;  %5979 = vpow2.f32 %v5383_v7  ;;  %v1056_v9 = vpop.f32.mrf.mxu2  ;;  %v8395_v7 = vmul.f32 %v8328_v13, %v8260_v48 }
 0x1d3   : > { %11509 = vst [vmem:[#allocation15_spill] sm:$0xff] %v8367_v56  ;;  %v5970_v14 = vpop.eup %5969  ;;  %5981 = vpow2.f32 %v5412_v52  ;;  %v8435_v60 = vmul.f32 %v8349_v10, %v8299_v45 }
 0x1d4   : > { %11510 = vst [vmem:[#allocation23_spill] sm:$0xff] %v8369_v33  ;;  %v4557_v12 = vpack.c.bf16 %v4294_v50, %v4262_v63  ;;  %v5972_v43 = vpop.eup %5971  ;;  %v8384_v17 = vadd.f32 1.0, %v5970_v14  ;;  %5983 = vpow2.f32 %v5413_v15  ;;  %v8389_v63 = vmul.f32 %v8316_v8, %v8240_v23 }
 0x1d5   : > { %v5974_v32 = vpop.eup %5973  ;;  %v8391_v50 = vadd.f32 1.0, %v5972_v43  ;;  %5985 = vpow2.f32 %v5414_v0  ;;  %11517 = vst [vmem:[#allocation137_spill] sm:$0xff] %v8395_v7  ;;  %v8399_v15 = vmul.f32 %v8337_v36, %v8267_v1  ;;  %v1083_v0 = vadd.f32 %v1082_v34, %v11382_v6  ;;  %v1085_v43 = vpop.f32.mrf.mxu3 }
 0x1d6   : > { %11514 = vst [vmem:[#allocation27_spill] sm:$0xff] %v8384_v17  ;;  %4664 = vmatpush.bf16.xpose.msra.mxu3 %v4557_v12  ;;  %v5976_v37 = vpop.eup %5975  ;;  %5987 = vrcp.f32 %v8384_v17  ;;  %v8402_v14 = vadd.f32 1.0, %v5974_v32  ;;  %v8426_v23 = vmul.f32 %v8342_v11, %v8274_v38 }
 0x1d7   : > { %11515 = vst [vmem:[#allocation135_spill] sm:$0xff] %v8389_v63  ;;  %v5978_v52 = vpop.eup %5977  ;;  %5989 = vrcp.f32 %v8391_v50  ;;  %v8406_v12 = vadd.f32 1.0, %v5976_v37 }
 0x1d8   : > { %11516 = vst [vmem:[#allocation136_spill] sm:$0xff] %v8391_v50  ;;  %v5980_v20 = vpop.eup %5979  ;;  %5991 = vrcp.f32 %v8402_v14  ;;  %v8412_v36 = vadd.f32 1.0, %v5978_v52  ;;  %v3166_v38 = vand.u32 2147483648, %v8402_v14  ;;  %v3164_v61 = vand.u32 2147483647, %v8402_v14 }
 0x1d9   : > { %11518 = vst [vmem:[#allocation138_spill] sm:$0xff] %v8399_v15  ;;  %v5982_v32 = vpop.eup %5981  ;;  %5993 = vrcp.f32 %v8406_v12  ;;  %v8417_v37 = vadd.f32 1.0, %v5980_v20  ;;  %v5415_v20 = vmul.f32 -1.442695, %v1083_v0  ;;  %v1000_v48 = vpop.f32.mrf.mxu0  ;;  %v8445_v0 = vmul.f32 %v8369_v33, %v8310_v3 }
 0x1da   : > { %v5984_v34 = vpop.eup %5983  ;;  %5995 = vrcp.f32 %v8412_v36  ;;  %v8422_v1 = vadd.f32 1.0, %v5982_v32  ;;  %11519 = vst [vmem:[#allocation139_spill] sm:$0xff] %v8426_v23  ;;  %v1029_v8 = vpop.f32.mrf.mxu1  ;;  %vm3160_vm7 = vweird.f32 %v8402_v14  ;;  %v8473_v33 = vadd.f32 %v1000_v48, %v11335_v22 }
 0x1db   : > { %v5986_v52 = vpop.eup %5985  ;;  %5997 = vrcp.f32 %v8417_v37  ;;  %v8429_v39 = vadd.f32 1.0, %v5984_v34  ;;  %11521 = vst [vmem:[#allocation141_spill] sm:$0xff] %v8435_v60  ;;  %v1058_v13 = vpop.f32.mrf.mxu2  ;;  %v11524_v34 = vld [vmem:[#allocation16_spill] sm:$0xff]  ;;  %v3167_v56 = vor.u32 1.1754944e-38, %v3166_v38  ;;  %vm3175_vm8 = vweird.f32 %v8406_v12 }
 0x1dc   : > { %v8431_v63 = vpop.eup %5987  ;;  %5999 = vrcp.f32 %v8422_v1  ;;  %v8438_v32 = vadd.f32 1.0, %v5986_v52  ;;  %11523 = vst [vmem:[#allocation143_spill] sm:$0xff] %v8445_v0  ;;  %v999_v15 = vadd.f32 %v998_v53, %v11524_v34  ;;  %v1028_v7 = vadd.f32 %v1027_v57, %v11524_v34 }
 0x1dd   : > { %11520 = vst [vmem:[#allocation140_spill] sm:$0xff] %v8431_v63  ;;  %v8441_v11 = vpop.eup %5989  ;;  %6001 = vrcp.f32 %v8429_v39  ;;  %v8454_v52 = vadd.f32 %v1056_v9, %v11524_v34  ;;  %v8457_v10 = vadd.f32 %v1085_v43, %v11524_v34  ;;  %v3179_v57 = vand.u32 2147483647, %v8406_v12  ;;  %v8475_v31 = vpop.f32.mrf.mxu3 }
 0x1de   : > { %11522 = vst [vmem:[#allocation142_spill] sm:$0xff] %v8441_v11  ;;  %v8450_v45 = vpop.eup %5991  ;;  %6003 = vrcp.f32 %v8438_v32  ;;  %v8487_v16 = vadd.f32 %v1029_v8, %v11335_v22  ;;  %v8493_v38 = vmul.f32 %v8441_v11, %v8391_v50  ;;  %vm8500_vm9 = vcmp.eq.f32.partialorder %v3164_v61, 8.507059e+37 }
 0x1df   : > { %5288 = vmatmul.msk.bf16.vlgmr.msrb.gmra.mxu1 %vm437_vm1, %v8062_v51  ;;  %v8462_v3 = vpop.eup %5993  ;;  %v3156_v53 = vmul.f32 %v8450_v45, %v8402_v14  ;;  %6005 = vpow2.f32 %v5415_v20  ;;  %v8482_v20 = vmul.f32 %v8431_v63, %v8384_v17  ;;  %v8498_v17 = vadd.f32 %v1058_v13, %v11335_v22 }
 0x1e0   : > { %v8468_v9 = vpop.eup %5995  ;;  %v3171_v43 = vmul.f32 %v8462_v3, %v8406_v12  ;;  %11526 = vst [vmem:[#allocation145_spill] sm:$0xff] %v8493_v38  ;;  %5284 = vmatmul.msk.bf16.vlgmr.msrb.gmra.mxu0 %vm437_vm1, %v8062_v51  ;;  %vm8510_vm11 = vcmp.eq.f32.partialorder %v3179_v57, 8.507059e+37  ;;  %v3181_v13 = vand.u32 2147483648, %v8406_v12  ;;  %vm3190_vm12 = vweird.f32 %v8412_v36  ;;  %5292 = vmatmul.msk.bf16.vlgmr.msrb.gmra.mxu2 %vm437_vm1, %v8062_v51 }
 0x1e1   : > { %v8478_v29 = vpop.eup %5997  ;;  %11525 = vst [vmem:[#allocation144_spill] sm:$0xff] %v8482_v20  ;;  %v3157_v54 = vsub.f32 1.0, %v3156_v53  ;;  %v3186_v59 = vmul.f32 %v8468_v9, %v8412_v36  ;;  %5296 = vmatmul.msk.bf16.vlgmr.msrb.gmra.mxu3 %vm437_vm1, %v8062_v51  ;;  %vm3161_vm13 = vweird.f32 %v8450_v45  ;;  %6007 = vtanh.f32 %v999_v15 }
 0x1e2   : > { %v8489_v48 = vpop.eup %5999  ;;  %v3172_v27 = vsub.f32 1.0, %v3171_v43  ;;  %v3201_v47 = vmul.f32 %v8478_v29, %v8417_v37  ;;  %v1003_v43 = vpop.f32.mrf.mxu0  ;;  %6009 = vtanh.f32 %v1028_v7  ;;  %vm3176_vm14 = vweird.f32 %v8462_v3  ;;  %vm3162_vm15 = vmor %vm3160_vm7, %vm3161_vm13 }
 0x1e3   : > { %v8506_v8 = vpop.eup %6001  ;;  %v3187_v63 = vsub.f32 1.0, %v3186_v59  ;;  %v3636_v50 = vmul.f32 %v8489_v48, %v8422_v1  ;;  %v3158_v59 = vmul.f32 %v8450_v45, %v3157_v54  ;;  %v1032_v49 = vpop.f32.mrf.mxu1  ;;  %vm3177_vm2 = vmor %vm3175_vm8, %vm3176_vm14  ;;  %vm3191_vm3 = vweird.f32 %v8468_v9 }
 0x1e4   : > { %v8520_v61 = vpop.eup %6003  ;;  %v3202_v30 = vsub.f32 1.0, %v3201_v47  ;;  %v8525_v57 = vmul.f32 %v8506_v8, %v8429_v39  ;;  %v3173_v42 = vmul.f32 %v8462_v3, %v3172_v27  ;;  %v1061_v47 = vpop.f32.mrf.mxu2  ;;  %v1004_v27 = vadd.f32 %v1003_v43, %v6710_v18  ;;  %vm8565_vm0 = vmor %vm3190_vm12, %vm3191_vm3 }
 0x1e5   : > { %v6006_v5 = vpop.eup %6005  ;;  %v3637_v21 = vsub.f32 1.0, %v3636_v50  ;;  %v8531_v62 = vmul.f32 %v8520_v61, %v8438_v32  ;;  %v3188_v51 = vmul.f32 %v8468_v9, %v3187_v63  ;;  %v3182_v50 = vor.u32 1.1754944e-38, %v3181_v13 }
 0x1e6   : > { %v8534_v54 = vadd.f32 1.0, %v6006_v5  ;;  %v3203_v41 = vmul.f32 %v8478_v29, %v3202_v30  ;;  %v3652_v19 = vsub.f32 1.0, %v8525_v57  ;;  %v3159_v15 = vadd.f32 %v8450_v45, %v3158_v59 }
 0x1e7   : > { %v3638_v40 = vmul.f32 %v8489_v48, %v3637_v21  ;;  %v1033_v5 = vadd.f32 %v1032_v49, %v6710_v18  ;;  %v3667_v7 = vsub.f32 1.0, %v8531_v62  ;;  %v3174_v30 = vadd.f32 %v8462_v3, %v3173_v42  ;;  %v1090_v62 = vpop.f32.mrf.mxu3  ;;  %v8558_v14 = vpop.eup %6007 }
 0x1e8   : > { %6011 = vrcp.f32 %v8534_v54  ;;  %v1062_v63 = vadd.f32 %v1061_v47, %v6710_v18  ;;  %v3163_v21 = vsel %vm3162_vm15, %v8450_v45, %v3159_v15  ;;  %v3189_v49 = vadd.f32 %v8468_v9, %v3188_v51  ;;  %11531 = vst [vmem:[#allocation146_spill] sm:$0xff] %v8558_v14  ;;  %v8571_v59 = vpop.eup %6009 }
 0x1e9   : > { %6013 = vtanh.f32 %v1004_v27  ;;  %v3168_v42 = vsel %vm8500_vm9, %v3167_v56, %v3163_v21  ;;  %v3178_v43 = vsel %vm3177_vm2, %v8462_v3, %v3174_v30  ;;  %v3194_v12 = vand.u32 2147483647, %v8412_v36  ;;  %11534 = vst [vmem:[#allocation147_spill] sm:$0xff] %v8571_v59 }
 0x1ea   : > { %6015 = vtanh.f32 %v1033_v5  ;;  %v3196_v13 = vand.u32 2147483648, %v8412_v36  ;;  %v4083_v57 = vsub.f32 1.0, %v3168_v42  ;;  %v3183_v51 = vsel %vm8510_vm11, %v3182_v50, %v3178_v43  ;;  %v1005_v27 = vpop.f32.mrf.mxu0 }
 0x1eb   : > { %v3193_v3 = vsel %vm8565_vm0, %v8468_v9, %v3189_v49  ;;  %6017 = vtanh.f32 %v1062_v63  ;;  %v4084_v56 = vsub.f32 1.0, %v3183_v51  ;;  %vm3195_vm4 = vcmp.eq.f32.partialorder %v3194_v12, 8.507059e+37  ;;  %v1034_v50 = vpop.f32.mrf.mxu1 }
 0x1ec   : > { %v3197_v53 = vor.u32 1.1754944e-38, %v3196_v13  ;;  %v1091_v47 = vadd.f32 %v1090_v62, %v6710_v18  ;;  %v3204_v36 = vadd.f32 %v8478_v29, %v3203_v41  ;;  %vm3205_vm10 = vweird.f32 %v8417_v37 }
 0x1ed   : > { %vm3206_vm5 = vweird.f32 %v8478_v29  ;;  %v3209_v11 = vand.u32 2147483647, %v8417_v37  ;;  %v3211_v41 = vand.u32 2147483648, %v8417_v37  ;;  %v3653_v49 = vmul.f32 %v8506_v8, %v3652_v19 }
 0x1ee   : > { %v8579_v15 = vpop.eup %6011  ;;  %v3198_v30 = vsel %vm3195_vm4, %v3197_v53, %v3193_v3  ;;  %vm8589_vm6 = vmor %vm3205_vm10, %vm3206_vm5  ;;  %6019 = vtanh.f32 %v1091_v47  ;;  %v1006_v51 = vadd.f32 %v1005_v27, %v6810_v2  ;;  %v3639_v37 = vadd.f32 %v8489_v48, %v3638_v40 }
 0x1ef   : > { %5289 = vmatmul.msk.bf16.gmra.mxu1 %vm437_vm1, %v8155_v25  ;;  %v6014_v9 = vpop.eup %6013  ;;  %v3681_v5 = vmul.f32 %v8579_v15, %v8534_v54  ;;  %v4085_v42 = vsub.f32 1.0, %v3198_v30  ;;  %v3208_v43 = vsel %vm8589_vm6, %v8478_v29, %v3204_v36  ;;  %v3212_v13 = vor.u32 1.1754944e-38, %v3211_v41 }
 0x1f0   : > { %v6016_v21 = vpop.eup %6015  ;;  %v8595_v62 = vmul.f32 %v6014_v9, %v4083_v57  ;;  %6021 = vtanh.f32 %v8454_v52  ;;  %vm3210_vm7 = vcmp.eq.f32.partialorder %v3209_v11, 8.507059e+37  ;;  %vm3641_vm8 = vweird.f32 %v8489_v48  ;;  %5285 = vmatmul.msk.bf16.gmra.mxu0 %vm437_vm1, %v8155_v25  ;;  %5293 = vmatmul.msk.bf16.gmra.mxu2 %vm437_vm1, %v8155_v25  ;;  %v1063_v11 = vpop.f32.mrf.mxu2 }
 0x1f1   : > { %v3682_v45 = vsub.f32 1.0, %v3681_v5  ;;  %v8600_v12 = vmul.f32 %v6016_v21, %v4084_v56  ;;  %v6018_v3 = vpop.eup %6017  ;;  %v3668_v19 = vmul.f32 %v8520_v61, %v3667_v7  ;;  %v3213_v57 = vsel %vm3210_vm7, %v3212_v13, %v3208_v43  ;;  %5297 = vmatmul.msk.bf16.gmra.mxu3 %vm437_vm1, %v8155_v25 }
 0x1f2   : > { %v8609_v29 = vmul.f32 %v6018_v3, %v4085_v42  ;;  %vm3640_vm9 = vweird.f32 %v8422_v1  ;;  %v4086_v52 = vsub.f32 1.0, %v3213_v57  ;;  %v3644_v7 = vand.u32 2147483647, %v8422_v1  ;;  %v1104_v63 = vpop.f32.mrf.mxu0 }
 0x1f3   : > { %v3683_v40 = vmul.f32 %v8579_v15, %v3682_v45  ;;  %vm8617_vm11 = vmor %vm3640_vm9, %vm3641_vm8  ;;  %v3646_v53 = vand.u32 2147483648, %v8422_v1  ;;  %6023 = vtanh.f32 %v1006_v51  ;;  %v1035_v36 = vadd.f32 %v1034_v50, %v6810_v2  ;;  %v1133_v42 = vpop.f32.mrf.mxu1 }
 0x1f4   : > { %v6020_v47 = vpop.eup %6019  ;;  %v3643_v27 = vsel %vm8617_vm11, %v8489_v48, %v3639_v37  ;;  %v3654_v25 = vadd.f32 %v8506_v8, %v3653_v49  ;;  %vm3645_vm12 = vcmp.eq.f32.partialorder %v3644_v7, 8.507059e+37  ;;  %vm3655_vm13 = vweird.f32 %v8429_v39  ;;  %v1092_v48 = vpop.f32.mrf.mxu3 }
 0x1f5   : > { %v8628_v9 = vmul.f32 %v6020_v47, %v4086_v52  ;;  %v3647_v5 = vor.u32 1.1754944e-38, %v3646_v53  ;;  %vm3656_vm14 = vweird.f32 %v8506_v8  ;;  %v3659_v1 = vand.u32 2147483647, %v8429_v39 }
 0x1f6   : > { %v3661_v30 = vand.u32 2147483648, %v8429_v39  ;;  %6025 = vtanh.f32 %v1035_v36  ;;  %v8634_v41 = vpop.eup %6021  ;;  %vm3657_vm15 = vmor %vm3655_vm13, %vm3656_vm14  ;;  %v1064_v21 = vadd.f32 %v1063_v11, %v6810_v2  ;;  %v3669_v49 = vadd.f32 %v8520_v61, %v3668_v19 }
 0x1f7   : > { %11539 = vst [vmem:[#allocation148_spill] sm:$0xff] %v8634_v41  ;;  %6027 = vtanh.f32 %v8457_v10  ;;  %v3648_v50 = vsel %vm3645_vm12, %v3647_v5, %v3643_v27  ;;  %v3658_v45 = vsel %vm3657_vm15, %v8506_v8, %v3654_v25  ;;  %vm3660_vm2 = vcmp.eq.f32.partialorder %v3659_v1, 8.507059e+37  ;;  %v6337_v25 = vld [vmem:[%s10882_s2 + $0x10] sm:$0xff]  ;;  %v11619_v41 = vld [vmem:[#allocation49_spill] sm:$0xff] }
 0x1f8   : > { %v4115_v43 = vsub.f32 1.0, %v3648_v50  ;;  %v3662_v13 = vor.u32 1.1754944e-38, %v3661_v30  ;;  %vm3670_vm3 = vweird.f32 %v8438_v32  ;;  %vm3671_vm0 = vweird.f32 %v8520_v61  ;;  %v11545_v50 = vld [vmem:[#allocation62_spill] sm:$0xff] }
 0x1f9   : > { %v3674_v39 = vand.u32 2147483647, %v8438_v32  ;;  %v3676_v10 = vand.u32 2147483648, %v8438_v32  ;;  %v6024_v51 = vpop.eup %6023  ;;  %vm8644_vm4 = vmor %vm3670_vm3, %vm3671_vm0  ;;  %6029 = vtanh.f32 %v1064_v21  ;;  %v1093_v19 = vadd.f32 %v1092_v48, %v6810_v2 }
 0x1fa   : > { %v3663_v3 = vsel %vm3660_vm2, %v3662_v13, %v3658_v45  ;;  %v3684_v8 = vadd.f32 %v8579_v15, %v3683_v40  ;;  %v8650_v57 = vmul.f32 %v6024_v51, %v4115_v43  ;;  %v3673_v56 = vsel %vm8644_vm4, %v8520_v61, %v3669_v49  ;;  %v11546_v45 = vld [vmem:[#allocation64_spill] sm:$0xff]  ;;  %v11548_v51 = vld [vmem:[#allocation66_spill] sm:$0xff] }
 0x1fb   : > { %v4116_v52 = vsub.f32 1.0, %v3663_v3  ;;  %vm3675_vm10 = vcmp.eq.f32.partialorder %v3674_v39, 8.507059e+37  ;;  %v3677_v7 = vor.u32 1.1754944e-38, %v3676_v10  ;;  %vm3685_vm5 = vweird.f32 %v8534_v54  ;;  %v11547_v39 = vld [vmem:[#allocation65_spill] sm:$0xff] }
 0x1fc   : > { %v6026_v32 = vpop.eup %6025  ;;  %vm3686_vm6 = vweird.f32 %v8579_v15  ;;  %v3689_v53 = vand.u32 2147483647, %v8534_v54  ;;  %v3691_v36 = vand.u32 2147483648, %v8534_v54  ;;  %6031 = vtanh.f32 %v1093_v19  ;;  %v1191_v37 = vpop.f32.mrf.mxu3 }
 0x1fd   : > { %v8658_v47 = vpop.eup %6027  ;;  %v8660_v27 = vmul.f32 %v6026_v32, %v4116_v52  ;;  %vm8662_vm7 = vmor %vm3685_vm5, %vm3686_vm6  ;;  %v1105_v61 = vadd.f32 %v1104_v63, %v6556_v44  ;;  %v3678_v11 = vsel %vm3675_vm10, %v3677_v7, %v3673_v56  ;;  %v1134_v1 = vadd.f32 %v1133_v42, %v6556_v44  ;;  %v1162_v63 = vpop.f32.mrf.mxu2  ;;  %v11549_v42 = vld [vmem:[#allocation58_spill] sm:$0xff] }
 0x1fe   : > { %11542 = vst [vmem:[#allocation149_spill] sm:$0xff] %v8658_v47  ;;  %v3688_v5 = vsel %vm8662_vm7, %v8579_v15, %v3684_v8  ;;  %vm3690_vm8 = vcmp.eq.f32.partialorder %v3689_v53, 8.507059e+37  ;;  %v4117_v30 = vsub.f32 1.0, %v3678_v11  ;;  %v3692_v48 = vor.u32 1.1754944e-38, %v3691_v36  ;;  %v1106_v19 = vpop.f32.mrf.mxu0  ;;  %v1135_v32 = vpop.f32.mrf.mxu1  ;;  %v11551_v53 = vld [vmem:[#allocation59_spill] sm:$0xff]  ;;  %v11615_v47 = vld [vmem:[#allocation54_spill] sm:$0xff] }
 0x1ff   : > { %5290 = vmatmul.msk.bf16.gmra.mxu1 %vm437_vm1, %v6337_v25  ;;  %v5320_v54 = vmul.f32 -1.442695, %v1105_v61  ;;  %v4359_v21 = vmax.f32 %v11545_v50, 0.0  ;;  %v6030_v49 = vpop.eup %6029  ;;  %v5321_v43 = vmul.f32 -1.442695, %v1134_v1  ;;  %v4360_v13 = vmax.f32 %v11546_v45, 0.0 }
 0x200   : > { %v4361_v10 = vmax.f32 %v11547_v39, 0.0  ;;  %v4362_v3 = vmax.f32 %v11548_v51, 0.0  ;;  %v8680_v15 = vmul.f32 %v6030_v49, %v4117_v30  ;;  %v3693_v8 = vsel %vm3690_vm8, %v3692_v48, %v3688_v5  ;;  %5286 = vmatmul.msk.bf16.gmra.mxu0 %vm437_vm1, %v6337_v25  ;;  %v11553_v61 = vld [vmem:[#allocation60_spill] sm:$0xff]  ;;  %5294 = vmatmul.msk.bf16.gmra.mxu2 %vm437_vm1, %v6337_v25  ;;  %v11555_v30 = vld [vmem:[#allocation61_spill] sm:$0xff] }
 0x201   : > { %6033 = vpow2.f32 %v5320_v54  ;;  %v11550_v52 = vmax.f32 %v11549_v42, 0.0  ;;  %v4118_v7 = vsub.f32 1.0, %v3693_v8  ;;  %v11552_v40 = vmax.f32 %v11551_v53, 0.0  ;;  %5298 = vmatmul.msk.bf16.gmra.mxu3 %vm437_vm1, %v6337_v25  ;;  %v11559_v25 = vld [vmem:[#allocation40_spill] sm:$0xff]  ;;  %v11560_v51 = vld [vmem:[#allocation29_spill] sm:$0xff] }
 0x202   : > { %6035 = vtanh.f32 %v8473_v33  ;;  %v11554_v11 = vmax.f32 %v11553_v61, 0.0  ;;  %v6032_v5 = vpop.eup %6031  ;;  %v11556_v48 = vmax.f32 %v11555_v30, 0.0  ;;  %v1163_v50 = vadd.f32 %v1162_v63, %v6556_v44 }
 0x203   : > { %v4590_v56 = vpack.c.bf16 %v4359_v21, %v11550_v52  ;;  %v4591_v36 = vpack.c.bf16 %v4360_v13, %v11552_v40  ;;  %v1192_v33 = vadd.f32 %v1191_v37, %v6556_v44  ;;  %v1107_v21 = vadd.f32 %v1106_v19, %v6570_v55  ;;  %v11557_v13 = vld [vmem:[#allocation76_spill] sm:$0xff] }
 0x204   : > { %v4592_v1 = vpack.c.bf16 %v4361_v10, %v11554_v11  ;;  %v4593_v54 = vpack.c.bf16 %v4362_v3, %v11556_v48  ;;  %v8697_v49 = vmul.f32 %v6032_v5, %v4118_v7  ;;  %v1136_v45 = vadd.f32 %v1135_v32, %v6570_v55  ;;  %v11565_v32 = vld [vmem:[#allocation44_spill] sm:$0xff] }
 0x205   : > { %4676 = vmatpush.bf16.xpose.msrb.mxu0 %v4590_v56  ;;  %4689 = vmatpush.bf16.xpose.msrb.mxu1 %v4591_v36  ;;  %v11558_v39 = vsub.f32 1.0, %v11557_v13  ;;  %vm2020_vm9 = vweird.f32 %v11560_v51  ;;  %v1088_v3 = vadd.f32 %v8475_v31, %v11335_v22  ;;  %6037 = vpow2.f32 %v5321_v43  ;;  %v11563_v31 = vld [vmem:[#allocation89_spill] sm:$0xff] }
 0x206   : > { %4702 = vmatpush.bf16.xpose.msrb.mxu2 %v4592_v1  ;;  %4715 = vmatpush.bf16.xpose.msrb.mxu3 %v4593_v54  ;;  %v5322_v63 = vmul.f32 -1.442695, %v1163_v50  ;;  %vm2021_vm11 = vweird.f32 %v11559_v25  ;;  %6039 = vtanh.f32 %v8487_v16  ;;  %v2024_v19 = vand.u32 2147483647, %v11560_v51  ;;  %v11568_v1 = vld [vmem:[#allocation36_spill] sm:$0xff] }
 0x207   : > { %v2018_v10 = vmul.f32 %v11559_v25, %v11558_v39  ;;  %v2026_v8 = vand.u32 2147483648, %v11560_v51  ;;  %v6034_v42 = vpop.eup %6033  ;;  %6041 = vtanh.f32 %v8498_v17  ;;  %v5323_v52 = vmul.f32 -1.442695, %v1192_v33  ;;  %vm8712_vm12 = vmor %vm2020_vm9, %vm2021_vm11  ;;  %v11571_v54 = vld [vmem:[#allocation84_spill] sm:$0xff]  ;;  %v11573_v33 = vld [vmem:[#allocation41_spill] sm:$0xff] }
 0x208   : > { %v11564_v43 = vsub.f32 1.0, %v11563_v31  ;;  %vm2501_vm13 = vweird.f32 %v11565_v32  ;;  %v8720_v16 = vpop.eup %6035  ;;  %6043 = vpow2.f32 %v5322_v63  ;;  %v5352_v53 = vmul.f32 -1.442695, %v1107_v21 }
 0x209   : > { %v2019_v37 = vadd.f32 %v11559_v25, %v2018_v10  ;;  %11566 = vst [vmem:[#allocation62_spill] sm:$0xff] %v8720_v16  ;;  %v5353_v40 = vmul.f32 -1.442695, %v1136_v45  ;;  %v8725_v36 = vadd.f32 1.0, %v6034_v42  ;;  %v2027_v61 = vor.u32 1.1754944e-38, %v2026_v8 }
 0x20a   : > { %v2498_v7 = vmul.f32 %v11565_v32, %v11564_v43  ;;  %vm2500_vm14 = vweird.f32 %v11568_v1  ;;  %vm2025_vm15 = vcmp.eq.f32.partialorder %v2024_v19, 8.507059e+37  ;;  %v2504_v30 = vand.u32 2147483647, %v11568_v1 }
 0x20b   : > { %v2023_v17 = vsel %vm8712_vm12, %v11559_v25, %v2019_v37  ;;  %11567 = vst [vmem:[#allocation64_spill] sm:$0xff] %v8725_v36  ;;  %vm8729_vm2 = vmor %vm2500_vm14, %vm2501_vm13  ;;  %v2506_v48 = vand.u32 2147483648, %v11568_v1  ;;  %v11572_v50 = vsub.f32 1.0, %v11571_v54  ;;  %v6038_v45 = vpop.eup %6037  ;;  %6045 = vpow2.f32 %v5323_v52  ;;  %v11574_v25 = vld [vmem:[#allocation32_spill] sm:$0xff] }
 0x20c   : > { %v2499_v11 = vadd.f32 %v11565_v32, %v2498_v7  ;;  %v2028_v13 = vsel %vm2025_vm15, %v2027_v61, %v2023_v17  ;;  %vm2035_vm3 = vweird.f32 %v11574_v25  ;;  %v8742_v10 = vpop.eup %6039  ;;  %6047 = vpow2.f32 %v5352_v53  ;;  %v6338_v52 = vld [vmem:[%s10882_s2 + $0x18] sm:$0xff]  ;;  %v11581_v17 = vld [vmem:[#allocation91_spill] sm:$0xff] }
 0x20d   : > { %v2033_v21 = vmul.f32 %v11573_v33, %v11572_v50  ;;  %11575 = vst [vmem:[#allocation65_spill] sm:$0xff] %v8742_v10  ;;  %vm2505_vm0 = vcmp.eq.f32.partialorder %v2504_v30, 8.507059e+37  ;;  %v2507_v51 = vor.u32 1.1754944e-38, %v2506_v48  ;;  %v4007_v63 = vsub.f32 1.0, %v2028_v13  ;;  %v8744_v37 = vpop.eup %6041  ;;  %v11584_v13 = vld [vmem:[#allocation56_spill] sm:$0xff]  ;;  %v1193_v50 = vpop.f32.mrf.mxu3 }
 0x20e   : > { %v2503_v39 = vsel %vm8729_vm2, %v11565_v32, %v2499_v11  ;;  %11576 = vst [vmem:[#allocation66_spill] sm:$0xff] %v8744_v37  ;;  %vm2036_vm4 = vweird.f32 %v11573_v33  ;;  %v2039_v8 = vand.u32 2147483647, %v11574_v25  ;;  %v2041_v42 = vand.u32 2147483648, %v11574_v25  ;;  %v6044_v56 = vpop.eup %6043  ;;  %v11578_v32 = vld [vmem:[#allocation51_spill] sm:$0xff]  ;;  %v11583_v11 = vld [vmem:[#allocation45_spill] sm:$0xff] }
 0x20f   : > { %v2034_v19 = vadd.f32 %v11573_v33, %v2033_v21  ;;  %5291 = vmatmul.msk.bf16.gmra.mxu1 %vm437_vm1, %v6338_v52  ;;  %v8754_v31 = vadd.f32 1.0, %v6038_v45  ;;  %v2508_v43 = vsel %vm2505_vm0, %v2507_v51, %v2503_v39  ;;  %v4135_v7 = vmul.f32 %v11578_v32, %v4007_v63  ;;  %vm8759_vm10 = vmor %vm2035_vm3, %vm2036_vm4 }
 0x210   : > { %v11582_v61 = vsub.f32 1.0, %v11581_v17  ;;  %6049 = vtanh.f32 %v1088_v3  ;;  %v4039_v30 = vsub.f32 1.0, %v2508_v43  ;;  %v2042_v21 = vor.u32 1.1754944e-38, %v2041_v42  ;;  %5287 = vmatmul.msk.bf16.gmra.mxu0 %vm437_vm1, %v6338_v52  ;;  %5295 = vmatmul.msk.bf16.gmra.mxu2 %vm437_vm1, %v6338_v52  ;;  %v11585_v42 = vld [vmem:[#allocation37_spill] sm:$0xff] }
 0x211   : > { %11577 = vst [vmem:[#allocation58_spill] sm:$0xff] %v8754_v31  ;;  %v2038_v48 = vsel %vm8759_vm10, %v11573_v33, %v2034_v19  ;;  %6051 = vrcp.f32 %v8725_v36  ;;  %v6046_v45 = vpop.eup %6045  ;;  %vm2040_vm5 = vcmp.eq.f32.partialorder %v2039_v8, 8.507059e+37  ;;  %5299 = vmatmul.msk.bf16.gmra.mxu3 %vm437_vm1, %v6338_v52  ;;  %vm2515_vm6 = vweird.f32 %v11585_v42 }
 0x212   : > { %v2513_v1 = vmul.f32 %v11583_v11, %v11582_v61  ;;  %6053 = vpow2.f32 %v5353_v40  ;;  %v4167_v39 = vmul.f32 %v11584_v13, %v4039_v30  ;;  %v6048_v3 = vpop.eup %6047  ;;  %v2043_v63 = vsel %vm2040_vm5, %v2042_v21, %v2038_v48  ;;  %v11593_v48 = vld [vmem:[#allocation42_spill] sm:$0xff]  ;;  %v8801_v13 = vpop.f32.mrf.mxu2 }
 0x213   : > { %6055 = vrcp.f32 %v8754_v31  ;;  %v4263_v40 = vmax.f32 %v4135_v7, 0.0  ;;  %vm2516_vm7 = vweird.f32 %v11583_v11  ;;  %v8783_v8 = vadd.f32 1.0, %v6044_v56  ;;  %v11591_v56 = vld [vmem:[#allocation85_spill] sm:$0xff] }
 0x214   : > { %v2514_v25 = vadd.f32 %v11583_v11, %v2513_v1  ;;  %v4295_v19 = vmax.f32 %v4167_v39, 0.0  ;;  %vm8785_vm8 = vmor %vm2515_vm6, %vm2516_vm7  ;;  %v2519_v32 = vand.u32 2147483647, %v11585_v42  ;;  %v2521_v53 = vand.u32 2147483648, %v11585_v42  ;;  %v11596_v42 = vld [vmem:[#allocation52_spill] sm:$0xff] }
 0x215   : > { %11586 = vst [vmem:[#allocation59_spill] sm:$0xff] %v8783_v8  ;;  %v4008_v17 = vsub.f32 1.0, %v2043_v63  ;;  %v8793_v52 = vadd.f32 1.0, %v6046_v45  ;;  %v11592_v30 = vsub.f32 1.0, %v11591_v56  ;;  %v8805_v33 = vadd.f32 1.0, %v6048_v3  ;;  %v1196_v10 = vpop.f32.mrf.mxu3 }
 0x216   : > { %v8791_v61 = vpop.eup %6049  ;;  %v4558_v7 = vpack.c.bf16 %v4295_v19, %v4263_v40  ;;  %v2518_v1 = vsel %vm8785_vm8, %v11583_v11, %v2514_v25  ;;  %vm2520_vm1 = vcmp.eq.f32.partialorder %v2519_v32, 8.507059e+37  ;;  %v2522_v63 = vor.u32 1.1754944e-38, %v2521_v53  ;;  %v11597_v19 = vld [vmem:[#allocation34_spill] sm:$0xff] }
 0x217   : > { %11589 = vst [vmem:[#allocation60_spill] sm:$0xff] %v8791_v61  ;;  %v2048_v21 = vmul.f32 %v11593_v48, %v11592_v30  ;;  %v8803_v39 = vpop.eup %6051  ;;  %v4136_v45 = vmul.f32 %v11596_v42, %v4008_v17  ;;  %vm2050_vm9 = vweird.f32 %v11597_v19  ;;  %vm2051_vm11 = vweird.f32 %v11593_v48  ;;  %v11604_v42 = vld [vmem:[#allocation47_spill] sm:$0xff] }
 0x218   : > { %11590 = vst [vmem:[#allocation61_spill] sm:$0xff] %v8793_v52  ;;  %v6054_v5 = vpop.eup %6053  ;;  %4677 = vmatpush.bf16.xpose.msrb.mxu0 %v4558_v7  ;;  %v2054_v11 = vand.u32 2147483647, %v11597_v19  ;;  %6057 = vrcp.f32 %v8783_v8  ;;  %v2523_v3 = vsel %vm2520_vm1, %v2522_v63, %v2518_v1  ;;  %vm8816_vm12 = vmor %vm2050_vm9, %vm2051_vm11  ;;  %v2056_v53 = vand.u32 2147483648, %v11597_v19  ;;  %v11605_v19 = vld [vmem:[#allocation57_spill] sm:$0xff] }
 0x219   : > { %11594 = vst [vmem:[#allocation76_spill] sm:$0xff] %v8803_v39  ;;  %v2049_v40 = vadd.f32 %v11593_v48, %v2048_v21  ;;  %v8812_v25 = vpop.eup %6055  ;;  %6059 = vrcp.f32 %v8793_v52  ;;  %v4040_v7 = vsub.f32 1.0, %v2523_v3  ;;  %v8827_v30 = vadd.f32 1.0, %v6054_v5  ;;  %v11602_v21 = vld [vmem:[#allocation93_spill] sm:$0xff]  ;;  %v1109_v3 = vpop.f32.mrf.mxu0 }
 0x21a   : > { %11595 = vst [vmem:[#allocation40_spill] sm:$0xff] %v8805_v33  ;;  %6061 = vrcp.f32 %v8805_v33  ;;  %v2057_v1 = vor.u32 1.1754944e-38, %v2056_v53  ;;  %v11603_v63 = vsub.f32 1.0, %v11602_v21  ;;  %v4264_v17 = vmax.f32 %v4136_v45, 0.0  ;;  %v11609_v45 = vld [vmem:[#allocation86_spill] sm:$0xff]  ;;  %v1167_v37 = vpop.f32.mrf.mxu2 }
 0x21b   : > { %11598 = vst [vmem:[#allocation29_spill] sm:$0xff] %v8812_v25  ;;  %v2053_v56 = vsel %vm8816_vm12, %v11593_v48, %v2049_v40  ;;  %v4168_v54 = vmul.f32 %v11605_v19, %v4040_v7  ;;  %vm2055_vm13 = vcmp.eq.f32.partialorder %v2054_v11, 8.507059e+37  ;;  %vm2531_vm14 = vweird.f32 %v11604_v42  ;;  %v11606_v40 = vld [vmem:[#allocation38_spill] sm:$0xff] }
 0x21c   : > { %11601 = vst [vmem:[#allocation89_spill] sm:$0xff] %v8827_v30  ;;  %v2528_v51 = vmul.f32 %v11604_v42, %v11603_v63  ;;  %v2058_v43 = vsel %vm2055_vm13, %v2057_v1, %v2053_v56  ;;  %vm2530_vm15 = vweird.f32 %v11606_v40  ;;  %v2534_v5 = vand.u32 2147483647, %v11606_v40  ;;  %v11611_v63 = vld [vmem:[#allocation43_spill] sm:$0xff]  ;;  %v1138_v56 = vpop.f32.mrf.mxu1 }
 0x21d   : > { %v4296_v32 = vmax.f32 %v4168_v54, 0.0  ;;  %vm8837_vm2 = vmor %vm2530_vm15, %vm2531_vm14  ;;  %v2536_v21 = vand.u32 2147483648, %v11606_v40  ;;  %v4009_v7 = vsub.f32 1.0, %v2058_v43  ;;  %v11610_v11 = vsub.f32 1.0, %v11609_v45  ;;  %v11613_v54 = vld [vmem:[#allocation35_spill] sm:$0xff] }
 0x21e   : > { %v2529_v48 = vadd.f32 %v11604_v42, %v2528_v51  ;;  %v8845_v61 = vpop.eup %6057  ;;  %6063 = vrcp.f32 %v8827_v30  ;;  %vm2535_vm3 = vcmp.eq.f32.partialorder %v2534_v5, 8.507059e+37  ;;  %vm2065_vm0 = vweird.f32 %v11613_v54 }
 0x21f   : > { %v2063_v19 = vmul.f32 %v11611_v63, %v11610_v11  ;;  %11612 = vst [vmem:[#allocation44_spill] sm:$0xff] %v8845_v61  ;;  %v8852_v1 = vpop.eup %6059  ;;  %v4559_v40 = vpack.c.bf16 %v4296_v32, %v4264_v17  ;;  %v2537_v43 = vor.u32 1.1754944e-38, %v2536_v21  ;;  %v4137_v45 = vmul.f32 %v11615_v47, %v4009_v7  ;;  %v11620_v47 = vld [vmem:[#allocation39_spill] sm:$0xff] }
 0x220   : > { %v2533_v51 = vsel %vm8837_vm2, %v11604_v42, %v2529_v48  ;;  %11614 = vst [vmem:[#allocation36_spill] sm:$0xff] %v8852_v1  ;;  %v8856_v38 = vpop.eup %6061  ;;  %vm2066_vm4 = vweird.f32 %v11611_v63  ;;  %v2069_v53 = vand.u32 2147483647, %v11613_v54  ;;  %v2071_v42 = vand.u32 2147483648, %v11613_v54  ;;  %v11617_v48 = vld [vmem:[#allocation94_spill] sm:$0xff] }
 0x221   : > { %v2064_v11 = vadd.f32 %v11611_v63, %v2063_v19  ;;  %11616 = vst [vmem:[#allocation84_spill] sm:$0xff] %v8856_v38  ;;  %v11618_v5 = vsub.f32 1.0, %v11617_v48  ;;  %4690 = vmatpush.bf16.xpose.msrb.mxu1 %v4559_v40  ;;  %v2538_v17 = vsel %vm2535_vm3, %v2537_v43, %v2533_v51  ;;  %v4265_v32 = vmax.f32 %v4137_v45, 0.0  ;;  %vm2067_vm10 = vmor %vm2065_vm0, %vm2066_vm4  ;;  %v11622_v43 = vld [vmem:[#allocation63_spill] sm:$0xff] }
 0x222   : > { %vm2545_vm5 = vweird.f32 %v11620_v47  ;;  %vm2546_vm6 = vweird.f32 %v11619_v41  ;;  %v4041_v21 = vsub.f32 1.0, %v2538_v17  ;;  %vm2070_vm7 = vcmp.eq.f32.partialorder %v2069_v53, 8.507059e+37  ;;  %v1111_v53 = vpop.f32.mrf.mxu0 }
 0x223   : > { %v2543_v23 = vmul.f32 %v11619_v41, %v11618_v5  ;;  %v2068_v7 = vsel %vm2067_vm10, %v11611_v63, %v2064_v11  ;;  %v2072_v19 = vor.u32 1.1754944e-38, %v2071_v42  ;;  %v2549_v5 = vand.u32 2147483647, %v11620_v47  ;;  %vm2547_vm8 = vmor %vm2545_vm5, %vm2546_vm6 }
 0x224   : > { %v2551_v51 = vand.u32 2147483648, %v11620_v47  ;;  %v1165_v54 = vadd.f32 %v8801_v13, %v6570_v55  ;;  %v8874_v40 = vpop.eup %6063  ;;  %v4169_v45 = vmul.f32 %v11622_v43, %v4041_v21  ;;  %v1194_v63 = vadd.f32 %v1193_v50, %v6570_v55  ;;  %v1140_v14 = vpop.f32.mrf.mxu1  ;;  %v11623_v21 = vld [vmem:[#allocation55_spill] sm:$0xff] }
 0x225   : > { %v2544_v48 = vadd.f32 %v11619_v41, %v2543_v23  ;;  %11621 = vst [vmem:[#allocation41_spill] sm:$0xff] %v8874_v40  ;;  %v2073_v20 = vsel %vm2070_vm7, %v2072_v19, %v2068_v7  ;;  %v1110_v11 = vadd.f32 %v1109_v3, %v6578_v4  ;;  %vm2550_vm1 = vcmp.eq.f32.partialorder %v2549_v5, 8.507059e+37  ;;  %v1169_v43 = vpop.f32.mrf.mxu2 }
 0x226   : > { %v2552_v42 = vor.u32 1.1754944e-38, %v2551_v51  ;;  %v4010_v17 = vsub.f32 1.0, %v2073_v20  ;;  %v4297_v47 = vmax.f32 %v4169_v45, 0.0  ;;  %v5354_v59 = vmul.f32 -1.442695, %v1165_v54 }
 0x227   : > { %v2548_v23 = vsel %vm2547_vm8, %v11619_v41, %v2544_v48  ;;  %v5355_v16 = vmul.f32 -1.442695, %v1194_v63  ;;  %v1139_v13 = vadd.f32 %v1138_v56, %v6578_v4  ;;  %v5384_v19 = vmul.f32 -1.442695, %v1110_v11  ;;  %v11624_v56 = vld [vmem:[#allocation73_spill] sm:$0xff] }
 0x228   : > { %v2553_v0 = vsel %vm2550_vm1, %v2552_v42, %v2548_v23  ;;  %v4138_v7 = vmul.f32 %v11623_v21, %v4010_v17  ;;  %v1168_v50 = vadd.f32 %v1167_v37, %v6578_v4  ;;  %v4560_v3 = vpack.c.bf16 %v4297_v47, %v4265_v32  ;;  %v1198_v37 = vpop.f32.mrf.mxu3 }
 0x229   : > { %v4042_v60 = vsub.f32 1.0, %v2553_v0  ;;  %6065 = vpow2.f32 %v5354_v59  ;;  %v5385_v41 = vmul.f32 -1.442695, %v1139_v13  ;;  %v1197_v5 = vadd.f32 %v1196_v10, %v6578_v4 }
 0x22a   : > { %6067 = vpow2.f32 %v5355_v16  ;;  %v5386_v20 = vmul.f32 -1.442695, %v1168_v50  ;;  %4703 = vmatpush.bf16.xpose.msrb.mxu2 %v4560_v3  ;;  %v1112_v54 = vadd.f32 %v1111_v53, %v11382_v6  ;;  %v1141_v45 = vadd.f32 %v1140_v14, %v11382_v6  ;;  %v1114_v47 = vpop.f32.mrf.mxu0 }
 0x22b   : > { %v4170_v51 = vmul.f32 %v11624_v56, %v4042_v60  ;;  %6069 = vpow2.f32 %v5384_v19  ;;  %v4266_v63 = vmax.f32 %v4138_v7, 0.0  ;;  %v5387_v0 = vmul.f32 -1.442695, %v1197_v5 }
 0x22c   : > { %6071 = vpow2.f32 %v5385_v41  ;;  %v1170_v59 = vadd.f32 %v1169_v43, %v11382_v6  ;;  %v5416_v16 = vmul.f32 -1.442695, %v1112_v54  ;;  %v5417_v11 = vmul.f32 -1.442695, %v1141_v45  ;;  %v1143_v13 = vpop.f32.mrf.mxu1 }
 0x22d   : > { %v4298_v32 = vmax.f32 %v4170_v51, 0.0  ;;  %6073 = vpow2.f32 %v5386_v20  ;;  %v8891_v10 = vmul.f32 %v8803_v39, %v8725_v36  ;;  %v8895_v60 = vmul.f32 %v8812_v25, %v8754_v31  ;;  %v1172_v43 = vpop.f32.mrf.mxu2 }
 0x22e   : > { %6075 = vpow2.f32 %v5387_v0  ;;  %v5418_v14 = vmul.f32 -1.442695, %v1170_v59  ;;  %v8899_v23 = vmul.f32 %v8845_v61, %v8783_v8  ;;  %v8903_v42 = vmul.f32 %v8852_v1, %v8793_v52 }
 0x22f   : > { %11625 = vst [vmem:[#allocation32_spill] sm:$0xff] %v8891_v10  ;;  %v6066_v53 = vpop.eup %6065  ;;  %v4561_v17 = vpack.c.bf16 %v4298_v32, %v4266_v63  ;;  %6077 = vpow2.f32 %v5416_v16  ;;  %v8907_v7 = vmul.f32 %v8856_v38, %v8805_v33  ;;  %v8911_v19 = vmul.f32 %v8874_v40, %v8827_v30 }
 0x230   : > { %11626 = vst [vmem:[#allocation51_spill] sm:$0xff] %v8895_v60  ;;  %v6068_v21 = vpop.eup %6067  ;;  %v8913_v50 = vadd.f32 1.0, %v6066_v53  ;;  %6079 = vpow2.f32 %v5417_v11  ;;  %v1199_v5 = vadd.f32 %v1198_v37, %v11382_v6  ;;  %v1201_v16 = vpop.f32.mrf.mxu3  ;;  %v1115_v54 = vadd.f32 %v1114_v47, %v11524_v34 }
 0x231   : > { %11627 = vst [vmem:[#allocation91_spill] sm:$0xff] %v8899_v23  ;;  %v6070_v3 = vpop.eup %6069  ;;  %4716 = vmatpush.bf16.xpose.msrb.mxu3 %v4561_v17  ;;  %v8916_v20 = vadd.f32 1.0, %v6068_v21  ;;  %6081 = vpow2.f32 %v5418_v14  ;;  %v1144_v14 = vadd.f32 %v1143_v13, %v11524_v34 }
 0x232   : > { %11628 = vst [vmem:[#allocation45_spill] sm:$0xff] %v8903_v42  ;;  %v6072_v56 = vpop.eup %6071  ;;  %6083 = vrcp.f32 %v8913_v50  ;;  %v8922_v45 = vadd.f32 1.0, %v6070_v3  ;;  %v5419_v3 = vmul.f32 -1.442695, %v1199_v5  ;;  %v1202_v5 = vadd.f32 %v1201_v16, %v11524_v34  ;;  %v1116_v51 = vpop.f32.mrf.mxu0 }
 0x233   : > { %11629 = vst [vmem:[#allocation56_spill] sm:$0xff] %v8907_v7  ;;  %v6074_v63 = vpop.eup %6073  ;;  %6085 = vrcp.f32 %v8916_v20  ;;  %v8927_v32 = vadd.f32 1.0, %v6072_v56  ;;  %v1117_v16 = vadd.f32 %v1116_v51, %v11335_v22 }
 0x234   : > { %11630 = vst [vmem:[#allocation37_spill] sm:$0xff] %v8911_v19  ;;  %v6076_v37 = vpop.eup %6075  ;;  %6087 = vrcp.f32 %v8922_v45  ;;  %v8932_v53 = vadd.f32 1.0, %v6074_v63  ;;  %v3226_v59 = vand.u32 2147483648, %v8922_v45  ;;  %v1145_v41 = vpop.f32.mrf.mxu1  ;;  %v3224_v13 = vand.u32 2147483647, %v8922_v45 }
 0x235   : > { %11631 = vst [vmem:[#allocation85_spill] sm:$0xff] %v8913_v50  ;;  %v6078_v17 = vpop.eup %6077  ;;  %6089 = vrcp.f32 %v8927_v32  ;;  %v8935_v21 = vadd.f32 1.0, %v6076_v37  ;;  %v1173_v37 = vadd.f32 %v1172_v43, %v11524_v34  ;;  %v1174_v47 = vpop.f32.mrf.mxu2  ;;  %v3239_v52 = vand.u32 2147483647, %v8927_v32 }
 0x236   : > { %11632 = vst [vmem:[#allocation42_spill] sm:$0xff] %v8916_v20  ;;  %v6080_v56 = vpop.eup %6079  ;;  %6091 = vrcp.f32 %v8932_v53  ;;  %v8939_v0 = vadd.f32 1.0, %v6078_v17  ;;  %v1146_v8 = vadd.f32 %v1145_v41, %v11335_v22  ;;  %v1175_v61 = vadd.f32 %v1174_v47, %v11335_v22 }
 0x237   : > { %v6082_v11 = vpop.eup %6081  ;;  %6093 = vrcp.f32 %v8935_v21  ;;  %v8944_v63 = vadd.f32 1.0, %v6080_v56  ;;  %v8963_v56 = vor.u32 1.1754944e-38, %v3226_v59  ;;  %vm3220_vm9 = vweird.f32 %v8922_v45 }
 0x238   : > { %v8948_v48 = vpop.eup %6083  ;;  %6095 = vrcp.f32 %v8939_v0  ;;  %v8951_v17 = vadd.f32 1.0, %v6082_v11  ;;  %vm3235_vm11 = vweird.f32 %v8927_v32  ;;  %vm8997_vm13 = vcmp.eq.f32.partialorder %v3224_v13, 8.507059e+37 }
 0x239   : > { %11633 = vst [vmem:[#allocation52_spill] sm:$0xff] %v8948_v48  ;;  %v8955_v1 = vpop.eup %6085  ;;  %v8959_v43 = vmul.f32 %v8948_v48, %v8913_v50  ;;  %6097 = vrcp.f32 %v8944_v63  ;;  %v1203_v48 = vpop.f32.mrf.mxu3  ;;  %vm3250_vm15 = vweird.f32 %v8932_v53  ;;  %vm9007_vm2 = vcmp.eq.f32.partialorder %v3239_v52, 8.507059e+37 }
 0x23a   : > { %11634 = vst [vmem:[#allocation34_spill] sm:$0xff] %v8955_v1  ;;  %v8965_v42 = vpop.eup %6087  ;;  %v8969_v11 = vmul.f32 %v8955_v1, %v8916_v20  ;;  %6099 = vrcp.f32 %v8951_v17  ;;  %v3241_v20 = vand.u32 2147483648, %v8927_v32  ;;  %v1204_v23 = vadd.f32 %v1203_v48, %v11335_v22  ;;  %v1119_v25 = vpop.f32.mrf.mxu0 }
 0x23b   : > { %11635 = vst [vmem:[#allocation93_spill] sm:$0xff] %v8959_v43  ;;  %v8975_v50 = vpop.eup %6089  ;;  %v3216_v59 = vmul.f32 %v8965_v42, %v8922_v45  ;;  %6101 = vpow2.f32 %v5419_v3  ;;  %vm3221_vm12 = vweird.f32 %v8965_v42  ;;  %vm3265_vm6 = vweird.f32 %v8935_v21 }
 0x23c   : > { %11636 = vst [vmem:[#allocation47_spill] sm:$0xff] %v8969_v11  ;;  %v8982_v1 = vpop.eup %6091  ;;  %v3231_v47 = vmul.f32 %v8975_v50, %v8927_v32  ;;  %6103 = vtanh.f32 %v1115_v54  ;;  %vm3236_vm14 = vweird.f32 %v8975_v50  ;;  %vm3222_vm3 = vmor %vm3220_vm9, %vm3221_vm12  ;;  %v3254_v32 = vand.u32 2147483647, %v8932_v53 }
 0x23d   : > { %v8988_v51 = vpop.eup %6093  ;;  %v3217_v43 = vsub.f32 1.0, %v3216_v59  ;;  %v3246_v3 = vmul.f32 %v8982_v1, %v8932_v53  ;;  %6105 = vtanh.f32 %v1144_v14  ;;  %v1177_v7 = vpop.f32.mrf.mxu2  ;;  %vm3237_vm0 = vmor %vm3235_vm11, %vm3236_vm14  ;;  %vm3251_vm4 = vweird.f32 %v8982_v1 }
 0x23e   : > { %v8993_v30 = vpop.eup %6095  ;;  %v3232_v40 = vsub.f32 1.0, %v3231_v47  ;;  %v3261_v41 = vmul.f32 %v8988_v51, %v8935_v21  ;;  %6107 = vtanh.f32 %v1173_v37  ;;  %v3242_v37 = vor.u32 1.1754944e-38, %v3241_v20  ;;  %vm9062_vm10 = vmor %vm3250_vm15, %vm3251_vm4 }
 0x23f   : > { %v9003_v59 = vpop.eup %6097  ;;  %v3247_v14 = vsub.f32 1.0, %v3246_v3  ;;  %v3696_v48 = vmul.f32 %v8993_v30, %v8939_v0  ;;  %6109 = vtanh.f32 %v1202_v5  ;;  %v3218_v11 = vmul.f32 %v8965_v42, %v3217_v43  ;;  %v1148_v5 = vpop.f32.mrf.mxu1 }
 0x240   : > { %v9011_v13 = vpop.eup %6099  ;;  %v3262_v19 = vsub.f32 1.0, %v3261_v41  ;;  %v3711_v31 = vmul.f32 %v9003_v59, %v8944_v63  ;;  %6111 = vtanh.f32 %v1117_v16  ;;  %v3233_v60 = vmul.f32 %v8975_v50, %v3232_v40 }
 0x241   : > { %v6102_v3 = vpop.eup %6101  ;;  %v3697_v33 = vsub.f32 1.0, %v3696_v48  ;;  %v3726_v52 = vmul.f32 %v9011_v13, %v8951_v17  ;;  %6113 = vtanh.f32 %v1146_v8  ;;  %v3248_v38 = vmul.f32 %v8982_v1, %v3247_v14  ;;  %v1206_v45 = vpop.f32.mrf.mxu3 }
 0x242   : > { %v9019_v20 = vpop.eup %6103  ;;  %v3712_v43 = vsub.f32 1.0, %v3711_v31  ;;  %v9022_v41 = vadd.f32 1.0, %v6102_v3  ;;  %6115 = vtanh.f32 %v1175_v61  ;;  %v3263_v36 = vmul.f32 %v8988_v51, %v3262_v19 }
 0x243   : > { %11641 = vst [vmem:[#allocation57_spill] sm:$0xff] %v9019_v20  ;;  %v9024_v16 = vpop.eup %6105  ;;  %v3698_v40 = vmul.f32 %v8993_v30, %v3697_v33  ;;  %6117 = vtanh.f32 %v1204_v23  ;;  %v1120_v48 = vadd.f32 %v1119_v25, %v6710_v18  ;;  %v3727_v39 = vsub.f32 1.0, %v3726_v52  ;;  %v11825_v20 = vld [vmem:[#allocation68_spill] sm:$0xff] }
 0x244   : > { %11642 = vst [vmem:[#allocation38_spill] sm:$0xff] %v9024_v16  ;;  %v9029_v8 = vpop.eup %6107  ;;  %6119 = vrcp.f32 %v9022_v41  ;;  %v3219_v31 = vadd.f32 %v8965_v42, %v3218_v11  ;;  %v1149_v14 = vadd.f32 %v1148_v5, %v6710_v18  ;;  %v9037_v3 = vmul.f32 %v9003_v59, %v3712_v43 }
 0x245   : > { %11643 = vst [vmem:[#allocation86_spill] sm:$0xff] %v9029_v8  ;;  %v9034_v61 = vpop.eup %6109  ;;  %6121 = vtanh.f32 %v1120_v48  ;;  %v3234_v33 = vadd.f32 %v8975_v50, %v3233_v60  ;;  %v1178_v25 = vadd.f32 %v1177_v7, %v6710_v18  ;;  %v3249_v11 = vadd.f32 %v8982_v1, %v3248_v38 }
 0x246   : > { %11644 = vst [vmem:[#allocation43_spill] sm:$0xff] %v9034_v61  ;;  %v9045_v23 = vpop.eup %6111  ;;  %v3223_v19 = vsel %vm3222_vm3, %v8965_v42, %v3219_v31  ;;  %6123 = vtanh.f32 %v1149_v14  ;;  %v3256_v38 = vand.u32 2147483648, %v8932_v53  ;;  %vm3255_vm5 = vcmp.eq.f32.partialorder %v3254_v32, 8.507059e+37 }
 0x247   : > { %11645 = vst [vmem:[#allocation35_spill] sm:$0xff] %v9045_v23  ;;  %v9054_v52 = vpop.eup %6113  ;;  %v3228_v60 = vsel %vm8997_vm13, %v8963_v56, %v3223_v19  ;;  %v3238_v7 = vsel %vm3237_vm0, %v8975_v50, %v3234_v33  ;;  %v3253_v50 = vsel %vm9062_vm10, %v8982_v1, %v3249_v11  ;;  %6125 = vtanh.f32 %v1178_v25  ;;  %v1179_v11 = vpop.f32.mrf.mxu2  ;;  %v11824_v23 = vld [vmem:[#allocation127_spill] sm:$0xff] }
 0x248   : > { %11646 = vst [vmem:[#allocation54_spill] sm:$0xff] %v9054_v52  ;;  %v9068_v5 = vpop.eup %6115  ;;  %v4087_v43 = vsub.f32 1.0, %v3228_v60  ;;  %v3243_v48 = vsel %vm9007_vm2, %v3242_v37, %v3238_v7  ;;  %v3257_v31 = vor.u32 1.1754944e-38, %v3256_v38  ;;  %v1207_v14 = vadd.f32 %v1206_v45, %v6710_v18  ;;  %v1121_v37 = vpop.f32.mrf.mxu0 }
 0x249   : > { %11649 = vst [vmem:[#allocation94_spill] sm:$0xff] %v9068_v5  ;;  %v9075_v56 = vpop.eup %6117  ;;  %v4088_v54 = vsub.f32 1.0, %v3243_v48  ;;  %v3264_v53 = vadd.f32 %v8988_v51, %v3263_v36  ;;  %vm3266_vm7 = vweird.f32 %v8988_v51  ;;  %v3269_v47 = vand.u32 2147483647, %v8935_v21  ;;  %v1150_v38 = vpop.f32.mrf.mxu1 }
 0x24a   : > { %11650 = vst [vmem:[#allocation49_spill] sm:$0xff] %v9075_v56  ;;  %v9078_v33 = vpop.eup %6119  ;;  %v3258_v19 = vsel %vm3255_vm5, %v3257_v31, %v3253_v50  ;;  %vm9086_vm8 = vmor %vm3265_vm6, %vm3266_vm7  ;;  %v3271_v45 = vand.u32 2147483648, %v8935_v21  ;;  %6127 = vtanh.f32 %v1207_v14  ;;  %v3728_v60 = vmul.f32 %v9011_v13, %v3727_v39 }
 0x24b   : > { %v6122_v1 = vpop.eup %6121  ;;  %v3741_v25 = vmul.f32 %v9078_v33, %v9022_v41  ;;  %v4089_v42 = vsub.f32 1.0, %v3258_v19  ;;  %v3268_v32 = vsel %vm9086_vm8, %v8988_v51, %v3264_v53  ;;  %v1122_v56 = vadd.f32 %v1121_v37, %v6810_v2 }
 0x24c   : > { %v6124_v36 = vpop.eup %6123  ;;  %v9092_v7 = vmul.f32 %v6122_v1, %v4087_v43  ;;  %v3272_v31 = vor.u32 1.1754944e-38, %v3271_v45  ;;  %vm3270_vm1 = vcmp.eq.f32.partialorder %v3269_v47, 8.507059e+37  ;;  %v3699_v39 = vadd.f32 %v8993_v30, %v3698_v40 }
 0x24d   : > { %v3742_v48 = vsub.f32 1.0, %v3741_v25  ;;  %v9097_v50 = vmul.f32 %v6124_v36, %v4088_v54  ;;  %v6126_v61 = vpop.eup %6125  ;;  %vm3701_vm9 = vweird.f32 %v8993_v30  ;;  %vm3700_vm11 = vweird.f32 %v8939_v0 }
 0x24e   : > { %v9104_v14 = vmul.f32 %v6126_v61, %v4089_v42  ;;  %v3273_v51 = vsel %vm3270_vm1, %v3272_v31, %v3268_v32  ;;  %vm9108_vm12 = vmor %vm3700_vm11, %vm3701_vm9  ;;  %v3704_v47 = vand.u32 2147483647, %v8939_v0  ;;  %v3706_v40 = vand.u32 2147483648, %v8939_v0 }
 0x24f   : > { %v3743_v43 = vmul.f32 %v9078_v33, %v3742_v48  ;;  %v4090_v53 = vsub.f32 1.0, %v3273_v51  ;;  %v3703_v61 = vsel %vm9108_vm12, %v8993_v30, %v3699_v39  ;;  %6129 = vtanh.f32 %v1122_v56  ;;  %v1208_v48 = vpop.f32.mrf.mxu3 }
 0x250   : > { %v6128_v1 = vpop.eup %6127  ;;  %v1151_v25 = vadd.f32 %v1150_v38, %v6810_v2  ;;  %v3714_v19 = vadd.f32 %v9003_v59, %v9037_v3  ;;  %vm3705_vm13 = vcmp.eq.f32.partialorder %v3704_v47, 8.507059e+37  ;;  %v3707_v36 = vor.u32 1.1754944e-38, %v3706_v40  ;;  %v1220_v37 = vpop.f32.mrf.mxu0 }
 0x251   : > { %vm3715_vm14 = vweird.f32 %v8944_v63  ;;  %vm3716_vm15 = vweird.f32 %v9003_v59  ;;  %v3719_v0 = vand.u32 2147483647, %v8944_v63  ;;  %v3721_v42 = vand.u32 2147483648, %v8944_v63  ;;  %v1249_v47 = vpop.f32.mrf.mxu1 }
 0x252   : > { %6131 = vtanh.f32 %v1151_v25  ;;  %v9125_v30 = vmul.f32 %v6128_v1, %v4090_v53  ;;  %v3708_v56 = vsel %vm3705_vm13, %v3707_v36, %v3703_v61  ;;  %vm9127_vm2 = vmor %vm3715_vm14, %vm3716_vm15  ;;  %v1180_v3 = vadd.f32 %v1179_v11, %v6810_v2 }
 0x253   : > { %v3729_v38 = vadd.f32 %v9011_v13, %v3728_v60  ;;  %v4119_v31 = vsub.f32 1.0, %v3708_v56  ;;  %v3718_v39 = vsel %vm9127_vm2, %v9003_v59, %v3714_v19  ;;  %vm3720_vm3 = vcmp.eq.f32.partialorder %v3719_v0, 8.507059e+37  ;;  %v11665_v56 = vld [vmem:[#allocation105_spill] sm:$0xff] }
 0x254   : > { %v3722_v63 = vor.u32 1.1754944e-38, %v3721_v42  ;;  %vm3730_vm0 = vweird.f32 %v8951_v17  ;;  %vm3731_vm4 = vweird.f32 %v9011_v13  ;;  %v3734_v51 = vand.u32 2147483647, %v8951_v17 }
 0x255   : > { %v3736_v53 = vand.u32 2147483648, %v8951_v17  ;;  %v6130_v60 = vpop.eup %6129  ;;  %vm9140_vm10 = vmor %vm3730_vm0, %vm3731_vm4  ;;  %6133 = vtanh.f32 %v1180_v3  ;;  %v1209_v59 = vadd.f32 %v1208_v48, %v6810_v2  ;;  %v3744_v61 = vadd.f32 %v9078_v33, %v3743_v43  ;;  %v11675_v17 = vld [vmem:[#allocation107_spill] sm:$0xff] }
 0x256   : > { %v3723_v40 = vsel %vm3720_vm3, %v3722_v63, %v3718_v39  ;;  %v9153_v25 = vmul.f32 %v6130_v60, %v4119_v31  ;;  %v3733_v11 = vsel %vm9140_vm10, %v9011_v13, %v3729_v38  ;;  %vm3745_vm5 = vweird.f32 %v9022_v41  ;;  %v9170_v13 = vld [vmem:[%s9150_s17] sm:$0xff] }
 0x257   : > { %v4120_v19 = vsub.f32 1.0, %v3723_v40  ;;  %v3737_v0 = vor.u32 1.1754944e-38, %v3736_v53  ;;  %vm3746_vm6 = vweird.f32 %v9078_v33  ;;  %v3749_v43 = vand.u32 2147483647, %v9022_v41 }
 0x258   : > { %v6132_v36 = vpop.eup %6131  ;;  %vm3735_vm7 = vcmp.eq.f32.partialorder %v3734_v51, 8.507059e+37  ;;  %vm9163_vm8 = vmor %vm3745_vm5, %vm3746_vm6  ;;  %v3751_v32 = vand.u32 2147483648, %v9022_v41  ;;  %v1221_v3 = vadd.f32 %v1220_v37, %v6556_v44  ;;  %6135 = vtanh.f32 %v1209_v59 }
 0x259   : > { %v9161_v42 = vmul.f32 %v6132_v36, %v4120_v19  ;;  %v3738_v38 = vsel %vm3735_vm7, %v3737_v0, %v3733_v11  ;;  %v3748_v48 = vsel %vm9163_vm8, %v9078_v33, %v3744_v61  ;;  %v1250_v31 = vadd.f32 %v1249_v47, %v6556_v44  ;;  %v1278_v61 = vpop.f32.mrf.mxu2  ;;  %v1307_v11 = vpop.f32.mrf.mxu3  ;;  %v11664_v0 = vld [vmem:[#allocation103_spill] sm:$0xff] }
 0x25a   : > { %vm3750_vm1 = vcmp.eq.f32.partialorder %v3749_v43, 8.507059e+37  ;;  %v3752_v39 = vor.u32 1.1754944e-38, %v3751_v32  ;;  %v5324_v63 = vmul.f32 -1.442695, %v1221_v3  ;;  %v4391_v51 = vlaneseq  ;;  %v1222_v3 = vpop.f32.mrf.mxu0 }
 0x25b   : > { %v6134_v53 = vpop.eup %6133  ;;  %v4121_v60 = vsub.f32 1.0, %v3738_v38  ;;  %v5325_v40 = vmul.f32 -1.442695, %v1250_v31  ;;  %v4393_v41 = vperm.slane %v9170_v13, 0  ;;  %v4394_v37 = vperm.slane %v9170_v13, 1  ;;  %v1251_v38 = vpop.f32.mrf.mxu1 }
 0x25c   : > { %v9178_v1 = vsel %vm3750_vm1, %v3752_v39, %v3748_v48  ;;  %6137 = vpow2.f32 %v5324_v63  ;;  %v9180_v19 = vshrl.u32 %v4391_v51, 7  ;;  %v4395_v47 = vperm.slane %v9170_v13, 2  ;;  %v11670_v51 = vld [vmem:[#allocation106_spill] sm:$0xff] }
 0x25d   : > { %v9182_v33 = vmul.f32 %v6134_v53, %v4121_v60  ;;  %6139 = vpow2.f32 %v5325_v40  ;;  %v4396_v59 = vperm.slane %v9170_v13, 3  ;;  %v4363_v43 = vmax.f32 %v11664_v0, 0.0  ;;  %v11671_v40 = vld [vmem:[#allocation99_spill] sm:$0xff] }
 0x25e   : > { %11661 = vst [vmem:[#allocation39_spill] sm:$0xff] %v9180_v19  ;;  %vm4425_vm9 = vcmp.eq.s32.totalorder %v9180_v19, %v4393_v41  ;;  %vm9188_vm11 = vcmp.eq.s32.totalorder %v9180_v19, %v4394_v37  ;;  %v4364_v32 = vmax.f32 %v11665_v56, 0.0  ;;  %v9194_v48 = vpop.eup %6135  ;;  %v4122_v31 = vsub.f32 1.0, %v9178_v1 }
 0x25f   : > { %vm5460_vm12 = vmpackc.low %vm4425_vm9, %vm4425_vm9  ;;  %vm9198_vm13 = vcmp.eq.s32.totalorder %v9180_v19, %v4395_v47  ;;  %vm9203_vm14 = vcmp.eq.s32.totalorder %v9180_v19, %v4396_v59  ;;  %v4365_v53 = vmax.f32 %v11670_v51, 0.0  ;;  %v11124_v60 = vmov 1.0|1.0   ;;  %v11673_v47 = vld [vmem:[#allocation100_spill] sm:$0xff]  ;;  %v11676_v51 = vld [vmem:[#allocation101_spill] sm:$0xff] }
 0x260   : > { %5461 = vmatmul.msk.bf16.vlgmr.msra.gmra.mxu0 %vm5460_vm12, %v11124_v60  ;;  %vm5462_vm15 = vmpackc.low %vm9188_vm11, %vm9188_vm11  ;;  %v11672_v41 = vmax.f32 %v11671_v40, 0.0  ;;  %v11674_v0 = vmax.f32 %v11673_v47, 0.0  ;;  %v4366_v59 = vmax.f32 %v11675_v17, 0.0  ;;  %v1279_v45 = vadd.f32 %v1278_v61, %v6556_v44  ;;  %v11678_v17 = vld [vmem:[#allocation102_spill] sm:$0xff]  ;;  %v11680_v47 = vld [vmem:[#allocation24_spill] sm:$0xff] }
 0x261   : > { %5463 = vmatmul.msk.bf16.vlgmr.msra.gmra.mxu1 %vm5462_vm15, %v11124_v60  ;;  %vm5464_vm2 = vmpackc.low %vm9198_vm13, %vm9198_vm13  ;;  %v11677_v36 = vmax.f32 %v11676_v51, 0.0  ;;  %v1308_v21 = vadd.f32 %v1307_v11, %v6556_v44  ;;  %v1252_v40 = vadd.f32 %v1251_v38, %v6570_v55  ;;  %v11679_v61 = vmax.f32 %v11678_v17, 0.0  ;;  %v11683_v51 = vld [vmem:[#allocation69_spill] sm:$0xff] }
 0x262   : > { %v4594_v37 = vpack.c.bf16 %v4363_v43, %v11672_v41  ;;  %v4595_v56 = vpack.c.bf16 %v4364_v32, %v11674_v0  ;;  %v1223_v43 = vadd.f32 %v1222_v3, %v6570_v55  ;;  %v6138_v32 = vpop.eup %6137  ;;  %5465 = vmatmul.msk.bf16.vlgmr.msra.gmra.mxu2 %vm5464_vm2, %v11124_v60  ;;  %vm5466_vm3 = vmpackc.low %vm9203_vm14, %vm9203_vm14  ;;  %v5326_v41 = vmul.f32 -1.442695, %v1279_v45  ;;  %v11682_v0 = vld [vmem:[#allocation78_spill] sm:$0xff] }
 0x263   : > { %v4596_v54 = vpack.c.bf16 %v4365_v53, %v11677_v36  ;;  %v4597_v39 = vpack.c.bf16 %v4366_v59, %v11679_v61  ;;  %v11681_v53 = vsub.f32 1.0, %v11680_v47  ;;  %vm2080_vm0 = vweird.f32 %v11683_v51  ;;  %v6140_v3 = vpop.eup %6139  ;;  %5467 = vmatmul.msk.bf16.vlgmr.msra.gmra.mxu3 %vm5466_vm3, %v11124_v60 }
 0x264   : > { %4728 = vmatpush.bf16.xpose.msra.mxu0 %v4594_v37  ;;  %v9237_v38 = vadd.f32 1.0, %v6138_v32  ;;  %4741 = vmatpush.bf16.xpose.msra.mxu1 %v4595_v56  ;;  %v5327_v63 = vmul.f32 -1.442695, %v1308_v21  ;;  %v5356_v36 = vmul.f32 -1.442695, %v1223_v43  ;;  %vm2081_vm4 = vweird.f32 %v11682_v0  ;;  %v11688_v43 = vld [vmem:[#allocation119_spill] sm:$0xff] }
 0x265   : > { %v2078_v11 = vmul.f32 %v11682_v0, %v11681_v53  ;;  %v9241_v37 = vadd.f32 1.0, %v6140_v3  ;;  %4754 = vmatpush.bf16.xpose.msra.mxu2 %v4596_v54  ;;  %4767 = vmatpush.bf16.xpose.msra.mxu3 %v4597_v39  ;;  %6141 = vpow2.f32 %v5326_v41  ;;  %v5357_v45 = vmul.f32 -1.442695, %v1252_v40  ;;  %vm9247_vm10 = vmor %vm2080_vm0, %vm2081_vm4  ;;  %v11690_v54 = vld [vmem:[#allocation87_spill] sm:$0xff]  ;;  %v11702_v53 = vld [vmem:[#allocation20_spill] sm:$0xff] }
 0x266   : > { %11684 = vst [vmem:[#allocation63_spill] sm:$0xff] %v9237_v38  ;;  %6143 = vrcp.f32 %v9237_v38  ;;  %v2084_v21 = vand.u32 2147483647, %v11683_v51  ;;  %v2086_v56 = vand.u32 2147483648, %v11683_v51  ;;  %v11689_v17 = vsub.f32 1.0, %v11688_v43  ;;  %v11691_v39 = vld [vmem:[#allocation75_spill] sm:$0xff] }
 0x267   : > { %11685 = vst [vmem:[#allocation55_spill] sm:$0xff] %v9241_v37  ;;  %v2079_v59 = vadd.f32 %v11682_v0, %v2078_v11  ;;  %6145 = vrcp.f32 %v9241_v37  ;;  %vm2560_vm5 = vweird.f32 %v11691_v39  ;;  %vm2561_vm6 = vweird.f32 %v11690_v54  ;;  %v11694_v3 = vld [vmem:[#allocation111_spill] sm:$0xff] }
 0x268   : > { %v2558_v61 = vmul.f32 %v11690_v54, %v11689_v17  ;;  %6147 = vpow2.f32 %v5327_v63  ;;  %vm2085_vm7 = vcmp.eq.f32.partialorder %v2084_v21, 8.507059e+37  ;;  %v2087_v41 = vor.u32 1.1754944e-38, %v2086_v56  ;;  %vm9263_vm8 = vmor %vm2560_vm5, %vm2561_vm6  ;;  %v11697_v21 = vld [vmem:[#allocation71_spill] sm:$0xff] }
 0x269   : > { %v2083_v40 = vsel %vm9247_vm10, %v11682_v0, %v2079_v59  ;;  %6149 = vpow2.f32 %v5356_v36  ;;  %v2564_v11 = vand.u32 2147483647, %v11691_v39  ;;  %v2566_v51 = vand.u32 2147483648, %v11691_v39  ;;  %v11696_v59 = vld [vmem:[#allocation80_spill] sm:$0xff] }
 0x26a   : > { %v2559_v47 = vadd.f32 %v11690_v54, %v2558_v61  ;;  %v11695_v0 = vsub.f32 1.0, %v11694_v3  ;;  %6151 = vpow2.f32 %v5357_v45  ;;  %v2088_v43 = vsel %vm2085_vm7, %v2087_v41, %v2083_v40 }
 0x26b   : > { %vm2095_vm1 = vweird.f32 %v11697_v21  ;;  %v6142_v36 = vpop.eup %6141  ;;  %vm2565_vm9 = vcmp.eq.f32.partialorder %v2564_v11, 8.507059e+37  ;;  %v2567_v56 = vor.u32 1.1754944e-38, %v2566_v51  ;;  %v4011_v17 = vsub.f32 1.0, %v2088_v43  ;;  %v11703_v51 = vld [vmem:[#allocation46_spill] sm:$0xff] }
 0x26c   : > { %v2093_v32 = vmul.f32 %v11696_v59, %v11695_v0  ;;  %v2563_v63 = vsel %vm9263_vm8, %v11690_v54, %v2559_v47  ;;  %v9277_v60 = vpop.eup %6143  ;;  %v9279_v39 = vadd.f32 1.0, %v6142_v36  ;;  %vm2096_vm11 = vweird.f32 %v11696_v59  ;;  %v11705_v0 = vld [vmem:[#allocation88_spill] sm:$0xff] }
 0x26d   : > { %11698 = vst [vmem:[#allocation73_spill] sm:$0xff] %v9277_v60  ;;  %v2099_v45 = vand.u32 2147483647, %v11697_v21  ;;  %v2101_v40 = vand.u32 2147483648, %v11697_v21  ;;  %v9284_v41 = vpop.eup %6145  ;;  %v9288_v54 = vmul.f32 %v9277_v60, %v9237_v38  ;;  %v2568_v47 = vsel %vm2565_vm9, %v2567_v56, %v2563_v63  ;;  %vm9306_vm12 = vmor %vm2095_vm1, %vm2096_vm11 }
 0x26e   : > { %v2094_v61 = vadd.f32 %v11696_v59, %v2093_v32  ;;  %11699 = vst [vmem:[#allocation103_spill] sm:$0xff] %v9279_v39  ;;  %v4139_v11 = vmul.f32 %v11702_v53, %v4011_v17  ;;  %v11704_v3 = vsub.f32 1.0, %v11703_v51  ;;  %v6148_v43 = vpop.eup %6147  ;;  %v9297_v36 = vmul.f32 %v9194_v48, %v4122_v31 }
 0x26f   : > { %11700 = vst [vmem:[#allocation105_spill] sm:$0xff] %v9284_v41  ;;  %v9301_v44 = vmul.f32 %v9284_v41, %v9241_v37  ;;  %6153 = vrcp.f32 %v9279_v39  ;;  %v4043_v38 = vsub.f32 1.0, %v2568_v47  ;;  %v6150_v56 = vpop.eup %6149  ;;  %v9311_v1 = vadd.f32 1.0, %v6148_v43  ;;  %v11711_v47 = vld [vmem:[#allocation97_spill] sm:$0xff] }
 0x270   : > { %11701 = vst [vmem:[#allocation106_spill] sm:$0xff] %v9288_v54  ;;  %v2573_v32 = vmul.f32 %v11705_v0, %v11704_v3  ;;  %v4267_v48 = vmax.f32 %v4139_v11, 0.0  ;;  %v2098_v31 = vsel %vm9306_vm12, %v11696_v59, %v2094_v61  ;;  %v6152_v53 = vpop.eup %6151  ;;  %v9316_v51 = vadd.f32 1.0, %v6150_v56  ;;  %v11713_v43 = vld [vmem:[#allocation77_spill] sm:$0xff] }
 0x271   : > { %11706 = vst [vmem:[#allocation99_spill] sm:$0xff] %v9301_v44  ;;  %v4171_v3 = vmul.f32 %v11711_v47, %v4043_v38  ;;  %vm2100_vm13 = vcmp.eq.f32.partialorder %v2099_v45, 8.507059e+37  ;;  %v2102_v21 = vor.u32 1.1754944e-38, %v2101_v40  ;;  %6155 = vrcp.f32 %v9311_v1  ;;  %v11719_v47 = vld [vmem:[#allocation81_spill] sm:$0xff]  ;;  %v11742_v44 = vld [vmem:[#allocation95_spill] sm:$0xff] }
 0x272   : > { %11709 = vst [vmem:[#allocation100_spill] sm:$0xff] %v9311_v1  ;;  %v9320_v37 = vadd.f32 1.0, %v6152_v53  ;;  %v2574_v17 = vadd.f32 %v11705_v0, %v2573_v32  ;;  %vm2575_vm14 = vweird.f32 %v11713_v43  ;;  %6157 = vrcp.f32 %v9316_v51 }
 0x273   : > { %11710 = vst [vmem:[#allocation107_spill] sm:$0xff] %v9316_v51  ;;  %v4299_v11 = vmax.f32 %v4171_v3, 0.0  ;;  %v2103_v63 = vsel %vm2100_vm13, %v2102_v21, %v2098_v31  ;;  %vm2576_vm15 = vweird.f32 %v11705_v0  ;;  %v2579_v59 = vand.u32 2147483647, %v11713_v43  ;;  %v11717_v31 = vld [vmem:[#allocation113_spill] sm:$0xff]  ;;  %v11720_v21 = vld [vmem:[#allocation72_spill] sm:$0xff] }
 0x274   : > { %11712 = vst [vmem:[#allocation101_spill] sm:$0xff] %v9320_v37  ;;  %6159 = vrcp.f32 %v9320_v37  ;;  %vm9327_vm2 = vmor %vm2575_vm14, %vm2576_vm15  ;;  %v2581_v61 = vand.u32 2147483648, %v11713_v43  ;;  %v4012_v45 = vsub.f32 1.0, %v2103_v63  ;;  %v11718_v53 = vsub.f32 1.0, %v11717_v31  ;;  %v11722_v63 = vld [vmem:[#allocation53_spill] sm:$0xff] }
 0x275   : > { %v9333_v40 = vpop.eup %6153  ;;  %v4562_v32 = vpack.c.bf16 %v4299_v11, %v4267_v48  ;;  %v2578_v56 = vsel %vm9327_vm2, %v11705_v0, %v2574_v17  ;;  %vm2110_vm3 = vweird.f32 %v11720_v21  ;;  %vm2580_vm0 = vcmp.eq.f32.partialorder %v2579_v59, 8.507059e+37 }
 0x276   : > { %11716 = vst [vmem:[#allocation102_spill] sm:$0xff] %v9333_v40  ;;  %v2108_v3 = vmul.f32 %v11719_v47, %v11718_v53  ;;  %v9344_v41 = vmul.f32 %v9333_v40, %v9279_v39  ;;  %v2582_v43 = vor.u32 1.1754944e-38, %v2581_v61  ;;  %v4140_v60 = vmul.f32 %v11722_v63, %v4012_v45  ;;  %v11726_v61 = vld [vmem:[#allocation122_spill] sm:$0xff] }
 0x277   : > { %4729 = vmatpush.bf16.xpose.msra.mxu0 %v4562_v32  ;;  %vm2111_vm4 = vweird.f32 %v11719_v47  ;;  %v2114_v0 = vand.u32 2147483647, %v11720_v21  ;;  %v2116_v17 = vand.u32 2147483648, %v11720_v21  ;;  %v9351_v11 = vpop.eup %6155  ;;  %v11727_v45 = vsub.f32 1.0, %v11726_v61  ;;  %v11728_v32 = vld [vmem:[#allocation90_spill] sm:$0xff] }
 0x278   : > { %11721 = vst [vmem:[#allocation24_spill] sm:$0xff] %v9344_v41  ;;  %v2109_v48 = vadd.f32 %v11719_v47, %v2108_v3  ;;  %v2583_v53 = vsel %vm2580_vm0, %v2582_v43, %v2578_v56  ;;  %vm9355_vm10 = vmor %vm2110_vm3, %vm2111_vm4  ;;  %v9362_v63 = vpop.eup %6157  ;;  %v9366_v21 = vmul.f32 %v9351_v11, %v9311_v1  ;;  %v4268_v40 = vmax.f32 %v4140_v60, 0.0  ;;  %v11733_v1 = vld [vmem:[#allocation98_spill] sm:$0xff] }
 0x279   : > { %11723 = vst [vmem:[#allocation78_spill] sm:$0xff] %v9351_v11  ;;  %v2588_v3 = vmul.f32 %v11728_v32, %v11727_v45  ;;  %v4044_v39 = vsub.f32 1.0, %v2583_v53  ;;  %v9375_v31 = vmul.f32 %v9362_v63, %v9316_v51  ;;  %vm2115_vm5 = vcmp.eq.f32.partialorder %v2114_v0, 8.507059e+37  ;;  %v11734_v53 = vld [vmem:[#allocation79_spill] sm:$0xff] }
 0x27a   : > { %11729 = vst [vmem:[#allocation69_spill] sm:$0xff] %v9362_v63  ;;  %v2113_v56 = vsel %vm9355_vm10, %v11719_v47, %v2109_v48  ;;  %v9371_v43 = vpop.eup %6159  ;;  %v2117_v61 = vor.u32 1.1754944e-38, %v2116_v17  ;;  %vm2590_vm6 = vweird.f32 %v11734_v53  ;;  %vm2591_vm7 = vweird.f32 %v11728_v32 }
 0x27b   : > { %11730 = vst [vmem:[#allocation119_spill] sm:$0xff] %v9366_v21  ;;  %v2589_v45 = vadd.f32 %v11728_v32, %v2588_v3  ;;  %v4172_v11 = vmul.f32 %v11733_v1, %v4044_v39  ;;  %v9384_v60 = vmul.f32 %v9371_v43, %v9320_v37  ;;  %vm9386_vm8 = vmor %vm2590_vm6, %vm2591_vm7  ;;  %v2594_v0 = vand.u32 2147483647, %v11734_v53  ;;  %v11738_v21 = vld [vmem:[#allocation115_spill] sm:$0xff]  ;;  %v11741_v37 = vld [vmem:[#allocation74_spill] sm:$0xff] }
 0x27c   : > { %11731 = vst [vmem:[#allocation87_spill] sm:$0xff] %v9371_v43  ;;  %v2118_v47 = vsel %vm2115_vm5, %v2117_v61, %v2113_v56  ;;  %v2596_v17 = vand.u32 2147483648, %v11734_v53  ;;  %v11739_v56 = vsub.f32 1.0, %v11738_v21  ;;  %v11740_v61 = vld [vmem:[#allocation83_spill] sm:$0xff]  ;;  %vm2125_vm9 = vweird.f32 %v11741_v37 }
 0x27d   : > { %11732 = vst [vmem:[#allocation75_spill] sm:$0xff] %v9375_v31  ;;  %v4300_v39 = vmax.f32 %v4172_v11, 0.0  ;;  %v2593_v1 = vsel %vm9386_vm8, %v11728_v32, %v2589_v45  ;;  %v4013_v3 = vsub.f32 1.0, %v2118_v47  ;;  %vm2595_vm1 = vcmp.eq.f32.partialorder %v2594_v0, 8.507059e+37  ;;  %v11743_v45 = vld [vmem:[#allocation123_spill] sm:$0xff]  ;;  %v11745_v0 = vld [vmem:[#allocation92_spill] sm:$0xff] }
 0x27e   : > { %11735 = vst [vmem:[#allocation111_spill] sm:$0xff] %v9384_v60  ;;  %v2597_v38 = vor.u32 1.1754944e-38, %v2596_v17  ;;  %v2123_v41 = vmul.f32 %v11740_v61, %v11739_v56  ;;  %vm2126_vm11 = vweird.f32 %v11740_v61  ;;  %v2129_v11 = vand.u32 2147483647, %v11741_v37  ;;  %v1280_v17 = vpop.f32.mrf.mxu2  ;;  %v1309_v56 = vpop.f32.mrf.mxu3 }
 0x27f   : > { %v4563_v43 = vpack.c.bf16 %v4300_v39, %v4268_v40  ;;  %v4141_v51 = vmul.f32 %v11742_v44, %v4013_v3  ;;  %v2131_v32 = vand.u32 2147483648, %v11741_v37  ;;  %v11744_v47 = vsub.f32 1.0, %v11743_v45  ;;  %vm2127_vm12 = vmor %vm2125_vm9, %vm2126_vm11  ;;  %v11746_v44 = vld [vmem:[#allocation82_spill] sm:$0xff]  ;;  %v1225_v39 = vpop.f32.mrf.mxu0  ;;  %v1254_v37 = vpop.f32.mrf.mxu1  ;;  %v11747_v3 = vld [vmem:[#allocation104_spill] sm:$0xff] }
 0x280   : > { %v2598_v53 = vsel %vm2595_vm1, %v2597_v38, %v2593_v1  ;;  %v2124_v48 = vadd.f32 %v11740_v61, %v2123_v41  ;;  %vm2130_vm13 = vcmp.eq.f32.partialorder %v2129_v11, 8.507059e+37  ;;  %vm2605_vm14 = vweird.f32 %v11746_v44 }
 0x281   : > { %v2603_v21 = vmul.f32 %v11745_v0, %v11744_v47  ;;  %4742 = vmatpush.bf16.xpose.msra.mxu1 %v4563_v43  ;;  %v4045_v59 = vsub.f32 1.0, %v2598_v53  ;;  %v4269_v40 = vmax.f32 %v4141_v51, 0.0  ;;  %v2132_v1 = vor.u32 1.1754944e-38, %v2131_v32 }
 0x282   : > { %v2128_v38 = vsel %vm2127_vm12, %v11740_v61, %v2124_v48  ;;  %vm2606_vm15 = vweird.f32 %v11745_v0  ;;  %v2609_v51 = vand.u32 2147483647, %v11746_v44  ;;  %v2611_v43 = vand.u32 2147483648, %v11746_v44 }
 0x283   : > { %v2604_v41 = vadd.f32 %v11745_v0, %v2603_v21  ;;  %v4173_v45 = vmul.f32 %v11747_v3, %v4045_v59  ;;  %vm9413_vm2 = vmor %vm2605_vm14, %vm2606_vm15  ;;  %v1281_v11 = vadd.f32 %v1280_v17, %v6570_v55  ;;  %v2133_v53 = vsel %vm2130_vm13, %v2132_v1, %v2128_v38  ;;  %v11750_v38 = vld [vmem:[#allocation96_spill] sm:$0xff] }
 0x284   : > { %v1310_v48 = vadd.f32 %v1309_v56, %v6570_v55  ;;  %v1226_v32 = vadd.f32 %v1225_v39, %v6578_v4  ;;  %vm2610_vm3 = vcmp.eq.f32.partialorder %v2609_v51, 8.507059e+37  ;;  %v2612_v21 = vor.u32 1.1754944e-38, %v2611_v43  ;;  %v11751_v51 = vld [vmem:[#allocation117_spill] sm:$0xff] }
 0x285   : > { %v2608_v61 = vsel %vm9413_vm2, %v11745_v0, %v2604_v41  ;;  %v4301_v59 = vmax.f32 %v4173_v45, 0.0  ;;  %v4014_v3 = vsub.f32 1.0, %v2133_v53  ;;  %v5358_v63 = vmul.f32 -1.442695, %v1281_v11 }
 0x286   : > { %v5359_v31 = vmul.f32 -1.442695, %v1310_v48  ;;  %v5388_v54 = vmul.f32 -1.442695, %v1226_v32  ;;  %v1255_v44 = vadd.f32 %v1254_v37, %v6578_v4  ;;  %v2613_v17 = vsel %vm2610_vm3, %v2612_v21, %v2608_v61  ;;  %v1283_v43 = vpop.f32.mrf.mxu2 }
 0x287   : > { %v4564_v5 = vpack.c.bf16 %v4301_v59, %v4269_v40  ;;  %v4142_v1 = vmul.f32 %v11750_v38, %v4014_v3  ;;  %v4397_v47 = vperm.slane %v9170_v13, 4  ;;  %v4046_v0 = vsub.f32 1.0, %v2613_v17  ;;  %v1227_v53 = vpop.f32.mrf.mxu0  ;;  %v1256_v48 = vpop.f32.mrf.mxu1 }
 0x288   : > { %6161 = vpow2.f32 %v5358_v63  ;;  %v5389_v56 = vmul.f32 -1.442695, %v1255_v44  ;;  %v4398_v39 = vperm.slane %v9170_v13, 5  ;;  %v4399_v45 = vperm.slane %v9170_v13, 6  ;;  %v1312_v63 = vpop.f32.mrf.mxu3 }
 0x289   : > { %4755 = vmatpush.bf16.xpose.msra.mxu2 %v4564_v5  ;;  %v4270_v41 = vmax.f32 %v4142_v1, 0.0  ;;  %6163 = vpow2.f32 %v5359_v31  ;;  %vm4429_vm0 = vcmp.eq.s32.totalorder %v9180_v19, %v4397_v47  ;;  %v4174_v37 = vmul.f32 %v11751_v51, %v4046_v0  ;;  %v11757_v1 = vld [vmem:[#allocation134_spill] sm:$0xff] }
 0x28a   : > { %6165 = vpow2.f32 %v5388_v54  ;;  %vm5468_vm4 = vmpackc.low %vm4429_vm0, %vm4429_vm0  ;;  %vm4430_vm10 = vcmp.eq.s32.totalorder %v9180_v19, %v4398_v39  ;;  %v4400_v40 = vperm.slane %v9170_v13, 7  ;;  %v11752_v11 = vmov 1.0|1.0  }
 0x28b   : > { %6167 = vpow2.f32 %v5389_v56  ;;  %5469 = vmatmul.msk.bf16.vlgmr.msrb.gmra.mxu0 %vm5468_vm4, %v11752_v11  ;;  %vm5470_vm5 = vmpackc.low %vm4430_vm10, %vm4430_vm10  ;;  %vm4431_vm6 = vcmp.eq.s32.totalorder %v9180_v19, %v4399_v45  ;;  %v4367_v5 = vmax.f32 %v8111_v58, 0.0  ;;  %v4368_v31 = vmax.f32 %v8137_v35, 0.0 }
 0x28c   : > { %v4302_v61 = vmax.f32 %v4174_v37, 0.0  ;;  %5471 = vmatmul.msk.bf16.vlgmr.msrb.gmra.mxu1 %vm5470_vm5, %v11752_v11  ;;  %vm5472_vm7 = vmpackc.low %vm4431_vm6, %vm4431_vm6  ;;  %vm4432_vm8 = vcmp.eq.s32.totalorder %v9180_v19, %v4400_v40  ;;  %v4369_v13 = vmax.f32 %v8160_v24, 0.0  ;;  %v4370_v54 = vmax.f32 %v8177_v46, 0.0  ;;  %v11755_v24 = vld [vmem:[#allocation133_spill] sm:$0xff] }
 0x28d   : > { %5473 = vmatmul.msk.bf16.vlgmr.msrb.gmra.mxu2 %vm5472_vm7, %v11752_v11  ;;  %vm5474_vm1 = vmpackc.low %vm4432_vm8, %vm4432_vm8  ;;  %v11753_v32 = vmax.f32 %v8053_v28, 0.0  ;;  %v11754_v35 = vmax.f32 %v8066_v26, 0.0  ;;  %v1284_v21 = vadd.f32 %v1283_v43, %v6578_v4  ;;  %v1313_v3 = vadd.f32 %v1312_v63, %v6578_v4  ;;  %v11761_v43 = vld [vmem:[#allocation128_spill] sm:$0xff] }
 0x28e   : > { %v6162_v44 = vpop.eup %6161  ;;  %v4565_v17 = vpack.c.bf16 %v4302_v61, %v4270_v41  ;;  %5475 = vmatmul.msk.bf16.vlgmr.msrb.gmra.mxu3 %vm5474_vm1, %v11752_v11  ;;  %v11756_v46 = vmax.f32 %v11755_v24, 0.0  ;;  %v11758_v47 = vmax.f32 %v11757_v1, 0.0  ;;  %v1228_v28 = vadd.f32 %v1227_v53, %v11382_v6  ;;  %v11764_v53 = vld [vmem:[#allocation108_spill] sm:$0xff] }
 0x28f   : > { %v4598_v58 = vpack.c.bf16 %v4367_v5, %v11753_v32  ;;  %v4599_v59 = vpack.c.bf16 %v4368_v31, %v11754_v35  ;;  %v6164_v56 = vpop.eup %6163  ;;  %v9456_v39 = vadd.f32 1.0, %v6162_v44  ;;  %v5390_v45 = vmul.f32 -1.442695, %v1284_v21  ;;  %v11763_v5 = vld [vmem:[#allocation11_spill] sm:$0xff] }
 0x290   : > { %v4600_v38 = vpack.c.bf16 %v4369_v13, %v11756_v46  ;;  %v4601_v0 = vpack.c.bf16 %v4370_v54, %v11758_v47  ;;  %v1257_v41 = vadd.f32 %v1256_v48, %v11382_v6  ;;  %v6166_v51 = vpop.eup %6165  ;;  %4768 = vmatpush.bf16.xpose.msra.mxu3 %v4565_v17  ;;  %v9459_v37 = vadd.f32 1.0, %v6164_v56  ;;  %v11769_v17 = vld [vmem:[#allocation125_spill] sm:$0xff] }
 0x291   : > { %11759 = vst [vmem:[#allocation80_spill] sm:$0xff] %v9456_v39  ;;  %4780 = vmatpush.bf16.xpose.msrb.mxu0 %v4598_v58  ;;  %4793 = vmatpush.bf16.xpose.msrb.mxu1 %v4599_v59  ;;  %v5391_v40 = vmul.f32 -1.442695, %v1313_v3  ;;  %v11762_v63 = vsub.f32 1.0, %v11761_v43  ;;  %vm2140_vm9 = vweird.f32 %v11764_v53  ;;  %v6168_v61 = vpop.eup %6167  ;;  %6169 = vrcp.f32 %v9456_v39  ;;  %v11767_v3 = vld [vmem:[#allocation21_spill] sm:$0xff]  ;;  %v11775_v43 = vld [vmem:[#allocation120_spill] sm:$0xff] }
 0x292   : > { %11760 = vst [vmem:[#allocation71_spill] sm:$0xff] %v9459_v37  ;;  %4806 = vmatpush.bf16.xpose.msrb.mxu2 %v4600_v38  ;;  %v9466_v13 = vadd.f32 1.0, %v6166_v51  ;;  %v5420_v54 = vmul.f32 -1.442695, %v1228_v28  ;;  %vm2141_vm11 = vweird.f32 %v11763_v5  ;;  %6171 = vrcp.f32 %v9459_v37  ;;  %v11770_v38 = vld [vmem:[#allocation114_spill] sm:$0xff] }
 0x293   : > { %v2138_v31 = vmul.f32 %v11763_v5, %v11762_v63  ;;  %v9470_v48 = vadd.f32 1.0, %v6168_v61  ;;  %v2144_v58 = vand.u32 2147483647, %v11764_v53  ;;  %v5421_v35 = vmul.f32 -1.442695, %v1257_v41  ;;  %vm9475_vm12 = vmor %vm2140_vm9, %vm2141_vm11  ;;  %v11773_v41 = vld [vmem:[#allocation129_spill] sm:$0xff] }
 0x294   : > { %6173 = vrcp.f32 %v9466_v13  ;;  %v2146_v21 = vand.u32 2147483648, %v11764_v53  ;;  %v11768_v44 = vsub.f32 1.0, %v11767_v3  ;;  %vm2620_vm13 = vweird.f32 %v11770_v38 }
 0x295   : > { %v2139_v32 = vadd.f32 %v11763_v5, %v2138_v31  ;;  %6175 = vrcp.f32 %v9470_v48  ;;  %vm2621_vm14 = vweird.f32 %v11769_v17  ;;  %vm2145_vm15 = vcmp.eq.f32.partialorder %v2144_v58, 8.507059e+37 }
 0x296   : > { %v2618_v24 = vmul.f32 %v11769_v17, %v11768_v44  ;;  %6177 = vpow2.f32 %v5390_v45  ;;  %v2147_v1 = vor.u32 1.1754944e-38, %v2146_v21  ;;  %vm9491_vm2 = vmor %vm2620_vm13, %vm2621_vm14  ;;  %v2626_v56 = vand.u32 2147483648, %v11770_v38 }
 0x297   : > { %v2143_v46 = vsel %vm9475_vm12, %v11763_v5, %v2139_v32  ;;  %6179 = vpow2.f32 %v5391_v40  ;;  %v11774_v51 = vsub.f32 1.0, %v11773_v41  ;;  %v9499_v5 = vpop.eup %6169  ;;  %v11777_v40 = vld [vmem:[#allocation109_spill] sm:$0xff]  ;;  %vm2156_vm4 = vweird.f32 %v11775_v43 }
 0x298   : > { %4819 = vmatpush.bf16.xpose.msrb.mxu3 %v4601_v0  ;;  %v2619_v47 = vadd.f32 %v11769_v17, %v2618_v24  ;;  %v2624_v0 = vand.u32 2147483647, %v11770_v38  ;;  %11776 = vst [vmem:[#allocation20_spill] sm:$0xff] %v9499_v5  ;;  %6181 = vpow2.f32 %v5420_v54  ;;  %v2148_v45 = vsel %vm2145_vm15, %v2147_v1, %v2143_v46  ;;  %v9505_v53 = vpop.eup %6171  ;;  %v11781_v24 = vld [vmem:[#allocation132_spill] sm:$0xff] }
 0x299   : > { %v2153_v63 = vmul.f32 %v11775_v43, %v11774_v51  ;;  %vm2155_vm3 = vweird.f32 %v11777_v40  ;;  %11778 = vst [vmem:[#allocation46_spill] sm:$0xff] %v9505_v53  ;;  %v9509_v61 = vmul.f32 %v9499_v5, %v9456_v39  ;;  %6183 = vpow2.f32 %v5421_v35 }
 0x29a   : > { %v2623_v31 = vsel %vm9491_vm2, %v11769_v17, %v2619_v47  ;;  %v2627_v32 = vor.u32 1.1754944e-38, %v2626_v56  ;;  %v4015_v58 = vsub.f32 1.0, %v2148_v45  ;;  %v9511_v59 = vpop.eup %6173  ;;  %vm2625_vm0 = vcmp.eq.f32.partialorder %v2624_v0, 8.507059e+37  ;;  %vm9527_vm10 = vmor %vm2155_vm3, %vm2156_vm4  ;;  %v11786_v47 = vld [vmem:[#allocation33_spill] sm:$0xff] }
 0x29b   : > { %11779 = vst [vmem:[#allocation88_spill] sm:$0xff] %v9509_v61  ;;  %v2154_v54 = vadd.f32 %v11775_v43, %v2153_v63  ;;  %v2159_v21 = vand.u32 2147483647, %v11777_v40  ;;  %v9516_v3 = vpop.eup %6175  ;;  %v9520_v44 = vmul.f32 %v9505_v53, %v9459_v37  ;;  %v3276_v35 = vmul.f32 %v9511_v59, %v9466_v13  ;;  %v11797_v53 = vld [vmem:[#allocation110_spill] sm:$0xff] }
 0x29c   : > { %v2628_v17 = vsel %vm2625_vm0, %v2627_v32, %v2623_v31  ;;  %v4143_v46 = vmul.f32 %v11781_v24, %v4015_v58  ;;  %v6178_v1 = vpop.eup %6177  ;;  %v3291_v0 = vmul.f32 %v9516_v3, %v9470_v48  ;;  %vm2170_vm1 = vweird.f32 %v11797_v53 }
 0x29d   : > { %11780 = vst [vmem:[#allocation97_spill] sm:$0xff] %v9520_v44  ;;  %v4047_v28 = vsub.f32 1.0, %v2628_v17  ;;  %v2158_v56 = vsel %vm9527_vm10, %v11775_v43, %v2154_v54  ;;  %v6180_v41 = vpop.eup %6179  ;;  %v3277_v51 = vsub.f32 1.0, %v3276_v35  ;;  %v9537_v63 = vadd.f32 1.0, %v6178_v1 }
 0x29e   : > { %v4271_v45 = vmax.f32 %v4143_v46, 0.0  ;;  %vm9539_vm5 = vcmp.eq.f32.partialorder %v2159_v21, 8.507059e+37  ;;  %v6182_v32 = vpop.eup %6181  ;;  %v3292_v58 = vsub.f32 1.0, %v3291_v0  ;;  %v9543_v24 = vadd.f32 1.0, %v6180_v41  ;;  %v11787_v21 = vld [vmem:[#allocation19_spill] sm:$0xff]  ;;  %v11789_v46 = vld [vmem:[#allocation126_spill] sm:$0xff] }
 0x29f   : > { %v4175_v26 = vmul.f32 %v11786_v47, %v4047_v28  ;;  %v2161_v17 = vand.u32 2147483648, %v11777_v40  ;;  %v6184_v37 = vpop.eup %6183  ;;  %v9548_v43 = vmul.f32 %v9511_v59, %v3277_v51  ;;  %6185 = vrcp.f32 %v9537_v63  ;;  %v11791_v41 = vld [vmem:[#allocation116_spill] sm:$0xff] }
 0x2a0   : > { %v9551_v54 = vadd.f32 1.0, %v6182_v32  ;;  %v11788_v35 = vsub.f32 1.0, %v11787_v21  ;;  %v9557_v1 = vmul.f32 %v9516_v3, %v3292_v58  ;;  %6187 = vrcp.f32 %v9543_v24 }
 0x2a1   : > { %v9560_v47 = vadd.f32 1.0, %v6184_v37  ;;  %v4303_v40 = vmax.f32 %v4175_v26, 0.0  ;;  %v2162_v0 = vor.u32 1.1754944e-38, %v2161_v17  ;;  %vm2635_vm6 = vweird.f32 %v11791_v41  ;;  %v11794_v17 = vld [vmem:[#allocation131_spill] sm:$0xff]  ;;  %v11803_v37 = vld [vmem:[#allocation26_spill] sm:$0xff] }
 0x2a2   : > { %v2633_v38 = vmul.f32 %v11789_v46, %v11788_v35  ;;  %6189 = vrcp.f32 %v9551_v54  ;;  %vm2636_vm7 = vweird.f32 %v11789_v46  ;;  %v2639_v32 = vand.u32 2147483647, %v11791_v41  ;;  %v11796_v35 = vld [vmem:[#allocation121_spill] sm:$0xff] }
 0x2a3   : > { %11790 = vst [vmem:[#allocation77_spill] sm:$0xff] %v9560_v47  ;;  %6191 = vrcp.f32 %v9560_v47  ;;  %v4566_v51 = vpack.c.bf16 %v4303_v40, %v4271_v45  ;;  %v2163_v58 = vsel %vm9539_vm5, %v2162_v0, %v2158_v56  ;;  %vm9570_vm8 = vmor %vm2635_vm6, %vm2636_vm7  ;;  %v2641_v26 = vand.u32 2147483648, %v11791_v41 }
 0x2a4   : > { %v2634_v28 = vadd.f32 %v11789_v46, %v2633_v38  ;;  %v11795_v21 = vsub.f32 1.0, %v11794_v17  ;;  %vm9582_vm9 = vcmp.eq.f32.partialorder %v2639_v32, 8.507059e+37  ;;  %v4016_v56 = vsub.f32 1.0, %v2163_v58 }
 0x2a5   : > { %4781 = vmatpush.bf16.xpose.msrb.mxu0 %v4566_v51  ;;  %vm2171_vm11 = vweird.f32 %v11796_v35  ;;  %v9587_v40 = vpop.eup %6185  ;;  %v2642_v0 = vor.u32 1.1754944e-38, %v2641_v26  ;;  %v2174_v17 = vand.u32 2147483647, %v11797_v53  ;;  %v2176_v51 = vand.u32 2147483648, %v11797_v53  ;;  %v11805_v26 = vld [vmem:[#allocation6_spill] sm:$0xff] }
 0x2a6   : > { %v2168_v38 = vmul.f32 %v11796_v35, %v11795_v21  ;;  %v2638_v45 = vsel %vm9570_vm8, %v11789_v46, %v2634_v28  ;;  %v9592_v21 = vpop.eup %6187  ;;  %v3306_v46 = vmul.f32 %v9587_v40, %v9537_v63  ;;  %v11800_v28 = vld [vmem:[#allocation28_spill] sm:$0xff]  ;;  %vm9597_vm12 = vmor %vm2170_vm1, %vm2171_vm11  ;;  %v11804_v39 = vsub.f32 1.0, %v11803_v37 }
 0x2a7   : > { %v4144_v32 = vmul.f32 %v11800_v28, %v4016_v56  ;;  %v3321_v53 = vmul.f32 %v9592_v21, %v9543_v24  ;;  %v2643_v60 = vsel %vm9582_vm9, %v2642_v0, %v2638_v45  ;;  %vm9614_vm14 = vcmp.eq.f32.partialorder %v2174_v17, 8.507059e+37  ;;  %v11810_v17 = vld [vmem:[#allocation48_spill] sm:$0xff] }
 0x2a8   : > { %v2169_v41 = vadd.f32 %v11796_v35, %v2168_v38  ;;  %v2648_v5 = vmul.f32 %v11805_v26, %v11804_v39  ;;  %v11806_v38 = vld [vmem:[#allocation118_spill] sm:$0xff]  ;;  %v9605_v61 = vpop.eup %6189  ;;  %v3307_v39 = vsub.f32 1.0, %v3306_v46  ;;  %v4048_v4 = vsub.f32 1.0, %v2643_v60 }
 0x2a9   : > { %vm2650_vm13 = vweird.f32 %v11806_v38  ;;  %v9618_v37 = vpop.eup %6191  ;;  %v3756_v44 = vmul.f32 %v9605_v61, %v9551_v54  ;;  %v4272_v55 = vmax.f32 %v4144_v32, 0.0  ;;  %v3322_v8 = vsub.f32 1.0, %v3321_v53 }
 0x2aa   : > { %v2173_v56 = vsel %vm9597_vm12, %v11796_v35, %v2169_v41  ;;  %11809 = vst [vmem:[#allocation113_spill] sm:$0xff] %v9618_v37  ;;  %v3771_v45 = vmul.f32 %v9618_v37, %v9560_v47  ;;  %v2177_v31 = vor.u32 1.1754944e-38, %v2176_v51  ;;  %v2649_v0 = vadd.f32 %v11805_v26, %v2648_v5 }
 0x2ab   : > { %v9626_v35 = vmul.f32 %v9587_v40, %v3307_v39  ;;  %v3757_v41 = vsub.f32 1.0, %v3756_v44  ;;  %v4176_v58 = vmul.f32 %v11810_v17, %v4048_v4  ;;  %vm2651_vm15 = vweird.f32 %v11805_v26  ;;  %v11814_v39 = vld [vmem:[#allocation17_spill] sm:$0xff] }
 0x2ac   : > { %v9631_v46 = vmul.f32 %v9592_v21, %v3322_v8  ;;  %v3772_v60 = vsub.f32 1.0, %v3771_v45  ;;  %v2178_v32 = vsel %vm9614_vm14, %v2177_v31, %v2173_v56  ;;  %vm9637_vm2 = vmor %vm2650_vm13, %vm2651_vm15  ;;  %v2654_v5 = vand.u32 2147483647, %v11806_v38  ;;  %v11816_v31 = vld [vmem:[#allocation124_spill] sm:$0xff] }
 0x2ad   : > { %v9643_v44 = vmul.f32 %v9605_v61, %v3757_v41  ;;  %v4304_v4 = vmax.f32 %v4176_v58, 0.0  ;;  %v2653_v8 = vsel %vm9637_vm2, %v11805_v26, %v2649_v0  ;;  %v2656_v53 = vand.u32 2147483648, %v11806_v38  ;;  %v11817_v41 = vld [vmem:[#allocation112_spill] sm:$0xff]  ;;  %v11818_v58 = vld [vmem:[#allocation30_spill] sm:$0xff] }
 0x2ae   : > { %v9650_v56 = vmul.f32 %v9618_v37, %v3772_v60  ;;  %vm2655_vm3 = vcmp.eq.f32.partialorder %v2654_v5, 8.507059e+37  ;;  %v4017_v28 = vsub.f32 1.0, %v2178_v32  ;;  %v11815_v45 = vsub.f32 1.0, %v11814_v39  ;;  %v1285_v60 = vpop.f32.mrf.mxu2  ;;  %v1314_v32 = vpop.f32.mrf.mxu3  ;;  %v9681_v39 = vld [vmem:[%s9150_s17 + $0x8] sm:$0xff] }
 0x2af   : > { %v4567_v52 = vpack.c.bf16 %v4304_v4, %v4272_v55  ;;  %v2657_v16 = vor.u32 1.1754944e-38, %v2656_v53  ;;  %vm2185_vm0 = vweird.f32 %v11817_v41  ;;  %vm2186_vm4 = vweird.f32 %v11816_v31  ;;  %v11821_v55 = vld [vmem:[#allocation15_spill] sm:$0xff]  ;;  %v11823_v53 = vld [vmem:[#allocation130_spill] sm:$0xff] }
 0x2b0   : > { %11813 = vst [vmem:[#allocation81_spill] sm:$0xff] %v9650_v56  ;;  %v2183_v17 = vmul.f32 %v11816_v31, %v11815_v45  ;;  %v4145_v51 = vmul.f32 %v11818_v58, %v4017_v28  ;;  %v2189_v38 = vand.u32 2147483647, %v11817_v41  ;;  %v2191_v0 = vand.u32 2147483648, %v11817_v41  ;;  %vm9661_vm10 = vmor %vm2185_vm0, %vm2186_vm4  ;;  %v1230_v28 = vpop.f32.mrf.mxu0 }
 0x2b1   : > { %4794 = vmatpush.bf16.xpose.msrb.mxu1 %v4567_v52  ;;  %v2658_v5 = vsel %vm2655_vm3, %v2657_v16, %v2653_v8  ;;  %v11822_v4 = vsub.f32 1.0, %v11821_v55  ;;  %vm2665_vm5 = vweird.f32 %v11824_v23  ;;  %vm2666_vm6 = vweird.f32 %v11823_v53  ;;  %v1259_v52 = vpop.f32.mrf.mxu1 }
 0x2b2   : > { %v2184_v26 = vadd.f32 %v11816_v31, %v2183_v17  ;;  %v4049_v17 = vsub.f32 1.0, %v2658_v5  ;;  %v4273_v41 = vmax.f32 %v4145_v51, 0.0  ;;  %vm2190_vm7 = vcmp.eq.f32.partialorder %v2189_v38, 8.507059e+37  ;;  %vm2667_vm8 = vmor %vm2665_vm5, %vm2666_vm6 }
 0x2b3   : > { %v2663_v45 = vmul.f32 %v11823_v53, %v11822_v4  ;;  %v2192_v8 = vor.u32 1.1754944e-38, %v2191_v0  ;;  %v2669_v55 = vand.u32 2147483647, %v11824_v23  ;;  %v2671_v4 = vand.u32 2147483648, %v11824_v23 }
 0x2b4   : > { %v2188_v16 = vsel %vm9661_vm10, %v11816_v31, %v2184_v26  ;;  %v4177_v10 = vmul.f32 %v11825_v20, %v4049_v17  ;;  %v1286_v47 = vadd.f32 %v1285_v60, %v11382_v6  ;;  %v1315_v51 = vadd.f32 %v1314_v32, %v11382_v6 }
 0x2b5   : > { %v2664_v58 = vadd.f32 %v11823_v53, %v2663_v45  ;;  %v1231_v5 = vadd.f32 %v1230_v28, %v11524_v34  ;;  %v2193_v31 = vsel %vm2190_vm7, %v2192_v8, %v2188_v16  ;;  %vm2670_vm1 = vcmp.eq.f32.partialorder %v2669_v55, 8.507059e+37  ;;  %v11826_v28 = vld [vmem:[#allocation31_spill] sm:$0xff] }
 0x2b6   : > { %v2672_v38 = vor.u32 1.1754944e-38, %v2671_v4  ;;  %v4305_v0 = vmax.f32 %v4177_v10, 0.0  ;;  %v4018_v45 = vsub.f32 1.0, %v2193_v31  ;;  %v5422_v37 = vmul.f32 -1.442695, %v1286_v47  ;;  %v11827_v47 = vld [vmem:[#allocation25_spill] sm:$0xff] }
 0x2b7   : > { %v2668_v26 = vsel %vm2667_vm8, %v11823_v53, %v2664_v58  ;;  %v5423_v23 = vmul.f32 -1.442695, %v1315_v51  ;;  %6193 = vtanh.f32 %v1231_v5  ;;  %v1260_v20 = vadd.f32 %v1259_v52, %v11524_v34 }
 0x2b8   : > { %v2673_v56 = vsel %vm2670_vm1, %v2672_v38, %v2668_v26  ;;  %v4401_v60 = vperm.slane %v9681_v39, 0  ;;  %v4568_v32 = vpack.c.bf16 %v4305_v0, %v4273_v41  ;;  %v4146_v6 = vmul.f32 %v11826_v28, %v4018_v45  ;;  %v1288_v41 = vpop.f32.mrf.mxu2 }
 0x2b9   : > { %v4050_v17 = vsub.f32 1.0, %v2673_v56  ;;  %6195 = vpow2.f32 %v5422_v37  ;;  %v4402_v53 = vperm.slane %v9681_v39, 1  ;;  %v4403_v10 = vperm.slane %v9681_v39, 2  ;;  %v1317_v56 = vpop.f32.mrf.mxu3  ;;  %v1261_v26 = vpop.f32.mrf.mxu1 }
 0x2ba   : > { %6197 = vpow2.f32 %v5423_v23  ;;  %vm4433_vm9 = vcmp.eq.s32.totalorder %v9180_v19, %v4401_v60  ;;  %4807 = vmatpush.bf16.xpose.msrb.mxu2 %v4568_v32  ;;  %v4274_v8 = vmax.f32 %v4146_v6, 0.0  ;;  %v4404_v52 = vperm.slane %v9681_v39, 3  ;;  %v1232_v6 = vpop.f32.mrf.mxu0 }
 0x2bb   : > { %v4178_v16 = vmul.f32 %v11827_v47, %v4050_v17  ;;  %6199 = vtanh.f32 %v1260_v20  ;;  %vm5476_vm11 = vmpackc.low %vm4433_vm9, %vm4433_vm9  ;;  %vm4434_vm12 = vcmp.eq.s32.totalorder %v9180_v19, %v4402_v53  ;;  %vm9695_vm13 = vcmp.eq.s32.totalorder %v9180_v19, %v4403_v10  ;;  %v11836_v47 = vld [vmem:[#allocation135_spill] sm:$0xff] }
 0x2bc   : > { %5477 = vmatmul.msk.bf16.vlgmr.msra.gmra.mxu0 %vm5476_vm11, %v11752_v11  ;;  %v4371_v58 = vmax.f32 %v8650_v57, 0.0  ;;  %v4372_v55 = vmax.f32 %v8660_v27, 0.0  ;;  %vm5478_vm14 = vmpackc.low %vm4434_vm12, %vm4434_vm12  ;;  %vm9702_vm15 = vcmp.eq.s32.totalorder %v9180_v19, %v4404_v52  ;;  %v4373_v5 = vmax.f32 %v8680_v15, 0.0 }
 0x2bd   : > { %v4306_v4 = vmax.f32 %v4178_v16, 0.0  ;;  %v4374_v31 = vmax.f32 %v8697_v49, 0.0  ;;  %v9708_v38 = vpop.eup %6193  ;;  %5479 = vmatmul.msk.bf16.vlgmr.msra.gmra.mxu1 %vm5478_vm14, %v11752_v11  ;;  %vm5480_vm2 = vmpackc.low %vm9695_vm13, %vm9695_vm13  ;;  %v11832_v57 = vmax.f32 %v8595_v62, 0.0  ;;  %v11833_v0 = vmax.f32 %v8600_v12, 0.0 }
 0x2be   : > { %v1289_v23 = vadd.f32 %v1288_v41, %v11524_v34  ;;  %v1318_v15 = vadd.f32 %v1317_v56, %v11524_v34  ;;  %5481 = vmatmul.msk.bf16.vlgmr.msra.gmra.mxu2 %vm5480_vm2, %v11752_v11  ;;  %vm5482_vm3 = vmpackc.low %vm9702_vm15, %vm9702_vm15  ;;  %v11834_v60 = vmax.f32 %v8609_v29, 0.0  ;;  %v11835_v62 = vmax.f32 %v8628_v9, 0.0  ;;  %v11839_v41 = vld [vmem:[#allocation67_spill] sm:$0xff] }
 0x2bf   : > { %v4602_v27 = vpack.c.bf16 %v4371_v58, %v11832_v57  ;;  %v4603_v45 = vpack.c.bf16 %v4372_v55, %v11833_v0  ;;  %v6196_v49 = vpop.eup %6195  ;;  %v4569_v20 = vpack.c.bf16 %v4306_v4, %v4274_v8  ;;  %v1233_v12 = vadd.f32 %v1232_v6, %v11335_v22  ;;  %5483 = vmatmul.msk.bf16.vlgmr.msra.gmra.mxu3 %vm5482_vm3, %v11752_v11  ;;  %v11838_v8 = vld [vmem:[#allocation22_spill] sm:$0xff]  ;;  %v11840_v55 = vld [vmem:[#allocation141_spill] sm:$0xff] }
 0x2c0   : > { %v4604_v32 = vpack.c.bf16 %v4373_v5, %v11834_v60  ;;  %v4605_v17 = vpack.c.bf16 %v4374_v31, %v11835_v62  ;;  %v6198_v28 = vpop.eup %6197  ;;  %v9729_v53 = vadd.f32 1.0, %v6196_v49  ;;  %6201 = vtanh.f32 %v1289_v23  ;;  %v11842_v4 = vld [vmem:[#allocation70_spill] sm:$0xff]  ;;  %v11846_v49 = vld [vmem:[#allocation137_spill] sm:$0xff] }
 0x2c1   : > { %4832 = vmatpush.bf16.xpose.msra.mxu0 %v4602_v27  ;;  %v1262_v10 = vadd.f32 %v1261_v26, %v11335_v22  ;;  %v11837_v16 = vsub.f32 1.0, %v11836_v47  ;;  %v9736_v29 = vpop.eup %6199  ;;  %4820 = vmatpush.bf16.xpose.msrb.mxu3 %v4569_v20  ;;  %v9738_v9 = vadd.f32 1.0, %v6198_v28  ;;  %6203 = vtanh.f32 %v1318_v15  ;;  %v11843_v5 = vld [vmem:[#allocation18_spill] sm:$0xff] }
 0x2c2   : > { %4845 = vmatpush.bf16.xpose.msra.mxu1 %v4603_v45  ;;  %vm2200_vm0 = vweird.f32 %v11839_v41  ;;  %vm2201_vm4 = vweird.f32 %v11838_v8  ;;  %6205 = vrcp.f32 %v9729_v53  ;;  %4858 = vmatpush.bf16.xpose.msra.mxu2 %v4604_v32  ;;  %v2204_v37 = vand.u32 2147483647, %v11839_v41  ;;  %v11848_v60 = vld [vmem:[#allocation50_spill] sm:$0xff] }
 0x2c3   : > { %v2198_v52 = vmul.f32 %v11838_v8, %v11837_v16  ;;  %v2206_v58 = vand.u32 2147483648, %v11839_v41  ;;  %6207 = vrcp.f32 %v9738_v9  ;;  %vm2202_vm10 = vmor %vm2200_vm0, %vm2201_vm4  ;;  %v11841_v6 = vsub.f32 1.0, %v11840_v55  ;;  %v11849_v62 = vld [vmem:[#allocation10_spill] sm:$0xff]  ;;  %v11851_v41 = vld [vmem:[#allocation143_spill] sm:$0xff] }
 0x2c4   : > { %vm2680_vm5 = vweird.f32 %v11843_v5  ;;  %vm2681_vm6 = vweird.f32 %v11842_v4  ;;  %6209 = vtanh.f32 %v1233_v12  ;;  %vm2205_vm7 = vcmp.eq.f32.partialorder %v2204_v37, 8.507059e+37  ;;  %v11853_v37 = vld [vmem:[#allocation23_spill] sm:$0xff] }
 0x2c5   : > { %v2199_v56 = vadd.f32 %v11838_v8, %v2198_v52  ;;  %v2678_v51 = vmul.f32 %v11842_v4, %v11841_v6  ;;  %v2207_v26 = vor.u32 1.1754944e-38, %v2206_v58  ;;  %6211 = vtanh.f32 %v1262_v10  ;;  %vm9758_vm8 = vmor %vm2680_vm5, %vm2681_vm6 }
 0x2c6   : > { %v2684_v27 = vand.u32 2147483647, %v11843_v5  ;;  %v2686_v0 = vand.u32 2147483648, %v11843_v5  ;;  %v9756_v45 = vpop.eup %6201  ;;  %v11847_v20 = vsub.f32 1.0, %v11846_v49  ;;  %vm2215_vm1 = vweird.f32 %v11849_v62 }
 0x2c7   : > { %v2203_v31 = vsel %vm2202_vm10, %v11838_v8, %v2199_v56  ;;  %v2679_v57 = vadd.f32 %v11842_v4, %v2678_v51  ;;  %vm2216_vm9 = vweird.f32 %v11848_v60  ;;  %v2219_v8 = vand.u32 2147483647, %v11849_v62  ;;  %v11854_v51 = vld [vmem:[#allocation146_spill] sm:$0xff] }
 0x2c8   : > { %v2208_v23 = vsel %vm2205_vm7, %v2207_v26, %v2203_v31  ;;  %v2213_v32 = vmul.f32 %v11848_v60, %v11847_v20  ;;  %vm2685_vm11 = vcmp.eq.f32.partialorder %v2684_v27, 8.507059e+37  ;;  %v2687_v28 = vor.u32 1.1754944e-38, %v2686_v0  ;;  %vm9789_vm12 = vmor %vm2215_vm1, %vm2216_vm9  ;;  %v11857_v26 = vld [vmem:[#allocation13_spill] sm:$0xff] }
 0x2c9   : > { %4871 = vmatpush.bf16.xpose.msra.mxu3 %v4605_v17  ;;  %v9767_v17 = vpop.eup %6203  ;;  %v2683_v12 = vsel %vm9758_vm8, %v11842_v4, %v2679_v57  ;;  %v4019_v10 = vsub.f32 1.0, %v2208_v23  ;;  %v2221_v52 = vand.u32 2147483648, %v11849_v62  ;;  %v11852_v56 = vsub.f32 1.0, %v11851_v41 }
 0x2ca   : > { %11850 = vst [vmem:[#allocation72_spill] sm:$0xff] %v9767_v17  ;;  %v9772_v47 = vpop.eup %6205  ;;  %v2214_v16 = vadd.f32 %v11848_v60, %v2213_v32  ;;  %v2688_v4 = vsel %vm2685_vm11, %v2687_v28, %v2683_v12  ;;  %vm2695_vm13 = vweird.f32 %v11857_v26  ;;  %vm2220_vm14 = vcmp.eq.f32.partialorder %v2219_v8, 8.507059e+37  ;;  %v11858_v28 = vld [vmem:[#allocation62_spill] sm:$0xff] }
 0x2cb   : > { %v2693_v58 = vmul.f32 %v11853_v37, %v11852_v56  ;;  %v9780_v55 = vpop.eup %6207  ;;  %v3786_v6 = vmul.f32 %v9772_v47, %v9729_v53  ;;  %v4147_v5 = vmul.f32 %v11854_v51, %v4019_v10  ;;  %v4051_v0 = vsub.f32 1.0, %v2688_v4  ;;  %v11861_v8 = vld [vmem:[#allocation138_spill] sm:$0xff] }
 0x2cc   : > { %v9794_v57 = vpop.eup %6209  ;;  %v3801_v27 = vmul.f32 %v9780_v55, %v9738_v9  ;;  %v2218_v23 = vsel %vm9789_vm12, %v11848_v60, %v2214_v16  ;;  %v2222_v32 = vor.u32 1.1754944e-38, %v2221_v52  ;;  %vm2696_vm15 = vweird.f32 %v11853_v37  ;;  %v11866_v60 = vld [vmem:[#allocation144_spill] sm:$0xff] }
 0x2cd   : > { %v9801_v15 = vpop.eup %6211  ;;  %v3787_v49 = vsub.f32 1.0, %v3786_v6  ;;  %v4275_v20 = vmax.f32 %v4147_v5, 0.0  ;;  %v2694_v62 = vadd.f32 %v11853_v37, %v2693_v58  ;;  %v4179_v10 = vmul.f32 %v11858_v28, %v4051_v0  ;;  %vm9812_vm2 = vmor %vm2695_vm13, %vm2696_vm15  ;;  %v11863_v58 = vld [vmem:[#allocation14_spill] sm:$0xff] }
 0x2ce   : > { %v3802_v12 = vsub.f32 1.0, %v3801_v27  ;;  %v2699_v41 = vand.u32 2147483647, %v11857_v26  ;;  %v2223_v4 = vsel %vm2220_vm14, %v2222_v32, %v2218_v23  ;;  %v2701_v16 = vand.u32 2147483648, %v11857_v26 }
 0x2cf   : > { %v9808_v56 = vmul.f32 %v9772_v47, %v3787_v49  ;;  %v11862_v52 = vsub.f32 1.0, %v11861_v8  ;;  %v4307_v5 = vmax.f32 %v4179_v10, 0.0  ;;  %v2698_v31 = vsel %vm9812_vm2, %v11853_v37, %v2694_v62  ;;  %v11864_v49 = vld [vmem:[#allocation12_spill] sm:$0xff]  ;;  %v11865_v10 = vld [vmem:[#allocation147_spill] sm:$0xff] }
 0x2d0   : > { %v9821_v51 = vmul.f32 %v9780_v55, %v3802_v12  ;;  %vm2700_vm3 = vcmp.eq.f32.partialorder %v2699_v41, 8.507059e+37  ;;  %v2702_v27 = vor.u32 1.1754944e-38, %v2701_v16  ;;  %v4020_v0 = vsub.f32 1.0, %v2223_v4  ;;  %v11868_v62 = vld [vmem:[#allocation140_spill] sm:$0xff]  ;;  %v11869_v4 = vld [vmem:[#allocation27_spill] sm:$0xff] }
 0x2d1   : > { %v2228_v6 = vmul.f32 %v11863_v58, %v11862_v52  ;;  %vm2230_vm0 = vweird.f32 %v11864_v49  ;;  %v4570_v26 = vpack.c.bf16 %v4307_v5, %v4275_v20  ;;  %vm2231_vm4 = vweird.f32 %v11863_v58 }
 0x2d2   : > { %v2234_v32 = vand.u32 2147483647, %v11864_v49  ;;  %v2236_v12 = vand.u32 2147483648, %v11864_v49  ;;  %v2703_v28 = vsel %vm2700_vm3, %v2702_v27, %v2698_v31  ;;  %v4148_v8 = vmul.f32 %v11865_v10, %v4020_v0  ;;  %vm2232_vm10 = vmor %vm2230_vm0, %vm2231_vm4  ;;  %v11870_v27 = vld [vmem:[#allocation65_spill] sm:$0xff] }
 0x2d3   : > { %v2229_v23 = vadd.f32 %v11863_v58, %v2228_v6  ;;  %v11867_v37 = vsub.f32 1.0, %v11866_v60  ;;  %vm2710_vm5 = vweird.f32 %v11869_v4  ;;  %4833 = vmatpush.bf16.xpose.msra.mxu0 %v4570_v26  ;;  %v4052_v16 = vsub.f32 1.0, %v2703_v28  ;;  %v11873_v28 = vld [vmem:[#allocation139_spill] sm:$0xff] }
 0x2d4   : > { %vm2235_vm6 = vcmp.eq.f32.partialorder %v2234_v32, 8.507059e+37  ;;  %v2237_v52 = vor.u32 1.1754944e-38, %v2236_v12  ;;  %v4276_v6 = vmax.f32 %v4148_v8, 0.0  ;;  %vm2711_vm7 = vweird.f32 %v11868_v62  ;;  %v11876_v60 = vld [vmem:[#allocation7_spill] sm:$0xff] }
 0x2d5   : > { %v2708_v41 = vmul.f32 %v11868_v62, %v11867_v37  ;;  %v2233_v20 = vsel %vm2232_vm10, %v11863_v58, %v2229_v23  ;;  %v2714_v31 = vand.u32 2147483647, %v11869_v4  ;;  %v4180_v0 = vmul.f32 %v11870_v27, %v4052_v16  ;;  %vm9841_vm8 = vmor %vm2710_vm5, %vm2711_vm7  ;;  %v11875_v23 = vld [vmem:[#allocation8_spill] sm:$0xff] }
 0x2d6   : > { %v2238_v49 = vsel %vm2235_vm6, %v2237_v52, %v2233_v20  ;;  %v2716_v26 = vand.u32 2147483648, %v11869_v4  ;;  %v11874_v58 = vsub.f32 1.0, %v11873_v28  ;;  %vm2245_vm9 = vweird.f32 %v11876_v60  ;;  %v11877_v20 = vld [vmem:[#allocation148_spill] sm:$0xff] }
 0x2d7   : > { %v2709_v5 = vadd.f32 %v11868_v62, %v2708_v41  ;;  %vm2715_vm1 = vcmp.eq.f32.partialorder %v2714_v31, 8.507059e+37  ;;  %v4021_v8 = vsub.f32 1.0, %v2238_v49  ;;  %v4308_v37 = vmax.f32 %v4180_v0, 0.0  ;;  %v11882_v49 = vld [vmem:[#allocation142_spill] sm:$0xff] }
 0x2d8   : > { %v2243_v32 = vmul.f32 %v11875_v23, %v11874_v58  ;;  %v2717_v41 = vor.u32 1.1754944e-38, %v2716_v26  ;;  %vm2246_vm11 = vweird.f32 %v11875_v23  ;;  %v2249_v27 = vand.u32 2147483647, %v11876_v60  ;;  %v11883_v58 = vld [vmem:[#allocation136_spill] sm:$0xff] }
 0x2d9   : > { %v2713_v12 = vsel %vm9841_vm8, %v11868_v62, %v2709_v5  ;;  %v4149_v4 = vmul.f32 %v11877_v20, %v4021_v8  ;;  %vm9856_vm12 = vmor %vm2245_vm9, %vm2246_vm11  ;;  %v2251_v62 = vand.u32 2147483648, %v11876_v60  ;;  %v11880_v5 = vld [vmem:[#allocation145_spill] sm:$0xff]  ;;  %v4571_v0 = vpack.c.bf16 %v4308_v37, %v4276_v6  ;;  %v1319_v8 = vpop.f32.mrf.mxu3  ;;  %v1235_v37 = vpop.f32.mrf.mxu0 }
 0x2da   : > { %v2244_v16 = vadd.f32 %v11875_v23, %v2243_v32  ;;  %v11881_v31 = vsub.f32 1.0, %v11880_v5  ;;  %v2718_v26 = vsel %vm2715_vm1, %v2717_v41, %v2713_v12  ;;  %vm2725_vm13 = vweird.f32 %v11883_v58  ;;  %v1290_v32 = vpop.f32.mrf.mxu2  ;;  %v11884_v41 = vld [vmem:[#allocation66_spill] sm:$0xff] }
 0x2db   : > { %v4053_v20 = vsub.f32 1.0, %v2718_v26  ;;  %v4277_v34 = vmax.f32 %v4149_v4, 0.0  ;;  %vm2250_vm14 = vcmp.eq.f32.partialorder %v2249_v27, 8.507059e+37  ;;  %v2252_v17 = vor.u32 1.1754944e-38, %v2251_v62  ;;  %4846 = vmatpush.bf16.xpose.msra.mxu1 %v4571_v0 }
 0x2dc   : > { %v2723_v10 = vmul.f32 %v11882_v49, %v11881_v31  ;;  %v2248_v28 = vsel %vm9856_vm12, %v11875_v23, %v2244_v16  ;;  %vm2726_vm15 = vweird.f32 %v11882_v49  ;;  %v2729_v6 = vand.u32 2147483647, %v11883_v58 }
 0x2dd   : > { %v2731_v12 = vand.u32 2147483648, %v11883_v58  ;;  %v4181_v23 = vmul.f32 %v11884_v41, %v4053_v20  ;;  %v2253_v16 = vsel %vm2250_vm14, %v2252_v17, %v2248_v28  ;;  %vm2727_vm2 = vmor %vm2725_vm13, %vm2726_vm15  ;;  %v1291_v4 = vadd.f32 %v1290_v32, %v11335_v22  ;;  %v1264_v17 = vpop.f32.mrf.mxu1  ;;  %v11885_v28 = vld [vmem:[#allocation149_spill] sm:$0xff] }
 0x2de   : > { %v2724_v60 = vadd.f32 %v11882_v49, %v2723_v10  ;;  %v1320_v52 = vadd.f32 %v1319_v8, %v11335_v22  ;;  %vm2730_vm3 = vcmp.eq.f32.partialorder %v2729_v6, 8.507059e+37  ;;  %v4022_v5 = vsub.f32 1.0, %v2253_v16 }
 0x2df   : > { %v2732_v62 = vor.u32 1.1754944e-38, %v2731_v12  ;;  %v4309_v31 = vmax.f32 %v4181_v23, 0.0  ;;  %6213 = vtanh.f32 %v1291_v4  ;;  %v1236_v10 = vadd.f32 %v1235_v37, %v6710_v18  ;;  %v11888_v12 = vld [vmem:[#allocation60_spill] sm:$0xff] }
 0x2e0   : > { %v2728_v27 = vsel %vm2727_vm2, %v11882_v49, %v2724_v60  ;;  %v3279_v0 = vadd.f32 %v9511_v59, %v9548_v43  ;;  %v4150_v58 = vmul.f32 %v11885_v28, %v4022_v5  ;;  %6215 = vtanh.f32 %v1320_v52 }
 0x2e1   : > { %v2733_v26 = vsel %vm2730_vm3, %v2732_v62, %v2728_v27  ;;  %vm3280_vm0 = vweird.f32 %v9466_v13  ;;  %v4572_v32 = vpack.c.bf16 %v4309_v31, %v4277_v34  ;;  %vm3281_vm4 = vweird.f32 %v9511_v59 }
 0x2e2   : > { %v4054_v8 = vsub.f32 1.0, %v2733_v26  ;;  %v3284_v49 = vand.u32 2147483647, %v9466_v13  ;;  %v4278_v20 = vmax.f32 %v4150_v58, 0.0  ;;  %vm9886_vm10 = vmor %vm3280_vm0, %vm3281_vm4  ;;  %v3286_v43 = vand.u32 2147483648, %v9466_v13 }
 0x2e3   : > { %6217 = vtanh.f32 %v1236_v10  ;;  %v1265_v6 = vadd.f32 %v1264_v17, %v6710_v18  ;;  %4859 = vmatpush.bf16.xpose.msra.mxu2 %v4572_v32  ;;  %v3283_v34 = vsel %vm9886_vm10, %v9511_v59, %v3279_v0  ;;  %v3294_v41 = vadd.f32 %v9516_v3, %v9557_v1 }
 0x2e4   : > { %v4182_v37 = vmul.f32 %v11888_v12, %v4054_v8  ;;  %vm3285_vm5 = vcmp.eq.f32.partialorder %v3284_v49, 8.507059e+37  ;;  %v3287_v23 = vor.u32 1.1754944e-38, %v3286_v43  ;;  %vm3295_vm6 = vweird.f32 %v9470_v48 }
 0x2e5   : > { %vm3296_vm7 = vweird.f32 %v9516_v3  ;;  %v3299_v13 = vand.u32 2147483647, %v9470_v48  ;;  %v9901_v16 = vpop.eup %6213  ;;  %v3301_v59 = vand.u32 2147483648, %v9470_v48  ;;  %6219 = vtanh.f32 %v1265_v6 }
 0x2e6   : > { %v4310_v4 = vmax.f32 %v4182_v37, 0.0  ;;  %vm9903_vm8 = vmor %vm3295_vm6, %vm3296_vm7  ;;  %v4405_v27 = vperm.slane %v9681_v39, 4  ;;  %v9909_v1 = vpop.eup %6215  ;;  %v3288_v62 = vsel %vm3285_vm5, %v3287_v23, %v3283_v34  ;;  %v4406_v31 = vperm.slane %v9681_v39, 5  ;;  %v1322_v23 = vpop.f32.mrf.mxu3 }
 0x2e7   : > { %v3298_v5 = vsel %vm9903_vm8, %v9516_v3, %v3294_v41  ;;  %vm3300_vm1 = vcmp.eq.f32.partialorder %v3299_v13, 8.507059e+37  ;;  %v4091_v0 = vsub.f32 1.0, %v3288_v62  ;;  %v3302_v17 = vor.u32 1.1754944e-38, %v3301_v59  ;;  %v1237_v62 = vpop.f32.mrf.mxu0 }
 0x2e8   : > { %v4573_v10 = vpack.c.bf16 %v4310_v4, %v4278_v20  ;;  %vm4437_vm9 = vcmp.eq.s32.totalorder %v9180_v19, %v4405_v27  ;;  %vm4438_vm12 = vcmp.eq.s32.totalorder %v9180_v19, %v4406_v31  ;;  %v4407_v48 = vperm.slane %v9681_v39, 6  ;;  %v1293_v20 = vpop.f32.mrf.mxu2 }
 0x2e9   : > { %v6218_v26 = vpop.eup %6217  ;;  %vm5484_vm11 = vmpackc.low %vm4437_vm9, %vm4437_vm9  ;;  %v4408_v28 = vperm.slane %v9681_v39, 7  ;;  %v4375_v58 = vmax.f32 %v9153_v25, 0.0  ;;  %v3303_v32 = vsel %vm3300_vm1, %v3302_v17, %v3298_v5  ;;  %v4376_v8 = vmax.f32 %v9161_v42, 0.0 }
 0x2ea   : > { %4872 = vmatpush.bf16.xpose.msra.mxu3 %v4573_v10  ;;  %v9920_v3 = vmul.f32 %v6218_v26, %v4091_v0  ;;  %5485 = vmatmul.msk.bf16.vlgmr.msrb.gmra.mxu0 %vm5484_vm11, %v11752_v11  ;;  %vm5486_vm13 = vmpackc.low %vm4438_vm12, %vm4438_vm12  ;;  %v4377_v49 = vmax.f32 %v9182_v33, 0.0  ;;  %v4092_v60 = vsub.f32 1.0, %v3303_v32  ;;  %vm4439_vm14 = vcmp.eq.s32.totalorder %v9180_v19, %v4407_v48 }
 0x2eb   : > { %5487 = vmatmul.msk.bf16.vlgmr.msrb.gmra.mxu1 %vm5486_vm13, %v11752_v11  ;;  %vm9928_vm15 = vcmp.eq.s32.totalorder %v9180_v19, %v4408_v28  ;;  %v11893_v39 = vmax.f32 %v9092_v7, 0.0  ;;  %v6220_v6 = vpop.eup %6219  ;;  %vm5488_vm2 = vmpackc.low %vm4439_vm14, %vm4439_vm14  ;;  %v11894_v42 = vmax.f32 %v9097_v50, 0.0  ;;  %v11895_v37 = vmax.f32 %v9104_v14, 0.0 }
 0x2ec   : > { %v4347_v12 = vmax.f32 %v9920_v3, 0.0  ;;  %v4378_v41 = vmax.f32 %v9297_v36, 0.0  ;;  %v9940_v13 = vmul.f32 %v6220_v6, %v4092_v60  ;;  %5489 = vmatmul.msk.bf16.vlgmr.msrb.gmra.mxu2 %vm5488_vm2, %v11752_v11  ;;  %vm5490_vm3 = vmpackc.low %vm9928_vm15, %vm9928_vm15  ;;  %v1294_v7 = vadd.f32 %v1293_v20, %v6710_v18  ;;  %v11900_v20 = vld [vmem:[#allocation113_spill] sm:$0xff] }
 0x2ed   : > { %v4606_v43 = vpack.c.bf16 %v4375_v58, %v11893_v39  ;;  %v4607_v33 = vpack.c.bf16 %v4376_v8, %v11894_v42  ;;  %v4608_v34 = vpack.c.bf16 %v4377_v49, %v11895_v37  ;;  %v3309_v50 = vadd.f32 %v9587_v40, %v9626_v35  ;;  %5491 = vmatmul.msk.bf16.vlgmr.msrb.gmra.mxu3 %vm5490_vm3, %v11752_v11  ;;  %v11899_v49 = vld [vmem:[#allocation81_spill] sm:$0xff] }
 0x2ee   : > { %vm3310_vm0 = vweird.f32 %v9537_v63  ;;  %v11896_v14 = vmax.f32 %v9125_v30, 0.0  ;;  %vm3311_vm4 = vweird.f32 %v9587_v40  ;;  %v3314_v4 = vand.u32 2147483647, %v9537_v63  ;;  %v11901_v60 = vld [vmem:[#allocation77_spill] sm:$0xff] }
 0x2ef   : > { %4884 = vmatpush.bf16.xpose.msrb.mxu0 %v4606_v43  ;;  %4897 = vmatpush.bf16.xpose.msrb.mxu1 %v4607_v33  ;;  %v3316_v52 = vand.u32 2147483648, %v9537_v63  ;;  %v4348_v59 = vmax.f32 %v9940_v13, 0.0  ;;  %vm3312_vm10 = vmor %vm3310_vm0, %vm3311_vm4  ;;  %6221 = vtanh.f32 %v1294_v7  ;;  %v1323_v35 = vadd.f32 %v1322_v23, %v6710_v18  ;;  %v11904_v7 = vld [vmem:[#allocation76_spill] sm:$0xff] }
 0x2f0   : > { %v4609_v36 = vpack.c.bf16 %v4378_v41, %v11896_v14  ;;  %4910 = vmatpush.bf16.xpose.msrb.mxu2 %v4608_v34  ;;  %v3324_v27 = vadd.f32 %v9592_v21, %v9631_v46  ;;  %v3313_v30 = vsel %vm3312_vm10, %v9587_v40, %v3309_v50  ;;  %vm3315_vm5 = vcmp.eq.f32.partialorder %v3314_v4, 8.507059e+37  ;;  %v1266_v40 = vpop.f32.mrf.mxu1  ;;  %v11902_v41 = vld [vmem:[#allocation32_spill] sm:$0xff] }
 0x2f1   : > { %v3317_v5 = vor.u32 1.1754944e-38, %v3316_v52  ;;  %vm3325_vm6 = vweird.f32 %v9543_v24  ;;  %vm3326_vm7 = vweird.f32 %v9592_v21  ;;  %v3329_v63 = vand.u32 2147483647, %v9543_v24 }
 0x2f2   : > { %4923 = vmatpush.bf16.xpose.msrb.mxu3 %v4609_v36  ;;  %v3331_v31 = vand.u32 2147483648, %v9543_v24  ;;  %6223 = vtanh.f32 %v1323_v35  ;;  %vm3327_vm8 = vmor %vm3325_vm6, %vm3326_vm7  ;;  %v1238_v0 = vadd.f32 %v1237_v62, %v6810_v2  ;;  %v3759_v46 = vadd.f32 %v9605_v61, %v9643_v44  ;;  %v11905_v62 = vld [vmem:[#allocation64_spill] sm:$0xff] }
 0x2f3   : > { %v3318_v10 = vsel %vm3315_vm5, %v3317_v5, %v3313_v30  ;;  %vm3760_vm1 = vweird.f32 %v9551_v54  ;;  %v3328_v26 = vsel %vm3327_vm8, %v9592_v21, %v3324_v27  ;;  %vm3330_vm9 = vcmp.eq.f32.partialorder %v3329_v63, 8.507059e+37 }
 0x2f4   : > { %v4093_v17 = vsub.f32 1.0, %v3318_v10  ;;  %v3332_v48 = vor.u32 1.1754944e-38, %v3331_v31  ;;  %vm3761_vm11 = vweird.f32 %v9605_v61  ;;  %v3764_v24 = vand.u32 2147483647, %v9551_v54 }
 0x2f5   : > { %v3766_v28 = vand.u32 2147483648, %v9551_v54  ;;  %6225 = vtanh.f32 %v1238_v0  ;;  %v6222_v58 = vpop.eup %6221  ;;  %vm9973_vm12 = vmor %vm3760_vm1, %vm3761_vm11  ;;  %v1267_v44 = vadd.f32 %v1266_v40, %v6810_v2  ;;  %v3774_v21 = vadd.f32 %v11900_v20, %v11899_v49  ;;  %v11906_v0 = vld [vmem:[#allocation56_spill] sm:$0xff] }
 0x2f6   : > { %v3333_v32 = vsel %vm3330_vm9, %v3332_v48, %v3328_v26  ;;  %vm3775_vm13 = vweird.f32 %v11901_v60  ;;  %v9981_v25 = vmul.f32 %v6222_v58, %v4093_v17  ;;  %v3763_v54 = vsel %vm9973_vm12, %v9605_v61, %v3759_v46  ;;  %v11908_v40 = vld [vmem:[#allocation84_spill] sm:$0xff] }
 0x2f7   : > { %v4094_v39 = vsub.f32 1.0, %v3333_v32  ;;  %vm3765_vm14 = vcmp.eq.f32.partialorder %v3764_v24, 8.507059e+37  ;;  %v3767_v6 = vor.u32 1.1754944e-38, %v3766_v28  ;;  %vm3776_vm15 = vweird.f32 %v11900_v20  ;;  %v11909_v26 = vld [vmem:[#allocation40_spill] sm:$0xff] }
 0x2f8   : > { %v6224_v43 = vpop.eup %6223  ;;  %v3779_v42 = vand.u32 2147483647, %v11901_v60  ;;  %v3781_v33 = vand.u32 2147483648, %v11901_v60  ;;  %v4349_v37 = vmax.f32 %v9981_v25, 0.0  ;;  %vm3777_vm2 = vmor %vm3775_vm13, %vm3776_vm15  ;;  %6227 = vtanh.f32 %v1267_v44  ;;  %v11910_v44 = vld [vmem:[#allocation51_spill] sm:$0xff] }
 0x2f9   : > { %v9990_v34 = vmul.f32 %v6224_v43, %v4094_v39  ;;  %v11903_v23 = vsub.f32 1.0, %v11902_v41  ;;  %v3768_v61 = vsel %vm3765_vm14, %v3767_v6, %v3763_v54  ;;  %v3778_v14 = vsel %vm3777_vm2, %v11900_v20, %v3774_v21  ;;  %v11912_v20 = vld [vmem:[#allocation29_spill] sm:$0xff]  ;;  %v11913_v54 = vld [vmem:[#allocation58_spill] sm:$0xff] }
 0x2fa   : > { %vm3780_vm3 = vcmp.eq.f32.partialorder %v3779_v42, 8.507059e+37  ;;  %v3782_v36 = vor.u32 1.1754944e-38, %v3781_v33  ;;  %v4123_v35 = vsub.f32 1.0, %v3768_v61  ;;  %vm2260_vm0 = vweird.f32 %v11905_v62  ;;  %v11916_v61 = vld [vmem:[#allocation41_spill] sm:$0xff] }
 0x2fb   : > { %v2258_v50 = vmul.f32 %v11904_v7, %v11903_v23  ;;  %v6226_v4 = vpop.eup %6225  ;;  %v4350_v52 = vmax.f32 %v9990_v34, 0.0  ;;  %vm2261_vm4 = vweird.f32 %v11904_v7  ;;  %v2264_v5 = vand.u32 2147483647, %v11905_v62 }
 0x2fc   : > { %v3783_v30 = vsel %vm3780_vm3, %v3782_v36, %v3778_v14  ;;  %v2266_v63 = vand.u32 2147483648, %v11905_v62  ;;  %v10002_v31 = vmul.f32 %v6226_v4, %v4123_v35  ;;  %vm2262_vm10 = vmor %vm2260_vm0, %vm2261_vm4  ;;  %v11907_v46 = vsub.f32 1.0, %v11906_v0  ;;  %v11917_v4 = vld [vmem:[#allocation57_spill] sm:$0xff] }
 0x2fd   : > { %v2259_v27 = vadd.f32 %v11904_v7, %v2258_v50  ;;  %v4124_v10 = vsub.f32 1.0, %v3783_v30  ;;  %vm2740_vm5 = vweird.f32 %v11909_v26  ;;  %vm2265_vm6 = vcmp.eq.f32.partialorder %v2264_v5, 8.507059e+37 }
 0x2fe   : > { %v2738_v17 = vmul.f32 %v11908_v40, %v11907_v46  ;;  %v2267_v24 = vor.u32 1.1754944e-38, %v2266_v63  ;;  %vm2741_vm7 = vweird.f32 %v11908_v40  ;;  %v6228_v28 = vpop.eup %6227  ;;  %v2744_v32 = vand.u32 2147483647, %v11909_v26 }
 0x2ff   : > { %v2263_v48 = vsel %vm2262_vm10, %v11904_v7, %v2259_v27  ;;  %v2746_v8 = vand.u32 2147483648, %v11909_v26  ;;  %v11911_v49 = vsub.f32 1.0, %v11910_v44  ;;  %v10016_v60 = vmul.f32 %v6228_v28, %v4124_v10  ;;  %vm2742_vm8 = vmor %vm2740_vm5, %vm2741_vm7  ;;  %v11914_v7 = vld [vmem:[#allocation37_spill] sm:$0xff]  ;;  %v11922_v28 = vld [vmem:[#allocation44_spill] sm:$0xff] }
 0x300   : > { %v2739_v58 = vadd.f32 %v11908_v40, %v2738_v17  ;;  %v2268_v39 = vsel %vm2265_vm6, %v2267_v24, %v2263_v48  ;;  %vm2275_vm1 = vweird.f32 %v11913_v54  ;;  %vm2276_vm9 = vweird.f32 %v11912_v20  ;;  %v11918_v27 = vld [vmem:[#allocation89_spill] sm:$0xff]  ;;  %v11920_v48 = vld [vmem:[#allocation91_spill] sm:$0xff] }
 0x301   : > { %v2273_v21 = vmul.f32 %v11912_v20, %v11911_v49  ;;  %vm2745_vm11 = vcmp.eq.f32.partialorder %v2744_v32, 8.507059e+37  ;;  %v2747_v6 = vor.u32 1.1754944e-38, %v2746_v8  ;;  %v4023_v42 = vsub.f32 1.0, %v2268_v39  ;;  %vm2277_vm12 = vmor %vm2275_vm1, %vm2276_vm9  ;;  %v11923_v32 = vld [vmem:[#allocation59_spill] sm:$0xff] }
 0x302   : > { %v2743_v43 = vsel %vm2742_vm8, %v11908_v40, %v2739_v58  ;;  %v2279_v41 = vand.u32 2147483647, %v11913_v54  ;;  %v2281_v23 = vand.u32 2147483648, %v11913_v54  ;;  %v11915_v50 = vsub.f32 1.0, %v11914_v7  ;;  %v11919_v40 = vld [vmem:[#allocation35_spill] sm:$0xff]  ;;  %v11929_v7 = vld [vmem:[#allocation52_spill] sm:$0xff] }
 0x303   : > { %v2274_v33 = vadd.f32 %v11912_v20, %v2273_v21  ;;  %v2748_v36 = vsel %vm2745_vm11, %v2747_v6, %v2743_v43  ;;  %v4151_v35 = vmul.f32 %v11917_v4, %v4023_v42  ;;  %vm2755_vm13 = vweird.f32 %v11918_v27  ;;  %v11924_v43 = vld [vmem:[#allocation38_spill] sm:$0xff] }
 0x304   : > { %v2753_v14 = vmul.f32 %v11916_v61, %v11915_v50  ;;  %vm2756_vm14 = vweird.f32 %v11916_v61  ;;  %v4055_v62 = vsub.f32 1.0, %v2748_v36  ;;  %vm2280_vm15 = vcmp.eq.f32.partialorder %v2279_v41, 8.507059e+37  ;;  %v11927_v41 = vld [vmem:[#allocation93_spill] sm:$0xff] }
 0x305   : > { %v2278_v30 = vsel %vm2277_vm12, %v11912_v20, %v2274_v33  ;;  %v2282_v5 = vor.u32 1.1754944e-38, %v2281_v23  ;;  %v4279_v63 = vmax.f32 %v4151_v35, 0.0  ;;  %v2759_v0 = vand.u32 2147483647, %v11918_v27  ;;  %vm2757_vm2 = vmor %vm2755_vm13, %vm2756_vm14 }
 0x306   : > { %v2754_v10 = vadd.f32 %v11916_v61, %v2753_v14  ;;  %v2761_v46 = vand.u32 2147483648, %v11918_v27  ;;  %v4183_v17 = vmul.f32 %v11919_v40, %v4055_v62  ;;  %v11921_v24 = vsub.f32 1.0, %v11920_v48  ;;  %v11930_v62 = vld [vmem:[#allocation85_spill] sm:$0xff] }
 0x307   : > { %v2283_v26 = vsel %vm2280_vm15, %v2282_v5, %v2278_v30  ;;  %vm2290_vm3 = vweird.f32 %v11923_v32  ;;  %vm2760_vm0 = vcmp.eq.f32.partialorder %v2759_v0, 8.507059e+37  ;;  %vm2291_vm4 = vweird.f32 %v11922_v28  ;;  %v11931_v30 = vld [vmem:[#allocation54_spill] sm:$0xff]  ;;  %v11934_v40 = vld [vmem:[#allocation45_spill] sm:$0xff] }
 0x308   : > { %v2288_v58 = vmul.f32 %v11922_v28, %v11921_v24  ;;  %v2758_v8 = vsel %vm2757_vm2, %v11916_v61, %v2754_v10  ;;  %v2762_v44 = vor.u32 1.1754944e-38, %v2761_v46  ;;  %v4024_v49 = vsub.f32 1.0, %v2283_v26  ;;  %vm10044_vm10 = vmor %vm2290_vm3, %vm2291_vm4  ;;  %v11936_v26 = vld [vmem:[#allocation36_spill] sm:$0xff]  ;;  %v11937_v24 = vld [vmem:[#allocation61_spill] sm:$0xff] }
 0x309   : > { %v4311_v20 = vmax.f32 %v4183_v17, 0.0  ;;  %v2294_v39 = vand.u32 2147483647, %v11923_v32  ;;  %v2296_v33 = vand.u32 2147483648, %v11923_v32  ;;  %v11928_v23 = vsub.f32 1.0, %v11927_v41 }
 0x30a   : > { %v2289_v21 = vadd.f32 %v11922_v28, %v2288_v58  ;;  %v2763_v54 = vsel %vm2760_vm0, %v2762_v44, %v2758_v8  ;;  %v4152_v6 = vmul.f32 %v11924_v43, %v4024_v49  ;;  %vm2770_vm6 = vweird.f32 %v11930_v62  ;;  %v1324_v58 = vpop.f32.mrf.mxu3  ;;  %v10073_v49 = vpop.f32.mrf.mxu0 }
 0x30b   : > { %v2768_v50 = vmul.f32 %v11929_v7, %v11928_v23  ;;  %v4574_v61 = vpack.c.bf16 %v4311_v20, %v4279_v63  ;;  %v4056_v14 = vsub.f32 1.0, %v2763_v54  ;;  %vm2295_vm5 = vcmp.eq.f32.partialorder %v2294_v39, 8.507059e+37  ;;  %v11942_v23 = vld [vmem:[#allocation34_spill] sm:$0xff] }
 0x30c   : > { %v2293_v36 = vsel %vm10044_vm10, %v11922_v28, %v2289_v21  ;;  %v4280_v4 = vmax.f32 %v4152_v6, 0.0  ;;  %v2297_v35 = vor.u32 1.1754944e-38, %v2296_v33  ;;  %vm2771_vm7 = vweird.f32 %v11929_v7  ;;  %v1295_v28 = vpop.f32.mrf.mxu2  ;;  %v11940_v33 = vld [vmem:[#allocation47_spill] sm:$0xff] }
 0x30d   : > { %v2769_v27 = vadd.f32 %v11929_v7, %v2768_v50  ;;  %4885 = vmatpush.bf16.xpose.msrb.mxu0 %v4574_v61  ;;  %v4184_v5 = vmul.f32 %v11931_v30, %v4056_v14  ;;  %v2774_v10 = vand.u32 2147483647, %v11930_v62  ;;  %v2776_v63 = vand.u32 2147483648, %v11930_v62  ;;  %vm10061_vm8 = vmor %vm2770_vm6, %vm2771_vm7  ;;  %v11943_v50 = vld [vmem:[#allocation42_spill] sm:$0xff] }
 0x30e   : > { %v2298_v0 = vsel %vm2295_vm5, %v2297_v35, %v2293_v36  ;;  %v11935_v17 = vsub.f32 1.0, %v11934_v40  ;;  %vm2305_vm1 = vweird.f32 %v11937_v24  ;;  %vm2306_vm9 = vweird.f32 %v11936_v26  ;;  %v11944_v14 = vld [vmem:[#allocation86_spill] sm:$0xff]  ;;  %v1365_v35 = vpop.f32.mrf.mxu1 }
 0x30f   : > { %v4312_v32 = vmax.f32 %v4184_v5, 0.0  ;;  %v2773_v8 = vsel %vm10061_vm8, %v11929_v7, %v2769_v27  ;;  %vm2775_vm11 = vcmp.eq.f32.partialorder %v2774_v10, 8.507059e+37  ;;  %v2777_v44 = vor.u32 1.1754944e-38, %v2776_v63  ;;  %vm10080_vm12 = vmor %vm2305_vm1, %vm2306_vm9  ;;  %v11945_v5 = vld [vmem:[#allocation94_spill] sm:$0xff] }
 0x310   : > { %v2303_v48 = vmul.f32 %v11936_v26, %v11935_v17  ;;  %v4025_v20 = vsub.f32 1.0, %v2298_v0  ;;  %v2309_v39 = vand.u32 2147483647, %v11937_v24  ;;  %v2311_v54 = vand.u32 2147483648, %v11937_v24 }
 0x311   : > { %v4575_v43 = vpack.c.bf16 %v4312_v32, %v4280_v4  ;;  %v2778_v6 = vsel %vm2775_vm11, %v2777_v44, %v2773_v8  ;;  %v11941_v41 = vsub.f32 1.0, %v11940_v33  ;;  %vm2785_vm13 = vweird.f32 %v11943_v50 }
 0x312   : > { %v2304_v21 = vadd.f32 %v11936_v26, %v2303_v48  ;;  %v4057_v61 = vsub.f32 1.0, %v2778_v6  ;;  %v4153_v36 = vmul.f32 %v11944_v14, %v4025_v20  ;;  %vm2310_vm14 = vcmp.eq.f32.partialorder %v2309_v39, 8.507059e+37  ;;  %v11948_v39 = vld [vmem:[#allocation43_spill] sm:$0xff]  ;;  %v1423_v42 = vpop.f32.mrf.mxu3 }
 0x313   : > { %v2783_v7 = vmul.f32 %v11942_v23, %v11941_v41  ;;  %4898 = vmatpush.bf16.xpose.msrb.mxu1 %v4575_v43  ;;  %v2312_v27 = vor.u32 1.1754944e-38, %v2311_v54  ;;  %vm2786_vm15 = vweird.f32 %v11942_v23  ;;  %v2789_v30 = vand.u32 2147483647, %v11943_v50 }
 0x314   : > { %v2308_v4 = vsel %vm10080_vm12, %v11936_v26, %v2304_v21  ;;  %v4185_v10 = vmul.f32 %v11945_v5, %v4057_v61  ;;  %v4281_v63 = vmax.f32 %v4153_v36, 0.0  ;;  %vm10096_vm2 = vmor %vm2785_vm13, %vm2786_vm15  ;;  %v2791_v46 = vand.u32 2147483648, %v11943_v50  ;;  %v1394_v6 = vpop.f32.mrf.mxu2 }
 0x315   : > { %v2784_v62 = vadd.f32 %v11942_v23, %v2783_v7  ;;  %v1296_v40 = vadd.f32 %v1295_v28, %v6810_v2  ;;  %v2313_v17 = vsel %vm2310_vm14, %v2312_v27, %v2308_v4  ;;  %vm2790_vm3 = vcmp.eq.f32.partialorder %v2789_v30, 8.507059e+37  ;;  %v10132_v27 = vld [vmem:[%s9150_s17 + $0x10] sm:$0xff] }
 0x316   : > { %v3789_v48 = vadd.f32 %v9772_v47, %v9808_v56  ;;  %v4313_v24 = vmax.f32 %v4185_v10, 0.0  ;;  %v2792_v32 = vor.u32 1.1754944e-38, %v2791_v46  ;;  %v4026_v8 = vsub.f32 1.0, %v2313_v17  ;;  %v11954_v30 = vld [vmem:[#allocation3_spill] sm:$0xff]  ;;  %v1367_v10 = vpop.f32.mrf.mxu1 }
 0x317   : > { %v2788_v26 = vsel %vm10096_vm2, %v11942_v23, %v2784_v62  ;;  %vm3790_vm0 = vweird.f32 %v9729_v53  ;;  %vm3791_vm4 = vweird.f32 %v9772_v47  ;;  %v3794_v44 = vand.u32 2147483647, %v9729_v53  ;;  %v1338_v23 = vpop.f32.mrf.mxu0 }
 0x318   : > { %v3796_v28 = vand.u32 2147483648, %v9729_v53  ;;  %6229 = vtanh.f32 %v1296_v40  ;;  %v4576_v20 = vpack.c.bf16 %v4313_v24, %v4281_v63  ;;  %v2793_v21 = vsel %vm2790_vm3, %v2792_v32, %v2788_v26  ;;  %vm10112_vm10 = vmor %vm3790_vm0, %vm3791_vm4 }
 0x319   : > { %v4154_v54 = vmul.f32 %v11948_v39, %v4026_v8  ;;  %v1325_v56 = vadd.f32 %v1324_v58, %v6810_v2  ;;  %v4058_v33 = vsub.f32 1.0, %v2793_v21  ;;  %v3793_v41 = vsel %vm10112_vm10, %v9772_v47, %v3789_v48  ;;  %v11951_v58 = vld [vmem:[#allocation49_spill] sm:$0xff] }
 0x31a   : > { %vm3795_vm5 = vcmp.eq.f32.partialorder %v3794_v44, 8.507059e+37  ;;  %v3797_v53 = vor.u32 1.1754944e-38, %v3796_v28  ;;  %4911 = vmatpush.bf16.xpose.msrb.mxu2 %v4576_v20  ;;  %v3804_v50 = vadd.f32 %v9780_v55, %v9821_v51  ;;  %vm3805_vm6 = vweird.f32 %v9738_v9 }
 0x31b   : > { %v4282_v7 = vmax.f32 %v4154_v54, 0.0  ;;  %vm3806_vm7 = vweird.f32 %v9780_v55  ;;  %v4186_v61 = vmul.f32 %v11951_v58, %v4058_v33  ;;  %v3809_v47 = vand.u32 2147483647, %v9738_v9  ;;  %v11959_v54 = vld [vmem:[#allocation4_spill] sm:$0xff] }
 0x31c   : > { %v3798_v14 = vsel %vm3795_vm5, %v3797_v53, %v3793_v41  ;;  %vm10125_vm8 = vmor %vm3805_vm6, %vm3806_vm7  ;;  %v3811_v4 = vand.u32 2147483648, %v9738_v9  ;;  %6231 = vtanh.f32 %v1325_v56  ;;  %v1337_v5 = vadd.f32 %v10073_v49, %v11954_v30  ;;  %v1396_v41 = vpop.f32.mrf.mxu2  ;;  %v1425_v53 = vpop.f32.mrf.mxu3  ;;  %v11967_v49 = vld [vmem:[#allocation75_spill] sm:$0xff] }
 0x31d   : > { %v4125_v62 = vsub.f32 1.0, %v3798_v14  ;;  %v3808_v51 = vsel %vm10125_vm8, %v9780_v55, %v3804_v50  ;;  %v4314_v0 = vmax.f32 %v4186_v61, 0.0  ;;  %vm3810_vm1 = vcmp.eq.f32.partialorder %v3809_v47, 8.507059e+37 }
 0x31e   : > { %v6230_v63 = vpop.eup %6229  ;;  %v3812_v46 = vor.u32 1.1754944e-38, %v3811_v4  ;;  %v1366_v40 = vadd.f32 %v1365_v35, %v11954_v30  ;;  %v5328_v9 = vmul.f32 -1.442695, %v1337_v5  ;;  %v4409_v26 = vperm.slane %v10132_v27, 0  ;;  %v1370_v5 = vpop.f32.mrf.mxu1 }
 0x31f   : > { %v4253_v17 = vmul.f32 %v6230_v63, %v4125_v62  ;;  %v4411_v48 = vperm.slane %v10132_v27, 2  ;;  %v4577_v24 = vpack.c.bf16 %v4314_v0, %v4282_v7  ;;  %v4410_v8 = vperm.slane %v10132_v27, 1  ;;  %v1341_v50 = vpop.f32.mrf.mxu0 }
 0x320   : > { %v3813_v32 = vsel %vm3810_vm1, %v3812_v46, %v3808_v51  ;;  %v5329_v55 = vmul.f32 -1.442695, %v1366_v40  ;;  %6233 = vpow2.f32 %v5328_v9  ;;  %vm4441_vm9 = vcmp.eq.s32.totalorder %v9180_v19, %v4409_v26  ;;  %v11960_v51 = vld [vmem:[#allocation5_spill] sm:$0xff] }
 0x321   : > { %v4126_v44 = vsub.f32 1.0, %v3813_v32  ;;  %vm10145_vm11 = vcmp.eq.s32.totalorder %v9180_v19, %v4411_v48  ;;  %4924 = vmatpush.bf16.xpose.msrb.mxu3 %v4577_v24  ;;  %vm5492_vm12 = vmpackc.low %vm4441_vm9, %vm4441_vm9  ;;  %vm10150_vm13 = vcmp.eq.s32.totalorder %v9180_v19, %v4410_v8  ;;  %v4412_v28 = vperm.slane %v10132_v27, 3  ;;  %v11963_v26 = vld [vmem:[#allocation73_spill] sm:$0xff]  ;;  %v11964_v24 = vld [vmem:[#allocation63_spill] sm:$0xff] }
 0x322   : > { %6235 = vpow2.f32 %v5329_v55  ;;  %v1395_v20 = vadd.f32 %v1394_v6, %v11954_v30  ;;  %v6232_v21 = vpop.eup %6231  ;;  %5493 = vmatmul.msk.bf16.vlgmr.msra.gmra.mxu0 %vm5492_vm12, %v11752_v11  ;;  %vm5496_vm14 = vmpackc.low %vm10145_vm11, %vm10145_vm11  ;;  %v1424_v39 = vadd.f32 %v1423_v42, %v11954_v30  ;;  %v1339_v43 = vadd.f32 %v1338_v23, %v11959_v54 }
 0x323   : > { %v1368_v56 = vadd.f32 %v1367_v10, %v11959_v54  ;;  %v4379_v33 = vmax.f32 %v10002_v31, 0.0  ;;  %v4254_v7 = vmul.f32 %v6232_v21, %v4126_v44  ;;  %5497 = vmatmul.msk.bf16.vlgmr.msra.gmra.mxu2 %vm5496_vm14, %v11752_v11  ;;  %vm5494_vm15 = vmpackc.low %vm10150_vm13, %vm10150_vm13  ;;  %vm4444_vm2 = vcmp.eq.s32.totalorder %v9180_v19, %v4412_v28  ;;  %v11969_v28 = vld [vmem:[#allocation69_spill] sm:$0xff] }
 0x324   : > { %v5330_v6 = vmul.f32 -1.442695, %v1395_v20  ;;  %v4380_v42 = vmax.f32 %v10016_v60, 0.0  ;;  %5495 = vmatmul.msk.bf16.vlgmr.msra.gmra.mxu1 %vm5494_vm15, %v11752_v11  ;;  %vm5498_vm3 = vmpackc.low %vm4444_vm2, %vm4444_vm2  ;;  %v5331_v23 = vmul.f32 -1.442695, %v1424_v39  ;;  %v1397_v36 = vadd.f32 %v1396_v41, %v11959_v54 }
 0x325   : > { %v5360_v31 = vmul.f32 -1.442695, %v1339_v43  ;;  %v5361_v58 = vmul.f32 -1.442695, %v1368_v56  ;;  %v4610_v61 = vpack.c.bf16 %v4379_v33, %v4347_v12  ;;  %5499 = vmatmul.msk.bf16.vlgmr.msra.gmra.mxu3 %vm5498_vm3, %v11752_v11  ;;  %v1426_v60 = vadd.f32 %v1425_v53, %v11959_v54  ;;  %v11970_v53 = vld [vmem:[#allocation107_spill] sm:$0xff] }
 0x326   : > { %6237 = vpow2.f32 %v5330_v6  ;;  %v4611_v14 = vpack.c.bf16 %v4380_v42, %v4348_v59  ;;  %v6234_v47 = vpop.eup %6233  ;;  %v4381_v4 = vmax.f32 %v4253_v17, 0.0  ;;  %v4382_v62 = vmax.f32 %v4254_v7, 0.0  ;;  %v11961_v17 = vld [vmem:[#allocation106_spill] sm:$0xff] }
 0x327   : > { %6239 = vpow2.f32 %v5331_v23  ;;  %4936 = vmatpush.bf16.xpose.msra.mxu0 %v4610_v61  ;;  %v1342_v30 = vadd.f32 %v1341_v50, %v11960_v51  ;;  %v10179_v12 = vadd.f32 1.0, %v6234_v47  ;;  %v5362_v10 = vmul.f32 -1.442695, %v1397_v36 }
 0x328   : > { %v6236_v3 = vpop.eup %6235  ;;  %6241 = vpow2.f32 %v5360_v31  ;;  %4949 = vmatpush.bf16.xpose.msra.mxu1 %v4611_v14  ;;  %v5363_v13 = vmul.f32 -1.442695, %v1426_v60  ;;  %v4612_v63 = vpack.c.bf16 %v4381_v4, %v4349_v37  ;;  %v4613_v0 = vpack.c.bf16 %v4382_v62, %v4350_v52  ;;  %v11971_v14 = vld [vmem:[#allocation97_spill] sm:$0xff] }
 0x329   : > { %v10181_v59 = vadd.f32 1.0, %v6236_v3  ;;  %6243 = vpow2.f32 %v5361_v58  ;;  %v5392_v46 = vmul.f32 -1.442695, %v1342_v30  ;;  %v1371_v40 = vadd.f32 %v1370_v5, %v11960_v51  ;;  %v12008_v30 = vld [vmem:[#allocation71_spill] sm:$0xff] }
 0x32a   : > { %6245 = vrcp.f32 %v10179_v12  ;;  %v11962_v9 = vsub.f32 1.0, %v11961_v17  ;;  %4962 = vmatpush.bf16.xpose.msra.mxu2 %v4612_v63  ;;  %4975 = vmatpush.bf16.xpose.msra.mxu3 %v4613_v0  ;;  %vm2320_vm0 = vweird.f32 %v11964_v24  ;;  %vm2321_vm4 = vweird.f32 %v11963_v26 }
 0x32b   : > { %6247 = vrcp.f32 %v10181_v59  ;;  %v2324_v25 = vand.u32 2147483647, %v11964_v24  ;;  %v5393_v34 = vmul.f32 -1.442695, %v1371_v40  ;;  %v2326_v32 = vand.u32 2147483648, %v11964_v24  ;;  %vm10200_vm10 = vmor %vm2320_vm0, %vm2321_vm4 }
 0x32c   : > { %v2318_v48 = vmul.f32 %v11963_v26, %v11962_v9  ;;  %v6238_v37 = vpop.eup %6237  ;;  %6249 = vpow2.f32 %v5362_v10  ;;  %v11968_v35 = vsub.f32 1.0, %v11967_v49  ;;  %vm2800_vm6 = vweird.f32 %v11970_v53  ;;  %v11975_v9 = vld [vmem:[#allocation99_spill] sm:$0xff] }
 0x32d   : > { %v6240_v55 = vpop.eup %6239  ;;  %v10198_v8 = vadd.f32 1.0, %v6238_v37  ;;  %6251 = vpow2.f32 %v5363_v13  ;;  %vm2325_vm5 = vcmp.eq.f32.partialorder %v2324_v25, 8.507059e+37  ;;  %v2327_v43 = vor.u32 1.1754944e-38, %v2326_v32 }
 0x32e   : > { %v2319_v52 = vadd.f32 %v11963_v26, %v2318_v48  ;;  %v2798_v20 = vmul.f32 %v11969_v28, %v11968_v35  ;;  %v6242_v21 = vpop.eup %6241  ;;  %v10207_v39 = vadd.f32 1.0, %v6240_v55  ;;  %6253 = vpow2.f32 %v5392_v46  ;;  %v11977_v48 = vld [vmem:[#allocation105_spill] sm:$0xff] }
 0x32f   : > { %v6244_v56 = vpop.eup %6243  ;;  %6255 = vrcp.f32 %v10198_v8  ;;  %v10213_v33 = vadd.f32 1.0, %v6242_v21  ;;  %vm2801_vm7 = vweird.f32 %v11969_v28  ;;  %v2804_v31 = vand.u32 2147483647, %v11970_v53 }
 0x330   : > { %v2323_v54 = vsel %vm10200_vm10, %v11963_v26, %v2319_v52  ;;  %v2799_v41 = vadd.f32 %v11969_v28, %v2798_v20  ;;  %v10217_v7 = vpop.eup %6245  ;;  %6257 = vrcp.f32 %v10207_v39  ;;  %v10220_v6 = vadd.f32 1.0, %v6244_v56  ;;  %vm10240_vm8 = vmor %vm2800_vm6, %vm2801_vm7 }
 0x331   : > { %v2328_v42 = vsel %vm2325_vm5, %v2327_v43, %v2323_v54  ;;  %v10223_v50 = vpop.eup %6247  ;;  %v10227_v23 = vmul.f32 %v10217_v7, %v10179_v12  ;;  %6259 = vrcp.f32 %v10213_v33  ;;  %v2806_v58 = vand.u32 2147483648, %v11970_v53 }
 0x332   : > { %v6250_v61 = vpop.eup %6249  ;;  %v2842_v36 = vsub.f32 1.0, %v11971_v14  ;;  %v10235_v60 = vmul.f32 %v10223_v50, %v10181_v59  ;;  %6261 = vrcp.f32 %v10220_v6  ;;  %v4027_v4 = vsub.f32 1.0, %v2328_v42 }
 0x333   : > { %v6252_v62 = vpop.eup %6251  ;;  %v10245_v5 = vadd.f32 1.0, %v6250_v61  ;;  %6263 = vpow2.f32 %v5393_v34  ;;  %v2803_v3 = vsel %vm10240_vm8, %v11969_v28, %v2799_v41  ;;  %vm2805_vm1 = vcmp.eq.f32.partialorder %v2804_v31, 8.507059e+37  ;;  %v11978_v34 = vld [vmem:[#allocation55_spill] sm:$0xff] }
 0x334   : > { %v6254_v10 = vpop.eup %6253  ;;  %v10250_v13 = vadd.f32 1.0, %v6252_v62  ;;  %v2807_v63 = vor.u32 1.1754944e-38, %v2806_v58  ;;  %v4155_v0 = vmul.f32 %v9708_v38, %v4027_v4  ;;  %v11976_v26 = vsub.f32 1.0, %v11975_v9  ;;  %v11981_v62 = vld [vmem:[#allocation111_spill] sm:$0xff] }
 0x335   : > { %v10253_v46 = vpop.eup %6255  ;;  %6265 = vrcp.f32 %v10245_v5  ;;  %v10257_v17 = vadd.f32 1.0, %v6254_v10  ;;  %vm2335_vm9 = vweird.f32 %v11978_v34  ;;  %vm2336_vm11 = vweird.f32 %v11977_v48  ;;  %v11983_v10 = vld [vmem:[#allocation87_spill] sm:$0xff] }
 0x336   : > { %11974 = vst [vmem:[#allocation53_spill] sm:$0xff] %v10250_v13  ;;  %v2333_v24 = vmul.f32 %v11977_v48, %v11976_v26  ;;  %v10262_v25 = vpop.eup %6257  ;;  %v10266_v37 = vmul.f32 %v10253_v46, %v10198_v8  ;;  %6267 = vrcp.f32 %v10250_v13  ;;  %v2808_v38 = vsel %vm2805_vm1, %v2807_v63, %v2803_v3  ;;  %vm10291_vm12 = vmor %vm2335_vm9, %vm2336_vm11  ;;  %v11985_v26 = vld [vmem:[#allocation101_spill] sm:$0xff] }
 0x337   : > { %v10270_v52 = vpop.eup %6259  ;;  %v10274_v32 = vmul.f32 %v10262_v25, %v10207_v39  ;;  %6269 = vrcp.f32 %v10257_v17  ;;  %v4059_v55 = vsub.f32 1.0, %v2808_v38  ;;  %v4283_v28 = vmax.f32 %v4155_v0, 0.0 }
 0x338   : > { %v2334_v44 = vadd.f32 %v11977_v48, %v2333_v24  ;;  %v10278_v49 = vpop.eup %6261  ;;  %v10282_v35 = vmul.f32 %v10270_v52, %v10213_v33  ;;  %v2339_v20 = vand.u32 2147483647, %v11978_v34  ;;  %v2341_v53 = vand.u32 2147483648, %v11978_v34 }
 0x339   : > { %v6264_v21 = vpop.eup %6263  ;;  %v4187_v56 = vmul.f32 %v9794_v57, %v4059_v55  ;;  %v10299_v31 = vmul.f32 %v10278_v49, %v10220_v6  ;;  %v11982_v3 = vsub.f32 1.0, %v11981_v62  ;;  %vm2815_vm14 = vweird.f32 %v11985_v26 }
 0x33a   : > { %v10301_v58 = vadd.f32 1.0, %v6264_v21  ;;  %v2338_v57 = vsel %vm10291_vm12, %v11977_v48, %v2334_v44  ;;  %vm2340_vm13 = vcmp.eq.f32.partialorder %v2339_v20, 8.507059e+37  ;;  %v2342_v4 = vor.u32 1.1754944e-38, %v2341_v53 }
 0x33b   : > { %v10306_v61 = vpop.eup %6265  ;;  %v4315_v47 = vmax.f32 %v4187_v56, 0.0  ;;  %v2813_v63 = vmul.f32 %v11983_v10, %v11982_v3  ;;  %vm2816_vm15 = vweird.f32 %v11983_v10  ;;  %v2819_v56 = vand.u32 2147483647, %v11985_v26 }
 0x33c   : > { %v10311_v0 = vpop.eup %6267  ;;  %v10315_v9 = vmul.f32 %v10306_v61, %v10245_v5  ;;  %6271 = vrcp.f32 %v10301_v58  ;;  %v2343_v34 = vsel %vm2340_vm13, %v2342_v4, %v2338_v57  ;;  %vm10330_vm2 = vmor %vm2815_vm14, %vm2816_vm15  ;;  %v2821_v41 = vand.u32 2147483648, %v11985_v26  ;;  %v1399_v4 = vpop.f32.mrf.mxu2 }
 0x33d   : > { %11984 = vst [vmem:[#allocation122_spill] sm:$0xff] %v10311_v0  ;;  %v10320_v48 = vpop.eup %6269  ;;  %v10324_v24 = vmul.f32 %v10311_v0, %v10250_v13  ;;  %v4578_v38 = vpack.c.bf16 %v4315_v47, %v4283_v28  ;;  %v2814_v55 = vadd.f32 %v11983_v10, %v2813_v63  ;;  %v4413_v47 = vperm.slane %v10132_v27, 4 }
 0x33e   : > { %v3336_v20 = vmul.f32 %v10320_v48, %v10257_v17  ;;  %v2822_v3 = vor.u32 1.1754944e-38, %v2821_v41  ;;  %v4028_v63 = vsub.f32 1.0, %v2343_v34  ;;  %v4415_v43 = vperm.slane %v10132_v27, 6  ;;  %v11989_v41 = vld [vmem:[#allocation24_spill] sm:$0xff] }
 0x33f   : > { %11986 = vst [vmem:[#allocation90_spill] sm:$0xff] %v10324_v24  ;;  %4937 = vmatpush.bf16.xpose.msra.mxu0 %v4578_v38  ;;  %v2818_v57 = vsel %vm10330_vm2, %v11983_v10, %v2814_v55  ;;  %vm2820_vm3 = vcmp.eq.f32.partialorder %v2819_v56, 8.507059e+37  ;;  %vm4445_vm0 = vcmp.eq.s32.totalorder %v9180_v19, %v4413_v47  ;;  %v4414_v26 = vperm.slane %v10132_v27, 5  ;;  %v1428_v38 = vpop.f32.mrf.mxu3  ;;  %v11991_v47 = vld [vmem:[#allocation102_spill] sm:$0xff] }
 0x340   : > { %v3337_v62 = vsub.f32 1.0, %v3336_v20  ;;  %v4416_v28 = vperm.slane %v10132_v27, 7  ;;  %v2823_v21 = vsel %vm2820_vm3, %v2822_v3, %v2818_v57  ;;  %v4156_v10 = vmul.f32 %v9736_v29, %v4028_v63  ;;  %vm5500_vm4 = vmpackc.low %vm4445_vm0, %vm4445_vm0  ;;  %v10358_v27 = vpop.f32.mrf.mxu0  ;;  %v11992_v63 = vld [vmem:[#allocation103_spill] sm:$0xff] }
 0x341   : > { %vm4447_vm10 = vcmp.eq.s32.totalorder %v9180_v19, %v4415_v43  ;;  %v1400_v34 = vadd.f32 %v1399_v4, %v11960_v51  ;;  %v4060_v56 = vsub.f32 1.0, %v2823_v21  ;;  %5501 = vmatmul.msk.bf16.vlgmr.msrb.gmra.mxu0 %vm5500_vm4, %v11752_v11  ;;  %vm4446_vm6 = vcmp.eq.s32.totalorder %v9180_v19, %v4414_v26 }
 0x342   : > { %v10346_v53 = vpop.eup %6271  ;;  %v10352_v55 = vmul.f32 %v10320_v48, %v3337_v62  ;;  %vm5504_vm5 = vmpackc.low %vm4447_vm10, %vm4447_vm10  ;;  %vm4448_vm8 = vcmp.eq.s32.totalorder %v9180_v19, %v4416_v28  ;;  %v1429_v43 = vadd.f32 %v1428_v38, %v11960_v51  ;;  %v11990_v57 = vsub.f32 1.0, %v11989_v41  ;;  %v11997_v41 = vld [vmem:[#allocation20_spill] sm:$0xff] }
 0x343   : > { %v3351_v20 = vmul.f32 %v10346_v53, %v10301_v58  ;;  %5505 = vmatmul.msk.bf16.vlgmr.msrb.gmra.mxu2 %vm5504_vm5, %v11752_v11  ;;  %vm5502_vm7 = vmpackc.low %vm4446_vm6, %vm4446_vm6  ;;  %v5394_v29 = vmul.f32 -1.442695, %v1400_v34  ;;  %v4188_v3 = vmul.f32 %v9801_v15, %v4060_v56  ;;  %vm2350_vm9 = vweird.f32 %v11992_v63 }
 0x344   : > { %v2348_v4 = vmul.f32 %v11991_v47, %v11990_v57  ;;  %5503 = vmatmul.msk.bf16.vlgmr.msrb.gmra.mxu1 %vm5502_vm7, %v11752_v11  ;;  %vm5506_vm1 = vmpackc.low %vm4448_vm8, %vm4448_vm8  ;;  %vm2351_vm11 = vweird.f32 %v11991_v47  ;;  %v5395_v28 = vmul.f32 -1.442695, %v1429_v43  ;;  %v2354_v26 = vand.u32 2147483647, %v11992_v63 }
 0x345   : > { %v3352_v62 = vsub.f32 1.0, %v3351_v20  ;;  %5507 = vmatmul.msk.bf16.vlgmr.msrb.gmra.mxu3 %vm5506_vm1, %v11752_v11  ;;  %6273 = vpow2.f32 %v5394_v29  ;;  %v4284_v38 = vmax.f32 %v4156_v10, 0.0  ;;  %v4316_v21 = vmax.f32 %v4188_v3, 0.0  ;;  %vm10373_vm12 = vmor %vm2350_vm9, %vm2351_vm11  ;;  %v11995_v20 = vld [vmem:[#allocation88_spill] sm:$0xff] }
 0x346   : > { %v2349_v51 = vadd.f32 %v11991_v47, %v2348_v4  ;;  %v2356_v15 = vand.u32 2147483648, %v11992_v63  ;;  %v11996_v56 = vsub.f32 1.0, %v11995_v20  ;;  %6275 = vpow2.f32 %v5395_v28  ;;  %v11998_v10 = vld [vmem:[#allocation80_spill] sm:$0xff]  ;;  %v12001_v20 = vld [vmem:[#allocation119_spill] sm:$0xff] }
 0x347   : > { %v10382_v54 = vmul.f32 %v10346_v53, %v3352_v62  ;;  %vm2830_vm13 = vweird.f32 %v11998_v10  ;;  %v4579_v43 = vpack.c.bf16 %v4316_v21, %v4284_v38  ;;  %vm2831_vm14 = vweird.f32 %v11997_v41 }
 0x348   : > { %v2828_v57 = vmul.f32 %v11997_v41, %v11996_v56  ;;  %v2353_v29 = vsel %vm10373_vm12, %v11991_v47, %v2349_v51  ;;  %v2357_v4 = vor.u32 1.1754944e-38, %v2356_v15  ;;  %vm2355_vm15 = vcmp.eq.f32.partialorder %v2354_v26, 8.507059e+37  ;;  %vm10390_vm2 = vmor %vm2830_vm13, %vm2831_vm14  ;;  %v12003_v47 = vld [vmem:[#allocation78_spill] sm:$0xff]  ;;  %v1372_v56 = vpop.f32.mrf.mxu1  ;;  %v12004_v26 = vld [vmem:[#allocation100_spill] sm:$0xff] }
 0x349   : > { %v2834_v62 = vand.u32 2147483647, %v11998_v10  ;;  %v2836_v28 = vand.u32 2147483648, %v11998_v10  ;;  %v12002_v34 = vsub.f32 1.0, %v12001_v20  ;;  %4950 = vmatpush.bf16.xpose.msra.mxu1 %v4579_v43  ;;  %vm2366_vm3 = vweird.f32 %v12003_v47  ;;  %v1430_v20 = vpop.f32.mrf.mxu3  ;;  %v12007_v43 = vld [vmem:[#allocation46_spill] sm:$0xff] }
 0x34a   : > { %v2829_v3 = vadd.f32 %v11997_v41, %v2828_v57  ;;  %v2358_v38 = vsel %vm2355_vm15, %v2357_v4, %v2353_v29  ;;  %v2369_v15 = vand.u32 2147483647, %v12004_v26  ;;  %v1401_v57 = vpop.f32.mrf.mxu2  ;;  %vm2365_vm0 = vweird.f32 %v12004_v26  ;;  %v12011_v29 = vld [vmem:[#allocation9_spill] sm:$0xff] }
 0x34b   : > { %v2363_v51 = vmul.f32 %v12003_v47, %v12002_v34  ;;  %v6274_v44 = vpop.eup %6273  ;;  %v2837_v40 = vor.u32 1.1754944e-38, %v2836_v28  ;;  %v4029_v42 = vsub.f32 1.0, %v2358_v38  ;;  %vm2835_vm4 = vcmp.eq.f32.partialorder %v2834_v62, 8.507059e+37  ;;  %vm10408_vm10 = vmor %vm2365_vm0, %vm2366_vm3 }
 0x34c   : > { %v2833_v21 = vsel %vm10390_vm2, %v11997_v41, %v2829_v3  ;;  %v10406_v34 = vadd.f32 1.0, %v6274_v44  ;;  %v2371_v41 = vand.u32 2147483648, %v12004_v26  ;;  %v2843_v4 = vmul.f32 %v12007_v43, %v2842_v36  ;;  %v1346_v3 = vpop.f32.mrf.mxu0  ;;  %v6276_v63 = vpop.eup %6275 }
 0x34d   : > { %v2364_v10 = vadd.f32 %v12003_v47, %v2363_v51  ;;  %v2838_v28 = vsel %vm2835_vm4, %v2837_v40, %v2833_v21  ;;  %v4157_v51 = vmul.f32 %v9756_v45, %v4029_v42  ;;  %vm2370_vm5 = vcmp.eq.f32.partialorder %v2369_v15, 8.507059e+37  ;;  %v10444_v42 = vld [vmem:[%s9150_s17 + $0x18] sm:$0xff] }
 0x34e   : > { %6277 = vrcp.f32 %v10406_v34  ;;  %v10421_v62 = vadd.f32 1.0, %v6276_v63  ;;  %v4061_v38 = vsub.f32 1.0, %v2838_v28  ;;  %v2372_v26 = vor.u32 1.1754944e-38, %v2371_v41  ;;  %12013 = vst [vmem:[#allocation98_spill] sm:$0xff] %v10444_v42 }
 0x34f   : > { %v2368_v44 = vsel %vm10408_vm10, %v12003_v47, %v2364_v10  ;;  %v2844_v14 = vadd.f32 %v12007_v43, %v2843_v4  ;;  %vm2845_vm6 = vweird.f32 %v12008_v30  ;;  %vm2846_vm7 = vweird.f32 %v12007_v43 }
 0x350   : > { %v2849_v36 = vand.u32 2147483647, %v12008_v30  ;;  %6279 = vrcp.f32 %v10421_v62  ;;  %v4189_v45 = vmul.f32 %v9901_v16, %v4061_v38  ;;  %v2373_v40 = vsel %vm2370_vm5, %v2372_v26, %v2368_v44  ;;  %vm10429_vm8 = vmor %vm2845_vm6, %vm2846_vm7  ;;  %v1375_v4 = vpop.f32.mrf.mxu1  ;;  %v12012_v26 = vld [vmem:[#allocation72_spill] sm:$0xff] }
 0x351   : > { %v2851_v47 = vand.u32 2147483648, %v12008_v30  ;;  %v4285_v21 = vmax.f32 %v4157_v51, 0.0  ;;  %v2848_v15 = vsel %vm10429_vm8, %v12007_v43, %v2844_v14  ;;  %v4030_v10 = vsub.f32 1.0, %v2373_v40  ;;  %v1433_v43 = vpop.f32.mrf.mxu3 }
 0x352   : > { %v1344_v41 = vadd.f32 %v10358_v27, %v12011_v29  ;;  %v4317_v63 = vmax.f32 %v4189_v45, 0.0  ;;  %v1373_v28 = vadd.f32 %v1372_v56, %v12011_v29  ;;  %v1402_v44 = vadd.f32 %v1401_v57, %v12011_v29  ;;  %v1404_v38 = vpop.f32.mrf.mxu2 }
 0x353   : > { %v2852_v16 = vor.u32 1.1754944e-38, %v2851_v47  ;;  %vm2850_vm1 = vcmp.eq.f32.partialorder %v2849_v36, 8.507059e+37  ;;  %v4158_v30 = vmul.f32 %v12012_v26, %v4030_v10  ;;  %v1431_v13 = vadd.f32 %v1430_v20, %v12011_v29  ;;  %v12014_v36 = vld [vmem:[#allocation16_spill] sm:$0xff] }
 0x354   : > { %v5424_v51 = vmul.f32 -1.442695, %v1344_v41  ;;  %v10446_v14 = vpop.eup %6277  ;;  %v4580_v27 = vpack.c.bf16 %v4317_v63, %v4285_v21  ;;  %v5425_v45 = vmul.f32 -1.442695, %v1373_v28  ;;  %v5426_v47 = vmul.f32 -1.442695, %v1402_v44  ;;  %v1348_v0 = vpop.f32.mrf.mxu0 }
 0x355   : > { %v2853_v40 = vsel %vm2850_vm1, %v2852_v16, %v2848_v15  ;;  %v3366_v56 = vmul.f32 %v10446_v14, %v10406_v34  ;;  %v1347_v10 = vadd.f32 %v1346_v3, %v12014_v36  ;;  %v5427_v20 = vmul.f32 -1.442695, %v1431_v13 }
 0x356   : > { %v4062_v57 = vsub.f32 1.0, %v2853_v40  ;;  %6281 = vpow2.f32 %v5424_v51  ;;  %v10451_v41 = vpop.eup %6279  ;;  %4963 = vmatpush.bf16.xpose.msra.mxu2 %v4580_v27  ;;  %v1376_v29 = vadd.f32 %v1375_v4, %v12014_v36  ;;  %v4417_v21 = vperm.slane %v10444_v42, 0 }
 0x357   : > { %6283 = vpow2.f32 %v5425_v45  ;;  %v3367_v15 = vsub.f32 1.0, %v3366_v56  ;;  %v3381_v63 = vmul.f32 %v10451_v41, %v10421_v62  ;;  %v4419_v3 = vperm.slane %v10444_v42, 2 }
 0x358   : > { %v4190_v16 = vmul.f32 %v9909_v1, %v4062_v57  ;;  %6285 = vpow2.f32 %v5426_v47  ;;  %vm4449_vm9 = vcmp.eq.s32.totalorder %v9180_v19, %v4417_v21  ;;  %v4418_v28 = vperm.slane %v10444_v42, 1  ;;  %v1377_v51 = vpop.f32.mrf.mxu1 }
 0x359   : > { %6287 = vpow2.f32 %v5427_v20  ;;  %v10462_v13 = vmul.f32 %v10446_v14, %v3367_v15  ;;  %v3382_v4 = vsub.f32 1.0, %v3381_v63  ;;  %v4286_v44 = vmax.f32 %v4158_v30, 0.0  ;;  %vm5508_vm11 = vmpackc.low %vm4449_vm9, %vm4449_vm9 }
 0x35a   : > { %v4318_v26 = vmax.f32 %v4190_v16, 0.0  ;;  %6289 = vtanh.f32 %v1347_v10  ;;  %5509 = vmatmul.msk.bf16.vlgmr.msra.gmra.mxu0 %vm5508_vm11, %v11752_v11  ;;  %vm10466_vm12 = vcmp.eq.s32.totalorder %v9180_v19, %v4419_v3  ;;  %vm10471_vm13 = vcmp.eq.s32.totalorder %v9180_v19, %v4418_v28  ;;  %v1406_v45 = vpop.f32.mrf.mxu2  ;;  %v1435_v10 = vpop.f32.mrf.mxu3 }
 0x35b   : > { %v4420_v40 = vperm.slane %v10444_v42, 3  ;;  %v10477_v47 = vmul.f32 %v10451_v41, %v3382_v4  ;;  %6291 = vtanh.f32 %v1376_v29  ;;  %vm5512_vm14 = vmpackc.low %vm10466_vm12, %vm10466_vm12  ;;  %v1405_v57 = vadd.f32 %v1404_v38, %v12014_v36 }
 0x35c   : > { %v6282_v30 = vpop.eup %6281  ;;  %v4581_v56 = vpack.c.bf16 %v4318_v26, %v4286_v44  ;;  %vm5510_vm15 = vmpackc.low %vm10471_vm13, %vm10471_vm13  ;;  %v1434_v29 = vadd.f32 %v1433_v43, %v12014_v36  ;;  %v1349_v63 = vadd.f32 %v1348_v0, %v11335_v22  ;;  %v1351_v16 = vpop.f32.mrf.mxu0  ;;  %v1378_v28 = vadd.f32 %v1377_v51, %v11335_v22 }
 0x35d   : > { %v6284_v20 = vpop.eup %6283  ;;  %v10483_v21 = vadd.f32 1.0, %v6282_v30  ;;  %vm10489_vm2 = vcmp.eq.s32.totalorder %v9180_v19, %v4420_v40  ;;  %5513 = vmatmul.msk.bf16.vlgmr.msra.gmra.mxu2 %vm5512_vm14, %v11752_v11  ;;  %6293 = vtanh.f32 %v1405_v57  ;;  %v1407_v4 = vadd.f32 %v1406_v45, %v11335_v22  ;;  %5511 = vmatmul.msk.bf16.vlgmr.msra.gmra.mxu1 %vm5510_vm15, %v11752_v11 }
 0x35e   : > { %v6286_v3 = vpop.eup %6285  ;;  %4976 = vmatpush.bf16.xpose.msra.mxu3 %v4581_v56  ;;  %v10495_v38 = vadd.f32 1.0, %v6284_v20  ;;  %v10505_v0 = vadd.f32 %v1435_v10, %v11335_v22  ;;  %v3339_v43 = vadd.f32 %v10320_v48, %v10352_v55  ;;  %vm3340_vm3 = vweird.f32 %v10257_v17  ;;  %vm5514_vm10 = vmpackc.low %vm10489_vm2, %vm10489_vm2 }
 0x35f   : > { %v6288_v44 = vpop.eup %6287  ;;  %6295 = vrcp.f32 %v10483_v21  ;;  %v10501_v26 = vadd.f32 1.0, %v6286_v3  ;;  %vm3341_vm0 = vweird.f32 %v10320_v48  ;;  %v3344_v22 = vand.u32 2147483647, %v10257_v17 }
 0x360   : > { %6297 = vrcp.f32 %v10495_v38  ;;  %v10510_v36 = vadd.f32 1.0, %v6288_v44  ;;  %v10514_v51 = vpop.eup %6289  ;;  %vm10517_vm4 = vmor %vm3340_vm3, %vm3341_vm0  ;;  %v3346_v55 = vand.u32 2147483648, %v10257_v17  ;;  %v3354_v27 = vadd.f32 %v10346_v53, %v10382_v54  ;;  %v1380_v56 = vpop.f32.mrf.mxu1 }
 0x361   : > { %6299 = vrcp.f32 %v10501_v26  ;;  %v10525_v40 = vpop.eup %6291  ;;  %v1352_v45 = vadd.f32 %v1351_v16, %v6710_v18  ;;  %v3343_v30 = vsel %vm10517_vm4, %v10320_v48, %v3339_v43  ;;  %vm3356_vm5 = vweird.f32 %v10346_v53 }
 0x362   : > { %6301 = vrcp.f32 %v10510_v36  ;;  %vm3345_vm6 = vcmp.eq.f32.partialorder %v3344_v22, 8.507059e+37  ;;  %v3347_v17 = vor.u32 1.1754944e-38, %v3346_v55  ;;  %vm3355_vm7 = vweird.f32 %v10301_v58  ;;  %v1409_v54 = vpop.f32.mrf.mxu2  ;;  %v1438_v3 = vpop.f32.mrf.mxu3 }
 0x363   : > { %6303 = vtanh.f32 %v1434_v29  ;;  %v10537_v57 = vpop.eup %6293  ;;  %v1381_v10 = vadd.f32 %v1380_v56, %v6710_v18  ;;  %vm10540_vm8 = vmor %vm3355_vm7, %vm3356_vm5  ;;  %v3359_v48 = vand.u32 2147483647, %v10301_v58  ;;  %v3361_v16 = vand.u32 2147483648, %v10301_v58 }
 0x364   : > { %12023 = vst [vmem:[#allocation79_spill] sm:$0xff] %v10537_v57  ;;  %6305 = vtanh.f32 %v1349_v63  ;;  %v3348_v63 = vsel %vm3345_vm6, %v3347_v17, %v3343_v30  ;;  %v3358_v44 = vsel %vm10540_vm8, %v10346_v53, %v3354_v27  ;;  %v1410_v43 = vadd.f32 %v1409_v54, %v6710_v18  ;;  %v1353_v1 = vpop.f32.mrf.mxu0 }
 0x365   : > { %v10546_v29 = vpop.eup %6295  ;;  %5515 = vmatmul.msk.bf16.vlgmr.msra.gmra.mxu3 %vm5514_vm10, %v11752_v11  ;;  %6307 = vtanh.f32 %v1378_v28  ;;  %v4095_v55 = vsub.f32 1.0, %v3348_v63  ;;  %v3369_v15 = vadd.f32 %v10446_v14, %v10462_v13  ;;  %vm3360_vm1 = vcmp.eq.f32.partialorder %v3359_v48, 8.507059e+37 }
 0x366   : > { %v10558_v58 = vpop.eup %6297  ;;  %v3816_v22 = vmul.f32 %v10546_v29, %v10483_v21  ;;  %6309 = vtanh.f32 %v1407_v4  ;;  %v3362_v53 = vor.u32 1.1754944e-38, %v3361_v16  ;;  %vm3370_vm9 = vweird.f32 %v10406_v34 }
 0x367   : > { %v10564_v56 = vpop.eup %6299  ;;  %v3831_v28 = vmul.f32 %v10558_v58, %v10495_v38  ;;  %6311 = vtanh.f32 %v1352_v45  ;;  %vm3371_vm11 = vweird.f32 %v10446_v14  ;;  %v3376_v19 = vand.u32 2147483648, %v10406_v34 }
 0x368   : > { %v10569_v27 = vpop.eup %6301  ;;  %v3817_v30 = vsub.f32 1.0, %v3816_v22  ;;  %v3846_v17 = vmul.f32 %v10564_v56, %v10501_v26  ;;  %v3363_v20 = vsel %vm3360_vm1, %v3362_v53, %v3358_v44  ;;  %6313 = vtanh.f32 %v1381_v10  ;;  %vm10578_vm12 = vmor %vm3370_vm9, %vm3371_vm11 }
 0x369   : > { %v10574_v4 = vpop.eup %6303  ;;  %v3832_v13 = vsub.f32 1.0, %v3831_v28  ;;  %v3861_v54 = vmul.f32 %v10569_v27, %v10510_v36  ;;  %v4096_v45 = vsub.f32 1.0, %v3363_v20  ;;  %v3373_v11 = vsel %vm10578_vm12, %v10446_v14, %v3369_v15  ;;  %v1382_v28 = vpop.f32.mrf.mxu1 }
 0x36a   : > { %12026 = vst [vmem:[#allocation115_spill] sm:$0xff] %v10574_v4  ;;  %v10582_v16 = vpop.eup %6305  ;;  %v3818_v63 = vmul.f32 %v10546_v29, %v3817_v30  ;;  %v3847_v22 = vsub.f32 1.0, %v3846_v17  ;;  %v3374_v53 = vand.u32 2147483647, %v10406_v34  ;;  %v1411_v42 = vpop.f32.mrf.mxu2  ;;  %6315 = vtanh.f32 %v1410_v43 }
 0x36b   : > { %v10588_v4 = vpop.eup %6307  ;;  %v3833_v44 = vmul.f32 %v10558_v58, %v3832_v13  ;;  %v3862_v10 = vsub.f32 1.0, %v3861_v54  ;;  %v1439_v17 = vadd.f32 %v1438_v3, %v6710_v18  ;;  %v3384_v14 = vadd.f32 %v10451_v41, %v10477_v47  ;;  %v10601_v15 = vpop.f32.mrf.mxu3 }
 0x36c   : > { %v10593_v57 = vpop.eup %6309  ;;  %v10596_v30 = vmul.f32 %v10564_v56, %v3847_v22  ;;  %vm3375_vm13 = vcmp.eq.f32.partialorder %v3374_v53, 8.507059e+37  ;;  %v3377_v54 = vor.u32 1.1754944e-38, %v3376_v19  ;;  %vm3385_vm14 = vweird.f32 %v10421_v62  ;;  %v10607_v34 = vpop.f32.mrf.mxu0 }
 0x36d   : > { %12029 = vst [vmem:[#allocation83_spill] sm:$0xff] %v10593_v57  ;;  %v10604_v13 = vmul.f32 %v10569_v27, %v3862_v10  ;;  %v6312_v20 = vpop.eup %6311  ;;  %vm3386_vm15 = vweird.f32 %v10451_v41  ;;  %v3389_v43 = vand.u32 2147483647, %v10421_v62  ;;  %v3391_v18 = vand.u32 2147483648, %v10421_v62 }
 0x36e   : > { %6317 = vtanh.f32 %v1439_v17  ;;  %v6314_v47 = vpop.eup %6313  ;;  %v10612_v3 = vmul.f32 %v6312_v20, %v4095_v55  ;;  %v3378_v48 = vsel %vm3375_vm13, %v3377_v54, %v3373_v11  ;;  %vm10614_vm2 = vmor %vm3385_vm14, %vm3386_vm15  ;;  %v1354_v19 = vadd.f32 %v1353_v1, %v6810_v2 }
 0x36f   : > { %v3819_v10 = vadd.f32 %v10546_v29, %v3818_v63  ;;  %v10620_v53 = vmul.f32 %v6314_v47, %v4096_v45  ;;  %v4097_v57 = vsub.f32 1.0, %v3378_v48  ;;  %v3388_v62 = vsel %vm10614_vm2, %v10451_v41, %v3384_v14 }
 0x370   : > { %vm3390_vm3 = vcmp.eq.f32.partialorder %v3389_v43, 8.507059e+37  ;;  %v3392_v17 = vor.u32 1.1754944e-38, %v3391_v18  ;;  %vm3820_vm0 = vweird.f32 %v10483_v21  ;;  %vm3821_vm4 = vweird.f32 %v10546_v29  ;;  %v6316_v11 = vpop.eup %6315 }
 0x371   : > { %vm10629_vm10 = vmor %vm3820_vm0, %vm3821_vm4  ;;  %v3824_v45 = vand.u32 2147483647, %v10483_v21  ;;  %v3826_v54 = vand.u32 2147483648, %v10483_v21  ;;  %6319 = vtanh.f32 %v1354_v19  ;;  %v4640_v41 = vpop.f32.mrf.mxu1  ;;  %v10635_v14 = vmul.f32 %v6316_v11, %v4097_v57 }
 0x372   : > { %v3393_v20 = vsel %vm3390_vm3, %v3392_v17, %v3388_v62  ;;  %v3823_v43 = vsel %vm10629_vm10, %v10546_v29, %v3819_v10  ;;  %v1383_v18 = vadd.f32 %v1382_v28, %v6810_v2  ;;  %v4653_v47 = vpop.f32.mrf.mxu2  ;;  %v3834_v55 = vadd.f32 %v10558_v58, %v3833_v44 }
 0x373   : > { %v4098_v22 = vsub.f32 1.0, %v3393_v20  ;;  %vm3825_vm5 = vcmp.eq.f32.partialorder %v3824_v45, 8.507059e+37  ;;  %v3827_v1 = vor.u32 1.1754944e-38, %v3826_v54  ;;  %v10642_v24 = vpop.f32.mrf.mxu3  ;;  %v4353_v21 = vmax.f32 %v10635_v14, 0.0 }
 0x374   : > { %v6318_v48 = vpop.eup %6317  ;;  %vm3835_vm6 = vweird.f32 %v10495_v38  ;;  %vm3836_vm7 = vweird.f32 %v10558_v58  ;;  %v3839_v57 = vand.u32 2147483647, %v10495_v38  ;;  %v4629_v29 = vpop.f32.mrf.mxu0  ;;  %v3841_v44 = vand.u32 2147483648, %v10495_v38 }
 0x375   : > { %v10648_v19 = vmul.f32 %v6318_v48, %v4098_v22  ;;  %v3828_v28 = vsel %vm3825_vm5, %v3827_v1, %v3823_v43  ;;  %vm10650_vm8 = vmor %vm3835_vm6, %vm3836_vm7  ;;  %6321 = vtanh.f32 %v1383_v18  ;;  %v1412_v11 = vadd.f32 %v1411_v42, %v6810_v2 }
 0x376   : > { %v4127_v62 = vsub.f32 1.0, %v3828_v28  ;;  %v3838_v17 = vsel %vm10650_vm8, %v10558_v58, %v3834_v55  ;;  %vm3840_vm1 = vcmp.eq.f32.partialorder %v3839_v57, 8.507059e+37  ;;  %v3842_v54 = vor.u32 1.1754944e-38, %v3841_v44 }
 0x377   : > { %v6320_v63 = vpop.eup %6319  ;;  %v4354_v45 = vmax.f32 %v10648_v19, 0.0  ;;  %v3849_v1 = vadd.f32 %v10564_v56, %v10596_v30  ;;  %vm3850_vm9 = vweird.f32 %v10501_v26  ;;  %vm3851_vm11 = vweird.f32 %v10564_v56 }
 0x378   : > { %v4255_v20 = vmul.f32 %v6320_v63, %v4127_v62  ;;  %v3854_v38 = vand.u32 2147483647, %v10501_v26  ;;  %v3856_v43 = vand.u32 2147483648, %v10501_v26  ;;  %v3843_v58 = vsel %vm3840_vm1, %v3842_v54, %v3838_v17  ;;  %vm10666_vm12 = vmor %vm3850_vm9, %vm3851_vm11 }
 0x379   : > { %6323 = vtanh.f32 %v1412_v11  ;;  %v1441_v42 = vadd.f32 %v10601_v15, %v6810_v2  ;;  %v3864_v30 = vadd.f32 %v10569_v27, %v10604_v13  ;;  %v4642_v18 = vpop.f32.mrf.mxu1  ;;  %v4128_v22 = vsub.f32 1.0, %v3843_v58 }
 0x37a   : > { %v4383_v48 = vmax.f32 %v4255_v20, 0.0  ;;  %v3853_v57 = vsel %vm10666_vm12, %v10564_v56, %v3849_v1  ;;  %vm3855_vm13 = vcmp.eq.f32.partialorder %v3854_v38, 8.507059e+37  ;;  %v4655_v26 = vpop.f32.mrf.mxu2  ;;  %v3857_v28 = vor.u32 1.1754944e-38, %v3856_v43 }
 0x37b   : > { %v6322_v29 = vpop.eup %6321  ;;  %vm3865_vm14 = vweird.f32 %v10510_v36  ;;  %vm3866_vm15 = vweird.f32 %v10569_v27  ;;  %v3869_v2 = vand.u32 2147483647, %v10510_v36  ;;  %v4668_v15 = vpop.f32.mrf.mxu3  ;;  %v3871_v44 = vand.u32 2147483648, %v10510_v36 }
 0x37c   : > { %v4256_v10 = vmul.f32 %v6322_v29, %v4128_v22  ;;  %vm10680_vm2 = vmor %vm3865_vm14, %vm3866_vm15  ;;  %6325 = vtanh.f32 %v1441_v42  ;;  %v4641_v56 = vadd.f32 %v4640_v41, %v10607_v34  ;;  %v4679_v62 = vpop.f32.mrf.mxu0  ;;  %v3858_v17 = vsel %vm3855_vm13, %v3857_v28, %v3853_v57 }
 0x37d   : > { %v3868_v11 = vsel %vm10680_vm2, %v10569_v27, %v3864_v30  ;;  %vm3870_vm3 = vcmp.eq.f32.partialorder %v3869_v2, 8.507059e+37  ;;  %v12040_v63 = vmax.f32 %v10612_v3, 0.0  ;;  %v4129_v20 = vsub.f32 1.0, %v3858_v17 }
 0x37e   : > { %v4384_v1 = vmax.f32 %v4256_v10, 0.0  ;;  %v3872_v38 = vor.u32 1.1754944e-38, %v3871_v44  ;;  %v4654_v43 = vadd.f32 %v4653_v47, %v4641_v56  ;;  %v12041_v36 = vsub.f32 1.0, %v10227_v23 }
 0x37f   : > { %v4614_v54 = vpack.c.bf16 %v4383_v48, %v12040_v63  ;;  %v6324_v58 = vpop.eup %6323  ;;  %vm2380_vm0 = vweird.f32 %v10179_v12  ;;  %vm2381_vm4 = vweird.f32 %v10217_v7  ;;  %v2384_v27 = vand.u32 2147483647, %v10179_v12 }
 0x380   : > { %v2378_v34 = vmul.f32 %v10217_v7, %v12041_v36  ;;  %v4257_v41 = vmul.f32 %v6324_v58, %v4129_v20  ;;  %v3873_v55 = vsel %vm3870_vm3, %v3872_v38, %v3868_v11  ;;  %v4667_v3 = vadd.f32 %v10642_v24, %v4654_v43  ;;  %vm2382_vm5 = vmor %vm2380_vm0, %vm2381_vm4 }
 0x381   : > { %4988 = vmatpush.bf16.xpose.msrb.mxu0 %v4614_v54  ;;  %v12042_v42 = vmax.f32 %v10620_v53, 0.0  ;;  %v4130_v47 = vsub.f32 1.0, %v3873_v55  ;;  %vm10701_vm10 = vcmp.eq.f32.partialorder %v2384_v27, 8.507059e+37  ;;  %v2386_v48 = vand.u32 2147483648, %v10179_v12  ;;  %v4692_v22 = vpop.f32.mrf.mxu1 }
 0x382   : > { %v2379_v18 = vadd.f32 %v10217_v7, %v2378_v34  ;;  %v6326_v57 = vpop.eup %6325  ;;  %v4385_v26 = vmax.f32 %v4257_v41, 0.0  ;;  %v4680_v29 = vadd.f32 %v4679_v62, %v4667_v3  ;;  %v12045_v24 = vsub.f32 1.0, %v10282_v35  ;;  %v4705_v28 = vpop.f32.mrf.mxu2 }
 0x383   : > { %v4615_v30 = vpack.c.bf16 %v4384_v1, %v12042_v42  ;;  %vm2860_vm6 = vweird.f32 %v10213_v33  ;;  %v4258_v2 = vmul.f32 %v6326_v57, %v4130_v47  ;;  %v2387_v10 = vor.u32 1.1754944e-38, %v2386_v48  ;;  %v10728_v54 = vpop.f32.mrf.mxu3 }
 0x384   : > { %v2858_v53 = vmul.f32 %v10270_v52, %v12045_v24  ;;  %v2383_v15 = vsel %vm2382_vm5, %v10217_v7, %v2379_v18  ;;  %vm2861_vm7 = vweird.f32 %v10270_v52  ;;  %v4616_v13 = vpack.c.bf16 %v4385_v26, %v4353_v21  ;;  %v4681_v56 = vpop.f32.mrf.mxu0 }
 0x385   : > { %5001 = vmatpush.bf16.xpose.msrb.mxu1 %v4615_v30  ;;  %v2864_v12 = vand.u32 2147483647, %v10213_v33  ;;  %v2866_v35 = vand.u32 2147483648, %v10213_v33  ;;  %v4386_v62 = vmax.f32 %v4258_v2, 0.0  ;;  %v2388_v17 = vsel %vm10701_vm10, %v2387_v10, %v2383_v15  ;;  %vm2862_vm8 = vmor %vm2860_vm6, %vm2861_vm7 }
 0x386   : > { %v2859_v44 = vadd.f32 %v10270_v52, %v2858_v53  ;;  %v12046_v7 = vsub.f32 1.0, %v10235_v60  ;;  %vm2395_vm1 = vweird.f32 %v10181_v59  ;;  %5014 = vmatpush.bf16.xpose.msrb.mxu2 %v4616_v13  ;;  %v4031_v63 = vsub.f32 1.0, %v2388_v17 }
 0x387   : > { %vm2865_vm9 = vcmp.eq.f32.partialorder %v2864_v12, 8.507059e+37  ;;  %v2867_v21 = vor.u32 1.1754944e-38, %v2866_v35  ;;  %v4617_v33 = vpack.c.bf16 %v4386_v62, %v4354_v45  ;;  %vm2396_vm11 = vweird.f32 %v10223_v50 }
 0x388   : > { %v2393_v11 = vmul.f32 %v10223_v50, %v12046_v7  ;;  %v2863_v14 = vsel %vm2862_vm8, %v10270_v52, %v2859_v44  ;;  %v2399_v60 = vand.u32 2147483647, %v10181_v59  ;;  %v4159_v38 = vmul.f32 %v10514_v51, %v4031_v63  ;;  %vm10736_vm12 = vmor %vm2395_vm1, %vm2396_vm11 }
 0x389   : > { %v2868_v20 = vsel %vm2865_vm9, %v2867_v21, %v2863_v14  ;;  %v2401_v52 = vand.u32 2147483648, %v10181_v59  ;;  %v12049_v58 = vsub.f32 1.0, %v10299_v31  ;;  %5027 = vmatpush.bf16.xpose.msrb.mxu3 %v4617_v33  ;;  %vm2875_vm14 = vweird.f32 %v10220_v6  ;;  %v4694_v51 = vpop.f32.mrf.mxu1 }
 0x38a   : > { %v2394_v1 = vadd.f32 %v10223_v50, %v2393_v11  ;;  %v4063_v45 = vsub.f32 1.0, %v2868_v20  ;;  %vm2400_vm13 = vcmp.eq.f32.partialorder %v2399_v60, 8.507059e+37  ;;  %v4287_v34 = vmax.f32 %v4159_v38, 0.0  ;;  %v4707_v59 = vpop.f32.mrf.mxu2  ;;  %v12064_v51 = vld [vmem:[#allocation79_spill] sm:$0xff] }
 0x38b   : > { %v2873_v19 = vmul.f32 %v10278_v49, %v12049_v58  ;;  %v2402_v27 = vor.u32 1.1754944e-38, %v2401_v52  ;;  %vm2876_vm15 = vweird.f32 %v10278_v49  ;;  %v2879_v3 = vand.u32 2147483647, %v10220_v6  ;;  %v12061_v52 = vld [vmem:[#allocation90_spill] sm:$0xff] }
 0x38c   : > { %v2398_v36 = vsel %vm10736_vm12, %v10223_v50, %v2394_v1  ;;  %v4191_v31 = vmul.f32 %v10582_v16, %v4063_v45  ;;  %vm10751_vm2 = vmor %vm2875_vm14, %vm2876_vm15  ;;  %v2881_v50 = vand.u32 2147483648, %v10220_v6  ;;  %v4693_v42 = vadd.f32 %v4692_v22, %v4680_v29  ;;  %v10764_v26 = vpop.f32.mrf.mxu0  ;;  %v4720_v22 = vpop.f32.mrf.mxu3  ;;  %v12063_v58 = vld [vmem:[#allocation122_spill] sm:$0xff] }
 0x38d   : > { %v2874_v41 = vadd.f32 %v10278_v49, %v2873_v19  ;;  %v2403_v30 = vsel %vm2400_vm13, %v2402_v27, %v2398_v36  ;;  %v12052_v18 = vsub.f32 1.0, %v10266_v37  ;;  %vm2410_vm3 = vweird.f32 %v10198_v8  ;;  %v12065_v27 = vld [vmem:[#allocation53_spill] sm:$0xff]  ;;  %v12070_v22 = vld [vmem:[#allocation39_spill] sm:$0xff] }
 0x38e   : > { %v4319_v16 = vmax.f32 %v4191_v31, 0.0  ;;  %vm2880_vm0 = vcmp.eq.f32.partialorder %v2879_v3, 8.507059e+37  ;;  %v2882_v48 = vor.u32 1.1754944e-38, %v2881_v50  ;;  %v4032_v57 = vsub.f32 1.0, %v2403_v30  ;;  %v12066_v31 = vld [vmem:[#allocation83_spill] sm:$0xff] }
 0x38f   : > { %v2878_v47 = vsel %vm10751_vm2, %v10278_v49, %v2874_v41  ;;  %v2408_v23 = vmul.f32 %v10253_v46, %v12052_v18  ;;  %v10766_v24 = vadd.f32 %v4705_v28, %v4693_v42  ;;  %vm2411_vm4 = vweird.f32 %v10253_v46 }
 0x390   : > { %v2414_v49 = vand.u32 2147483647, %v10198_v8  ;;  %v4582_v37 = vpack.c.bf16 %v4319_v16, %v4287_v34  ;;  %v2883_v29 = vsel %vm2880_vm0, %v2882_v48, %v2878_v47  ;;  %v4160_v53 = vmul.f32 %v10525_v40, %v4032_v57  ;;  %vm10772_vm10 = vmor %vm2410_vm3, %vm2411_vm4 }
 0x391   : > { %v2409_v6 = vadd.f32 %v10253_v46, %v2408_v23  ;;  %v2416_v15 = vand.u32 2147483648, %v10198_v8  ;;  %v4064_v10 = vsub.f32 1.0, %v2883_v29  ;;  %v12055_v13 = vsub.f32 1.0, %v10315_v9  ;;  %v10785_v40 = vpop.f32.mrf.mxu1 }
 0x392   : > { %vm2415_vm5 = vcmp.eq.f32.partialorder %v2414_v49, 8.507059e+37  ;;  %4989 = vmatpush.bf16.xpose.msrb.mxu0 %v4582_v37  ;;  %v4288_v12 = vmax.f32 %v4160_v53, 0.0  ;;  %vm2890_vm6 = vweird.f32 %v10245_v5  ;;  %vm2891_vm7 = vweird.f32 %v10306_v61  ;;  %v10791_v9 = vpop.f32.mrf.mxu2 }
 0x393   : > { %v2413_v28 = vsel %vm10772_vm10, %v10253_v46, %v2409_v6  ;;  %v2888_v44 = vmul.f32 %v10306_v61, %v12055_v13  ;;  %v2417_v35 = vor.u32 1.1754944e-38, %v2416_v15  ;;  %v4192_v8 = vmul.f32 %v10588_v4, %v4064_v10  ;;  %vm10793_vm8 = vmor %vm2890_vm6, %vm2891_vm7 }
 0x394   : > { %v2894_v46 = vand.u32 2147483647, %v10245_v5  ;;  %v2896_v62 = vand.u32 2147483648, %v10245_v5  ;;  %v12058_v11 = vsub.f32 1.0, %v10274_v32  ;;  %vm2425_vm1 = vweird.f32 %v10207_v39  ;;  %v4733_v60 = vpop.f32.mrf.mxu0  ;;  %v4770_v45 = vpop.f32.mrf.mxu3 }
 0x395   : > { %v2889_v56 = vadd.f32 %v10306_v61, %v2888_v44  ;;  %v2418_v17 = vsel %vm2415_vm5, %v2417_v35, %v2413_v28  ;;  %vm2426_vm9 = vweird.f32 %v10262_v25  ;;  %v4320_v4 = vmax.f32 %v4192_v8, 0.0  ;;  %v12071_v28 = vld [vmem:[#allocation115_spill] sm:$0xff] }
 0x396   : > { %v2423_v14 = vmul.f32 %v10262_v25, %v12058_v11  ;;  %vm2895_vm11 = vcmp.eq.f32.partialorder %v2894_v46, 8.507059e+37  ;;  %v2897_v21 = vor.u32 1.1754944e-38, %v2896_v62  ;;  %v4033_v63 = vsub.f32 1.0, %v2418_v17  ;;  %vm10809_vm12 = vmor %vm2425_vm1, %vm2426_vm9 }
 0x397   : > { %v2893_v5 = vsel %vm10793_vm8, %v10306_v61, %v2889_v56  ;;  %v2429_v1 = vand.u32 2147483647, %v10207_v39  ;;  %v2431_v32 = vand.u32 2147483648, %v10207_v39  ;;  %6327 = vtanh.f32 %v10505_v0 }
 0x398   : > { %v2424_v33 = vadd.f32 %v10262_v25, %v2423_v14  ;;  %v4583_v20 = vpack.c.bf16 %v4320_v4, %v4288_v12  ;;  %v2898_v38 = vsel %vm2895_vm11, %v2897_v21, %v2893_v5  ;;  %v12062_v61 = vsub.f32 1.0, %v12061_v52 }
 0x399   : > { %v4065_v36 = vsub.f32 1.0, %v2898_v38  ;;  %v4161_v34 = vmul.f32 %v12064_v51, %v4033_v63  ;;  %vm2905_vm13 = vweird.f32 %v12065_v27  ;;  %v2432_v0 = vor.u32 1.1754944e-38, %v2431_v32  ;;  %v4746_v30 = vpop.f32.mrf.mxu1 }
 0x39a   : > { %v2903_v19 = vmul.f32 %v12063_v58, %v12062_v61  ;;  %v2428_v39 = vsel %vm10809_vm12, %v10262_v25, %v2424_v33  ;;  %5002 = vmatpush.bf16.xpose.msrb.mxu1 %v4583_v20  ;;  %vm2906_vm14 = vweird.f32 %v12063_v58  ;;  %v2909_v59 = vand.u32 2147483647, %v12065_v27  ;;  %v12069_v25 = vld [vmem:[#allocation98_spill] sm:$0xff]  ;;  %v4759_v48 = vpop.f32.mrf.mxu2 }
 0x39b   : > { %v4193_v55 = vmul.f32 %v12066_v31, %v4065_v36  ;;  %vm2430_vm15 = vcmp.eq.f32.partialorder %v2429_v1, 8.507059e+37  ;;  %vm10825_vm2 = vmor %vm2905_vm13, %vm2906_vm14  ;;  %v2911_v50 = vand.u32 2147483648, %v12065_v27  ;;  %v4421_v42 = vperm.slane %v12069_v25, 4 }
 0x39c   : > { %v2904_v41 = vadd.f32 %v12063_v58, %v2903_v19  ;;  %v4289_v47 = vmax.f32 %v4161_v34, 0.0  ;;  %v2433_v18 = vsel %vm2430_vm15, %v2432_v0, %v2428_v39  ;;  %v4719_v16 = vadd.f32 %v10728_v54, %v10766_v24  ;;  %v4783_v24 = vpop.f32.mrf.mxu0  ;;  %v4772_v12 = vpop.f32.mrf.mxu3 }
 0x39d   : > { %v4321_v57 = vmax.f32 %v4193_v55, 0.0  ;;  %v2912_v6 = vor.u32 1.1754944e-38, %v2911_v50  ;;  %v4034_v49 = vsub.f32 1.0, %v2433_v18  ;;  %vm4453_vm3 = vcmp.eq.s32.totalorder %v12070_v22, %v4421_v42  ;;  %v6328_v37 = vpop.eup %6327 }
 0x39e   : > { %v2908_v23 = vsel %vm10825_vm2, %v12063_v58, %v2904_v41  ;;  %vm2910_vm0 = vcmp.eq.f32.partialorder %v2909_v59, 8.507059e+37  ;;  %vm5516_vm4 = vmpackc.low %vm4453_vm3, %vm4453_vm3  ;;  %v4422_v29 = vperm.slane %v12069_v25, 5  ;;  %v4423_v53 = vperm.slane %v12069_v25, 6 }
 0x39f   : > { %v4732_v2 = vadd.f32 %v10764_v26, %v4719_v16  ;;  %v4584_v15 = vpack.c.bf16 %v4321_v57, %v4289_v47  ;;  %v2913_v10 = vsel %vm2910_vm0, %v2912_v6, %v2908_v23  ;;  %v4162_v13 = vmul.f32 %v12071_v28, %v4034_v49  ;;  %v5049_v28 = vld [vmem:[%s10884_s4 + $0x8] sm:$0xff] }
 0x3a0   : > { %v12072_v54 = vmov 1.0|1.0   ;;  %v4066_v44 = vsub.f32 1.0, %v2913_v10  ;;  %vm4454_vm10 = vcmp.eq.s32.totalorder %v12070_v22, %v4422_v29  ;;  %vm4455_vm6 = vcmp.eq.s32.totalorder %v12070_v22, %v4423_v53  ;;  %v5050_v10 = vld [vmem:[%s10884_s4 + $0x10] sm:$0xff] }
 0x3a1   : > { %5517 = vmatmul.msk.bf16.vlgmr.msrb.gmra.mxu0 %vm5516_vm4, %v12072_v54  ;;  %5015 = vmatpush.bf16.xpose.msrb.mxu2 %v4584_v15  ;;  %vm5518_vm5 = vmpackc.low %vm4454_vm10, %vm4454_vm10  ;;  %v4745_v35 = vadd.f32 %v10785_v40, %v4732_v2  ;;  %v4796_v56 = vpop.f32.mrf.mxu1  ;;  %v4290_v46 = vmax.f32 %v4162_v13, 0.0  ;;  %v4424_v7 = vperm.slane %v12069_v25, 7  ;;  %vm302_vm9 = vcmask 261120   ;;  %v5051_v15 = vld [vmem:[%s10884_s4 + $0x18] sm:$0xff]  ;;  %v5048_v13 = vld [vmem:[%s10884_s4] sm:$0xff] }
 0x3a2   : > { %v4194_v8 = vmul.f32 %v6328_v37, %v4066_v44  ;;  %5519 = vmatmul.msk.bf16.vlgmr.msrb.gmra.mxu1 %vm5518_vm5, %v12072_v54  ;;  %v4809_v17 = vpop.f32.mrf.mxu2  ;;  %vm5520_vm7 = vmpackc.low %vm4455_vm6, %vm4455_vm6  ;;  %v6365_v2 = vmov 0.0   ;;  %5067 = vmatpush.msra.mxu0 %v5051_v15  ;;  %vm5075_vm11 = vcmask 7168  }
 0x3a3   : > { %v4758_v26 = vadd.f32 %v10791_v9, %v4745_v35  ;;  %vm4456_vm8 = vcmp.eq.s32.totalorder %v12070_v22, %v4424_v7  ;;  %303 = vst.msk [vmem:[#allocation2] sm:$0xff] %vm302_vm9, %v6365_v2 }
 0x3a4   : > { %v4322_v62 = vmax.f32 %v4194_v8, 0.0  ;;  %v4785_v5 = vpop.f32.mrf.mxu0  ;;  %v4822_v40 = vpop.f32.mrf.mxu3  ;;  %vm5522_vm1 = vmpackc.low %vm4456_vm8, %vm4456_vm8  ;;  %5068 = vmatpush.msra.mxu0 %v5050_v10 }
 0x3a5   : > { %v4771_v11 = vadd.f32 %v4770_v45, %v4758_v26 }
 0x3a6   : > { %v4585_v14 = vpack.c.bf16 %v4322_v62, %v4290_v46  ;;  %5069 = vmatpush.msra.mxu0 %v5049_v28 }
 0x3a7   : > { %v4784_v4 = vadd.f32 %v4783_v24, %v4771_v11 }
 0x3a8   : > { %5028 = vmatpush.bf16.xpose.msrb.mxu3 %v4585_v14  ;;  %5521 = vmatmul.msk.bf16.vlgmr.msrb.gmra.mxu2 %vm5520_vm7, %v12072_v54 }
 0x3a9   : > { %v4797_v21 = vadd.f32 %v4796_v56, %v4784_v4  ;;  %v4798_v9 = vpop.f32.mrf.mxu1  ;;  %5070 = vmatpush.msra.mxu0 %v5048_v13  ;;  %v5045_v4 = vpop.permute.xlu2 %5044 }
 0x3aa   : > { %v4811_v33 = vpop.f32.mrf.mxu2  ;;  %v4553_v46 = vld [vmem:[#allocation2] sm:$0xff] }
 0x3ab   : > { %v4810_v63 = vadd.f32 %v4809_v17, %v4797_v21 }
 0x3ac   : > { %v4835_v32 = vpop.f32.mrf.mxu0  ;;  %v4824_v60 = vpop.f32.mrf.mxu3 }
 0x3ad   : > { %v4823_v1 = vadd.f32 %v4822_v40, %v4810_v63 }
 0x3af   : > { %5523 = vmatmul.msk.bf16.vlgmr.msrb.gmra.mxu3 %vm5522_vm1, %v12072_v54  ;;  %v4836_v20 = vadd.f32 %v4835_v32, %v4823_v1 }
 0x3b1   : > { %v4848_v38 = vpop.f32.mrf.mxu1 }
 0x3b2   : > { %v4849_v43 = vadd.f32 %v4848_v38, %v4836_v20  ;;  %v4861_v52 = vpop.f32.mrf.mxu2 }
 0x3b4   : > { %v4862_v61 = vadd.f32 %v4861_v52, %v4849_v43  ;;  %v4837_v58 = vpop.f32.mrf.mxu0  ;;  %v4874_v19 = vpop.f32.mrf.mxu3 }
 0x3b6   : > { %v4875_v45 = vadd.f32 %v4874_v19, %v4862_v61 }
 0x3b9   : > { %v4850_v36 = vpop.f32.mrf.mxu1 }
 0x3ba   : > { %v4863_v51 = vpop.f32.mrf.mxu2 }
 0x3bc   : > { %v4876_v34 = vpop.f32.mrf.mxu3 }
 0x3be   : > { %v4887_v39 = vpop.f32.mrf.mxu0 }
 0x3bf   : > { %v4888_v27 = vadd.f32 %v4887_v39, %v4875_v45 }
 0x3c1   : > { %v4900_v0 = vpop.f32.mrf.mxu1 }
 0x3c2   : > { %v4901_v41 = vadd.f32 %v4900_v0, %v4888_v27 }
 0x3c6   : > { %v4913_v59 = vpop.f32.mrf.mxu2  ;;  %v4889_v55 = vpop.f32.mrf.mxu0 }
 0x3c7   : > { %v4914_v31 = vadd.f32 %v4913_v59, %v4901_v41 }
 0x3c8   : > { %v4926_v3 = vpop.f32.mrf.mxu3 }
 0x3c9   : > { %v4927_v50 = vadd.f32 %v4926_v3, %v4914_v31  ;;  %v4902_v25 = vpop.f32.mrf.mxu1 }
 0x3ce   : > { %v4915_v42 = vpop.f32.mrf.mxu2 }
 0x3d0   : > { %v4928_v30 = vpop.f32.mrf.mxu3 }
 0x3d7   : > { %v4939_v47 = vpop.f32.mrf.mxu0 }
 0x3d8   : > { %v4940_v18 = vadd.f32 %v4939_v47, %v4927_v50 }
 0x3da   : > { %v4952_v23 = vpop.f32.mrf.mxu1 }
 0x3db   : > { %v4953_v16 = vadd.f32 %v4952_v23, %v4940_v18 }
 0x3df   : > { %v4941_v48 = vpop.f32.mrf.mxu0 }
 0x3e0   : > { %v4965_v57 = vpop.f32.mrf.mxu2 }
 0x3e1   : > { %v4966_v6 = vadd.f32 %v4965_v57, %v4953_v16 }
 0x3e2   : > { %v4954_v49 = vpop.f32.mrf.mxu1 }
 0x3e8   : > { %v4978_v22 = vpop.f32.mrf.mxu3  ;;  %v4967_v29 = vpop.f32.mrf.mxu2 }
 0x3e9   : > { %v4979_v37 = vadd.f32 %v4978_v22, %v4966_v6 }
 0x3f0   : > { %v4980_v53 = vpop.f32.mrf.mxu3 }
 0x41e   : > { %v4991_v54 = vpop.f32.mrf.mxu0 }
 0x41f   : > { %v5004_v24 = vpop.f32.mrf.mxu1  ;;  %v4992_v35 = vadd.f32 %v4991_v54, %v4979_v37 }
 0x421   : > { %v5005_v26 = vadd.f32 %v5004_v24, %v4992_v35 }
 0x426   : > { %v4993_v44 = vpop.f32.mrf.mxu0 }
 0x427   : > { %v5006_v12 = vpop.f32.mrf.mxu1 }
 0x42b   : > { %v5017_v8 = vpop.f32.mrf.mxu2 }
 0x42c   : > { %v5018_v56 = vadd.f32 %v5017_v8, %v5005_v26 }
 0x432   : > { %v5030_v62 = vpop.f32.mrf.mxu3 }
 0x433   : > { %v5031_v17 = vadd.f32 %v5030_v62, %v5018_v56  ;;  %v5019_v7 = vpop.f32.mrf.mxu2 }
 0x435   : > { %v5034_v11 = vadd.f32 %v5031_v17, %v4553_v46 }
 0x437   : > { %5036 = vst.msk [vmem:[#allocation2] sm:$0xff] %vm302_vm9, %v5034_v11 }
 0x43a   : > { %v5032_v14 = vpop.f32.mrf.mxu3 }
 0x43e   : > { %v5040_v5 = vld [vmem:[#allocation2] sm:$0xff] }
 0x43f   : > { %v5047_v40 = vmul.f32 %v5045_v4, %v5040_v5 }
 0x441   : > { %5524 = vmatmul.msk.f32.vlgmr.msra.gmra.mxu0 %vm302_vm9, %v5047_v40 }
 0x4be   : > { %v5072_v21 = vpop.f32.mrf.mxu0 }
 0x4bf   : > { %5076 = vst.msk [vmem:[%s296_s9] sm:$0xff] %vm5075_vm11, %v5072_v21 }
 0x4c0 PF: > { %s16_s23 = sadd.s32 1, %s6361_s23   ;;  %s12073_s21 = smov %s6357_s22 }
 0x4c1   : > { %p13_p6 = scmp.ge.s32.totalorder %s16_s23, 4   ;;  %s12074_s22 = smov %s12076_s24 }
 0x4c3   :  { %15 = sbr.rel (!%p13_p6) target bundleno = 2 (0x2), region = 86 }

</bundles_post_ra>
